<compile_context>
chip_gen: v6e
topology: v6e:2x2x1
jax: 0.10.0
libtpu: 0.0.40
codegen_flags: <defaults>
</compile_context>

<pallas_src>
import jax
import jax.numpy as jnp
from jax.experimental import pallas as pl
from jax.experimental.pallas import tpu as pltpu

# Real model dims.
CIN, C1, C2 = 4, 10, 20
KH = KW = 5
FC1_IN, FC1_OUT, NCLS = 500, 100, 34

# Lane-padded dims used inside the kernel (zero-padded weights/bias => exact).
CP1 = 32     # conv1 out channels 10 -> 32
CP2 = 128    # conv2 out channels 20 -> 128
HP = 128     # fc1 out 100 -> 128
OP = 128     # fc2 out 34 -> 128 (sliced back to 34 outside)

H0 = 32             # input spatial (32x32 => 20*5*5 = 500 flat features)
OH1, PH1 = 28, 14   # conv1 / pool1 spatial
OH2, PH2 = 10, 5    # conv2 / pool2 spatial


# ---------------------------------------------------------------------------
# Fused forward kernel (one grid step == one image)
# ---------------------------------------------------------------------------

def _fused_net_kernel(x_ref, w1_ref, b1_ref, w2_ref, b2_ref,
                      wf1_ref, bf1_ref, wf2_ref, bf2_ref,
                      out_ref,
                      patch1_ref, patch2_ref, p1_ref, p2_ref):
    f32, bf16 = jnp.float32, jnp.bfloat16

    # 0/1 selector matrices that pick even / odd columns of a row-pair max; the
    # 2x-width pooling is then two tiny MXU matmuls (exactly one nonzero term per
    # output element), avoiding strided slices / reshapes of vector values.
    def pool_selectors(n_out):
        r = jax.lax.broadcasted_iota(jnp.int32, (n_out, 2 * n_out), 0)
        c = jax.lax.broadcasted_iota(jnp.int32, (n_out, 2 * n_out), 1)
        return (c == 2 * r).astype(f32), (c == 2 * r + 1).astype(f32)

    se1, so1 = pool_selectors(PH1)   # (14, 28)
    se2, so2 = pool_selectors(PH2)   # (5, 10)

    # ---- conv1 + ReLU + 2x2 max-pool: x (32,32,4) -> p1 (14,14,CP1) ----------
    def conv1_row(h):
        # in-VMEM im2col for one output row: patch[w, (i,j,ci)] = x[h+i, w+j, ci]
        for k in range(KH * KW):
            i, j = divmod(k, KW)
            patch1_ref[:, 4 * k:4 * k + 4] = x_ref[h + i, pl.ds(j, OH1), :]
        acc = jnp.dot(patch1_ref[...].astype(bf16), w1_ref[...],
                      preferred_element_type=f32)
        return jnp.maximum(acc + b1_ref[...], 0.0)               # (28, CP1)

    def stage1(ph, carry):
        m = jnp.maximum(conv1_row(2 * ph), conv1_row(2 * ph + 1))
        p1_ref[ph] = jnp.maximum(jnp.dot(se1, m, preferred_element_type=f32),
                                 jnp.dot(so1, m, preferred_element_type=f32))
        return carry

    jax.lax.fori_loop(0, PH1, stage1, 0)

    # ---- conv2 + ReLU + 2x2 max-pool: p1 (14,14,CP1) -> p2 (5,5,CP2) ---------
    def conv2_row(h):
        for k in range(KH * KW):
            i, j = divmod(k, KW)
            patch2_ref[:, CP1 * k:CP1 * (k + 1)] = p1_ref[h + i, pl.ds(j, OH2), :]
        acc = jnp.dot(patch2_ref[...].astype(bf16), w2_ref[...],
                      preferred_element_type=f32)
        return jnp.maximum(acc + b2_ref[...], 0.0)               # (10, CP2)

    def stage2(ph, carry):
        m = jnp.maximum(conv2_row(2 * ph), conv2_row(2 * ph + 1))
        p2_ref[ph] = jnp.maximum(jnp.dot(se2, m, preferred_element_type=f32),
                                 jnp.dot(so2, m, preferred_element_type=f32))
        return carry

    jax.lax.fori_loop(0, PH2, stage2, 0)

    # ---- fc1 + ReLU (PyTorch NCHW flatten is pre-folded into wf1's layout) ----
    h1 = bf1_ref[...]                                            # (1, HP) f32
    for r in range(PH2 * PH2):
        ph, pw = divmod(r, PH2)
        v = p2_ref[ph, pl.ds(pw, 1), :].astype(bf16)             # (1, CP2)
        h1 = h1 + jnp.dot(v, wf1_ref[r], preferred_element_type=f32)
    h1 = jnp.maximum(h1, 0.0)

    # ---- fc2 + log_softmax over the 34 real classes (f32 epilogue) ------------
    z = jnp.dot(h1.astype(bf16), wf2_ref[...],
                preferred_element_type=f32) + bf2_ref[...]       # (1, OP)
    lane = jax.lax.broadcasted_iota(jnp.int32, z.shape, 1)
    valid = lane < NCLS
    zmax = jnp.max(jnp.where(valid, z, -jnp.inf), axis=-1, keepdims=True)
    ez = jnp.where(valid, jnp.exp(z - zmax), 0.0)
    lse = jnp.log(jnp.sum(ez, axis=-1, keepdims=True)) + zmax
    out_ref[...] = z - lse          # padded lanes >= 34 are sliced off outside


# ---------------------------------------------------------------------------
# Forward wrapper (single fused pallas_call)
# ---------------------------------------------------------------------------

def net_forward(kp, x_nchw):
    n = x_nchw.shape[0]
    x = jnp.transpose(x_nchw, (0, 2, 3, 1)).astype(jnp.float32)   # NCHW -> NHWC

    out = pl.pallas_call(
        _fused_net_kernel,
        out_shape=jax.ShapeDtypeStruct((n, 1, OP), jnp.float32),
        grid=(n,),
        in_specs=[
            pl.BlockSpec((None, H0, H0, CIN), lambda b: (b, 0, 0, 0)),   # x
            pl.BlockSpec((KH * KW * CIN, CP1), lambda b: (0, 0)),        # w1
            pl.BlockSpec((1, CP1), lambda b: (0, 0)),                    # b1
            pl.BlockSpec((KH * KW * CP1, CP2), lambda b: (0, 0)),        # w2
            pl.BlockSpec((1, CP2), lambda b: (0, 0)),                    # b2
            pl.BlockSpec((PH2 * PH2, CP2, HP), lambda b: (0, 0, 0)),     # wf1
            pl.BlockSpec((1, HP), lambda b: (0, 0)),                     # bf1
            pl.BlockSpec((HP, OP), lambda b: (0, 0)),                    # wf2
            pl.BlockSpec((1, OP), lambda b: (0, 0)),                     # bf2
        ],
        out_specs=pl.BlockSpec((None, 1, OP), lambda b: (b, 0, 0)),
        scratch_shapes=[
            pltpu.VMEM((OH1, KH * KW * CIN), jnp.float32),   # conv1 im2col row patch
            pltpu.VMEM((OH2, KH * KW * CP1), jnp.float32),   # conv2 im2col row patch
            pltpu.VMEM((PH1, PH1, CP1), jnp.float32),        # pooled conv1 output
            pltpu.VMEM((PH2, PH2, CP2), jnp.float32),        # pooled conv2 output
        ],
        compiler_params=pltpu.CompilerParams(
            dimension_semantics=("parallel",)),
    )(x, kp["w1"], kp["b1"], kp["w2"], kp["b2"],
      kp["wf1"], kp["bf1"], kp["wf2"], kp["bf2"])

    return out[:, 0, :NCLS]                                       # (N, 34) log-probs


# ---------------------------------------------------------------------------
# Parameters: PyTorch-style init, then ONE-TIME kernel-layout conversion
# ---------------------------------------------------------------------------

def init_params(key):
    ks = jax.random.split(key, 8)

    def u(k, shape, fan_in):
        bound = 1.0 / jnp.sqrt(jnp.float32(fan_in))
        return jax.random.uniform(k, shape, jnp.float32, -bound, bound)

    return {
        "conv1_w": u(ks[0], (C1, CIN, KH, KW), CIN * KH * KW),
        "conv1_b": u(ks[1], (C1,), CIN * KH * KW),
        "conv2_w": u(ks[2], (C2, C1, KH, KW), C1 * KH * KW),
        "conv2_b": u(ks[3], (C2,), C1 * KH * KW),
        "fc1_w":   u(ks[4], (FC1_OUT, FC1_IN), FC1_IN),
        "fc1_b":   u(ks[5], (FC1_OUT,), FC1_IN),
        "fc2_w":   u(ks[6], (NCLS, FC1_OUT), FC1_OUT),
        "fc2_b":   u(ks[7], (NCLS,), FC1_OUT),
    }


def prepare_kernel_params(p):
    """One-time re-layout of PyTorch-style params into kernel layouts.

    All transposes, the NCHW .view(-1, 500) flatten permutation, the channel /
    feature zero-padding and the bf16 casts happen here exactly once.
    """
    def pad_to(a, shape):
        return jnp.pad(a, [(0, t - s) for s, t in zip(a.shape, shape)])

    # conv weights -> (kh*kw*cin, cout_padded), matching the in-kernel im2col order.
    w1 = jnp.transpose(p["conv1_w"], (2, 3, 1, 0)).reshape(KH * KW * CIN, C1)
    w1 = pad_to(w1, (KH * KW * CIN, CP1)).astype(jnp.bfloat16)
    b1 = pad_to(p["conv1_b"], (CP1,)).reshape(1, CP1).astype(jnp.float32)

    w2 = jnp.transpose(p["conv2_w"], (2, 3, 1, 0))                # (5,5,10,20)
    w2 = pad_to(w2, (KH, KW, CP1, C2)).reshape(KH * KW * CP1, C2)
    w2 = pad_to(w2, (KH * KW * CP1, CP2)).astype(jnp.bfloat16)
    b2 = pad_to(p["conv2_b"], (CP2,)).reshape(1, CP2).astype(jnp.float32)

    # fc1: PyTorch consumes the NCHW flatten (c*25 + ph*5 + pw); fold that
    # permutation into the weight so the kernel consumes NHWC (ph, pw, c) directly.
    wf1 = p["fc1_w"].reshape(FC1_OUT, C2, PH2, PH2)
    wf1 = jnp.transpose(wf1, (2, 3, 1, 0)).reshape(PH2 * PH2, C2, FC1_OUT)
    wf1 = pad_to(wf1, (PH2 * PH2, CP2, HP)).astype(jnp.bfloat16)
    bf1 = pad_to(p["fc1_b"], (HP,)).reshape(1, HP).astype(jnp.float32)

    wf2 = pad_to(p["fc2_w"].T, (HP, OP)).astype(jnp.bfloat16)     # (128, 128)
    bf2 = pad_to(p["fc2_b"], (OP,)).reshape(1, OP).astype(jnp.float32)

    return dict(w1=w1, b1=b1, w2=w2, b2=b2, wf1=wf1, bf1=bf1, wf2=wf2, bf2=bf2)


# ---------------------------------------------------------------------------

if __name__ == "__main__":
    key = jax.random.PRNGKey(0)
    pkey, xkey = jax.random.split(key)
    kparams = prepare_kernel_params(init_params(pkey))

    # fc1 expects 500 = 20*5*5 flat features => input spatial must be 32x32.
    x = jax.random.normal(xkey, (2, CIN, H0, H0), dtype=jnp.float32)

    out = jax.jit(net_forward)(kparams, x)
    out = jax.block_until_ready(out)

    assert out.shape == (2, NCLS), out.shape
    # log_softmax rows must exponentiate-sum to ~1.
    row_sums = jnp.exp(out).sum(axis=1)
    assert bool(jnp.all(jnp.abs(row_sums - 1.0) < 1e-3)), row_sums

    print("KERNEL_OK")
</pallas_src>

<mosaic_0001>
module attributes {stable_mosaic.version = 11 : i64} {
  func.func @_fused_net_kernel(%arg0: i32, %arg1: memref<1x32x32x4xf32, #tpu.memory_space<vmem>>, %arg2: memref<100x32xbf16, #tpu.memory_space<vmem>>, %arg3: memref<1x32xf32, #tpu.memory_space<vmem>>, %arg4: memref<800x128xbf16, #tpu.memory_space<vmem>>, %arg5: memref<1x128xf32, #tpu.memory_space<vmem>>, %arg6: memref<25x128x128xbf16, #tpu.memory_space<vmem>>, %arg7: memref<1x128xf32, #tpu.memory_space<vmem>>, %arg8: memref<128x128xbf16, #tpu.memory_space<vmem>>, %arg9: memref<1x128xf32, #tpu.memory_space<vmem>>, %arg10: memref<1x1x128xf32, #tpu.memory_space<vmem>>, %arg11: memref<28x100xf32, #tpu.memory_space<vmem>>, %arg12: memref<10x800xf32, #tpu.memory_space<vmem>>, %arg13: memref<14x14x32xf32, #tpu.memory_space<vmem>>, %arg14: memref<5x5x128xf32, #tpu.memory_space<vmem>>) attributes {dimension_semantics = [#tpu.dimension_semantics<parallel>], iteration_bounds = array<i64: 2>, scalar_prefetch = 0 : i64, scratch_operands = 4 : i64, tpu.core_type = #tpu.core_type<tc>, window_params = [{transform_indices = @transform_0, window_bounds = array<i64: 1, 32, 32, 4>}, {pipeline_mode = #tpu.pipeline_mode<synchronous>, transform_indices = @transform_1, window_bounds = array<i64: 100, 32>}, {pipeline_mode = #tpu.pipeline_mode<synchronous>, transform_indices = @transform_2, window_bounds = array<i64: 1, 32>}, {pipeline_mode = #tpu.pipeline_mode<synchronous>, transform_indices = @transform_3, window_bounds = array<i64: 800, 128>}, {pipeline_mode = #tpu.pipeline_mode<synchronous>, transform_indices = @transform_4, window_bounds = array<i64: 1, 128>}, {pipeline_mode = #tpu.pipeline_mode<synchronous>, transform_indices = @transform_5, window_bounds = array<i64: 25, 128, 128>}, {pipeline_mode = #tpu.pipeline_mode<synchronous>, transform_indices = @transform_6, window_bounds = array<i64: 1, 128>}, {pipeline_mode = #tpu.pipeline_mode<synchronous>, transform_indices = @transform_7, window_bounds = array<i64: 128, 128>}, {pipeline_mode = #tpu.pipeline_mode<synchronous>, transform_indices = @transform_8, window_bounds = array<i64: 1, 128>}, {transform_indices = @transform_9, window_bounds = array<i64: 1, 1, 128>}]} {
    %0 = tpu.iota {dimensions = array<i32: 0>} : vector<14x28xi32>
    %1 = tpu.iota {dimensions = array<i32: 1>} : vector<14x28xi32>
    %c2_i32 = arith.constant 2 : i32
    %2 = vector.broadcast %c2_i32 : i32 to vector<14x28xi32>
    %3 = arith.muli %2, %0 : vector<14x28xi32>
    %4 = arith.cmpi eq, %1, %3 : vector<14x28xi32>
    %5 = arith.extui %4 : vector<14x28xi1> to vector<14x28xi32>
    %6 = arith.sitofp %5 : vector<14x28xi32> to vector<14x28xf32>
    %c2_i32_0 = arith.constant 2 : i32
    %7 = vector.broadcast %c2_i32_0 : i32 to vector<14x28xi32>
    %8 = arith.muli %7, %0 : vector<14x28xi32>
    %c1_i32 = arith.constant 1 : i32
    %9 = vector.broadcast %c1_i32 : i32 to vector<14x28xi32>
    %10 = arith.addi %8, %9 : vector<14x28xi32>
    %11 = arith.cmpi eq, %1, %10 : vector<14x28xi32>
    %12 = arith.extui %11 : vector<14x28xi1> to vector<14x28xi32>
    %13 = arith.sitofp %12 : vector<14x28xi32> to vector<14x28xf32>
    %14 = tpu.iota {dimensions = array<i32: 0>} : vector<5x10xi32>
    %15 = tpu.iota {dimensions = array<i32: 1>} : vector<5x10xi32>
    %c2_i32_1 = arith.constant 2 : i32
    %16 = vector.broadcast %c2_i32_1 : i32 to vector<5x10xi32>
    %17 = arith.muli %16, %14 : vector<5x10xi32>
    %18 = arith.cmpi eq, %15, %17 : vector<5x10xi32>
    %19 = arith.extui %18 : vector<5x10xi1> to vector<5x10xi32>
    %20 = arith.sitofp %19 : vector<5x10xi32> to vector<5x10xf32>
    %c2_i32_2 = arith.constant 2 : i32
    %21 = vector.broadcast %c2_i32_2 : i32 to vector<5x10xi32>
    %22 = arith.muli %21, %14 : vector<5x10xi32>
    %c1_i32_3 = arith.constant 1 : i32
    %23 = vector.broadcast %c1_i32_3 : i32 to vector<5x10xi32>
    %24 = arith.addi %22, %23 : vector<5x10xi32>
    %25 = arith.cmpi eq, %15, %24 : vector<5x10xi32>
    %26 = arith.extui %25 : vector<5x10xi1> to vector<5x10xi32>
    %27 = arith.sitofp %26 : vector<5x10xi32> to vector<5x10xf32>
    %c0_i32 = arith.constant 0 : i32
    %c14_i32 = arith.constant 14 : i32
    %28 = arith.addi %c0_i32, %c14_i32 : i32
    %c1_i32_4 = arith.constant 1 : i32
    scf.for %arg15 = %c0_i32 to %28 step %c1_i32_4  : i32 {
      %c2_i32_173 = arith.constant 2 : i32
      %234 = arith.muli %c2_i32_173, %arg15 : i32
      %c0_i32_174 = arith.constant 0 : i32
      %235 = arith.addi %234, %c0_i32_174 : i32
      %c0_175 = arith.constant 0 : index
      %236 = arith.index_cast %235 : i32 to index
      %c0_176 = arith.constant 0 : index
      %c0_177 = arith.constant 0 : index
      %237 = vector.load %arg1[%c0_175, %236, %c0_176, %c0_177] : memref<1x32x32x4xf32, #tpu.memory_space<vmem>>, vector<1x1x28x4xf32>
      %238 = vector.shape_cast %237 : vector<1x1x28x4xf32> to vector<28x4xf32>
      %c0_178 = arith.constant 0 : index
      %c0_179 = arith.constant 0 : index
      %239 = vector.load %arg11[%c0_178, %c0_179] : memref<28x100xf32, #tpu.memory_space<vmem>>, vector<28x4xf32>
      tpu.vector_store %arg11[%c0_178, %c0_179], %238 {strides = array<i32>} : memref<28x100xf32, #tpu.memory_space<vmem>>, vector<28x4xf32>,
      %c0_i32_180 = arith.constant 0 : i32
      %240 = arith.addi %234, %c0_i32_180 : i32
      %c0_181 = arith.constant 0 : index
      %241 = arith.index_cast %240 : i32 to index
      %c1_182 = arith.constant 1 : index
      %c0_183 = arith.constant 0 : index
      %242 = vector.load %arg1[%c0_181, %241, %c1_182, %c0_183] : memref<1x32x32x4xf32, #tpu.memory_space<vmem>>, vector<1x1x28x4xf32>
      %243 = vector.shape_cast %242 : vector<1x1x28x4xf32> to vector<28x4xf32>
      %c0_184 = arith.constant 0 : index
      %c4_185 = arith.constant 4 : index
      %244 = vector.load %arg11[%c0_184, %c4_185] : memref<28x100xf32, #tpu.memory_space<vmem>>, vector<28x4xf32>
      tpu.vector_store %arg11[%c0_184, %c4_185], %243 {strides = array<i32>} : memref<28x100xf32, #tpu.memory_space<vmem>>, vector<28x4xf32>,
      %c0_i32_186 = arith.constant 0 : i32
      %245 = arith.addi %234, %c0_i32_186 : i32
      %c0_187 = arith.constant 0 : index
      %246 = arith.index_cast %245 : i32 to index
      %c2_188 = arith.constant 2 : index
      %c0_189 = arith.constant 0 : index
      %247 = vector.load %arg1[%c0_187, %246, %c2_188, %c0_189] : memref<1x32x32x4xf32, #tpu.memory_space<vmem>>, vector<1x1x28x4xf32>
      %248 = vector.shape_cast %247 : vector<1x1x28x4xf32> to vector<28x4xf32>
      %c0_190 = arith.constant 0 : index
      %c8_191 = arith.constant 8 : index
      %249 = vector.load %arg11[%c0_190, %c8_191] : memref<28x100xf32, #tpu.memory_space<vmem>>, vector<28x4xf32>
      tpu.vector_store %arg11[%c0_190, %c8_191], %248 {strides = array<i32>} : memref<28x100xf32, #tpu.memory_space<vmem>>, vector<28x4xf32>,
      %c0_i32_192 = arith.constant 0 : i32
      %250 = arith.addi %234, %c0_i32_192 : i32
      %c0_193 = arith.constant 0 : index
      %251 = arith.index_cast %250 : i32 to index
      %c3_194 = arith.constant 3 : index
      %c0_195 = arith.constant 0 : index
      %252 = vector.load %arg1[%c0_193, %251, %c3_194, %c0_195] : memref<1x32x32x4xf32, #tpu.memory_space<vmem>>, vector<1x1x28x4xf32>
      %253 = vector.shape_cast %252 : vector<1x1x28x4xf32> to vector<28x4xf32>
      %c0_196 = arith.constant 0 : index
      %c12_197 = arith.constant 12 : index
      %254 = vector.load %arg11[%c0_196, %c12_197] : memref<28x100xf32, #tpu.memory_space<vmem>>, vector<28x4xf32>
      tpu.vector_store %arg11[%c0_196, %c12_197], %253 {strides = array<i32>} : memref<28x100xf32, #tpu.memory_space<vmem>>, vector<28x4xf32>,
      %c0_i32_198 = arith.constant 0 : i32
      %255 = arith.addi %234, %c0_i32_198 : i32
      %c0_199 = arith.constant 0 : index
      %256 = arith.index_cast %255 : i32 to index
      %c4_200 = arith.constant 4 : index
      %c0_201 = arith.constant 0 : index
      %257 = vector.load %arg1[%c0_199, %256, %c4_200, %c0_201] : memref<1x32x32x4xf32, #tpu.memory_space<vmem>>, vector<1x1x28x4xf32>
      %258 = vector.shape_cast %257 : vector<1x1x28x4xf32> to vector<28x4xf32>
      %c0_202 = arith.constant 0 : index
      %c16_203 = arith.constant 16 : index
      %259 = vector.load %arg11[%c0_202, %c16_203] : memref<28x100xf32, #tpu.memory_space<vmem>>, vector<28x4xf32>
      tpu.vector_store %arg11[%c0_202, %c16_203], %258 {strides = array<i32>} : memref<28x100xf32, #tpu.memory_space<vmem>>, vector<28x4xf32>,
      %c1_i32_204 = arith.constant 1 : i32
      %260 = arith.addi %234, %c1_i32_204 : i32
      %c0_205 = arith.constant 0 : index
      %261 = arith.index_cast %260 : i32 to index
      %c0_206 = arith.constant 0 : index
      %c0_207 = arith.constant 0 : index
      %262 = vector.load %arg1[%c0_205, %261, %c0_206, %c0_207] : memref<1x32x32x4xf32, #tpu.memory_space<vmem>>, vector<1x1x28x4xf32>
      %263 = vector.shape_cast %262 : vector<1x1x28x4xf32> to vector<28x4xf32>
      %c0_208 = arith.constant 0 : index
      %c20_209 = arith.constant 20 : index
      %264 = vector.load %arg11[%c0_208, %c20_209] : memref<28x100xf32, #tpu.memory_space<vmem>>, vector<28x4xf32>
      tpu.vector_store %arg11[%c0_208, %c20_209], %263 {strides = array<i32>} : memref<28x100xf32, #tpu.memory_space<vmem>>, vector<28x4xf32>,
      %c1_i32_210 = arith.constant 1 : i32
      %265 = arith.addi %234, %c1_i32_210 : i32
      %c0_211 = arith.constant 0 : index
      %266 = arith.index_cast %265 : i32 to index
      %c1_212 = arith.constant 1 : index
      %c0_213 = arith.constant 0 : index
      %267 = vector.load %arg1[%c0_211, %266, %c1_212, %c0_213] : memref<1x32x32x4xf32, #tpu.memory_space<vmem>>, vector<1x1x28x4xf32>
      %268 = vector.shape_cast %267 : vector<1x1x28x4xf32> to vector<28x4xf32>
      %c0_214 = arith.constant 0 : index
      %c24_215 = arith.constant 24 : index
      %269 = vector.load %arg11[%c0_214, %c24_215] : memref<28x100xf32, #tpu.memory_space<vmem>>, vector<28x4xf32>
      tpu.vector_store %arg11[%c0_214, %c24_215], %268 {strides = array<i32>} : memref<28x100xf32, #tpu.memory_space<vmem>>, vector<28x4xf32>,
      %c1_i32_216 = arith.constant 1 : i32
      %270 = arith.addi %234, %c1_i32_216 : i32
      %c0_217 = arith.constant 0 : index
      %271 = arith.index_cast %270 : i32 to index
      %c2_218 = arith.constant 2 : index
      %c0_219 = arith.constant 0 : index
      %272 = vector.load %arg1[%c0_217, %271, %c2_218, %c0_219] : memref<1x32x32x4xf32, #tpu.memory_space<vmem>>, vector<1x1x28x4xf32>
      %273 = vector.shape_cast %272 : vector<1x1x28x4xf32> to vector<28x4xf32>
      %c0_220 = arith.constant 0 : index
      %c28 = arith.constant 28 : index
      %274 = vector.load %arg11[%c0_220, %c28] : memref<28x100xf32, #tpu.memory_space<vmem>>, vector<28x4xf32>
      tpu.vector_store %arg11[%c0_220, %c28], %273 {strides = array<i32>} : memref<28x100xf32, #tpu.memory_space<vmem>>, vector<28x4xf32>,
      %c1_i32_221 = arith.constant 1 : i32
      %275 = arith.addi %234, %c1_i32_221 : i32
      %c0_222 = arith.constant 0 : index
      %276 = arith.index_cast %275 : i32 to index
      %c3_223 = arith.constant 3 : index
      %c0_224 = arith.constant 0 : index
      %277 = vector.load %arg1[%c0_222, %276, %c3_223, %c0_224] : memref<1x32x32x4xf32, #tpu.memory_space<vmem>>, vector<1x1x28x4xf32>
      %278 = vector.shape_cast %277 : vector<1x1x28x4xf32> to vector<28x4xf32>
      %c0_225 = arith.constant 0 : index
      %c32 = arith.constant 32 : index
      %279 = vector.load %arg11[%c0_225, %c32] : memref<28x100xf32, #tpu.memory_space<vmem>>, vector<28x4xf32>
      tpu.vector_store %arg11[%c0_225, %c32], %278 {strides = array<i32>} : memref<28x100xf32, #tpu.memory_space<vmem>>, vector<28x4xf32>,
      %c1_i32_226 = arith.constant 1 : i32
      %280 = arith.addi %234, %c1_i32_226 : i32
      %c0_227 = arith.constant 0 : index
      %281 = arith.index_cast %280 : i32 to index
      %c4_228 = arith.constant 4 : index
      %c0_229 = arith.constant 0 : index
      %282 = vector.load %arg1[%c0_227, %281, %c4_228, %c0_229] : memref<1x32x32x4xf32, #tpu.memory_space<vmem>>, vector<1x1x28x4xf32>
      %283 = vector.shape_cast %282 : vector<1x1x28x4xf32> to vector<28x4xf32>
      %c0_230 = arith.constant 0 : index
      %c36 = arith.constant 36 : index
      %284 = vector.load %arg11[%c0_230, %c36] : memref<28x100xf32, #tpu.memory_space<vmem>>, vector<28x4xf32>
      tpu.vector_store %arg11[%c0_230, %c36], %283 {strides = array<i32>} : memref<28x100xf32, #tpu.memory_space<vmem>>, vector<28x4xf32>,
      %c2_i32_231 = arith.constant 2 : i32
      %285 = arith.addi %234, %c2_i32_231 : i32
      %c0_232 = arith.constant 0 : index
      %286 = arith.index_cast %285 : i32 to index
      %c0_233 = arith.constant 0 : index
      %c0_234 = arith.constant 0 : index
      %287 = vector.load %arg1[%c0_232, %286, %c0_233, %c0_234] : memref<1x32x32x4xf32, #tpu.memory_space<vmem>>, vector<1x1x28x4xf32>
      %288 = vector.shape_cast %287 : vector<1x1x28x4xf32> to vector<28x4xf32>
      %c0_235 = arith.constant 0 : index
      %c40 = arith.constant 40 : index
      %289 = vector.load %arg11[%c0_235, %c40] : memref<28x100xf32, #tpu.memory_space<vmem>>, vector<28x4xf32>
      tpu.vector_store %arg11[%c0_235, %c40], %288 {strides = array<i32>} : memref<28x100xf32, #tpu.memory_space<vmem>>, vector<28x4xf32>,
      %c2_i32_236 = arith.constant 2 : i32
      %290 = arith.addi %234, %c2_i32_236 : i32
      %c0_237 = arith.constant 0 : index
      %291 = arith.index_cast %290 : i32 to index
      %c1_238 = arith.constant 1 : index
      %c0_239 = arith.constant 0 : index
      %292 = vector.load %arg1[%c0_237, %291, %c1_238, %c0_239] : memref<1x32x32x4xf32, #tpu.memory_space<vmem>>, vector<1x1x28x4xf32>
      %293 = vector.shape_cast %292 : vector<1x1x28x4xf32> to vector<28x4xf32>
      %c0_240 = arith.constant 0 : index
      %c44 = arith.constant 44 : index
      %294 = vector.load %arg11[%c0_240, %c44] : memref<28x100xf32, #tpu.memory_space<vmem>>, vector<28x4xf32>
      tpu.vector_store %arg11[%c0_240, %c44], %293 {strides = array<i32>} : memref<28x100xf32, #tpu.memory_space<vmem>>, vector<28x4xf32>,
      %c2_i32_241 = arith.constant 2 : i32
      %295 = arith.addi %234, %c2_i32_241 : i32
      %c0_242 = arith.constant 0 : index
      %296 = arith.index_cast %295 : i32 to index
      %c2_243 = arith.constant 2 : index
      %c0_244 = arith.constant 0 : index
      %297 = vector.load %arg1[%c0_242, %296, %c2_243, %c0_244] : memref<1x32x32x4xf32, #tpu.memory_space<vmem>>, vector<1x1x28x4xf32>
      %298 = vector.shape_cast %297 : vector<1x1x28x4xf32> to vector<28x4xf32>
      %c0_245 = arith.constant 0 : index
      %c48 = arith.constant 48 : index
      %299 = vector.load %arg11[%c0_245, %c48] : memref<28x100xf32, #tpu.memory_space<vmem>>, vector<28x4xf32>
      tpu.vector_store %arg11[%c0_245, %c48], %298 {strides = array<i32>} : memref<28x100xf32, #tpu.memory_space<vmem>>, vector<28x4xf32>,
      %c2_i32_246 = arith.constant 2 : i32
      %300 = arith.addi %234, %c2_i32_246 : i32
      %c0_247 = arith.constant 0 : index
      %301 = arith.index_cast %300 : i32 to index
      %c3_248 = arith.constant 3 : index
      %c0_249 = arith.constant 0 : index
      %302 = vector.load %arg1[%c0_247, %301, %c3_248, %c0_249] : memref<1x32x32x4xf32, #tpu.memory_space<vmem>>, vector<1x1x28x4xf32>
      %303 = vector.shape_cast %302 : vector<1x1x28x4xf32> to vector<28x4xf32>
      %c0_250 = arith.constant 0 : index
      %c52 = arith.constant 52 : index
      %304 = vector.load %arg11[%c0_250, %c52] : memref<28x100xf32, #tpu.memory_space<vmem>>, vector<28x4xf32>
      tpu.vector_store %arg11[%c0_250, %c52], %303 {strides = array<i32>} : memref<28x100xf32, #tpu.memory_space<vmem>>, vector<28x4xf32>,
      %c2_i32_251 = arith.constant 2 : i32
      %305 = arith.addi %234, %c2_i32_251 : i32
      %c0_252 = arith.constant 0 : index
      %306 = arith.index_cast %305 : i32 to index
      %c4_253 = arith.constant 4 : index
      %c0_254 = arith.constant 0 : index
      %307 = vector.load %arg1[%c0_252, %306, %c4_253, %c0_254] : memref<1x32x32x4xf32, #tpu.memory_space<vmem>>, vector<1x1x28x4xf32>
      %308 = vector.shape_cast %307 : vector<1x1x28x4xf32> to vector<28x4xf32>
      %c0_255 = arith.constant 0 : index
      %c56 = arith.constant 56 : index
      %309 = vector.load %arg11[%c0_255, %c56] : memref<28x100xf32, #tpu.memory_space<vmem>>, vector<28x4xf32>
      tpu.vector_store %arg11[%c0_255, %c56], %308 {strides = array<i32>} : memref<28x100xf32, #tpu.memory_space<vmem>>, vector<28x4xf32>,
      %c3_i32 = arith.constant 3 : i32
      %310 = arith.addi %234, %c3_i32 : i32
      %c0_256 = arith.constant 0 : index
      %311 = arith.index_cast %310 : i32 to index
      %c0_257 = arith.constant 0 : index
      %c0_258 = arith.constant 0 : index
      %312 = vector.load %arg1[%c0_256, %311, %c0_257, %c0_258] : memref<1x32x32x4xf32, #tpu.memory_space<vmem>>, vector<1x1x28x4xf32>
      %313 = vector.shape_cast %312 : vector<1x1x28x4xf32> to vector<28x4xf32>
      %c0_259 = arith.constant 0 : index
      %c60 = arith.constant 60 : index
      %314 = vector.load %arg11[%c0_259, %c60] : memref<28x100xf32, #tpu.memory_space<vmem>>, vector<28x4xf32>
      tpu.vector_store %arg11[%c0_259, %c60], %313 {strides = array<i32>} : memref<28x100xf32, #tpu.memory_space<vmem>>, vector<28x4xf32>,
      %c3_i32_260 = arith.constant 3 : i32
      %315 = arith.addi %234, %c3_i32_260 : i32
      %c0_261 = arith.constant 0 : index
      %316 = arith.index_cast %315 : i32 to index
      %c1_262 = arith.constant 1 : index
      %c0_263 = arith.constant 0 : index
      %317 = vector.load %arg1[%c0_261, %316, %c1_262, %c0_263] : memref<1x32x32x4xf32, #tpu.memory_space<vmem>>, vector<1x1x28x4xf32>
      %318 = vector.shape_cast %317 : vector<1x1x28x4xf32> to vector<28x4xf32>
      %c0_264 = arith.constant 0 : index
      %c64 = arith.constant 64 : index
      %319 = vector.load %arg11[%c0_264, %c64] : memref<28x100xf32, #tpu.memory_space<vmem>>, vector<28x4xf32>
      tpu.vector_store %arg11[%c0_264, %c64], %318 {strides = array<i32>} : memref<28x100xf32, #tpu.memory_space<vmem>>, vector<28x4xf32>,
      %c3_i32_265 = arith.constant 3 : i32
      %320 = arith.addi %234, %c3_i32_265 : i32
      %c0_266 = arith.constant 0 : index
      %321 = arith.index_cast %320 : i32 to index
      %c2_267 = arith.constant 2 : index
      %c0_268 = arith.constant 0 : index
      %322 = vector.load %arg1[%c0_266, %321, %c2_267, %c0_268] : memref<1x32x32x4xf32, #tpu.memory_space<vmem>>, vector<1x1x28x4xf32>
      %323 = vector.shape_cast %322 : vector<1x1x28x4xf32> to vector<28x4xf32>
      %c0_269 = arith.constant 0 : index
      %c68 = arith.constant 68 : index
      %324 = vector.load %arg11[%c0_269, %c68] : memref<28x100xf32, #tpu.memory_space<vmem>>, vector<28x4xf32>
      tpu.vector_store %arg11[%c0_269, %c68], %323 {strides = array<i32>} : memref<28x100xf32, #tpu.memory_space<vmem>>, vector<28x4xf32>,
      %c3_i32_270 = arith.constant 3 : i32
      %325 = arith.addi %234, %c3_i32_270 : i32
      %c0_271 = arith.constant 0 : index
      %326 = arith.index_cast %325 : i32 to index
      %c3_272 = arith.constant 3 : index
      %c0_273 = arith.constant 0 : index
      %327 = vector.load %arg1[%c0_271, %326, %c3_272, %c0_273] : memref<1x32x32x4xf32, #tpu.memory_space<vmem>>, vector<1x1x28x4xf32>
      %328 = vector.shape_cast %327 : vector<1x1x28x4xf32> to vector<28x4xf32>
      %c0_274 = arith.constant 0 : index
      %c72 = arith.constant 72 : index
      %329 = vector.load %arg11[%c0_274, %c72] : memref<28x100xf32, #tpu.memory_space<vmem>>, vector<28x4xf32>
      tpu.vector_store %arg11[%c0_274, %c72], %328 {strides = array<i32>} : memref<28x100xf32, #tpu.memory_space<vmem>>, vector<28x4xf32>,
      %c3_i32_275 = arith.constant 3 : i32
      %330 = arith.addi %234, %c3_i32_275 : i32
      %c0_276 = arith.constant 0 : index
      %331 = arith.index_cast %330 : i32 to index
      %c4_277 = arith.constant 4 : index
      %c0_278 = arith.constant 0 : index
      %332 = vector.load %arg1[%c0_276, %331, %c4_277, %c0_278] : memref<1x32x32x4xf32, #tpu.memory_space<vmem>>, vector<1x1x28x4xf32>
      %333 = vector.shape_cast %332 : vector<1x1x28x4xf32> to vector<28x4xf32>
      %c0_279 = arith.constant 0 : index
      %c76 = arith.constant 76 : index
      %334 = vector.load %arg11[%c0_279, %c76] : memref<28x100xf32, #tpu.memory_space<vmem>>, vector<28x4xf32>
      tpu.vector_store %arg11[%c0_279, %c76], %333 {strides = array<i32>} : memref<28x100xf32, #tpu.memory_space<vmem>>, vector<28x4xf32>,
      %c4_i32 = arith.constant 4 : i32
      %335 = arith.addi %234, %c4_i32 : i32
      %c0_280 = arith.constant 0 : index
      %336 = arith.index_cast %335 : i32 to index
      %c0_281 = arith.constant 0 : index
      %c0_282 = arith.constant 0 : index
      %337 = vector.load %arg1[%c0_280, %336, %c0_281, %c0_282] : memref<1x32x32x4xf32, #tpu.memory_space<vmem>>, vector<1x1x28x4xf32>
      %338 = vector.shape_cast %337 : vector<1x1x28x4xf32> to vector<28x4xf32>
      %c0_283 = arith.constant 0 : index
      %c80 = arith.constant 80 : index
      %339 = vector.load %arg11[%c0_283, %c80] : memref<28x100xf32, #tpu.memory_space<vmem>>, vector<28x4xf32>
      tpu.vector_store %arg11[%c0_283, %c80], %338 {strides = array<i32>} : memref<28x100xf32, #tpu.memory_space<vmem>>, vector<28x4xf32>,
      %c4_i32_284 = arith.constant 4 : i32
      %340 = arith.addi %234, %c4_i32_284 : i32
      %c0_285 = arith.constant 0 : index
      %341 = arith.index_cast %340 : i32 to index
      %c1_286 = arith.constant 1 : index
      %c0_287 = arith.constant 0 : index
      %342 = vector.load %arg1[%c0_285, %341, %c1_286, %c0_287] : memref<1x32x32x4xf32, #tpu.memory_space<vmem>>, vector<1x1x28x4xf32>
      %343 = vector.shape_cast %342 : vector<1x1x28x4xf32> to vector<28x4xf32>
      %c0_288 = arith.constant 0 : index
      %c84 = arith.constant 84 : index
      %344 = vector.load %arg11[%c0_288, %c84] : memref<28x100xf32, #tpu.memory_space<vmem>>, vector<28x4xf32>
      tpu.vector_store %arg11[%c0_288, %c84], %343 {strides = array<i32>} : memref<28x100xf32, #tpu.memory_space<vmem>>, vector<28x4xf32>,
      %c4_i32_289 = arith.constant 4 : i32
      %345 = arith.addi %234, %c4_i32_289 : i32
      %c0_290 = arith.constant 0 : index
      %346 = arith.index_cast %345 : i32 to index
      %c2_291 = arith.constant 2 : index
      %c0_292 = arith.constant 0 : index
      %347 = vector.load %arg1[%c0_290, %346, %c2_291, %c0_292] : memref<1x32x32x4xf32, #tpu.memory_space<vmem>>, vector<1x1x28x4xf32>
      %348 = vector.shape_cast %347 : vector<1x1x28x4xf32> to vector<28x4xf32>
      %c0_293 = arith.constant 0 : index
      %c88 = arith.constant 88 : index
      %349 = vector.load %arg11[%c0_293, %c88] : memref<28x100xf32, #tpu.memory_space<vmem>>, vector<28x4xf32>
      tpu.vector_store %arg11[%c0_293, %c88], %348 {strides = array<i32>} : memref<28x100xf32, #tpu.memory_space<vmem>>, vector<28x4xf32>,
      %c4_i32_294 = arith.constant 4 : i32
      %350 = arith.addi %234, %c4_i32_294 : i32
      %c0_295 = arith.constant 0 : index
      %351 = arith.index_cast %350 : i32 to index
      %c3_296 = arith.constant 3 : index
      %c0_297 = arith.constant 0 : index
      %352 = vector.load %arg1[%c0_295, %351, %c3_296, %c0_297] : memref<1x32x32x4xf32, #tpu.memory_space<vmem>>, vector<1x1x28x4xf32>
      %353 = vector.shape_cast %352 : vector<1x1x28x4xf32> to vector<28x4xf32>
      %c0_298 = arith.constant 0 : index
      %c92 = arith.constant 92 : index
      %354 = vector.load %arg11[%c0_298, %c92] : memref<28x100xf32, #tpu.memory_space<vmem>>, vector<28x4xf32>
      tpu.vector_store %arg11[%c0_298, %c92], %353 {strides = array<i32>} : memref<28x100xf32, #tpu.memory_space<vmem>>, vector<28x4xf32>,
      %c4_i32_299 = arith.constant 4 : i32
      %355 = arith.addi %234, %c4_i32_299 : i32
      %c0_300 = arith.constant 0 : index
      %356 = arith.index_cast %355 : i32 to index
      %c4_301 = arith.constant 4 : index
      %c0_302 = arith.constant 0 : index
      %357 = vector.load %arg1[%c0_300, %356, %c4_301, %c0_302] : memref<1x32x32x4xf32, #tpu.memory_space<vmem>>, vector<1x1x28x4xf32>
      %358 = vector.shape_cast %357 : vector<1x1x28x4xf32> to vector<28x4xf32>
      %c0_303 = arith.constant 0 : index
      %c96 = arith.constant 96 : index
      %359 = vector.load %arg11[%c0_303, %c96] : memref<28x100xf32, #tpu.memory_space<vmem>>, vector<28x4xf32>
      tpu.vector_store %arg11[%c0_303, %c96], %358 {strides = array<i32>} : memref<28x100xf32, #tpu.memory_space<vmem>>, vector<28x4xf32>,
      %c0_304 = arith.constant 0 : index
      %c0_305 = arith.constant 0 : index
      %360 = vector.load %arg11[%c0_304, %c0_305] : memref<28x100xf32, #tpu.memory_space<vmem>>, vector<28x100xf32>
      %361 = arith.truncf %360 : vector<28x100xf32> to vector<28x100xbf16>
      %c0_306 = arith.constant 0 : index
      %c0_307 = arith.constant 0 : index
      %362 = vector.load %arg2[%c0_306, %c0_307] : memref<100x32xbf16, #tpu.memory_space<vmem>>, vector<100x32xbf16>
      %cst_308 = arith.constant dense<0.000000e+00> : vector<28x32xf32>
      %363 = tpu.matmul %361, %362, %cst_308 {dimension_numbers = #tpu.dot_dimension_numbers<[1], [0], [0], [1], [0, 0, 1, 1], [], []>} : vector<28x100xbf16>, vector<100x32xbf16>, vector<28x32xf32> -> vector<28x32xf32>
      %c0_309 = arith.constant 0 : index
      %c0_310 = arith.constant 0 : index
      %364 = vector.load %arg3[%c0_309, %c0_310] : memref<1x32xf32, #tpu.memory_space<vmem>>, vector<1x32xf32>
      %365 = vector.broadcast %364 : vector<1x32xf32> to vector<28x32xf32>
      %366 = arith.addf %363, %365 : vector<28x32xf32>
      %cst_311 = arith.constant 0.000000e+00 : f32
      %367 = vector.broadcast %cst_311 : f32 to vector<28x32xf32>
      %368 = arith.maximumf %366, %367 : vector<28x32xf32>
      %c2_i32_312 = arith.constant 2 : i32
      %369 = arith.muli %c2_i32_312, %arg15 : i32
      %c1_i32_313 = arith.constant 1 : i32
      %370 = arith.addi %369, %c1_i32_313 : i32
      %c0_i32_314 = arith.constant 0 : i32
      %371 = arith.addi %370, %c0_i32_314 : i32
      %c0_315 = arith.constant 0 : index
      %372 = arith.index_cast %371 : i32 to index
      %c0_316 = arith.constant 0 : index
      %c0_317 = arith.constant 0 : index
      %373 = vector.load %arg1[%c0_315, %372, %c0_316, %c0_317] : memref<1x32x32x4xf32, #tpu.memory_space<vmem>>, vector<1x1x28x4xf32>
      %374 = vector.shape_cast %373 : vector<1x1x28x4xf32> to vector<28x4xf32>
      %c0_318 = arith.constant 0 : index
      %c0_319 = arith.constant 0 : index
      %375 = vector.load %arg11[%c0_318, %c0_319] : memref<28x100xf32, #tpu.memory_space<vmem>>, vector<28x4xf32>
      tpu.vector_store %arg11[%c0_318, %c0_319], %374 {strides = array<i32>} : memref<28x100xf32, #tpu.memory_space<vmem>>, vector<28x4xf32>,
      %c0_i32_320 = arith.constant 0 : i32
      %376 = arith.addi %370, %c0_i32_320 : i32
      %c0_321 = arith.constant 0 : index
      %377 = arith.index_cast %376 : i32 to index
      %c1_322 = arith.constant 1 : index
      %c0_323 = arith.constant 0 : index
      %378 = vector.load %arg1[%c0_321, %377, %c1_322, %c0_323] : memref<1x32x32x4xf32, #tpu.memory_space<vmem>>, vector<1x1x28x4xf32>
      %379 = vector.shape_cast %378 : vector<1x1x28x4xf32> to vector<28x4xf32>
      %c0_324 = arith.constant 0 : index
      %c4_325 = arith.constant 4 : index
      %380 = vector.load %arg11[%c0_324, %c4_325] : memref<28x100xf32, #tpu.memory_space<vmem>>, vector<28x4xf32>
      tpu.vector_store %arg11[%c0_324, %c4_325], %379 {strides = array<i32>} : memref<28x100xf32, #tpu.memory_space<vmem>>, vector<28x4xf32>,
      %c0_i32_326 = arith.constant 0 : i32
      %381 = arith.addi %370, %c0_i32_326 : i32
      %c0_327 = arith.constant 0 : index
      %382 = arith.index_cast %381 : i32 to index
      %c2_328 = arith.constant 2 : index
      %c0_329 = arith.constant 0 : index
      %383 = vector.load %arg1[%c0_327, %382, %c2_328, %c0_329] : memref<1x32x32x4xf32, #tpu.memory_space<vmem>>, vector<1x1x28x4xf32>
      %384 = vector.shape_cast %383 : vector<1x1x28x4xf32> to vector<28x4xf32>
      %c0_330 = arith.constant 0 : index
      %c8_331 = arith.constant 8 : index
      %385 = vector.load %arg11[%c0_330, %c8_331] : memref<28x100xf32, #tpu.memory_space<vmem>>, vector<28x4xf32>
      tpu.vector_store %arg11[%c0_330, %c8_331], %384 {strides = array<i32>} : memref<28x100xf32, #tpu.memory_space<vmem>>, vector<28x4xf32>,
      %c0_i32_332 = arith.constant 0 : i32
      %386 = arith.addi %370, %c0_i32_332 : i32
      %c0_333 = arith.constant 0 : index
      %387 = arith.index_cast %386 : i32 to index
      %c3_334 = arith.constant 3 : index
      %c0_335 = arith.constant 0 : index
      %388 = vector.load %arg1[%c0_333, %387, %c3_334, %c0_335] : memref<1x32x32x4xf32, #tpu.memory_space<vmem>>, vector<1x1x28x4xf32>
      %389 = vector.shape_cast %388 : vector<1x1x28x4xf32> to vector<28x4xf32>
      %c0_336 = arith.constant 0 : index
      %c12_337 = arith.constant 12 : index
      %390 = vector.load %arg11[%c0_336, %c12_337] : memref<28x100xf32, #tpu.memory_space<vmem>>, vector<28x4xf32>
      tpu.vector_store %arg11[%c0_336, %c12_337], %389 {strides = array<i32>} : memref<28x100xf32, #tpu.memory_space<vmem>>, vector<28x4xf32>,
      %c0_i32_338 = arith.constant 0 : i32
      %391 = arith.addi %370, %c0_i32_338 : i32
      %c0_339 = arith.constant 0 : index
      %392 = arith.index_cast %391 : i32 to index
      %c4_340 = arith.constant 4 : index
      %c0_341 = arith.constant 0 : index
      %393 = vector.load %arg1[%c0_339, %392, %c4_340, %c0_341] : memref<1x32x32x4xf32, #tpu.memory_space<vmem>>, vector<1x1x28x4xf32>
      %394 = vector.shape_cast %393 : vector<1x1x28x4xf32> to vector<28x4xf32>
      %c0_342 = arith.constant 0 : index
      %c16_343 = arith.constant 16 : index
      %395 = vector.load %arg11[%c0_342, %c16_343] : memref<28x100xf32, #tpu.memory_space<vmem>>, vector<28x4xf32>
      tpu.vector_store %arg11[%c0_342, %c16_343], %394 {strides = array<i32>} : memref<28x100xf32, #tpu.memory_space<vmem>>, vector<28x4xf32>,
      %c1_i32_344 = arith.constant 1 : i32
      %396 = arith.addi %370, %c1_i32_344 : i32
      %c0_345 = arith.constant 0 : index
      %397 = arith.index_cast %396 : i32 to index
      %c0_346 = arith.constant 0 : index
      %c0_347 = arith.constant 0 : index
      %398 = vector.load %arg1[%c0_345, %397, %c0_346, %c0_347] : memref<1x32x32x4xf32, #tpu.memory_space<vmem>>, vector<1x1x28x4xf32>
      %399 = vector.shape_cast %398 : vector<1x1x28x4xf32> to vector<28x4xf32>
      %c0_348 = arith.constant 0 : index
      %c20_349 = arith.constant 20 : index
      %400 = vector.load %arg11[%c0_348, %c20_349] : memref<28x100xf32, #tpu.memory_space<vmem>>, vector<28x4xf32>
      tpu.vector_store %arg11[%c0_348, %c20_349], %399 {strides = array<i32>} : memref<28x100xf32, #tpu.memory_space<vmem>>, vector<28x4xf32>,
      %c1_i32_350 = arith.constant 1 : i32
      %401 = arith.addi %370, %c1_i32_350 : i32
      %c0_351 = arith.constant 0 : index
      %402 = arith.index_cast %401 : i32 to index
      %c1_352 = arith.constant 1 : index
      %c0_353 = arith.constant 0 : index
      %403 = vector.load %arg1[%c0_351, %402, %c1_352, %c0_353] : memref<1x32x32x4xf32, #tpu.memory_space<vmem>>, vector<1x1x28x4xf32>
      %404 = vector.shape_cast %403 : vector<1x1x28x4xf32> to vector<28x4xf32>
      %c0_354 = arith.constant 0 : index
      %c24_355 = arith.constant 24 : index
      %405 = vector.load %arg11[%c0_354, %c24_355] : memref<28x100xf32, #tpu.memory_space<vmem>>, vector<28x4xf32>
      tpu.vector_store %arg11[%c0_354, %c24_355], %404 {strides = array<i32>} : memref<28x100xf32, #tpu.memory_space<vmem>>, vector<28x4xf32>,
      %c1_i32_356 = arith.constant 1 : i32
      %406 = arith.addi %370, %c1_i32_356 : i32
      %c0_357 = arith.constant 0 : index
      %407 = arith.index_cast %406 : i32 to index
      %c2_358 = arith.constant 2 : index
      %c0_359 = arith.constant 0 : index
      %408 = vector.load %arg1[%c0_357, %407, %c2_358, %c0_359] : memref<1x32x32x4xf32, #tpu.memory_space<vmem>>, vector<1x1x28x4xf32>
      %409 = vector.shape_cast %408 : vector<1x1x28x4xf32> to vector<28x4xf32>
      %c0_360 = arith.constant 0 : index
      %c28_361 = arith.constant 28 : index
      %410 = vector.load %arg11[%c0_360, %c28_361] : memref<28x100xf32, #tpu.memory_space<vmem>>, vector<28x4xf32>
      tpu.vector_store %arg11[%c0_360, %c28_361], %409 {strides = array<i32>} : memref<28x100xf32, #tpu.memory_space<vmem>>, vector<28x4xf32>,
      %c1_i32_362 = arith.constant 1 : i32
      %411 = arith.addi %370, %c1_i32_362 : i32
      %c0_363 = arith.constant 0 : index
      %412 = arith.index_cast %411 : i32 to index
      %c3_364 = arith.constant 3 : index
      %c0_365 = arith.constant 0 : index
      %413 = vector.load %arg1[%c0_363, %412, %c3_364, %c0_365] : memref<1x32x32x4xf32, #tpu.memory_space<vmem>>, vector<1x1x28x4xf32>
      %414 = vector.shape_cast %413 : vector<1x1x28x4xf32> to vector<28x4xf32>
      %c0_366 = arith.constant 0 : index
      %c32_367 = arith.constant 32 : index
      %415 = vector.load %arg11[%c0_366, %c32_367] : memref<28x100xf32, #tpu.memory_space<vmem>>, vector<28x4xf32>
      tpu.vector_store %arg11[%c0_366, %c32_367], %414 {strides = array<i32>} : memref<28x100xf32, #tpu.memory_space<vmem>>, vector<28x4xf32>,
      %c1_i32_368 = arith.constant 1 : i32
      %416 = arith.addi %370, %c1_i32_368 : i32
      %c0_369 = arith.constant 0 : index
      %417 = arith.index_cast %416 : i32 to index
      %c4_370 = arith.constant 4 : index
      %c0_371 = arith.constant 0 : index
      %418 = vector.load %arg1[%c0_369, %417, %c4_370, %c0_371] : memref<1x32x32x4xf32, #tpu.memory_space<vmem>>, vector<1x1x28x4xf32>
      %419 = vector.shape_cast %418 : vector<1x1x28x4xf32> to vector<28x4xf32>
      %c0_372 = arith.constant 0 : index
      %c36_373 = arith.constant 36 : index
      %420 = vector.load %arg11[%c0_372, %c36_373] : memref<28x100xf32, #tpu.memory_space<vmem>>, vector<28x4xf32>
      tpu.vector_store %arg11[%c0_372, %c36_373], %419 {strides = array<i32>} : memref<28x100xf32, #tpu.memory_space<vmem>>, vector<28x4xf32>,
      %c2_i32_374 = arith.constant 2 : i32
      %421 = arith.addi %370, %c2_i32_374 : i32
      %c0_375 = arith.constant 0 : index
      %422 = arith.index_cast %421 : i32 to index
      %c0_376 = arith.constant 0 : index
      %c0_377 = arith.constant 0 : index
      %423 = vector.load %arg1[%c0_375, %422, %c0_376, %c0_377] : memref<1x32x32x4xf32, #tpu.memory_space<vmem>>, vector<1x1x28x4xf32>
      %424 = vector.shape_cast %423 : vector<1x1x28x4xf32> to vector<28x4xf32>
      %c0_378 = arith.constant 0 : index
      %c40_379 = arith.constant 40 : index
      %425 = vector.load %arg11[%c0_378, %c40_379] : memref<28x100xf32, #tpu.memory_space<vmem>>, vector<28x4xf32>
      tpu.vector_store %arg11[%c0_378, %c40_379], %424 {strides = array<i32>} : memref<28x100xf32, #tpu.memory_space<vmem>>, vector<28x4xf32>,
      %c2_i32_380 = arith.constant 2 : i32
      %426 = arith.addi %370, %c2_i32_380 : i32
      %c0_381 = arith.constant 0 : index
      %427 = arith.index_cast %426 : i32 to index
      %c1_382 = arith.constant 1 : index
      %c0_383 = arith.constant 0 : index
      %428 = vector.load %arg1[%c0_381, %427, %c1_382, %c0_383] : memref<1x32x32x4xf32, #tpu.memory_space<vmem>>, vector<1x1x28x4xf32>
      %429 = vector.shape_cast %428 : vector<1x1x28x4xf32> to vector<28x4xf32>
      %c0_384 = arith.constant 0 : index
      %c44_385 = arith.constant 44 : index
      %430 = vector.load %arg11[%c0_384, %c44_385] : memref<28x100xf32, #tpu.memory_space<vmem>>, vector<28x4xf32>
      tpu.vector_store %arg11[%c0_384, %c44_385], %429 {strides = array<i32>} : memref<28x100xf32, #tpu.memory_space<vmem>>, vector<28x4xf32>,
      %c2_i32_386 = arith.constant 2 : i32
      %431 = arith.addi %370, %c2_i32_386 : i32
      %c0_387 = arith.constant 0 : index
      %432 = arith.index_cast %431 : i32 to index
      %c2_388 = arith.constant 2 : index
      %c0_389 = arith.constant 0 : index
      %433 = vector.load %arg1[%c0_387, %432, %c2_388, %c0_389] : memref<1x32x32x4xf32, #tpu.memory_space<vmem>>, vector<1x1x28x4xf32>
      %434 = vector.shape_cast %433 : vector<1x1x28x4xf32> to vector<28x4xf32>
      %c0_390 = arith.constant 0 : index
      %c48_391 = arith.constant 48 : index
      %435 = vector.load %arg11[%c0_390, %c48_391] : memref<28x100xf32, #tpu.memory_space<vmem>>, vector<28x4xf32>
      tpu.vector_store %arg11[%c0_390, %c48_391], %434 {strides = array<i32>} : memref<28x100xf32, #tpu.memory_space<vmem>>, vector<28x4xf32>,
      %c2_i32_392 = arith.constant 2 : i32
      %436 = arith.addi %370, %c2_i32_392 : i32
      %c0_393 = arith.constant 0 : index
      %437 = arith.index_cast %436 : i32 to index
      %c3_394 = arith.constant 3 : index
      %c0_395 = arith.constant 0 : index
      %438 = vector.load %arg1[%c0_393, %437, %c3_394, %c0_395] : memref<1x32x32x4xf32, #tpu.memory_space<vmem>>, vector<1x1x28x4xf32>
      %439 = vector.shape_cast %438 : vector<1x1x28x4xf32> to vector<28x4xf32>
      %c0_396 = arith.constant 0 : index
      %c52_397 = arith.constant 52 : index
      %440 = vector.load %arg11[%c0_396, %c52_397] : memref<28x100xf32, #tpu.memory_space<vmem>>, vector<28x4xf32>
      tpu.vector_store %arg11[%c0_396, %c52_397], %439 {strides = array<i32>} : memref<28x100xf32, #tpu.memory_space<vmem>>, vector<28x4xf32>,
      %c2_i32_398 = arith.constant 2 : i32
      %441 = arith.addi %370, %c2_i32_398 : i32
      %c0_399 = arith.constant 0 : index
      %442 = arith.index_cast %441 : i32 to index
      %c4_400 = arith.constant 4 : index
      %c0_401 = arith.constant 0 : index
      %443 = vector.load %arg1[%c0_399, %442, %c4_400, %c0_401] : memref<1x32x32x4xf32, #tpu.memory_space<vmem>>, vector<1x1x28x4xf32>
      %444 = vector.shape_cast %443 : vector<1x1x28x4xf32> to vector<28x4xf32>
      %c0_402 = arith.constant 0 : index
      %c56_403 = arith.constant 56 : index
      %445 = vector.load %arg11[%c0_402, %c56_403] : memref<28x100xf32, #tpu.memory_space<vmem>>, vector<28x4xf32>
      tpu.vector_store %arg11[%c0_402, %c56_403], %444 {strides = array<i32>} : memref<28x100xf32, #tpu.memory_space<vmem>>, vector<28x4xf32>,
      %c3_i32_404 = arith.constant 3 : i32
      %446 = arith.addi %370, %c3_i32_404 : i32
      %c0_405 = arith.constant 0 : index
      %447 = arith.index_cast %446 : i32 to index
      %c0_406 = arith.constant 0 : index
      %c0_407 = arith.constant 0 : index
      %448 = vector.load %arg1[%c0_405, %447, %c0_406, %c0_407] : memref<1x32x32x4xf32, #tpu.memory_space<vmem>>, vector<1x1x28x4xf32>
      %449 = vector.shape_cast %448 : vector<1x1x28x4xf32> to vector<28x4xf32>
      %c0_408 = arith.constant 0 : index
      %c60_409 = arith.constant 60 : index
      %450 = vector.load %arg11[%c0_408, %c60_409] : memref<28x100xf32, #tpu.memory_space<vmem>>, vector<28x4xf32>
      tpu.vector_store %arg11[%c0_408, %c60_409], %449 {strides = array<i32>} : memref<28x100xf32, #tpu.memory_space<vmem>>, vector<28x4xf32>,
      %c3_i32_410 = arith.constant 3 : i32
      %451 = arith.addi %370, %c3_i32_410 : i32
      %c0_411 = arith.constant 0 : index
      %452 = arith.index_cast %451 : i32 to index
      %c1_412 = arith.constant 1 : index
      %c0_413 = arith.constant 0 : index
      %453 = vector.load %arg1[%c0_411, %452, %c1_412, %c0_413] : memref<1x32x32x4xf32, #tpu.memory_space<vmem>>, vector<1x1x28x4xf32>
      %454 = vector.shape_cast %453 : vector<1x1x28x4xf32> to vector<28x4xf32>
      %c0_414 = arith.constant 0 : index
      %c64_415 = arith.constant 64 : index
      %455 = vector.load %arg11[%c0_414, %c64_415] : memref<28x100xf32, #tpu.memory_space<vmem>>, vector<28x4xf32>
      tpu.vector_store %arg11[%c0_414, %c64_415], %454 {strides = array<i32>} : memref<28x100xf32, #tpu.memory_space<vmem>>, vector<28x4xf32>,
      %c3_i32_416 = arith.constant 3 : i32
      %456 = arith.addi %370, %c3_i32_416 : i32
      %c0_417 = arith.constant 0 : index
      %457 = arith.index_cast %456 : i32 to index
      %c2_418 = arith.constant 2 : index
      %c0_419 = arith.constant 0 : index
      %458 = vector.load %arg1[%c0_417, %457, %c2_418, %c0_419] : memref<1x32x32x4xf32, #tpu.memory_space<vmem>>, vector<1x1x28x4xf32>
      %459 = vector.shape_cast %458 : vector<1x1x28x4xf32> to vector<28x4xf32>
      %c0_420 = arith.constant 0 : index
      %c68_421 = arith.constant 68 : index
      %460 = vector.load %arg11[%c0_420, %c68_421] : memref<28x100xf32, #tpu.memory_space<vmem>>, vector<28x4xf32>
      tpu.vector_store %arg11[%c0_420, %c68_421], %459 {strides = array<i32>} : memref<28x100xf32, #tpu.memory_space<vmem>>, vector<28x4xf32>,
      %c3_i32_422 = arith.constant 3 : i32
      %461 = arith.addi %370, %c3_i32_422 : i32
      %c0_423 = arith.constant 0 : index
      %462 = arith.index_cast %461 : i32 to index
      %c3_424 = arith.constant 3 : index
      %c0_425 = arith.constant 0 : index
      %463 = vector.load %arg1[%c0_423, %462, %c3_424, %c0_425] : memref<1x32x32x4xf32, #tpu.memory_space<vmem>>, vector<1x1x28x4xf32>
      %464 = vector.shape_cast %463 : vector<1x1x28x4xf32> to vector<28x4xf32>
      %c0_426 = arith.constant 0 : index
      %c72_427 = arith.constant 72 : index
      %465 = vector.load %arg11[%c0_426, %c72_427] : memref<28x100xf32, #tpu.memory_space<vmem>>, vector<28x4xf32>
      tpu.vector_store %arg11[%c0_426, %c72_427], %464 {strides = array<i32>} : memref<28x100xf32, #tpu.memory_space<vmem>>, vector<28x4xf32>,
      %c3_i32_428 = arith.constant 3 : i32
      %466 = arith.addi %370, %c3_i32_428 : i32
      %c0_429 = arith.constant 0 : index
      %467 = arith.index_cast %466 : i32 to index
      %c4_430 = arith.constant 4 : index
      %c0_431 = arith.constant 0 : index
      %468 = vector.load %arg1[%c0_429, %467, %c4_430, %c0_431] : memref<1x32x32x4xf32, #tpu.memory_space<vmem>>, vector<1x1x28x4xf32>
      %469 = vector.shape_cast %468 : vector<1x1x28x4xf32> to vector<28x4xf32>
      %c0_432 = arith.constant 0 : index
      %c76_433 = arith.constant 76 : index
      %470 = vector.load %arg11[%c0_432, %c76_433] : memref<28x100xf32, #tpu.memory_space<vmem>>, vector<28x4xf32>
      tpu.vector_store %arg11[%c0_432, %c76_433], %469 {strides = array<i32>} : memref<28x100xf32, #tpu.memory_space<vmem>>, vector<28x4xf32>,
      %c4_i32_434 = arith.constant 4 : i32
      %471 = arith.addi %370, %c4_i32_434 : i32
      %c0_435 = arith.constant 0 : index
      %472 = arith.index_cast %471 : i32 to index
      %c0_436 = arith.constant 0 : index
      %c0_437 = arith.constant 0 : index
      %473 = vector.load %arg1[%c0_435, %472, %c0_436, %c0_437] : memref<1x32x32x4xf32, #tpu.memory_space<vmem>>, vector<1x1x28x4xf32>
      %474 = vector.shape_cast %473 : vector<1x1x28x4xf32> to vector<28x4xf32>
      %c0_438 = arith.constant 0 : index
      %c80_439 = arith.constant 80 : index
      %475 = vector.load %arg11[%c0_438, %c80_439] : memref<28x100xf32, #tpu.memory_space<vmem>>, vector<28x4xf32>
      tpu.vector_store %arg11[%c0_438, %c80_439], %474 {strides = array<i32>} : memref<28x100xf32, #tpu.memory_space<vmem>>, vector<28x4xf32>,
      %c4_i32_440 = arith.constant 4 : i32
      %476 = arith.addi %370, %c4_i32_440 : i32
      %c0_441 = arith.constant 0 : index
      %477 = arith.index_cast %476 : i32 to index
      %c1_442 = arith.constant 1 : index
      %c0_443 = arith.constant 0 : index
      %478 = vector.load %arg1[%c0_441, %477, %c1_442, %c0_443] : memref<1x32x32x4xf32, #tpu.memory_space<vmem>>, vector<1x1x28x4xf32>
      %479 = vector.shape_cast %478 : vector<1x1x28x4xf32> to vector<28x4xf32>
      %c0_444 = arith.constant 0 : index
      %c84_445 = arith.constant 84 : index
      %480 = vector.load %arg11[%c0_444, %c84_445] : memref<28x100xf32, #tpu.memory_space<vmem>>, vector<28x4xf32>
      tpu.vector_store %arg11[%c0_444, %c84_445], %479 {strides = array<i32>} : memref<28x100xf32, #tpu.memory_space<vmem>>, vector<28x4xf32>,
      %c4_i32_446 = arith.constant 4 : i32
      %481 = arith.addi %370, %c4_i32_446 : i32
      %c0_447 = arith.constant 0 : index
      %482 = arith.index_cast %481 : i32 to index
      %c2_448 = arith.constant 2 : index
      %c0_449 = arith.constant 0 : index
      %483 = vector.load %arg1[%c0_447, %482, %c2_448, %c0_449] : memref<1x32x32x4xf32, #tpu.memory_space<vmem>>, vector<1x1x28x4xf32>
      %484 = vector.shape_cast %483 : vector<1x1x28x4xf32> to vector<28x4xf32>
      %c0_450 = arith.constant 0 : index
      %c88_451 = arith.constant 88 : index
      %485 = vector.load %arg11[%c0_450, %c88_451] : memref<28x100xf32, #tpu.memory_space<vmem>>, vector<28x4xf32>
      tpu.vector_store %arg11[%c0_450, %c88_451], %484 {strides = array<i32>} : memref<28x100xf32, #tpu.memory_space<vmem>>, vector<28x4xf32>,
      %c4_i32_452 = arith.constant 4 : i32
      %486 = arith.addi %370, %c4_i32_452 : i32
      %c0_453 = arith.constant 0 : index
      %487 = arith.index_cast %486 : i32 to index
      %c3_454 = arith.constant 3 : index
      %c0_455 = arith.constant 0 : index
      %488 = vector.load %arg1[%c0_453, %487, %c3_454, %c0_455] : memref<1x32x32x4xf32, #tpu.memory_space<vmem>>, vector<1x1x28x4xf32>
      %489 = vector.shape_cast %488 : vector<1x1x28x4xf32> to vector<28x4xf32>
      %c0_456 = arith.constant 0 : index
      %c92_457 = arith.constant 92 : index
      %490 = vector.load %arg11[%c0_456, %c92_457] : memref<28x100xf32, #tpu.memory_space<vmem>>, vector<28x4xf32>
      tpu.vector_store %arg11[%c0_456, %c92_457], %489 {strides = array<i32>} : memref<28x100xf32, #tpu.memory_space<vmem>>, vector<28x4xf32>,
      %c4_i32_458 = arith.constant 4 : i32
      %491 = arith.addi %370, %c4_i32_458 : i32
      %c0_459 = arith.constant 0 : index
      %492 = arith.index_cast %491 : i32 to index
      %c4_460 = arith.constant 4 : index
      %c0_461 = arith.constant 0 : index
      %493 = vector.load %arg1[%c0_459, %492, %c4_460, %c0_461] : memref<1x32x32x4xf32, #tpu.memory_space<vmem>>, vector<1x1x28x4xf32>
      %494 = vector.shape_cast %493 : vector<1x1x28x4xf32> to vector<28x4xf32>
      %c0_462 = arith.constant 0 : index
      %c96_463 = arith.constant 96 : index
      %495 = vector.load %arg11[%c0_462, %c96_463] : memref<28x100xf32, #tpu.memory_space<vmem>>, vector<28x4xf32>
      tpu.vector_store %arg11[%c0_462, %c96_463], %494 {strides = array<i32>} : memref<28x100xf32, #tpu.memory_space<vmem>>, vector<28x4xf32>,
      %c0_464 = arith.constant 0 : index
      %c0_465 = arith.constant 0 : index
      %496 = vector.load %arg11[%c0_464, %c0_465] : memref<28x100xf32, #tpu.memory_space<vmem>>, vector<28x100xf32>
      %497 = arith.truncf %496 : vector<28x100xf32> to vector<28x100xbf16>
      %c0_466 = arith.constant 0 : index
      %c0_467 = arith.constant 0 : index
      %498 = vector.load %arg2[%c0_466, %c0_467] : memref<100x32xbf16, #tpu.memory_space<vmem>>, vector<100x32xbf16>
      %cst_468 = arith.constant dense<0.000000e+00> : vector<28x32xf32>
      %499 = tpu.matmul %497, %498, %cst_468 {dimension_numbers = #tpu.dot_dimension_numbers<[1], [0], [0], [1], [0, 0, 1, 1], [], []>} : vector<28x100xbf16>, vector<100x32xbf16>, vector<28x32xf32> -> vector<28x32xf32>
      %c0_469 = arith.constant 0 : index
      %c0_470 = arith.constant 0 : index
      %500 = vector.load %arg3[%c0_469, %c0_470] : memref<1x32xf32, #tpu.memory_space<vmem>>, vector<1x32xf32>
      %501 = vector.broadcast %500 : vector<1x32xf32> to vector<28x32xf32>
      %502 = arith.addf %499, %501 : vector<28x32xf32>
      %cst_471 = arith.constant 0.000000e+00 : f32
      %503 = vector.broadcast %cst_471 : f32 to vector<28x32xf32>
      %504 = arith.maximumf %502, %503 : vector<28x32xf32>
      %505 = arith.maximumf %368, %504 : vector<28x32xf32>
      %cst_472 = arith.constant dense<0.000000e+00> : vector<14x32xf32>
      %506 = tpu.matmul %6, %505, %cst_472 {dimension_numbers = #tpu.dot_dimension_numbers<[1], [0], [0], [1], [0, 0, 1, 1], [], []>} : vector<14x28xf32>, vector<28x32xf32>, vector<14x32xf32> -> vector<14x32xf32>
      %cst_473 = arith.constant dense<0.000000e+00> : vector<14x32xf32>
      %507 = tpu.matmul %13, %505, %cst_473 {dimension_numbers = #tpu.dot_dimension_numbers<[1], [0], [0], [1], [0, 0, 1, 1], [], []>} : vector<14x28xf32>, vector<28x32xf32>, vector<14x32xf32> -> vector<14x32xf32>
      %508 = arith.maximumf %506, %507 : vector<14x32xf32>
      %509 = arith.index_cast %arg15 : i32 to index
      %c0_474 = arith.constant 0 : index
      %c0_475 = arith.constant 0 : index
      %510 = vector.load %arg13[%509, %c0_474, %c0_475] : memref<14x14x32xf32, #tpu.memory_space<vmem>>, vector<1x14x32xf32>
      %511 = vector.shape_cast %510 : vector<1x14x32xf32> to vector<14x32xf32>
      %512 = vector.shape_cast %508 : vector<14x32xf32> to vector<1x14x32xf32>
      tpu.vector_store %arg13[%509, %c0_474, %c0_475], %512 {strides = array<i32>} : memref<14x14x32xf32, #tpu.memory_space<vmem>>, vector<1x14x32xf32>,
    }
    %c14_i32_5 = arith.constant 14 : i32
    %c0_i32_6 = arith.constant 0 : i32
    %c5_i32 = arith.constant 5 : i32
    %29 = arith.addi %c0_i32_6, %c5_i32 : i32
    %c1_i32_7 = arith.constant 1 : i32
    scf.for %arg15 = %c0_i32_6 to %29 step %c1_i32_7  : i32 {
      %c2_i32_173 = arith.constant 2 : i32
      %234 = arith.muli %c2_i32_173, %arg15 : i32
      %c0_i32_174 = arith.constant 0 : i32
      %235 = arith.addi %234, %c0_i32_174 : i32
      %236 = arith.index_cast %235 : i32 to index
      %c0_175 = arith.constant 0 : index
      %c0_176 = arith.constant 0 : index
      %237 = vector.load %arg13[%236, %c0_175, %c0_176] : memref<14x14x32xf32, #tpu.memory_space<vmem>>, vector<1x10x32xf32>
      %238 = vector.shape_cast %237 : vector<1x10x32xf32> to vector<10x32xf32>
      %c0_177 = arith.constant 0 : index
      %c0_178 = arith.constant 0 : index
      %239 = vector.load %arg12[%c0_177, %c0_178] : memref<10x800xf32, #tpu.memory_space<vmem>>, vector<10x32xf32>
      tpu.vector_store %arg12[%c0_177, %c0_178], %238 {strides = array<i32>} : memref<10x800xf32, #tpu.memory_space<vmem>>, vector<10x32xf32>,
      %c0_i32_179 = arith.constant 0 : i32
      %240 = arith.addi %234, %c0_i32_179 : i32
      %241 = arith.index_cast %240 : i32 to index
      %c1_180 = arith.constant 1 : index
      %c0_181 = arith.constant 0 : index
      %242 = vector.load %arg13[%241, %c1_180, %c0_181] : memref<14x14x32xf32, #tpu.memory_space<vmem>>, vector<1x10x32xf32>
      %243 = vector.shape_cast %242 : vector<1x10x32xf32> to vector<10x32xf32>
      %c0_182 = arith.constant 0 : index
      %c32 = arith.constant 32 : index
      %244 = vector.load %arg12[%c0_182, %c32] : memref<10x800xf32, #tpu.memory_space<vmem>>, vector<10x32xf32>
      tpu.vector_store %arg12[%c0_182, %c32], %243 {strides = array<i32>} : memref<10x800xf32, #tpu.memory_space<vmem>>, vector<10x32xf32>,
      %c0_i32_183 = arith.constant 0 : i32
      %245 = arith.addi %234, %c0_i32_183 : i32
      %246 = arith.index_cast %245 : i32 to index
      %c2_184 = arith.constant 2 : index
      %c0_185 = arith.constant 0 : index
      %247 = vector.load %arg13[%246, %c2_184, %c0_185] : memref<14x14x32xf32, #tpu.memory_space<vmem>>, vector<1x10x32xf32>
      %248 = vector.shape_cast %247 : vector<1x10x32xf32> to vector<10x32xf32>
      %c0_186 = arith.constant 0 : index
      %c64 = arith.constant 64 : index
      %249 = vector.load %arg12[%c0_186, %c64] : memref<10x800xf32, #tpu.memory_space<vmem>>, vector<10x32xf32>
      tpu.vector_store %arg12[%c0_186, %c64], %248 {strides = array<i32>} : memref<10x800xf32, #tpu.memory_space<vmem>>, vector<10x32xf32>,
      %c0_i32_187 = arith.constant 0 : i32
      %250 = arith.addi %234, %c0_i32_187 : i32
      %251 = arith.index_cast %250 : i32 to index
      %c3_188 = arith.constant 3 : index
      %c0_189 = arith.constant 0 : index
      %252 = vector.load %arg13[%251, %c3_188, %c0_189] : memref<14x14x32xf32, #tpu.memory_space<vmem>>, vector<1x10x32xf32>
      %253 = vector.shape_cast %252 : vector<1x10x32xf32> to vector<10x32xf32>
      %c0_190 = arith.constant 0 : index
      %c96 = arith.constant 96 : index
      %254 = vector.load %arg12[%c0_190, %c96] : memref<10x800xf32, #tpu.memory_space<vmem>>, vector<10x32xf32>
      tpu.vector_store %arg12[%c0_190, %c96], %253 {strides = array<i32>} : memref<10x800xf32, #tpu.memory_space<vmem>>, vector<10x32xf32>,
      %c0_i32_191 = arith.constant 0 : i32
      %255 = arith.addi %234, %c0_i32_191 : i32
      %256 = arith.index_cast %255 : i32 to index
      %c4_192 = arith.constant 4 : index
      %c0_193 = arith.constant 0 : index
      %257 = vector.load %arg13[%256, %c4_192, %c0_193] : memref<14x14x32xf32, #tpu.memory_space<vmem>>, vector<1x10x32xf32>
      %258 = vector.shape_cast %257 : vector<1x10x32xf32> to vector<10x32xf32>
      %c0_194 = arith.constant 0 : index
      %c128 = arith.constant 128 : index
      %259 = vector.load %arg12[%c0_194, %c128] : memref<10x800xf32, #tpu.memory_space<vmem>>, vector<10x32xf32>
      tpu.vector_store %arg12[%c0_194, %c128], %258 {strides = array<i32>} : memref<10x800xf32, #tpu.memory_space<vmem>>, vector<10x32xf32>,
      %c1_i32_195 = arith.constant 1 : i32
      %260 = arith.addi %234, %c1_i32_195 : i32
      %261 = arith.index_cast %260 : i32 to index
      %c0_196 = arith.constant 0 : index
      %c0_197 = arith.constant 0 : index
      %262 = vector.load %arg13[%261, %c0_196, %c0_197] : memref<14x14x32xf32, #tpu.memory_space<vmem>>, vector<1x10x32xf32>
      %263 = vector.shape_cast %262 : vector<1x10x32xf32> to vector<10x32xf32>
      %c0_198 = arith.constant 0 : index
      %c160 = arith.constant 160 : index
      %264 = vector.load %arg12[%c0_198, %c160] : memref<10x800xf32, #tpu.memory_space<vmem>>, vector<10x32xf32>
      tpu.vector_store %arg12[%c0_198, %c160], %263 {strides = array<i32>} : memref<10x800xf32, #tpu.memory_space<vmem>>, vector<10x32xf32>,
      %c1_i32_199 = arith.constant 1 : i32
      %265 = arith.addi %234, %c1_i32_199 : i32
      %266 = arith.index_cast %265 : i32 to index
      %c1_200 = arith.constant 1 : index
      %c0_201 = arith.constant 0 : index
      %267 = vector.load %arg13[%266, %c1_200, %c0_201] : memref<14x14x32xf32, #tpu.memory_space<vmem>>, vector<1x10x32xf32>
      %268 = vector.shape_cast %267 : vector<1x10x32xf32> to vector<10x32xf32>
      %c0_202 = arith.constant 0 : index
      %c192 = arith.constant 192 : index
      %269 = vector.load %arg12[%c0_202, %c192] : memref<10x800xf32, #tpu.memory_space<vmem>>, vector<10x32xf32>
      tpu.vector_store %arg12[%c0_202, %c192], %268 {strides = array<i32>} : memref<10x800xf32, #tpu.memory_space<vmem>>, vector<10x32xf32>,
      %c1_i32_203 = arith.constant 1 : i32
      %270 = arith.addi %234, %c1_i32_203 : i32
      %271 = arith.index_cast %270 : i32 to index
      %c2_204 = arith.constant 2 : index
      %c0_205 = arith.constant 0 : index
      %272 = vector.load %arg13[%271, %c2_204, %c0_205] : memref<14x14x32xf32, #tpu.memory_space<vmem>>, vector<1x10x32xf32>
      %273 = vector.shape_cast %272 : vector<1x10x32xf32> to vector<10x32xf32>
      %c0_206 = arith.constant 0 : index
      %c224 = arith.constant 224 : index
      %274 = vector.load %arg12[%c0_206, %c224] : memref<10x800xf32, #tpu.memory_space<vmem>>, vector<10x32xf32>
      tpu.vector_store %arg12[%c0_206, %c224], %273 {strides = array<i32>} : memref<10x800xf32, #tpu.memory_space<vmem>>, vector<10x32xf32>,
      %c1_i32_207 = arith.constant 1 : i32
      %275 = arith.addi %234, %c1_i32_207 : i32
      %276 = arith.index_cast %275 : i32 to index
      %c3_208 = arith.constant 3 : index
      %c0_209 = arith.constant 0 : index
      %277 = vector.load %arg13[%276, %c3_208, %c0_209] : memref<14x14x32xf32, #tpu.memory_space<vmem>>, vector<1x10x32xf32>
      %278 = vector.shape_cast %277 : vector<1x10x32xf32> to vector<10x32xf32>
      %c0_210 = arith.constant 0 : index
      %c256 = arith.constant 256 : index
      %279 = vector.load %arg12[%c0_210, %c256] : memref<10x800xf32, #tpu.memory_space<vmem>>, vector<10x32xf32>
      tpu.vector_store %arg12[%c0_210, %c256], %278 {strides = array<i32>} : memref<10x800xf32, #tpu.memory_space<vmem>>, vector<10x32xf32>,
      %c1_i32_211 = arith.constant 1 : i32
      %280 = arith.addi %234, %c1_i32_211 : i32
      %281 = arith.index_cast %280 : i32 to index
      %c4_212 = arith.constant 4 : index
      %c0_213 = arith.constant 0 : index
      %282 = vector.load %arg13[%281, %c4_212, %c0_213] : memref<14x14x32xf32, #tpu.memory_space<vmem>>, vector<1x10x32xf32>
      %283 = vector.shape_cast %282 : vector<1x10x32xf32> to vector<10x32xf32>
      %c0_214 = arith.constant 0 : index
      %c288 = arith.constant 288 : index
      %284 = vector.load %arg12[%c0_214, %c288] : memref<10x800xf32, #tpu.memory_space<vmem>>, vector<10x32xf32>
      tpu.vector_store %arg12[%c0_214, %c288], %283 {strides = array<i32>} : memref<10x800xf32, #tpu.memory_space<vmem>>, vector<10x32xf32>,
      %c2_i32_215 = arith.constant 2 : i32
      %285 = arith.addi %234, %c2_i32_215 : i32
      %286 = arith.index_cast %285 : i32 to index
      %c0_216 = arith.constant 0 : index
      %c0_217 = arith.constant 0 : index
      %287 = vector.load %arg13[%286, %c0_216, %c0_217] : memref<14x14x32xf32, #tpu.memory_space<vmem>>, vector<1x10x32xf32>
      %288 = vector.shape_cast %287 : vector<1x10x32xf32> to vector<10x32xf32>
      %c0_218 = arith.constant 0 : index
      %c320 = arith.constant 320 : index
      %289 = vector.load %arg12[%c0_218, %c320] : memref<10x800xf32, #tpu.memory_space<vmem>>, vector<10x32xf32>
      tpu.vector_store %arg12[%c0_218, %c320], %288 {strides = array<i32>} : memref<10x800xf32, #tpu.memory_space<vmem>>, vector<10x32xf32>,
      %c2_i32_219 = arith.constant 2 : i32
      %290 = arith.addi %234, %c2_i32_219 : i32
      %291 = arith.index_cast %290 : i32 to index
      %c1_220 = arith.constant 1 : index
      %c0_221 = arith.constant 0 : index
      %292 = vector.load %arg13[%291, %c1_220, %c0_221] : memref<14x14x32xf32, #tpu.memory_space<vmem>>, vector<1x10x32xf32>
      %293 = vector.shape_cast %292 : vector<1x10x32xf32> to vector<10x32xf32>
      %c0_222 = arith.constant 0 : index
      %c352 = arith.constant 352 : index
      %294 = vector.load %arg12[%c0_222, %c352] : memref<10x800xf32, #tpu.memory_space<vmem>>, vector<10x32xf32>
      tpu.vector_store %arg12[%c0_222, %c352], %293 {strides = array<i32>} : memref<10x800xf32, #tpu.memory_space<vmem>>, vector<10x32xf32>,
      %c2_i32_223 = arith.constant 2 : i32
      %295 = arith.addi %234, %c2_i32_223 : i32
      %296 = arith.index_cast %295 : i32 to index
      %c2_224 = arith.constant 2 : index
      %c0_225 = arith.constant 0 : index
      %297 = vector.load %arg13[%296, %c2_224, %c0_225] : memref<14x14x32xf32, #tpu.memory_space<vmem>>, vector<1x10x32xf32>
      %298 = vector.shape_cast %297 : vector<1x10x32xf32> to vector<10x32xf32>
      %c0_226 = arith.constant 0 : index
      %c384 = arith.constant 384 : index
      %299 = vector.load %arg12[%c0_226, %c384] : memref<10x800xf32, #tpu.memory_space<vmem>>, vector<10x32xf32>
      tpu.vector_store %arg12[%c0_226, %c384], %298 {strides = array<i32>} : memref<10x800xf32, #tpu.memory_space<vmem>>, vector<10x32xf32>,
      %c2_i32_227 = arith.constant 2 : i32
      %300 = arith.addi %234, %c2_i32_227 : i32
      %301 = arith.index_cast %300 : i32 to index
      %c3_228 = arith.constant 3 : index
      %c0_229 = arith.constant 0 : index
      %302 = vector.load %arg13[%301, %c3_228, %c0_229] : memref<14x14x32xf32, #tpu.memory_space<vmem>>, vector<1x10x32xf32>
      %303 = vector.shape_cast %302 : vector<1x10x32xf32> to vector<10x32xf32>
      %c0_230 = arith.constant 0 : index
      %c416 = arith.constant 416 : index
      %304 = vector.load %arg12[%c0_230, %c416] : memref<10x800xf32, #tpu.memory_space<vmem>>, vector<10x32xf32>
      tpu.vector_store %arg12[%c0_230, %c416], %303 {strides = array<i32>} : memref<10x800xf32, #tpu.memory_space<vmem>>, vector<10x32xf32>,
      %c2_i32_231 = arith.constant 2 : i32
      %305 = arith.addi %234, %c2_i32_231 : i32
      %306 = arith.index_cast %305 : i32 to index
      %c4_232 = arith.constant 4 : index
      %c0_233 = arith.constant 0 : index
      %307 = vector.load %arg13[%306, %c4_232, %c0_233] : memref<14x14x32xf32, #tpu.memory_space<vmem>>, vector<1x10x32xf32>
      %308 = vector.shape_cast %307 : vector<1x10x32xf32> to vector<10x32xf32>
      %c0_234 = arith.constant 0 : index
      %c448 = arith.constant 448 : index
      %309 = vector.load %arg12[%c0_234, %c448] : memref<10x800xf32, #tpu.memory_space<vmem>>, vector<10x32xf32>
      tpu.vector_store %arg12[%c0_234, %c448], %308 {strides = array<i32>} : memref<10x800xf32, #tpu.memory_space<vmem>>, vector<10x32xf32>,
      %c3_i32 = arith.constant 3 : i32
      %310 = arith.addi %234, %c3_i32 : i32
      %311 = arith.index_cast %310 : i32 to index
      %c0_235 = arith.constant 0 : index
      %c0_236 = arith.constant 0 : index
      %312 = vector.load %arg13[%311, %c0_235, %c0_236] : memref<14x14x32xf32, #tpu.memory_space<vmem>>, vector<1x10x32xf32>
      %313 = vector.shape_cast %312 : vector<1x10x32xf32> to vector<10x32xf32>
      %c0_237 = arith.constant 0 : index
      %c480 = arith.constant 480 : index
      %314 = vector.load %arg12[%c0_237, %c480] : memref<10x800xf32, #tpu.memory_space<vmem>>, vector<10x32xf32>
      tpu.vector_store %arg12[%c0_237, %c480], %313 {strides = array<i32>} : memref<10x800xf32, #tpu.memory_space<vmem>>, vector<10x32xf32>,
      %c3_i32_238 = arith.constant 3 : i32
      %315 = arith.addi %234, %c3_i32_238 : i32
      %316 = arith.index_cast %315 : i32 to index
      %c1_239 = arith.constant 1 : index
      %c0_240 = arith.constant 0 : index
      %317 = vector.load %arg13[%316, %c1_239, %c0_240] : memref<14x14x32xf32, #tpu.memory_space<vmem>>, vector<1x10x32xf32>
      %318 = vector.shape_cast %317 : vector<1x10x32xf32> to vector<10x32xf32>
      %c0_241 = arith.constant 0 : index
      %c512 = arith.constant 512 : index
      %319 = vector.load %arg12[%c0_241, %c512] : memref<10x800xf32, #tpu.memory_space<vmem>>, vector<10x32xf32>
      tpu.vector_store %arg12[%c0_241, %c512], %318 {strides = array<i32>} : memref<10x800xf32, #tpu.memory_space<vmem>>, vector<10x32xf32>,
      %c3_i32_242 = arith.constant 3 : i32
      %320 = arith.addi %234, %c3_i32_242 : i32
      %321 = arith.index_cast %320 : i32 to index
      %c2_243 = arith.constant 2 : index
      %c0_244 = arith.constant 0 : index
      %322 = vector.load %arg13[%321, %c2_243, %c0_244] : memref<14x14x32xf32, #tpu.memory_space<vmem>>, vector<1x10x32xf32>
      %323 = vector.shape_cast %322 : vector<1x10x32xf32> to vector<10x32xf32>
      %c0_245 = arith.constant 0 : index
      %c544 = arith.constant 544 : index
      %324 = vector.load %arg12[%c0_245, %c544] : memref<10x800xf32, #tpu.memory_space<vmem>>, vector<10x32xf32>
      tpu.vector_store %arg12[%c0_245, %c544], %323 {strides = array<i32>} : memref<10x800xf32, #tpu.memory_space<vmem>>, vector<10x32xf32>,
      %c3_i32_246 = arith.constant 3 : i32
      %325 = arith.addi %234, %c3_i32_246 : i32
      %326 = arith.index_cast %325 : i32 to index
      %c3_247 = arith.constant 3 : index
      %c0_248 = arith.constant 0 : index
      %327 = vector.load %arg13[%326, %c3_247, %c0_248] : memref<14x14x32xf32, #tpu.memory_space<vmem>>, vector<1x10x32xf32>
      %328 = vector.shape_cast %327 : vector<1x10x32xf32> to vector<10x32xf32>
      %c0_249 = arith.constant 0 : index
      %c576 = arith.constant 576 : index
      %329 = vector.load %arg12[%c0_249, %c576] : memref<10x800xf32, #tpu.memory_space<vmem>>, vector<10x32xf32>
      tpu.vector_store %arg12[%c0_249, %c576], %328 {strides = array<i32>} : memref<10x800xf32, #tpu.memory_space<vmem>>, vector<10x32xf32>,
      %c3_i32_250 = arith.constant 3 : i32
      %330 = arith.addi %234, %c3_i32_250 : i32
      %331 = arith.index_cast %330 : i32 to index
      %c4_251 = arith.constant 4 : index
      %c0_252 = arith.constant 0 : index
      %332 = vector.load %arg13[%331, %c4_251, %c0_252] : memref<14x14x32xf32, #tpu.memory_space<vmem>>, vector<1x10x32xf32>
      %333 = vector.shape_cast %332 : vector<1x10x32xf32> to vector<10x32xf32>
      %c0_253 = arith.constant 0 : index
      %c608 = arith.constant 608 : index
      %334 = vector.load %arg12[%c0_253, %c608] : memref<10x800xf32, #tpu.memory_space<vmem>>, vector<10x32xf32>
      tpu.vector_store %arg12[%c0_253, %c608], %333 {strides = array<i32>} : memref<10x800xf32, #tpu.memory_space<vmem>>, vector<10x32xf32>,
      %c4_i32 = arith.constant 4 : i32
      %335 = arith.addi %234, %c4_i32 : i32
      %336 = arith.index_cast %335 : i32 to index
      %c0_254 = arith.constant 0 : index
      %c0_255 = arith.constant 0 : index
      %337 = vector.load %arg13[%336, %c0_254, %c0_255] : memref<14x14x32xf32, #tpu.memory_space<vmem>>, vector<1x10x32xf32>
      %338 = vector.shape_cast %337 : vector<1x10x32xf32> to vector<10x32xf32>
      %c0_256 = arith.constant 0 : index
      %c640 = arith.constant 640 : index
      %339 = vector.load %arg12[%c0_256, %c640] : memref<10x800xf32, #tpu.memory_space<vmem>>, vector<10x32xf32>
      tpu.vector_store %arg12[%c0_256, %c640], %338 {strides = array<i32>} : memref<10x800xf32, #tpu.memory_space<vmem>>, vector<10x32xf32>,
      %c4_i32_257 = arith.constant 4 : i32
      %340 = arith.addi %234, %c4_i32_257 : i32
      %341 = arith.index_cast %340 : i32 to index
      %c1_258 = arith.constant 1 : index
      %c0_259 = arith.constant 0 : index
      %342 = vector.load %arg13[%341, %c1_258, %c0_259] : memref<14x14x32xf32, #tpu.memory_space<vmem>>, vector<1x10x32xf32>
      %343 = vector.shape_cast %342 : vector<1x10x32xf32> to vector<10x32xf32>
      %c0_260 = arith.constant 0 : index
      %c672 = arith.constant 672 : index
      %344 = vector.load %arg12[%c0_260, %c672] : memref<10x800xf32, #tpu.memory_space<vmem>>, vector<10x32xf32>
      tpu.vector_store %arg12[%c0_260, %c672], %343 {strides = array<i32>} : memref<10x800xf32, #tpu.memory_space<vmem>>, vector<10x32xf32>,
      %c4_i32_261 = arith.constant 4 : i32
      %345 = arith.addi %234, %c4_i32_261 : i32
      %346 = arith.index_cast %345 : i32 to index
      %c2_262 = arith.constant 2 : index
      %c0_263 = arith.constant 0 : index
      %347 = vector.load %arg13[%346, %c2_262, %c0_263] : memref<14x14x32xf32, #tpu.memory_space<vmem>>, vector<1x10x32xf32>
      %348 = vector.shape_cast %347 : vector<1x10x32xf32> to vector<10x32xf32>
      %c0_264 = arith.constant 0 : index
      %c704 = arith.constant 704 : index
      %349 = vector.load %arg12[%c0_264, %c704] : memref<10x800xf32, #tpu.memory_space<vmem>>, vector<10x32xf32>
      tpu.vector_store %arg12[%c0_264, %c704], %348 {strides = array<i32>} : memref<10x800xf32, #tpu.memory_space<vmem>>, vector<10x32xf32>,
      %c4_i32_265 = arith.constant 4 : i32
      %350 = arith.addi %234, %c4_i32_265 : i32
      %351 = arith.index_cast %350 : i32 to index
      %c3_266 = arith.constant 3 : index
      %c0_267 = arith.constant 0 : index
      %352 = vector.load %arg13[%351, %c3_266, %c0_267] : memref<14x14x32xf32, #tpu.memory_space<vmem>>, vector<1x10x32xf32>
      %353 = vector.shape_cast %352 : vector<1x10x32xf32> to vector<10x32xf32>
      %c0_268 = arith.constant 0 : index
      %c736 = arith.constant 736 : index
      %354 = vector.load %arg12[%c0_268, %c736] : memref<10x800xf32, #tpu.memory_space<vmem>>, vector<10x32xf32>
      tpu.vector_store %arg12[%c0_268, %c736], %353 {strides = array<i32>} : memref<10x800xf32, #tpu.memory_space<vmem>>, vector<10x32xf32>,
      %c4_i32_269 = arith.constant 4 : i32
      %355 = arith.addi %234, %c4_i32_269 : i32
      %356 = arith.index_cast %355 : i32 to index
      %c4_270 = arith.constant 4 : index
      %c0_271 = arith.constant 0 : index
      %357 = vector.load %arg13[%356, %c4_270, %c0_271] : memref<14x14x32xf32, #tpu.memory_space<vmem>>, vector<1x10x32xf32>
      %358 = vector.shape_cast %357 : vector<1x10x32xf32> to vector<10x32xf32>
      %c0_272 = arith.constant 0 : index
      %c768 = arith.constant 768 : index
      %359 = vector.load %arg12[%c0_272, %c768] : memref<10x800xf32, #tpu.memory_space<vmem>>, vector<10x32xf32>
      tpu.vector_store %arg12[%c0_272, %c768], %358 {strides = array<i32>} : memref<10x800xf32, #tpu.memory_space<vmem>>, vector<10x32xf32>,
      %c0_273 = arith.constant 0 : index
      %c0_274 = arith.constant 0 : index
      %360 = vector.load %arg12[%c0_273, %c0_274] : memref<10x800xf32, #tpu.memory_space<vmem>>, vector<10x800xf32>
      %361 = arith.truncf %360 : vector<10x800xf32> to vector<10x800xbf16>
      %c0_275 = arith.constant 0 : index
      %c0_276 = arith.constant 0 : index
      %362 = vector.load %arg4[%c0_275, %c0_276] : memref<800x128xbf16, #tpu.memory_space<vmem>>, vector<800x128xbf16>
      %cst_277 = arith.constant dense<0.000000e+00> : vector<10x128xf32>
      %363 = tpu.matmul %361, %362, %cst_277 {dimension_numbers = #tpu.dot_dimension_numbers<[1], [0], [0], [1], [0, 0, 1, 1], [], []>} : vector<10x800xbf16>, vector<800x128xbf16>, vector<10x128xf32> -> vector<10x128xf32>
      %c0_278 = arith.constant 0 : index
      %c0_279 = arith.constant 0 : index
      %364 = vector.load %arg5[%c0_278, %c0_279] : memref<1x128xf32, #tpu.memory_space<vmem>>, vector<1x128xf32>
      %365 = vector.broadcast %364 : vector<1x128xf32> to vector<10x128xf32>
      %366 = arith.addf %363, %365 : vector<10x128xf32>
      %cst_280 = arith.constant 0.000000e+00 : f32
      %367 = vector.broadcast %cst_280 : f32 to vector<10x128xf32>
      %368 = arith.maximumf %366, %367 : vector<10x128xf32>
      %c2_i32_281 = arith.constant 2 : i32
      %369 = arith.muli %c2_i32_281, %arg15 : i32
      %c1_i32_282 = arith.constant 1 : i32
      %370 = arith.addi %369, %c1_i32_282 : i32
      %c0_i32_283 = arith.constant 0 : i32
      %371 = arith.addi %370, %c0_i32_283 : i32
      %372 = arith.index_cast %371 : i32 to index
      %c0_284 = arith.constant 0 : index
      %c0_285 = arith.constant 0 : index
      %373 = vector.load %arg13[%372, %c0_284, %c0_285] : memref<14x14x32xf32, #tpu.memory_space<vmem>>, vector<1x10x32xf32>
      %374 = vector.shape_cast %373 : vector<1x10x32xf32> to vector<10x32xf32>
      %c0_286 = arith.constant 0 : index
      %c0_287 = arith.constant 0 : index
      %375 = vector.load %arg12[%c0_286, %c0_287] : memref<10x800xf32, #tpu.memory_space<vmem>>, vector<10x32xf32>
      tpu.vector_store %arg12[%c0_286, %c0_287], %374 {strides = array<i32>} : memref<10x800xf32, #tpu.memory_space<vmem>>, vector<10x32xf32>,
      %c0_i32_288 = arith.constant 0 : i32
      %376 = arith.addi %370, %c0_i32_288 : i32
      %377 = arith.index_cast %376 : i32 to index
      %c1_289 = arith.constant 1 : index
      %c0_290 = arith.constant 0 : index
      %378 = vector.load %arg13[%377, %c1_289, %c0_290] : memref<14x14x32xf32, #tpu.memory_space<vmem>>, vector<1x10x32xf32>
      %379 = vector.shape_cast %378 : vector<1x10x32xf32> to vector<10x32xf32>
      %c0_291 = arith.constant 0 : index
      %c32_292 = arith.constant 32 : index
      %380 = vector.load %arg12[%c0_291, %c32_292] : memref<10x800xf32, #tpu.memory_space<vmem>>, vector<10x32xf32>
      tpu.vector_store %arg12[%c0_291, %c32_292], %379 {strides = array<i32>} : memref<10x800xf32, #tpu.memory_space<vmem>>, vector<10x32xf32>,
      %c0_i32_293 = arith.constant 0 : i32
      %381 = arith.addi %370, %c0_i32_293 : i32
      %382 = arith.index_cast %381 : i32 to index
      %c2_294 = arith.constant 2 : index
      %c0_295 = arith.constant 0 : index
      %383 = vector.load %arg13[%382, %c2_294, %c0_295] : memref<14x14x32xf32, #tpu.memory_space<vmem>>, vector<1x10x32xf32>
      %384 = vector.shape_cast %383 : vector<1x10x32xf32> to vector<10x32xf32>
      %c0_296 = arith.constant 0 : index
      %c64_297 = arith.constant 64 : index
      %385 = vector.load %arg12[%c0_296, %c64_297] : memref<10x800xf32, #tpu.memory_space<vmem>>, vector<10x32xf32>
      tpu.vector_store %arg12[%c0_296, %c64_297], %384 {strides = array<i32>} : memref<10x800xf32, #tpu.memory_space<vmem>>, vector<10x32xf32>,
      %c0_i32_298 = arith.constant 0 : i32
      %386 = arith.addi %370, %c0_i32_298 : i32
      %387 = arith.index_cast %386 : i32 to index
      %c3_299 = arith.constant 3 : index
      %c0_300 = arith.constant 0 : index
      %388 = vector.load %arg13[%387, %c3_299, %c0_300] : memref<14x14x32xf32, #tpu.memory_space<vmem>>, vector<1x10x32xf32>
      %389 = vector.shape_cast %388 : vector<1x10x32xf32> to vector<10x32xf32>
      %c0_301 = arith.constant 0 : index
      %c96_302 = arith.constant 96 : index
      %390 = vector.load %arg12[%c0_301, %c96_302] : memref<10x800xf32, #tpu.memory_space<vmem>>, vector<10x32xf32>
      tpu.vector_store %arg12[%c0_301, %c96_302], %389 {strides = array<i32>} : memref<10x800xf32, #tpu.memory_space<vmem>>, vector<10x32xf32>,
      %c0_i32_303 = arith.constant 0 : i32
      %391 = arith.addi %370, %c0_i32_303 : i32
      %392 = arith.index_cast %391 : i32 to index
      %c4_304 = arith.constant 4 : index
      %c0_305 = arith.constant 0 : index
      %393 = vector.load %arg13[%392, %c4_304, %c0_305] : memref<14x14x32xf32, #tpu.memory_space<vmem>>, vector<1x10x32xf32>
      %394 = vector.shape_cast %393 : vector<1x10x32xf32> to vector<10x32xf32>
      %c0_306 = arith.constant 0 : index
      %c128_307 = arith.constant 128 : index
      %395 = vector.load %arg12[%c0_306, %c128_307] : memref<10x800xf32, #tpu.memory_space<vmem>>, vector<10x32xf32>
      tpu.vector_store %arg12[%c0_306, %c128_307], %394 {strides = array<i32>} : memref<10x800xf32, #tpu.memory_space<vmem>>, vector<10x32xf32>,
      %c1_i32_308 = arith.constant 1 : i32
      %396 = arith.addi %370, %c1_i32_308 : i32
      %397 = arith.index_cast %396 : i32 to index
      %c0_309 = arith.constant 0 : index
      %c0_310 = arith.constant 0 : index
      %398 = vector.load %arg13[%397, %c0_309, %c0_310] : memref<14x14x32xf32, #tpu.memory_space<vmem>>, vector<1x10x32xf32>
      %399 = vector.shape_cast %398 : vector<1x10x32xf32> to vector<10x32xf32>
      %c0_311 = arith.constant 0 : index
      %c160_312 = arith.constant 160 : index
      %400 = vector.load %arg12[%c0_311, %c160_312] : memref<10x800xf32, #tpu.memory_space<vmem>>, vector<10x32xf32>
      tpu.vector_store %arg12[%c0_311, %c160_312], %399 {strides = array<i32>} : memref<10x800xf32, #tpu.memory_space<vmem>>, vector<10x32xf32>,
      %c1_i32_313 = arith.constant 1 : i32
      %401 = arith.addi %370, %c1_i32_313 : i32
      %402 = arith.index_cast %401 : i32 to index
      %c1_314 = arith.constant 1 : index
      %c0_315 = arith.constant 0 : index
      %403 = vector.load %arg13[%402, %c1_314, %c0_315] : memref<14x14x32xf32, #tpu.memory_space<vmem>>, vector<1x10x32xf32>
      %404 = vector.shape_cast %403 : vector<1x10x32xf32> to vector<10x32xf32>
      %c0_316 = arith.constant 0 : index
      %c192_317 = arith.constant 192 : index
      %405 = vector.load %arg12[%c0_316, %c192_317] : memref<10x800xf32, #tpu.memory_space<vmem>>, vector<10x32xf32>
      tpu.vector_store %arg12[%c0_316, %c192_317], %404 {strides = array<i32>} : memref<10x800xf32, #tpu.memory_space<vmem>>, vector<10x32xf32>,
      %c1_i32_318 = arith.constant 1 : i32
      %406 = arith.addi %370, %c1_i32_318 : i32
      %407 = arith.index_cast %406 : i32 to index
      %c2_319 = arith.constant 2 : index
      %c0_320 = arith.constant 0 : index
      %408 = vector.load %arg13[%407, %c2_319, %c0_320] : memref<14x14x32xf32, #tpu.memory_space<vmem>>, vector<1x10x32xf32>
      %409 = vector.shape_cast %408 : vector<1x10x32xf32> to vector<10x32xf32>
      %c0_321 = arith.constant 0 : index
      %c224_322 = arith.constant 224 : index
      %410 = vector.load %arg12[%c0_321, %c224_322] : memref<10x800xf32, #tpu.memory_space<vmem>>, vector<10x32xf32>
      tpu.vector_store %arg12[%c0_321, %c224_322], %409 {strides = array<i32>} : memref<10x800xf32, #tpu.memory_space<vmem>>, vector<10x32xf32>,
      %c1_i32_323 = arith.constant 1 : i32
      %411 = arith.addi %370, %c1_i32_323 : i32
      %412 = arith.index_cast %411 : i32 to index
      %c3_324 = arith.constant 3 : index
      %c0_325 = arith.constant 0 : index
      %413 = vector.load %arg13[%412, %c3_324, %c0_325] : memref<14x14x32xf32, #tpu.memory_space<vmem>>, vector<1x10x32xf32>
      %414 = vector.shape_cast %413 : vector<1x10x32xf32> to vector<10x32xf32>
      %c0_326 = arith.constant 0 : index
      %c256_327 = arith.constant 256 : index
      %415 = vector.load %arg12[%c0_326, %c256_327] : memref<10x800xf32, #tpu.memory_space<vmem>>, vector<10x32xf32>
      tpu.vector_store %arg12[%c0_326, %c256_327], %414 {strides = array<i32>} : memref<10x800xf32, #tpu.memory_space<vmem>>, vector<10x32xf32>,
      %c1_i32_328 = arith.constant 1 : i32
      %416 = arith.addi %370, %c1_i32_328 : i32
      %417 = arith.index_cast %416 : i32 to index
      %c4_329 = arith.constant 4 : index
      %c0_330 = arith.constant 0 : index
      %418 = vector.load %arg13[%417, %c4_329, %c0_330] : memref<14x14x32xf32, #tpu.memory_space<vmem>>, vector<1x10x32xf32>
      %419 = vector.shape_cast %418 : vector<1x10x32xf32> to vector<10x32xf32>
      %c0_331 = arith.constant 0 : index
      %c288_332 = arith.constant 288 : index
      %420 = vector.load %arg12[%c0_331, %c288_332] : memref<10x800xf32, #tpu.memory_space<vmem>>, vector<10x32xf32>
      tpu.vector_store %arg12[%c0_331, %c288_332], %419 {strides = array<i32>} : memref<10x800xf32, #tpu.memory_space<vmem>>, vector<10x32xf32>,
      %c2_i32_333 = arith.constant 2 : i32
      %421 = arith.addi %370, %c2_i32_333 : i32
      %422 = arith.index_cast %421 : i32 to index
      %c0_334 = arith.constant 0 : index
      %c0_335 = arith.constant 0 : index
      %423 = vector.load %arg13[%422, %c0_334, %c0_335] : memref<14x14x32xf32, #tpu.memory_space<vmem>>, vector<1x10x32xf32>
      %424 = vector.shape_cast %423 : vector<1x10x32xf32> to vector<10x32xf32>
      %c0_336 = arith.constant 0 : index
      %c320_337 = arith.constant 320 : index
      %425 = vector.load %arg12[%c0_336, %c320_337] : memref<10x800xf32, #tpu.memory_space<vmem>>, vector<10x32xf32>
      tpu.vector_store %arg12[%c0_336, %c320_337], %424 {strides = array<i32>} : memref<10x800xf32, #tpu.memory_space<vmem>>, vector<10x32xf32>,
      %c2_i32_338 = arith.constant 2 : i32
      %426 = arith.addi %370, %c2_i32_338 : i32
      %427 = arith.index_cast %426 : i32 to index
      %c1_339 = arith.constant 1 : index
      %c0_340 = arith.constant 0 : index
      %428 = vector.load %arg13[%427, %c1_339, %c0_340] : memref<14x14x32xf32, #tpu.memory_space<vmem>>, vector<1x10x32xf32>
      %429 = vector.shape_cast %428 : vector<1x10x32xf32> to vector<10x32xf32>
      %c0_341 = arith.constant 0 : index
      %c352_342 = arith.constant 352 : index
      %430 = vector.load %arg12[%c0_341, %c352_342] : memref<10x800xf32, #tpu.memory_space<vmem>>, vector<10x32xf32>
      tpu.vector_store %arg12[%c0_341, %c352_342], %429 {strides = array<i32>} : memref<10x800xf32, #tpu.memory_space<vmem>>, vector<10x32xf32>,
      %c2_i32_343 = arith.constant 2 : i32
      %431 = arith.addi %370, %c2_i32_343 : i32
      %432 = arith.index_cast %431 : i32 to index
      %c2_344 = arith.constant 2 : index
      %c0_345 = arith.constant 0 : index
      %433 = vector.load %arg13[%432, %c2_344, %c0_345] : memref<14x14x32xf32, #tpu.memory_space<vmem>>, vector<1x10x32xf32>
      %434 = vector.shape_cast %433 : vector<1x10x32xf32> to vector<10x32xf32>
      %c0_346 = arith.constant 0 : index
      %c384_347 = arith.constant 384 : index
      %435 = vector.load %arg12[%c0_346, %c384_347] : memref<10x800xf32, #tpu.memory_space<vmem>>, vector<10x32xf32>
      tpu.vector_store %arg12[%c0_346, %c384_347], %434 {strides = array<i32>} : memref<10x800xf32, #tpu.memory_space<vmem>>, vector<10x32xf32>,
      %c2_i32_348 = arith.constant 2 : i32
      %436 = arith.addi %370, %c2_i32_348 : i32
      %437 = arith.index_cast %436 : i32 to index
      %c3_349 = arith.constant 3 : index
      %c0_350 = arith.constant 0 : index
      %438 = vector.load %arg13[%437, %c3_349, %c0_350] : memref<14x14x32xf32, #tpu.memory_space<vmem>>, vector<1x10x32xf32>
      %439 = vector.shape_cast %438 : vector<1x10x32xf32> to vector<10x32xf32>
      %c0_351 = arith.constant 0 : index
      %c416_352 = arith.constant 416 : index
      %440 = vector.load %arg12[%c0_351, %c416_352] : memref<10x800xf32, #tpu.memory_space<vmem>>, vector<10x32xf32>
      tpu.vector_store %arg12[%c0_351, %c416_352], %439 {strides = array<i32>} : memref<10x800xf32, #tpu.memory_space<vmem>>, vector<10x32xf32>,
      %c2_i32_353 = arith.constant 2 : i32
      %441 = arith.addi %370, %c2_i32_353 : i32
      %442 = arith.index_cast %441 : i32 to index
      %c4_354 = arith.constant 4 : index
      %c0_355 = arith.constant 0 : index
      %443 = vector.load %arg13[%442, %c4_354, %c0_355] : memref<14x14x32xf32, #tpu.memory_space<vmem>>, vector<1x10x32xf32>
      %444 = vector.shape_cast %443 : vector<1x10x32xf32> to vector<10x32xf32>
      %c0_356 = arith.constant 0 : index
      %c448_357 = arith.constant 448 : index
      %445 = vector.load %arg12[%c0_356, %c448_357] : memref<10x800xf32, #tpu.memory_space<vmem>>, vector<10x32xf32>
      tpu.vector_store %arg12[%c0_356, %c448_357], %444 {strides = array<i32>} : memref<10x800xf32, #tpu.memory_space<vmem>>, vector<10x32xf32>,
      %c3_i32_358 = arith.constant 3 : i32
      %446 = arith.addi %370, %c3_i32_358 : i32
      %447 = arith.index_cast %446 : i32 to index
      %c0_359 = arith.constant 0 : index
      %c0_360 = arith.constant 0 : index
      %448 = vector.load %arg13[%447, %c0_359, %c0_360] : memref<14x14x32xf32, #tpu.memory_space<vmem>>, vector<1x10x32xf32>
      %449 = vector.shape_cast %448 : vector<1x10x32xf32> to vector<10x32xf32>
      %c0_361 = arith.constant 0 : index
      %c480_362 = arith.constant 480 : index
      %450 = vector.load %arg12[%c0_361, %c480_362] : memref<10x800xf32, #tpu.memory_space<vmem>>, vector<10x32xf32>
      tpu.vector_store %arg12[%c0_361, %c480_362], %449 {strides = array<i32>} : memref<10x800xf32, #tpu.memory_space<vmem>>, vector<10x32xf32>,
      %c3_i32_363 = arith.constant 3 : i32
      %451 = arith.addi %370, %c3_i32_363 : i32
      %452 = arith.index_cast %451 : i32 to index
      %c1_364 = arith.constant 1 : index
      %c0_365 = arith.constant 0 : index
      %453 = vector.load %arg13[%452, %c1_364, %c0_365] : memref<14x14x32xf32, #tpu.memory_space<vmem>>, vector<1x10x32xf32>
      %454 = vector.shape_cast %453 : vector<1x10x32xf32> to vector<10x32xf32>
      %c0_366 = arith.constant 0 : index
      %c512_367 = arith.constant 512 : index
      %455 = vector.load %arg12[%c0_366, %c512_367] : memref<10x800xf32, #tpu.memory_space<vmem>>, vector<10x32xf32>
      tpu.vector_store %arg12[%c0_366, %c512_367], %454 {strides = array<i32>} : memref<10x800xf32, #tpu.memory_space<vmem>>, vector<10x32xf32>,
      %c3_i32_368 = arith.constant 3 : i32
      %456 = arith.addi %370, %c3_i32_368 : i32
      %457 = arith.index_cast %456 : i32 to index
      %c2_369 = arith.constant 2 : index
      %c0_370 = arith.constant 0 : index
      %458 = vector.load %arg13[%457, %c2_369, %c0_370] : memref<14x14x32xf32, #tpu.memory_space<vmem>>, vector<1x10x32xf32>
      %459 = vector.shape_cast %458 : vector<1x10x32xf32> to vector<10x32xf32>
      %c0_371 = arith.constant 0 : index
      %c544_372 = arith.constant 544 : index
      %460 = vector.load %arg12[%c0_371, %c544_372] : memref<10x800xf32, #tpu.memory_space<vmem>>, vector<10x32xf32>
      tpu.vector_store %arg12[%c0_371, %c544_372], %459 {strides = array<i32>} : memref<10x800xf32, #tpu.memory_space<vmem>>, vector<10x32xf32>,
      %c3_i32_373 = arith.constant 3 : i32
      %461 = arith.addi %370, %c3_i32_373 : i32
      %462 = arith.index_cast %461 : i32 to index
      %c3_374 = arith.constant 3 : index
      %c0_375 = arith.constant 0 : index
      %463 = vector.load %arg13[%462, %c3_374, %c0_375] : memref<14x14x32xf32, #tpu.memory_space<vmem>>, vector<1x10x32xf32>
      %464 = vector.shape_cast %463 : vector<1x10x32xf32> to vector<10x32xf32>
      %c0_376 = arith.constant 0 : index
      %c576_377 = arith.constant 576 : index
      %465 = vector.load %arg12[%c0_376, %c576_377] : memref<10x800xf32, #tpu.memory_space<vmem>>, vector<10x32xf32>
      tpu.vector_store %arg12[%c0_376, %c576_377], %464 {strides = array<i32>} : memref<10x800xf32, #tpu.memory_space<vmem>>, vector<10x32xf32>,
      %c3_i32_378 = arith.constant 3 : i32
      %466 = arith.addi %370, %c3_i32_378 : i32
      %467 = arith.index_cast %466 : i32 to index
      %c4_379 = arith.constant 4 : index
      %c0_380 = arith.constant 0 : index
      %468 = vector.load %arg13[%467, %c4_379, %c0_380] : memref<14x14x32xf32, #tpu.memory_space<vmem>>, vector<1x10x32xf32>
      %469 = vector.shape_cast %468 : vector<1x10x32xf32> to vector<10x32xf32>
      %c0_381 = arith.constant 0 : index
      %c608_382 = arith.constant 608 : index
      %470 = vector.load %arg12[%c0_381, %c608_382] : memref<10x800xf32, #tpu.memory_space<vmem>>, vector<10x32xf32>
      tpu.vector_store %arg12[%c0_381, %c608_382], %469 {strides = array<i32>} : memref<10x800xf32, #tpu.memory_space<vmem>>, vector<10x32xf32>,
      %c4_i32_383 = arith.constant 4 : i32
      %471 = arith.addi %370, %c4_i32_383 : i32
      %472 = arith.index_cast %471 : i32 to index
      %c0_384 = arith.constant 0 : index
      %c0_385 = arith.constant 0 : index
      %473 = vector.load %arg13[%472, %c0_384, %c0_385] : memref<14x14x32xf32, #tpu.memory_space<vmem>>, vector<1x10x32xf32>
      %474 = vector.shape_cast %473 : vector<1x10x32xf32> to vector<10x32xf32>
      %c0_386 = arith.constant 0 : index
      %c640_387 = arith.constant 640 : index
      %475 = vector.load %arg12[%c0_386, %c640_387] : memref<10x800xf32, #tpu.memory_space<vmem>>, vector<10x32xf32>
      tpu.vector_store %arg12[%c0_386, %c640_387], %474 {strides = array<i32>} : memref<10x800xf32, #tpu.memory_space<vmem>>, vector<10x32xf32>,
      %c4_i32_388 = arith.constant 4 : i32
      %476 = arith.addi %370, %c4_i32_388 : i32
      %477 = arith.index_cast %476 : i32 to index
      %c1_389 = arith.constant 1 : index
      %c0_390 = arith.constant 0 : index
      %478 = vector.load %arg13[%477, %c1_389, %c0_390] : memref<14x14x32xf32, #tpu.memory_space<vmem>>, vector<1x10x32xf32>
      %479 = vector.shape_cast %478 : vector<1x10x32xf32> to vector<10x32xf32>
      %c0_391 = arith.constant 0 : index
      %c672_392 = arith.constant 672 : index
      %480 = vector.load %arg12[%c0_391, %c672_392] : memref<10x800xf32, #tpu.memory_space<vmem>>, vector<10x32xf32>
      tpu.vector_store %arg12[%c0_391, %c672_392], %479 {strides = array<i32>} : memref<10x800xf32, #tpu.memory_space<vmem>>, vector<10x32xf32>,
      %c4_i32_393 = arith.constant 4 : i32
      %481 = arith.addi %370, %c4_i32_393 : i32
      %482 = arith.index_cast %481 : i32 to index
      %c2_394 = arith.constant 2 : index
      %c0_395 = arith.constant 0 : index
      %483 = vector.load %arg13[%482, %c2_394, %c0_395] : memref<14x14x32xf32, #tpu.memory_space<vmem>>, vector<1x10x32xf32>
      %484 = vector.shape_cast %483 : vector<1x10x32xf32> to vector<10x32xf32>
      %c0_396 = arith.constant 0 : index
      %c704_397 = arith.constant 704 : index
      %485 = vector.load %arg12[%c0_396, %c704_397] : memref<10x800xf32, #tpu.memory_space<vmem>>, vector<10x32xf32>
      tpu.vector_store %arg12[%c0_396, %c704_397], %484 {strides = array<i32>} : memref<10x800xf32, #tpu.memory_space<vmem>>, vector<10x32xf32>,
      %c4_i32_398 = arith.constant 4 : i32
      %486 = arith.addi %370, %c4_i32_398 : i32
      %487 = arith.index_cast %486 : i32 to index
      %c3_399 = arith.constant 3 : index
      %c0_400 = arith.constant 0 : index
      %488 = vector.load %arg13[%487, %c3_399, %c0_400] : memref<14x14x32xf32, #tpu.memory_space<vmem>>, vector<1x10x32xf32>
      %489 = vector.shape_cast %488 : vector<1x10x32xf32> to vector<10x32xf32>
      %c0_401 = arith.constant 0 : index
      %c736_402 = arith.constant 736 : index
      %490 = vector.load %arg12[%c0_401, %c736_402] : memref<10x800xf32, #tpu.memory_space<vmem>>, vector<10x32xf32>
      tpu.vector_store %arg12[%c0_401, %c736_402], %489 {strides = array<i32>} : memref<10x800xf32, #tpu.memory_space<vmem>>, vector<10x32xf32>,
      %c4_i32_403 = arith.constant 4 : i32
      %491 = arith.addi %370, %c4_i32_403 : i32
      %492 = arith.index_cast %491 : i32 to index
      %c4_404 = arith.constant 4 : index
      %c0_405 = arith.constant 0 : index
      %493 = vector.load %arg13[%492, %c4_404, %c0_405] : memref<14x14x32xf32, #tpu.memory_space<vmem>>, vector<1x10x32xf32>
      %494 = vector.shape_cast %493 : vector<1x10x32xf32> to vector<10x32xf32>
      %c0_406 = arith.constant 0 : index
      %c768_407 = arith.constant 768 : index
      %495 = vector.load %arg12[%c0_406, %c768_407] : memref<10x800xf32, #tpu.memory_space<vmem>>, vector<10x32xf32>
      tpu.vector_store %arg12[%c0_406, %c768_407], %494 {strides = array<i32>} : memref<10x800xf32, #tpu.memory_space<vmem>>, vector<10x32xf32>,
      %c0_408 = arith.constant 0 : index
      %c0_409 = arith.constant 0 : index
      %496 = vector.load %arg12[%c0_408, %c0_409] : memref<10x800xf32, #tpu.memory_space<vmem>>, vector<10x800xf32>
      %497 = arith.truncf %496 : vector<10x800xf32> to vector<10x800xbf16>
      %c0_410 = arith.constant 0 : index
      %c0_411 = arith.constant 0 : index
      %498 = vector.load %arg4[%c0_410, %c0_411] : memref<800x128xbf16, #tpu.memory_space<vmem>>, vector<800x128xbf16>
      %cst_412 = arith.constant dense<0.000000e+00> : vector<10x128xf32>
      %499 = tpu.matmul %497, %498, %cst_412 {dimension_numbers = #tpu.dot_dimension_numbers<[1], [0], [0], [1], [0, 0, 1, 1], [], []>} : vector<10x800xbf16>, vector<800x128xbf16>, vector<10x128xf32> -> vector<10x128xf32>
      %c0_413 = arith.constant 0 : index
      %c0_414 = arith.constant 0 : index
      %500 = vector.load %arg5[%c0_413, %c0_414] : memref<1x128xf32, #tpu.memory_space<vmem>>, vector<1x128xf32>
      %501 = vector.broadcast %500 : vector<1x128xf32> to vector<10x128xf32>
      %502 = arith.addf %499, %501 : vector<10x128xf32>
      %cst_415 = arith.constant 0.000000e+00 : f32
      %503 = vector.broadcast %cst_415 : f32 to vector<10x128xf32>
      %504 = arith.maximumf %502, %503 : vector<10x128xf32>
      %505 = arith.maximumf %368, %504 : vector<10x128xf32>
      %cst_416 = arith.constant dense<0.000000e+00> : vector<5x128xf32>
      %506 = tpu.matmul %20, %505, %cst_416 {dimension_numbers = #tpu.dot_dimension_numbers<[1], [0], [0], [1], [0, 0, 1, 1], [], []>} : vector<5x10xf32>, vector<10x128xf32>, vector<5x128xf32> -> vector<5x128xf32>
      %cst_417 = arith.constant dense<0.000000e+00> : vector<5x128xf32>
      %507 = tpu.matmul %27, %505, %cst_417 {dimension_numbers = #tpu.dot_dimension_numbers<[1], [0], [0], [1], [0, 0, 1, 1], [], []>} : vector<5x10xf32>, vector<10x128xf32>, vector<5x128xf32> -> vector<5x128xf32>
      %508 = arith.maximumf %506, %507 : vector<5x128xf32>
      %509 = arith.index_cast %arg15 : i32 to index
      %c0_418 = arith.constant 0 : index
      %c0_419 = arith.constant 0 : index
      %510 = vector.load %arg14[%509, %c0_418, %c0_419] : memref<5x5x128xf32, #tpu.memory_space<vmem>>, vector<1x5x128xf32>
      %511 = vector.shape_cast %510 : vector<1x5x128xf32> to vector<5x128xf32>
      %512 = vector.shape_cast %508 : vector<5x128xf32> to vector<1x5x128xf32>
      tpu.vector_store %arg14[%509, %c0_418, %c0_419], %512 {strides = array<i32>} : memref<5x5x128xf32, #tpu.memory_space<vmem>>, vector<1x5x128xf32>,
    }
    %c5_i32_8 = arith.constant 5 : i32
    %c0 = arith.constant 0 : index
    %c0_9 = arith.constant 0 : index
    %30 = vector.load %arg7[%c0, %c0_9] : memref<1x128xf32, #tpu.memory_space<vmem>>, vector<1x128xf32>
    %c0_10 = arith.constant 0 : index
    %c0_11 = arith.constant 0 : index
    %c0_12 = arith.constant 0 : index
    %31 = vector.load %arg14[%c0_10, %c0_11, %c0_12] : memref<5x5x128xf32, #tpu.memory_space<vmem>>, vector<1x1x128xf32>
    %32 = vector.shape_cast %31 : vector<1x1x128xf32> to vector<1x128xf32>
    %33 = arith.truncf %32 : vector<1x128xf32> to vector<1x128xbf16>
    %c0_13 = arith.constant 0 : index
    %c0_14 = arith.constant 0 : index
    %c0_15 = arith.constant 0 : index
    %34 = vector.load %arg6[%c0_13, %c0_14, %c0_15] : memref<25x128x128xbf16, #tpu.memory_space<vmem>>, vector<1x128x128xbf16>
    %35 = vector.shape_cast %34 : vector<1x128x128xbf16> to vector<128x128xbf16>
    %cst = arith.constant dense<0.000000e+00> : vector<1x128xf32>
    %36 = tpu.matmul %33, %35, %cst {dimension_numbers = #tpu.dot_dimension_numbers<[1], [0], [0], [1], [0, 0, 1, 1], [], []>} : vector<1x128xbf16>, vector<128x128xbf16>, vector<1x128xf32> -> vector<1x128xf32>
    %37 = arith.addf %30, %36 : vector<1x128xf32>
    %c0_16 = arith.constant 0 : index
    %c1 = arith.constant 1 : index
    %c0_17 = arith.constant 0 : index
    %38 = vector.load %arg14[%c0_16, %c1, %c0_17] : memref<5x5x128xf32, #tpu.memory_space<vmem>>, vector<1x1x128xf32>
    %39 = vector.shape_cast %38 : vector<1x1x128xf32> to vector<1x128xf32>
    %40 = arith.truncf %39 : vector<1x128xf32> to vector<1x128xbf16>
    %c1_18 = arith.constant 1 : index
    %c0_19 = arith.constant 0 : index
    %c0_20 = arith.constant 0 : index
    %41 = vector.load %arg6[%c1_18, %c0_19, %c0_20] : memref<25x128x128xbf16, #tpu.memory_space<vmem>>, vector<1x128x128xbf16>
    %42 = vector.shape_cast %41 : vector<1x128x128xbf16> to vector<128x128xbf16>
    %cst_21 = arith.constant dense<0.000000e+00> : vector<1x128xf32>
    %43 = tpu.matmul %40, %42, %cst_21 {dimension_numbers = #tpu.dot_dimension_numbers<[1], [0], [0], [1], [0, 0, 1, 1], [], []>} : vector<1x128xbf16>, vector<128x128xbf16>, vector<1x128xf32> -> vector<1x128xf32>
    %44 = arith.addf %37, %43 : vector<1x128xf32>
    %c0_22 = arith.constant 0 : index
    %c2 = arith.constant 2 : index
    %c0_23 = arith.constant 0 : index
    %45 = vector.load %arg14[%c0_22, %c2, %c0_23] : memref<5x5x128xf32, #tpu.memory_space<vmem>>, vector<1x1x128xf32>
    %46 = vector.shape_cast %45 : vector<1x1x128xf32> to vector<1x128xf32>
    %47 = arith.truncf %46 : vector<1x128xf32> to vector<1x128xbf16>
    %c2_24 = arith.constant 2 : index
    %c0_25 = arith.constant 0 : index
    %c0_26 = arith.constant 0 : index
    %48 = vector.load %arg6[%c2_24, %c0_25, %c0_26] : memref<25x128x128xbf16, #tpu.memory_space<vmem>>, vector<1x128x128xbf16>
    %49 = vector.shape_cast %48 : vector<1x128x128xbf16> to vector<128x128xbf16>
    %cst_27 = arith.constant dense<0.000000e+00> : vector<1x128xf32>
    %50 = tpu.matmul %47, %49, %cst_27 {dimension_numbers = #tpu.dot_dimension_numbers<[1], [0], [0], [1], [0, 0, 1, 1], [], []>} : vector<1x128xbf16>, vector<128x128xbf16>, vector<1x128xf32> -> vector<1x128xf32>
    %51 = arith.addf %44, %50 : vector<1x128xf32>
    %c0_28 = arith.constant 0 : index
    %c3 = arith.constant 3 : index
    %c0_29 = arith.constant 0 : index
    %52 = vector.load %arg14[%c0_28, %c3, %c0_29] : memref<5x5x128xf32, #tpu.memory_space<vmem>>, vector<1x1x128xf32>
    %53 = vector.shape_cast %52 : vector<1x1x128xf32> to vector<1x128xf32>
    %54 = arith.truncf %53 : vector<1x128xf32> to vector<1x128xbf16>
    %c3_30 = arith.constant 3 : index
    %c0_31 = arith.constant 0 : index
    %c0_32 = arith.constant 0 : index
    %55 = vector.load %arg6[%c3_30, %c0_31, %c0_32] : memref<25x128x128xbf16, #tpu.memory_space<vmem>>, vector<1x128x128xbf16>
    %56 = vector.shape_cast %55 : vector<1x128x128xbf16> to vector<128x128xbf16>
    %cst_33 = arith.constant dense<0.000000e+00> : vector<1x128xf32>
    %57 = tpu.matmul %54, %56, %cst_33 {dimension_numbers = #tpu.dot_dimension_numbers<[1], [0], [0], [1], [0, 0, 1, 1], [], []>} : vector<1x128xbf16>, vector<128x128xbf16>, vector<1x128xf32> -> vector<1x128xf32>
    %58 = arith.addf %51, %57 : vector<1x128xf32>
    %c0_34 = arith.constant 0 : index
    %c4 = arith.constant 4 : index
    %c0_35 = arith.constant 0 : index
    %59 = vector.load %arg14[%c0_34, %c4, %c0_35] : memref<5x5x128xf32, #tpu.memory_space<vmem>>, vector<1x1x128xf32>
    %60 = vector.shape_cast %59 : vector<1x1x128xf32> to vector<1x128xf32>
    %61 = arith.truncf %60 : vector<1x128xf32> to vector<1x128xbf16>
    %c4_36 = arith.constant 4 : index
    %c0_37 = arith.constant 0 : index
    %c0_38 = arith.constant 0 : index
    %62 = vector.load %arg6[%c4_36, %c0_37, %c0_38] : memref<25x128x128xbf16, #tpu.memory_space<vmem>>, vector<1x128x128xbf16>
    %63 = vector.shape_cast %62 : vector<1x128x128xbf16> to vector<128x128xbf16>
    %cst_39 = arith.constant dense<0.000000e+00> : vector<1x128xf32>
    %64 = tpu.matmul %61, %63, %cst_39 {dimension_numbers = #tpu.dot_dimension_numbers<[1], [0], [0], [1], [0, 0, 1, 1], [], []>} : vector<1x128xbf16>, vector<128x128xbf16>, vector<1x128xf32> -> vector<1x128xf32>
    %65 = arith.addf %58, %64 : vector<1x128xf32>
    %c1_40 = arith.constant 1 : index
    %c0_41 = arith.constant 0 : index
    %c0_42 = arith.constant 0 : index
    %66 = vector.load %arg14[%c1_40, %c0_41, %c0_42] : memref<5x5x128xf32, #tpu.memory_space<vmem>>, vector<1x1x128xf32>
    %67 = vector.shape_cast %66 : vector<1x1x128xf32> to vector<1x128xf32>
    %68 = arith.truncf %67 : vector<1x128xf32> to vector<1x128xbf16>
    %c5 = arith.constant 5 : index
    %c0_43 = arith.constant 0 : index
    %c0_44 = arith.constant 0 : index
    %69 = vector.load %arg6[%c5, %c0_43, %c0_44] : memref<25x128x128xbf16, #tpu.memory_space<vmem>>, vector<1x128x128xbf16>
    %70 = vector.shape_cast %69 : vector<1x128x128xbf16> to vector<128x128xbf16>
    %cst_45 = arith.constant dense<0.000000e+00> : vector<1x128xf32>
    %71 = tpu.matmul %68, %70, %cst_45 {dimension_numbers = #tpu.dot_dimension_numbers<[1], [0], [0], [1], [0, 0, 1, 1], [], []>} : vector<1x128xbf16>, vector<128x128xbf16>, vector<1x128xf32> -> vector<1x128xf32>
    %72 = arith.addf %65, %71 : vector<1x128xf32>
    %c1_46 = arith.constant 1 : index
    %c1_47 = arith.constant 1 : index
    %c0_48 = arith.constant 0 : index
    %73 = vector.load %arg14[%c1_46, %c1_47, %c0_48] : memref<5x5x128xf32, #tpu.memory_space<vmem>>, vector<1x1x128xf32>
    %74 = vector.shape_cast %73 : vector<1x1x128xf32> to vector<1x128xf32>
    %75 = arith.truncf %74 : vector<1x128xf32> to vector<1x128xbf16>
    %c6 = arith.constant 6 : index
    %c0_49 = arith.constant 0 : index
    %c0_50 = arith.constant 0 : index
    %76 = vector.load %arg6[%c6, %c0_49, %c0_50] : memref<25x128x128xbf16, #tpu.memory_space<vmem>>, vector<1x128x128xbf16>
    %77 = vector.shape_cast %76 : vector<1x128x128xbf16> to vector<128x128xbf16>
    %cst_51 = arith.constant dense<0.000000e+00> : vector<1x128xf32>
    %78 = tpu.matmul %75, %77, %cst_51 {dimension_numbers = #tpu.dot_dimension_numbers<[1], [0], [0], [1], [0, 0, 1, 1], [], []>} : vector<1x128xbf16>, vector<128x128xbf16>, vector<1x128xf32> -> vector<1x128xf32>
    %79 = arith.addf %72, %78 : vector<1x128xf32>
    %c1_52 = arith.constant 1 : index
    %c2_53 = arith.constant 2 : index
    %c0_54 = arith.constant 0 : index
    %80 = vector.load %arg14[%c1_52, %c2_53, %c0_54] : memref<5x5x128xf32, #tpu.memory_space<vmem>>, vector<1x1x128xf32>
    %81 = vector.shape_cast %80 : vector<1x1x128xf32> to vector<1x128xf32>
    %82 = arith.truncf %81 : vector<1x128xf32> to vector<1x128xbf16>
    %c7 = arith.constant 7 : index
    %c0_55 = arith.constant 0 : index
    %c0_56 = arith.constant 0 : index
    %83 = vector.load %arg6[%c7, %c0_55, %c0_56] : memref<25x128x128xbf16, #tpu.memory_space<vmem>>, vector<1x128x128xbf16>
    %84 = vector.shape_cast %83 : vector<1x128x128xbf16> to vector<128x128xbf16>
    %cst_57 = arith.constant dense<0.000000e+00> : vector<1x128xf32>
    %85 = tpu.matmul %82, %84, %cst_57 {dimension_numbers = #tpu.dot_dimension_numbers<[1], [0], [0], [1], [0, 0, 1, 1], [], []>} : vector<1x128xbf16>, vector<128x128xbf16>, vector<1x128xf32> -> vector<1x128xf32>
    %86 = arith.addf %79, %85 : vector<1x128xf32>
    %c1_58 = arith.constant 1 : index
    %c3_59 = arith.constant 3 : index
    %c0_60 = arith.constant 0 : index
    %87 = vector.load %arg14[%c1_58, %c3_59, %c0_60] : memref<5x5x128xf32, #tpu.memory_space<vmem>>, vector<1x1x128xf32>
    %88 = vector.shape_cast %87 : vector<1x1x128xf32> to vector<1x128xf32>
    %89 = arith.truncf %88 : vector<1x128xf32> to vector<1x128xbf16>
    %c8 = arith.constant 8 : index
    %c0_61 = arith.constant 0 : index
    %c0_62 = arith.constant 0 : index
    %90 = vector.load %arg6[%c8, %c0_61, %c0_62] : memref<25x128x128xbf16, #tpu.memory_space<vmem>>, vector<1x128x128xbf16>
    %91 = vector.shape_cast %90 : vector<1x128x128xbf16> to vector<128x128xbf16>
    %cst_63 = arith.constant dense<0.000000e+00> : vector<1x128xf32>
    %92 = tpu.matmul %89, %91, %cst_63 {dimension_numbers = #tpu.dot_dimension_numbers<[1], [0], [0], [1], [0, 0, 1, 1], [], []>} : vector<1x128xbf16>, vector<128x128xbf16>, vector<1x128xf32> -> vector<1x128xf32>
    %93 = arith.addf %86, %92 : vector<1x128xf32>
    %c1_64 = arith.constant 1 : index
    %c4_65 = arith.constant 4 : index
    %c0_66 = arith.constant 0 : index
    %94 = vector.load %arg14[%c1_64, %c4_65, %c0_66] : memref<5x5x128xf32, #tpu.memory_space<vmem>>, vector<1x1x128xf32>
    %95 = vector.shape_cast %94 : vector<1x1x128xf32> to vector<1x128xf32>
    %96 = arith.truncf %95 : vector<1x128xf32> to vector<1x128xbf16>
    %c9 = arith.constant 9 : index
    %c0_67 = arith.constant 0 : index
    %c0_68 = arith.constant 0 : index
    %97 = vector.load %arg6[%c9, %c0_67, %c0_68] : memref<25x128x128xbf16, #tpu.memory_space<vmem>>, vector<1x128x128xbf16>
    %98 = vector.shape_cast %97 : vector<1x128x128xbf16> to vector<128x128xbf16>
    %cst_69 = arith.constant dense<0.000000e+00> : vector<1x128xf32>
    %99 = tpu.matmul %96, %98, %cst_69 {dimension_numbers = #tpu.dot_dimension_numbers<[1], [0], [0], [1], [0, 0, 1, 1], [], []>} : vector<1x128xbf16>, vector<128x128xbf16>, vector<1x128xf32> -> vector<1x128xf32>
    %100 = arith.addf %93, %99 : vector<1x128xf32>
    %c2_70 = arith.constant 2 : index
    %c0_71 = arith.constant 0 : index
    %c0_72 = arith.constant 0 : index
    %101 = vector.load %arg14[%c2_70, %c0_71, %c0_72] : memref<5x5x128xf32, #tpu.memory_space<vmem>>, vector<1x1x128xf32>
    %102 = vector.shape_cast %101 : vector<1x1x128xf32> to vector<1x128xf32>
    %103 = arith.truncf %102 : vector<1x128xf32> to vector<1x128xbf16>
    %c10 = arith.constant 10 : index
    %c0_73 = arith.constant 0 : index
    %c0_74 = arith.constant 0 : index
    %104 = vector.load %arg6[%c10, %c0_73, %c0_74] : memref<25x128x128xbf16, #tpu.memory_space<vmem>>, vector<1x128x128xbf16>
    %105 = vector.shape_cast %104 : vector<1x128x128xbf16> to vector<128x128xbf16>
    %cst_75 = arith.constant dense<0.000000e+00> : vector<1x128xf32>
    %106 = tpu.matmul %103, %105, %cst_75 {dimension_numbers = #tpu.dot_dimension_numbers<[1], [0], [0], [1], [0, 0, 1, 1], [], []>} : vector<1x128xbf16>, vector<128x128xbf16>, vector<1x128xf32> -> vector<1x128xf32>
    %107 = arith.addf %100, %106 : vector<1x128xf32>
    %c2_76 = arith.constant 2 : index
    %c1_77 = arith.constant 1 : index
    %c0_78 = arith.constant 0 : index
    %108 = vector.load %arg14[%c2_76, %c1_77, %c0_78] : memref<5x5x128xf32, #tpu.memory_space<vmem>>, vector<1x1x128xf32>
    %109 = vector.shape_cast %108 : vector<1x1x128xf32> to vector<1x128xf32>
    %110 = arith.truncf %109 : vector<1x128xf32> to vector<1x128xbf16>
    %c11 = arith.constant 11 : index
    %c0_79 = arith.constant 0 : index
    %c0_80 = arith.constant 0 : index
    %111 = vector.load %arg6[%c11, %c0_79, %c0_80] : memref<25x128x128xbf16, #tpu.memory_space<vmem>>, vector<1x128x128xbf16>
    %112 = vector.shape_cast %111 : vector<1x128x128xbf16> to vector<128x128xbf16>
    %cst_81 = arith.constant dense<0.000000e+00> : vector<1x128xf32>
    %113 = tpu.matmul %110, %112, %cst_81 {dimension_numbers = #tpu.dot_dimension_numbers<[1], [0], [0], [1], [0, 0, 1, 1], [], []>} : vector<1x128xbf16>, vector<128x128xbf16>, vector<1x128xf32> -> vector<1x128xf32>
    %114 = arith.addf %107, %113 : vector<1x128xf32>
    %c2_82 = arith.constant 2 : index
    %c2_83 = arith.constant 2 : index
    %c0_84 = arith.constant 0 : index
    %115 = vector.load %arg14[%c2_82, %c2_83, %c0_84] : memref<5x5x128xf32, #tpu.memory_space<vmem>>, vector<1x1x128xf32>
    %116 = vector.shape_cast %115 : vector<1x1x128xf32> to vector<1x128xf32>
    %117 = arith.truncf %116 : vector<1x128xf32> to vector<1x128xbf16>
    %c12 = arith.constant 12 : index
    %c0_85 = arith.constant 0 : index
    %c0_86 = arith.constant 0 : index
    %118 = vector.load %arg6[%c12, %c0_85, %c0_86] : memref<25x128x128xbf16, #tpu.memory_space<vmem>>, vector<1x128x128xbf16>
    %119 = vector.shape_cast %118 : vector<1x128x128xbf16> to vector<128x128xbf16>
    %cst_87 = arith.constant dense<0.000000e+00> : vector<1x128xf32>
    %120 = tpu.matmul %117, %119, %cst_87 {dimension_numbers = #tpu.dot_dimension_numbers<[1], [0], [0], [1], [0, 0, 1, 1], [], []>} : vector<1x128xbf16>, vector<128x128xbf16>, vector<1x128xf32> -> vector<1x128xf32>
    %121 = arith.addf %114, %120 : vector<1x128xf32>
    %c2_88 = arith.constant 2 : index
    %c3_89 = arith.constant 3 : index
    %c0_90 = arith.constant 0 : index
    %122 = vector.load %arg14[%c2_88, %c3_89, %c0_90] : memref<5x5x128xf32, #tpu.memory_space<vmem>>, vector<1x1x128xf32>
    %123 = vector.shape_cast %122 : vector<1x1x128xf32> to vector<1x128xf32>
    %124 = arith.truncf %123 : vector<1x128xf32> to vector<1x128xbf16>
    %c13 = arith.constant 13 : index
    %c0_91 = arith.constant 0 : index
    %c0_92 = arith.constant 0 : index
    %125 = vector.load %arg6[%c13, %c0_91, %c0_92] : memref<25x128x128xbf16, #tpu.memory_space<vmem>>, vector<1x128x128xbf16>
    %126 = vector.shape_cast %125 : vector<1x128x128xbf16> to vector<128x128xbf16>
    %cst_93 = arith.constant dense<0.000000e+00> : vector<1x128xf32>
    %127 = tpu.matmul %124, %126, %cst_93 {dimension_numbers = #tpu.dot_dimension_numbers<[1], [0], [0], [1], [0, 0, 1, 1], [], []>} : vector<1x128xbf16>, vector<128x128xbf16>, vector<1x128xf32> -> vector<1x128xf32>
    %128 = arith.addf %121, %127 : vector<1x128xf32>
    %c2_94 = arith.constant 2 : index
    %c4_95 = arith.constant 4 : index
    %c0_96 = arith.constant 0 : index
    %129 = vector.load %arg14[%c2_94, %c4_95, %c0_96] : memref<5x5x128xf32, #tpu.memory_space<vmem>>, vector<1x1x128xf32>
    %130 = vector.shape_cast %129 : vector<1x1x128xf32> to vector<1x128xf32>
    %131 = arith.truncf %130 : vector<1x128xf32> to vector<1x128xbf16>
    %c14 = arith.constant 14 : index
    %c0_97 = arith.constant 0 : index
    %c0_98 = arith.constant 0 : index
    %132 = vector.load %arg6[%c14, %c0_97, %c0_98] : memref<25x128x128xbf16, #tpu.memory_space<vmem>>, vector<1x128x128xbf16>
    %133 = vector.shape_cast %132 : vector<1x128x128xbf16> to vector<128x128xbf16>
    %cst_99 = arith.constant dense<0.000000e+00> : vector<1x128xf32>
    %134 = tpu.matmul %131, %133, %cst_99 {dimension_numbers = #tpu.dot_dimension_numbers<[1], [0], [0], [1], [0, 0, 1, 1], [], []>} : vector<1x128xbf16>, vector<128x128xbf16>, vector<1x128xf32> -> vector<1x128xf32>
    %135 = arith.addf %128, %134 : vector<1x128xf32>
    %c3_100 = arith.constant 3 : index
    %c0_101 = arith.constant 0 : index
    %c0_102 = arith.constant 0 : index
    %136 = vector.load %arg14[%c3_100, %c0_101, %c0_102] : memref<5x5x128xf32, #tpu.memory_space<vmem>>, vector<1x1x128xf32>
    %137 = vector.shape_cast %136 : vector<1x1x128xf32> to vector<1x128xf32>
    %138 = arith.truncf %137 : vector<1x128xf32> to vector<1x128xbf16>
    %c15 = arith.constant 15 : index
    %c0_103 = arith.constant 0 : index
    %c0_104 = arith.constant 0 : index
    %139 = vector.load %arg6[%c15, %c0_103, %c0_104] : memref<25x128x128xbf16, #tpu.memory_space<vmem>>, vector<1x128x128xbf16>
    %140 = vector.shape_cast %139 : vector<1x128x128xbf16> to vector<128x128xbf16>
    %cst_105 = arith.constant dense<0.000000e+00> : vector<1x128xf32>
    %141 = tpu.matmul %138, %140, %cst_105 {dimension_numbers = #tpu.dot_dimension_numbers<[1], [0], [0], [1], [0, 0, 1, 1], [], []>} : vector<1x128xbf16>, vector<128x128xbf16>, vector<1x128xf32> -> vector<1x128xf32>
    %142 = arith.addf %135, %141 : vector<1x128xf32>
    %c3_106 = arith.constant 3 : index
    %c1_107 = arith.constant 1 : index
    %c0_108 = arith.constant 0 : index
    %143 = vector.load %arg14[%c3_106, %c1_107, %c0_108] : memref<5x5x128xf32, #tpu.memory_space<vmem>>, vector<1x1x128xf32>
    %144 = vector.shape_cast %143 : vector<1x1x128xf32> to vector<1x128xf32>
    %145 = arith.truncf %144 : vector<1x128xf32> to vector<1x128xbf16>
    %c16 = arith.constant 16 : index
    %c0_109 = arith.constant 0 : index
    %c0_110 = arith.constant 0 : index
    %146 = vector.load %arg6[%c16, %c0_109, %c0_110] : memref<25x128x128xbf16, #tpu.memory_space<vmem>>, vector<1x128x128xbf16>
    %147 = vector.shape_cast %146 : vector<1x128x128xbf16> to vector<128x128xbf16>
    %cst_111 = arith.constant dense<0.000000e+00> : vector<1x128xf32>
    %148 = tpu.matmul %145, %147, %cst_111 {dimension_numbers = #tpu.dot_dimension_numbers<[1], [0], [0], [1], [0, 0, 1, 1], [], []>} : vector<1x128xbf16>, vector<128x128xbf16>, vector<1x128xf32> -> vector<1x128xf32>
    %149 = arith.addf %142, %148 : vector<1x128xf32>
    %c3_112 = arith.constant 3 : index
    %c2_113 = arith.constant 2 : index
    %c0_114 = arith.constant 0 : index
    %150 = vector.load %arg14[%c3_112, %c2_113, %c0_114] : memref<5x5x128xf32, #tpu.memory_space<vmem>>, vector<1x1x128xf32>
    %151 = vector.shape_cast %150 : vector<1x1x128xf32> to vector<1x128xf32>
    %152 = arith.truncf %151 : vector<1x128xf32> to vector<1x128xbf16>
    %c17 = arith.constant 17 : index
    %c0_115 = arith.constant 0 : index
    %c0_116 = arith.constant 0 : index
    %153 = vector.load %arg6[%c17, %c0_115, %c0_116] : memref<25x128x128xbf16, #tpu.memory_space<vmem>>, vector<1x128x128xbf16>
    %154 = vector.shape_cast %153 : vector<1x128x128xbf16> to vector<128x128xbf16>
    %cst_117 = arith.constant dense<0.000000e+00> : vector<1x128xf32>
    %155 = tpu.matmul %152, %154, %cst_117 {dimension_numbers = #tpu.dot_dimension_numbers<[1], [0], [0], [1], [0, 0, 1, 1], [], []>} : vector<1x128xbf16>, vector<128x128xbf16>, vector<1x128xf32> -> vector<1x128xf32>
    %156 = arith.addf %149, %155 : vector<1x128xf32>
    %c3_118 = arith.constant 3 : index
    %c3_119 = arith.constant 3 : index
    %c0_120 = arith.constant 0 : index
    %157 = vector.load %arg14[%c3_118, %c3_119, %c0_120] : memref<5x5x128xf32, #tpu.memory_space<vmem>>, vector<1x1x128xf32>
    %158 = vector.shape_cast %157 : vector<1x1x128xf32> to vector<1x128xf32>
    %159 = arith.truncf %158 : vector<1x128xf32> to vector<1x128xbf16>
    %c18 = arith.constant 18 : index
    %c0_121 = arith.constant 0 : index
    %c0_122 = arith.constant 0 : index
    %160 = vector.load %arg6[%c18, %c0_121, %c0_122] : memref<25x128x128xbf16, #tpu.memory_space<vmem>>, vector<1x128x128xbf16>
    %161 = vector.shape_cast %160 : vector<1x128x128xbf16> to vector<128x128xbf16>
    %cst_123 = arith.constant dense<0.000000e+00> : vector<1x128xf32>
    %162 = tpu.matmul %159, %161, %cst_123 {dimension_numbers = #tpu.dot_dimension_numbers<[1], [0], [0], [1], [0, 0, 1, 1], [], []>} : vector<1x128xbf16>, vector<128x128xbf16>, vector<1x128xf32> -> vector<1x128xf32>
    %163 = arith.addf %156, %162 : vector<1x128xf32>
    %c3_124 = arith.constant 3 : index
    %c4_125 = arith.constant 4 : index
    %c0_126 = arith.constant 0 : index
    %164 = vector.load %arg14[%c3_124, %c4_125, %c0_126] : memref<5x5x128xf32, #tpu.memory_space<vmem>>, vector<1x1x128xf32>
    %165 = vector.shape_cast %164 : vector<1x1x128xf32> to vector<1x128xf32>
    %166 = arith.truncf %165 : vector<1x128xf32> to vector<1x128xbf16>
    %c19 = arith.constant 19 : index
    %c0_127 = arith.constant 0 : index
    %c0_128 = arith.constant 0 : index
    %167 = vector.load %arg6[%c19, %c0_127, %c0_128] : memref<25x128x128xbf16, #tpu.memory_space<vmem>>, vector<1x128x128xbf16>
    %168 = vector.shape_cast %167 : vector<1x128x128xbf16> to vector<128x128xbf16>
    %cst_129 = arith.constant dense<0.000000e+00> : vector<1x128xf32>
    %169 = tpu.matmul %166, %168, %cst_129 {dimension_numbers = #tpu.dot_dimension_numbers<[1], [0], [0], [1], [0, 0, 1, 1], [], []>} : vector<1x128xbf16>, vector<128x128xbf16>, vector<1x128xf32> -> vector<1x128xf32>
    %170 = arith.addf %163, %169 : vector<1x128xf32>
    %c4_130 = arith.constant 4 : index
    %c0_131 = arith.constant 0 : index
    %c0_132 = arith.constant 0 : index
    %171 = vector.load %arg14[%c4_130, %c0_131, %c0_132] : memref<5x5x128xf32, #tpu.memory_space<vmem>>, vector<1x1x128xf32>
    %172 = vector.shape_cast %171 : vector<1x1x128xf32> to vector<1x128xf32>
    %173 = arith.truncf %172 : vector<1x128xf32> to vector<1x128xbf16>
    %c20 = arith.constant 20 : index
    %c0_133 = arith.constant 0 : index
    %c0_134 = arith.constant 0 : index
    %174 = vector.load %arg6[%c20, %c0_133, %c0_134] : memref<25x128x128xbf16, #tpu.memory_space<vmem>>, vector<1x128x128xbf16>
    %175 = vector.shape_cast %174 : vector<1x128x128xbf16> to vector<128x128xbf16>
    %cst_135 = arith.constant dense<0.000000e+00> : vector<1x128xf32>
    %176 = tpu.matmul %173, %175, %cst_135 {dimension_numbers = #tpu.dot_dimension_numbers<[1], [0], [0], [1], [0, 0, 1, 1], [], []>} : vector<1x128xbf16>, vector<128x128xbf16>, vector<1x128xf32> -> vector<1x128xf32>
    %177 = arith.addf %170, %176 : vector<1x128xf32>
    %c4_136 = arith.constant 4 : index
    %c1_137 = arith.constant 1 : index
    %c0_138 = arith.constant 0 : index
    %178 = vector.load %arg14[%c4_136, %c1_137, %c0_138] : memref<5x5x128xf32, #tpu.memory_space<vmem>>, vector<1x1x128xf32>
    %179 = vector.shape_cast %178 : vector<1x1x128xf32> to vector<1x128xf32>
    %180 = arith.truncf %179 : vector<1x128xf32> to vector<1x128xbf16>
    %c21 = arith.constant 21 : index
    %c0_139 = arith.constant 0 : index
    %c0_140 = arith.constant 0 : index
    %181 = vector.load %arg6[%c21, %c0_139, %c0_140] : memref<25x128x128xbf16, #tpu.memory_space<vmem>>, vector<1x128x128xbf16>
    %182 = vector.shape_cast %181 : vector<1x128x128xbf16> to vector<128x128xbf16>
    %cst_141 = arith.constant dense<0.000000e+00> : vector<1x128xf32>
    %183 = tpu.matmul %180, %182, %cst_141 {dimension_numbers = #tpu.dot_dimension_numbers<[1], [0], [0], [1], [0, 0, 1, 1], [], []>} : vector<1x128xbf16>, vector<128x128xbf16>, vector<1x128xf32> -> vector<1x128xf32>
    %184 = arith.addf %177, %183 : vector<1x128xf32>
    %c4_142 = arith.constant 4 : index
    %c2_143 = arith.constant 2 : index
    %c0_144 = arith.constant 0 : index
    %185 = vector.load %arg14[%c4_142, %c2_143, %c0_144] : memref<5x5x128xf32, #tpu.memory_space<vmem>>, vector<1x1x128xf32>
    %186 = vector.shape_cast %185 : vector<1x1x128xf32> to vector<1x128xf32>
    %187 = arith.truncf %186 : vector<1x128xf32> to vector<1x128xbf16>
    %c22 = arith.constant 22 : index
    %c0_145 = arith.constant 0 : index
    %c0_146 = arith.constant 0 : index
    %188 = vector.load %arg6[%c22, %c0_145, %c0_146] : memref<25x128x128xbf16, #tpu.memory_space<vmem>>, vector<1x128x128xbf16>
    %189 = vector.shape_cast %188 : vector<1x128x128xbf16> to vector<128x128xbf16>
    %cst_147 = arith.constant dense<0.000000e+00> : vector<1x128xf32>
    %190 = tpu.matmul %187, %189, %cst_147 {dimension_numbers = #tpu.dot_dimension_numbers<[1], [0], [0], [1], [0, 0, 1, 1], [], []>} : vector<1x128xbf16>, vector<128x128xbf16>, vector<1x128xf32> -> vector<1x128xf32>
    %191 = arith.addf %184, %190 : vector<1x128xf32>
    %c4_148 = arith.constant 4 : index
    %c3_149 = arith.constant 3 : index
    %c0_150 = arith.constant 0 : index
    %192 = vector.load %arg14[%c4_148, %c3_149, %c0_150] : memref<5x5x128xf32, #tpu.memory_space<vmem>>, vector<1x1x128xf32>
    %193 = vector.shape_cast %192 : vector<1x1x128xf32> to vector<1x128xf32>
    %194 = arith.truncf %193 : vector<1x128xf32> to vector<1x128xbf16>
    %c23 = arith.constant 23 : index
    %c0_151 = arith.constant 0 : index
    %c0_152 = arith.constant 0 : index
    %195 = vector.load %arg6[%c23, %c0_151, %c0_152] : memref<25x128x128xbf16, #tpu.memory_space<vmem>>, vector<1x128x128xbf16>
    %196 = vector.shape_cast %195 : vector<1x128x128xbf16> to vector<128x128xbf16>
    %cst_153 = arith.constant dense<0.000000e+00> : vector<1x128xf32>
    %197 = tpu.matmul %194, %196, %cst_153 {dimension_numbers = #tpu.dot_dimension_numbers<[1], [0], [0], [1], [0, 0, 1, 1], [], []>} : vector<1x128xbf16>, vector<128x128xbf16>, vector<1x128xf32> -> vector<1x128xf32>
    %198 = arith.addf %191, %197 : vector<1x128xf32>
    %c4_154 = arith.constant 4 : index
    %c4_155 = arith.constant 4 : index
    %c0_156 = arith.constant 0 : index
    %199 = vector.load %arg14[%c4_154, %c4_155, %c0_156] : memref<5x5x128xf32, #tpu.memory_space<vmem>>, vector<1x1x128xf32>
    %200 = vector.shape_cast %199 : vector<1x1x128xf32> to vector<1x128xf32>
    %201 = arith.truncf %200 : vector<1x128xf32> to vector<1x128xbf16>
    %c24 = arith.constant 24 : index
    %c0_157 = arith.constant 0 : index
    %c0_158 = arith.constant 0 : index
    %202 = vector.load %arg6[%c24, %c0_157, %c0_158] : memref<25x128x128xbf16, #tpu.memory_space<vmem>>, vector<1x128x128xbf16>
    %203 = vector.shape_cast %202 : vector<1x128x128xbf16> to vector<128x128xbf16>
    %cst_159 = arith.constant dense<0.000000e+00> : vector<1x128xf32>
    %204 = tpu.matmul %201, %203, %cst_159 {dimension_numbers = #tpu.dot_dimension_numbers<[1], [0], [0], [1], [0, 0, 1, 1], [], []>} : vector<1x128xbf16>, vector<128x128xbf16>, vector<1x128xf32> -> vector<1x128xf32>
    %205 = arith.addf %198, %204 : vector<1x128xf32>
    %cst_160 = arith.constant 0.000000e+00 : f32
    %206 = vector.broadcast %cst_160 : f32 to vector<1x128xf32>
    %207 = arith.maximumf %205, %206 : vector<1x128xf32>
    %208 = arith.truncf %207 : vector<1x128xf32> to vector<1x128xbf16>
    %c0_161 = arith.constant 0 : index
    %c0_162 = arith.constant 0 : index
    %209 = vector.load %arg8[%c0_161, %c0_162] : memref<128x128xbf16, #tpu.memory_space<vmem>>, vector<128x128xbf16>
    %cst_163 = arith.constant dense<0.000000e+00> : vector<1x128xf32>
    %210 = tpu.matmul %208, %209, %cst_163 {dimension_numbers = #tpu.dot_dimension_numbers<[1], [0], [0], [1], [0, 0, 1, 1], [], []>} : vector<1x128xbf16>, vector<128x128xbf16>, vector<1x128xf32> -> vector<1x128xf32>
    %c0_164 = arith.constant 0 : index
    %c0_165 = arith.constant 0 : index
    %211 = vector.load %arg9[%c0_164, %c0_165] : memref<1x128xf32, #tpu.memory_space<vmem>>, vector<1x128xf32>
    %212 = arith.addf %210, %211 : vector<1x128xf32>
    %213 = tpu.iota {dimensions = array<i32: 1>} : vector<1x128xi32>
    %c34_i32 = arith.constant 34 : i32
    %214 = vector.broadcast %c34_i32 : i32 to vector<1x128xi32>
    %215 = arith.cmpi slt, %213, %214 : vector<1x128xi32>
    %cst_166 = arith.constant 0xFF800000 : f32
    %216 = vector.broadcast %cst_166 : f32 to vector<1x128xf32>
    %217 = arith.select %215, %212, %216 : vector<1x128xi1>, vector<1x128xf32>
    %cst_167 = arith.constant dense<0xFF800000> : vector<1xf32>
    %218 = vector.multi_reduction <maximumf>, %217, %cst_167 [1] : vector<1x128xf32> to vector<1xf32>
    %219 = vector.shape_cast %218 : vector<1xf32> to vector<1x1xf32>
    %220 = vector.broadcast %219 : vector<1x1xf32> to vector<1x128xf32>
    %221 = arith.subf %212, %220 : vector<1x128xf32>
    %222 = math.exp %221 : vector<1x128xf32>
    %cst_168 = arith.constant 0.000000e+00 : f32
    %223 = vector.broadcast %cst_168 : f32 to vector<1x128xf32>
    %224 = arith.select %215, %222, %223 : vector<1x128xi1>, vector<1x128xf32>
    %cst_169 = arith.constant dense<0.000000e+00> : vector<1xf32>
    %225 = vector.multi_reduction <add>, %224, %cst_169 [1] : vector<1x128xf32> to vector<1xf32>
    %226 = vector.shape_cast %225 : vector<1xf32> to vector<1x1xf32>
    %227 = math.log %226 : vector<1x1xf32>
    %228 = arith.addf %227, %219 : vector<1x1xf32>
    %229 = vector.broadcast %228 : vector<1x1xf32> to vector<1x128xf32>
    %230 = arith.subf %212, %229 : vector<1x128xf32>
    %c0_170 = arith.constant 0 : index
    %c0_171 = arith.constant 0 : index
    %c0_172 = arith.constant 0 : index
    %231 = vector.load %arg10[%c0_170, %c0_171, %c0_172] : memref<1x1x128xf32, #tpu.memory_space<vmem>>, vector<1x1x128xf32>
    %232 = vector.shape_cast %231 : vector<1x1x128xf32> to vector<1x128xf32>
    %233 = vector.shape_cast %230 : vector<1x128xf32> to vector<1x1x128xf32>
    tpu.vector_store %arg10[%c0_170, %c0_171, %c0_172], %233 {strides = array<i32>} : memref<1x1x128xf32, #tpu.memory_space<vmem>>, vector<1x1x128xf32>,
    return
  }
  func.func @transform_0(%arg0: i32) -> (i32, i32, i32, i32) {
    %c0_i32 = arith.constant 0 : i32
    %c0_i32_0 = arith.constant 0 : i32
    %c0_i32_1 = arith.constant 0 : i32
    %c0_i32_2 = arith.constant 0 : i32
    return %arg0, %c0_i32, %c0_i32_0, %c0_i32_1 : i32, i32, i32, i32
  }
  func.func @transform_1(%arg0: i32) -> (i32, i32) {
    %c0_i32 = arith.constant 0 : i32
    %c0_i32_0 = arith.constant 0 : i32
    %c0_i32_1 = arith.constant 0 : i32
    return %c0_i32, %c0_i32_0 : i32, i32
  }
  func.func @transform_2(%arg0: i32) -> (i32, i32) {
    %c0_i32 = arith.constant 0 : i32
    %c0_i32_0 = arith.constant 0 : i32
    %c0_i32_1 = arith.constant 0 : i32
    return %c0_i32, %c0_i32_0 : i32, i32
  }
  func.func @transform_3(%arg0: i32) -> (i32, i32) {
    %c0_i32 = arith.constant 0 : i32
    %c0_i32_0 = arith.constant 0 : i32
    %c0_i32_1 = arith.constant 0 : i32
    return %c0_i32, %c0_i32_0 : i32, i32
  }
  func.func @transform_4(%arg0: i32) -> (i32, i32) {
    %c0_i32 = arith.constant 0 : i32
    %c0_i32_0 = arith.constant 0 : i32
    %c0_i32_1 = arith.constant 0 : i32
    return %c0_i32, %c0_i32_0 : i32, i32
  }
  func.func @transform_5(%arg0: i32) -> (i32, i32, i32) {
    %c0_i32 = arith.constant 0 : i32
    %c0_i32_0 = arith.constant 0 : i32
    %c0_i32_1 = arith.constant 0 : i32
    %c0_i32_2 = arith.constant 0 : i32
    return %c0_i32, %c0_i32_0, %c0_i32_1 : i32, i32, i32
  }
  func.func @transform_6(%arg0: i32) -> (i32, i32) {
    %c0_i32 = arith.constant 0 : i32
    %c0_i32_0 = arith.constant 0 : i32
    %c0_i32_1 = arith.constant 0 : i32
    return %c0_i32, %c0_i32_0 : i32, i32
  }
  func.func @transform_7(%arg0: i32) -> (i32, i32) {
    %c0_i32 = arith.constant 0 : i32
    %c0_i32_0 = arith.constant 0 : i32
    %c0_i32_1 = arith.constant 0 : i32
    return %c0_i32, %c0_i32_0 : i32, i32
  }
  func.func @transform_8(%arg0: i32) -> (i32, i32) {
    %c0_i32 = arith.constant 0 : i32
    %c0_i32_0 = arith.constant 0 : i32
    %c0_i32_1 = arith.constant 0 : i32
    return %c0_i32, %c0_i32_0 : i32, i32
  }
  func.func @transform_9(%arg0: i32) -> (i32, i32, i32) {
    %c0_i32 = arith.constant 0 : i32
    %c0_i32_0 = arith.constant 0 : i32
    %c0_i32_1 = arith.constant 0 : i32
    return %arg0, %c0_i32, %c0_i32_0 : i32, i32, i32
  }
}

</mosaic_0001>

<bundles_post_ra>
// kernel: net_forward.1
= control target key start
LH: loop header
LB: loop body
LE: loop exit
PB: predicated region body
PF: predicated region fallthrough
CT: control target
= control target key end

     0   :  { %s12001_s0 = inlined_call_operand.vmem [shape: f32[2,32,32,4], index: 0, kind: input, shape index: {}]   ;;  %s12002_s1 = inlined_call_operand.vmem [shape: bf16[100,32], index: 1, kind: input, shape index: {}]   ;;  %s12003_s2 = inlined_call_operand.vmem [shape: f32[1,32], index: 2, kind: input, shape index: {}]   ;;  %s12004_s3 = inlined_call_operand.vmem [shape: bf16[800,128], index: 3, kind: input, shape index: {}]   ;;  %s12005_s4 = inlined_call_operand.vmem [shape: f32[1,128], index: 4, kind: input, shape index: {}]   ;;  %s12006_s5 = inlined_call_operand.vmem [shape: bf16[25,128,128], index: 5, kind: input, shape index: {}]   ;;  %s12007_s6 = inlined_call_operand.vmem [shape: f32[1,128], index: 6, kind: input, shape index: {}]   ;;  %s12008_s7 = inlined_call_operand.vmem [shape: bf16[128,128], index: 7, kind: input, shape index: {}]   ;;  %s12009_s8 = inlined_call_operand.vmem [shape: f32[1,128], index: 8, kind: input, shape index: {}]   ;;  %s12010_s9 = inlined_call_operand.hbm [shape: f32[2,1,128], index: 9, kind: output, shape index: {}]  }
   0x1   :  { %12091 = sst [smem:[#allocation13_spill]] %s12001_s0 }
   0x2   :  { %14 = vsyncpa [#allocation7], 0 }
   0x3   :  { %16 = vsyncpa [#allocation7 + $0x1], 0  ;;  %s9493_s30 = smov 0   ;;  %s9495_s10 = smov 0  }
   0x4   :  { %s9497_s11 = smov 0   ;;  %s9499_s12 = smov 0  }
   0x5 LB: > { %s9514_s13 = sadd.s32 4294967295, %s9401_s12   ;;  %s6855_s14 = sadd.s32 4294967294, %s9401_s12   ;;  %s9401_s12 = sphi %s9499_s12, %s12202_s12   ;;  %s9397_s11 = sphi %s9497_s11, %s12201_s11   ;;  %s9393_s10 = sphi %s9495_s10, %s12200_s10   ;;  %s9389_s30 = sphi %s9493_s30, %s12199_s30  }
   0x6   : > { %s9518_s15 = sadd.s32 1, %s9401_s12   ;;  %s223_s16 = sadd.s32 1, %s9397_s11 }
   0x7   : > { %s220_s17 = ssub.s32 %s9401_s12, %s9518_s15  ;;  %p233_p0 = scmp.ne.s32.totalorder %s9397_s11, %s9393_s10 }
   0x8   : > { %p221_p1 = scmp.eq.s32.totalorder %s220_s17, 0  ;;  %p234_p2 = scmp.eq.s32.totalorder %s9514_s13, 1 }
   0x9   : > { %p239_p3 = scmp.ne.s32.totalorder %s9393_s10, %s9389_s30  ;;  %p240_p4 = scmp.eq.s32.totalorder %s6855_s14, 1 }
   0xa   : > { %s9529_s18 = scalar_select %p221_p1, %s9397_s11, %s223_s16  }
   0xb   : > { %p9531_p5 = por %p234_p2, %p233_p0  ;;  %p9535_p6 = por %p240_p4, %p239_p3 }
   0xc   : > { %p6858_p7 = scmp.ge.s32.totalorder %s9401_s12, 1  ;;  %p290_p8 = scmp.lt.s32.totalorder %s9401_s12, 3 }
   0xe   : > { %p291_p9 = pnand %p6858_p7, %p290_p8 }
  0x10   : > { %294 = sbr.rel (%p291_p9) target bundleno = 2751 (0xabf), region = 56 }
  0x15   : > { %s12011_s21 = sand.u32 1, %s9393_s10   ;;  %p325_p10 = scmp.lt.s32.totalorder %s9514_s13, 1  ;;  %v331_v0 = vlaneseq  ;;  %v12050_v7 = vmov 0.0  }
  0x16   : > { %s12095_s0 = sld [smem:[#allocation13_spill]]  ;;  %s9569_s27 = scalar_lea.vmem [#allocation6], %s12011_s21 }
  0x17   : > { %s326_s22 = scalar_select %p325_p10, %s9514_s13, 1  ;;  %v332_v1 = vshrl.u32 %v331_v0, 7  ;;  %v9544_v2 = vand.u32 127, %v331_v0 }
  0x18   : > { %s9571_s28 = smov 0  }
  0x19   : > { %12094 = vst [vmem:[#allocation9_spill] sm:$0xff] %v9544_v2  ;;  %s7890_s23 = sshll.u32 %s326_s22, 10  ;;  %v333_v3 = vadd.s32 8, %v332_v1  ;;  %v336_v4 = vmul.u32 2, %v332_v1 }
  0x1b   : > { %v337_v5 = vmul.u32 2, %v333_v3  ;;  %vm338_vm0 = vcmp.eq.s32.totalorder %v9544_v2, %v336_v4  ;;  %v344_v6 = vadd.s32 1, %v336_v4 }
  0x1c   : > { %s9549_s26 = scalar_lea.vmem %s12095_s0, %s7890_s23  ;;  %v9553_v8 = vsel %vm338_vm0, 1.0, %v12050_v7 }
  0x1d   : > { %vm339_vm1 = vcmp.eq.s32.totalorder %v9544_v2, %v337_v5  ;;  %v345_v9 = vadd.s32 1, %v337_v5  ;;  %vm346_vm2 = vcmp.eq.s32.totalorder %v9544_v2, %v344_v6 }
  0x1e   : > { %v9558_v10 = vsel %vm339_vm1, 1.0, %v12050_v7  ;;  %v9561_v11 = vsel %vm346_vm2, 1.0, %v12050_v7 }
  0x1f   : > { %12096 = vst [vmem:[#allocation10_spill] sm:$0xff] %v9558_v10  ;;  %12097 = vst [vmem:[#allocation11_spill] sm:$0xff] %v9561_v11  ;;  %vm347_vm3 = vcmp.eq.s32.totalorder %v9544_v2, %v345_v9 }
  0x20   : > { %v9565_v12 = vsel %vm347_vm3, 1.0, %v12050_v7 }
  0x21   : > { %12098 = vst [vmem:[#allocation12_spill] sm:$0xff] %v9565_v12 }
  0x22 LB: >> { %s7891_s29 = sshll.u32 %s9405_s28, 6  ;;  %s9412_s16 = smov 4   ;;  %vm365_vm4 = vcmask 31744   ;;  %vm369_vm5 = vcmask 27648   ;;  %vm391_vm6 = vcmask 64544   ;;  %vm395_vm7 = vcmask 60448   ;;  %s9405_s28 = sphi %s9571_s28, %s357_s28  }
  0x23   : >> { %s9578_s14 = scalar_lea.vmem %s9549_s26, %s7891_s29  ;;  %s9413_s17 = smov 8   ;;  %vm417_vm8 = vcmask 97344   ;;  %vm421_vm9 = vcmask 93248   ;;  %vm443_vm10 = vcmask 130144   ;;  %vm447_vm11 = vcmask 126048   ;;  %v9013_v7 = vld [vmem:[%s12002_s1] sm:$0xff]  }
  0x24   : >> { %v373_v13 = vld [vmem:[%s9578_s14 + $0x11] sm:$0xff]  ;;  %v371_v14 = vld [vmem:[%s9578_s14 + $0x1] sm:$0xff]  ;;  %v374_v15 = vld [vmem:[%s9578_s14 + $0x19] sm:$0xf]  ;;  %s9414_s22 = smov 12   ;;  %s9415_s23 = smov 16  }
  0x25   : >> { %383 = vrot.lane.b32.xlu1 %v373_v13, %s9412_s16  ;;  %379 = vrot.lane.b32.xlu0 %v371_v14, %s9412_s16  ;;  %v372_v16 = vld [vmem:[%s9578_s14 + $0x9] sm:$0xff]  ;;  %v400_v19 = vld [vmem:[%s9578_s14 + $0x1a] sm:$0xf]  ;;  %s12043_s24 = smov 20   ;;  %s12038_s25 = smov 24   ;;  %vm469_vm12 = vcmask 162944  }
  0x26   : >> { %v398_v17 = vld [vmem:[%s9578_s14 + $0xa] sm:$0xff]  ;;  %v397_v18 = vld [vmem:[%s9578_s14 + $0x2] sm:$0xff]  ;;  %v399_v20 = vld [vmem:[%s9578_s14 + $0x12] sm:$0xff]  ;;  %s12012_s29 = smov 28   ;;  %s12014_s21 = smov 32   ;;  %vm473_vm13 = vcmask 158848  }
  0x27   : >> { %v424_v21 = vld [vmem:[%s9578_s14 + $0xb] sm:$0xff]  ;;  %v423_v22 = vld [vmem:[%s9578_s14 + $0x3] sm:$0xff]  ;;  %v426_v23 = vld [vmem:[%s9578_s14 + $0x1b] sm:$0xf]  ;;  %vm498_vm14 = vcmask 195744   ;;  %vm502_vm15 = vcmask 191648  }
  0x28   : >> { %v425_v24 = vld [vmem:[%s9578_s14 + $0x13] sm:$0xff]  ;;  %v361_v26 = vld [vmem:[%s9578_s14] sm:$0xff]  ;;  %v362_v30 = vld [vmem:[%s9578_s14 + $0x8] sm:$0xff]  ;;  %vm524_vm0 = vcmask 228544   ;;  %vm12042_vm1 = vcmask 224448   ;;  %vm12045_vm2 = vcmask 1041408  }
  0x29   : >> { %385 = vrot.lane.b32.xlu1 %v374_v15, %s9412_s16  ;;  %381 = vrot.lane.b32.xlu0 %v372_v16, %s9412_s16  ;;  %v363_v25 = vld [vmem:[%s9578_s14 + $0x10] sm:$0xff]  ;;  %v449_v28 = vld [vmem:[%s9578_s14 + $0x4] sm:$0xff]  ;;  %366 = vst.msk [vmem:[#allocation2] sm:$0xff] %vm365_vm4, %v361_v26  ;;  %367 = vst.msk [vmem:[#allocation2 + $0x8] sm:$0xff] %vm365_vm4, %v362_v30  ;;  %vm12049_vm3 = vcmask 261344  }
  0x2a   : >> { %v450_v27 = vld [vmem:[%s9578_s14 + $0xc] sm:$0xff]  ;;  %368 = vst.msk [vmem:[#allocation2 + $0x10] sm:$0xff] %vm365_vm4, %v363_v25  ;;  %v364_v29 = vld [vmem:[%s9578_s14 + $0x18] sm:$0xf]  ;;  %v452_v31 = vld [vmem:[%s9578_s14 + $0x1c] sm:$0xf] }
  0x2b   : >> { %370 = vst.msk [vmem:[#allocation2 + $0x18] sm:$0xf] %vm369_vm5, %v364_v29  ;;  %v451_v32 = vld [vmem:[%s9578_s14 + $0x14] sm:$0xff]  ;;  %v6870_v33 = vld [vmem:[%s9578_s14 + $0x28] sm:$0xff]  ;;  %v6869_v34 = vld [vmem:[%s9578_s14 + $0x20] sm:$0xff] }
  0x2c   : >> { %v6872_v35 = vld [vmem:[%s9578_s14 + $0x38] sm:$0xf]  ;;  %v6871_v36 = vld [vmem:[%s9578_s14 + $0x30] sm:$0xff]  ;;  %v9630_v38 = vld [vmem:[%s9578_s14 + $0x21] sm:$0xff] }
  0x2d   : >> { %407 = vrot.lane.b32.xlu1 %v398_v17, %s9413_s17  ;;  %405 = vrot.lane.b32.xlu0 %v397_v18, %s9413_s17  ;;  %v9627_v37 = vld [vmem:[%s9578_s14 + $0x29] sm:$0xff]  ;;  %v6876_v39 = vld [vmem:[%s9578_s14 + $0x39] sm:$0xf] }
  0x2e   : >> { %v9640_v40 = vld [vmem:[%s9578_s14 + $0x31] sm:$0xff]  ;;  %v9649_v42 = vld [vmem:[%s9578_s14 + $0x22] sm:$0xff]  ;;  %v6880_v43 = vld [vmem:[%s9578_s14 + $0x3a] sm:$0xf] }
  0x2f   : >> { %v9646_v41 = vld [vmem:[%s9578_s14 + $0x2a] sm:$0xff]  ;;  %v9657_v44 = vld [vmem:[%s9578_s14 + $0x32] sm:$0xff]  ;;  %v6884_v47 = vld [vmem:[%s9578_s14 + $0x3b] sm:$0xf] }
  0x30   : >> { %v9663_v45 = vld [vmem:[%s9578_s14 + $0x2b] sm:$0xff]  ;;  %v9666_v46 = vld [vmem:[%s9578_s14 + $0x23] sm:$0xff]  ;;  %v9674_v48 = vld [vmem:[%s9578_s14 + $0x33] sm:$0xff] }
  0x31   : >> { %411 = vrot.lane.b32.xlu1 %v400_v19, %s9413_s17  ;;  %409 = vrot.lane.b32.xlu0 %v399_v20, %s9413_s17  ;;  %v9680_v49 = vld [vmem:[%s9578_s14 + $0x2c] sm:$0xff]  ;;  %v9683_v50 = vld [vmem:[%s9578_s14 + $0x24] sm:$0xff] }
  0x32   : >> { %v6888_v51 = vld [vmem:[%s9578_s14 + $0x3c] sm:$0xf]  ;;  %v9691_v52 = vld [vmem:[%s9578_s14 + $0x34] sm:$0xff]  ;;  %v9697_v53 = vld [vmem:[%s9578_s14 + $0x48] sm:$0xff] }
  0x33   : >> { %v9700_v54 = vld [vmem:[%s9578_s14 + $0x40] sm:$0xff]  ;;  %v6894_v55 = vld [vmem:[%s9578_s14 + $0x58] sm:$0xf]  ;;  %v9708_v56 = vld [vmem:[%s9578_s14 + $0x50] sm:$0xff] }
  0x34   : >> { %v9714_v57 = vld [vmem:[%s9578_s14 + $0x49] sm:$0xff]  ;;  %v9717_v58 = vld [vmem:[%s9578_s14 + $0x41] sm:$0xff]  ;;  %v6898_v59 = vld [vmem:[%s9578_s14 + $0x59] sm:$0xf] }
  0x35   : >> { %433 = vrot.lane.b32.xlu1 %v424_v21, %s9414_s22  ;;  %431 = vrot.lane.b32.xlu0 %v423_v22, %s9414_s22  ;;  %v9725_v60 = vld [vmem:[%s9578_s14 + $0x51] sm:$0xff]  ;;  %v9734_v62 = vld [vmem:[%s9578_s14 + $0x42] sm:$0xff] }
  0x36   : >> { %v9731_v61 = vld [vmem:[%s9578_s14 + $0x4a] sm:$0xff]  ;;  %v6902_v63 = vld [vmem:[%s9578_s14 + $0x5a] sm:$0xf]  ;;  %v9742_v0 = vld [vmem:[%s9578_s14 + $0x52] sm:$0xff] }
  0x37   : >> { %v9748_v1 = vld [vmem:[%s9578_s14 + $0x4b] sm:$0xff]  ;;  %v9751_v3 = vld [vmem:[%s9578_s14 + $0x43] sm:$0xff]  ;;  %v6906_v4 = vld [vmem:[%s9578_s14 + $0x5b] sm:$0xf] }
  0x38   : >> { %v9759_v5 = vld [vmem:[%s9578_s14 + $0x53] sm:$0xff]  ;;  %v9768_v9 = vld [vmem:[%s9578_s14 + $0x44] sm:$0xff]  ;;  %v6910_v13 = vld [vmem:[%s9578_s14 + $0x5c] sm:$0xf] }
  0x39   : >> { %437 = vrot.lane.b32.xlu1 %v426_v23, %s9414_s22  ;;  %435 = vrot.lane.b32.xlu0 %v425_v24, %s9414_s22  ;;  %v9765_v6 = vld [vmem:[%s9578_s14 + $0x4c] sm:$0xff]  ;;  %v9776_v14 = vld [vmem:[%s9578_s14 + $0x54] sm:$0xff] }
  0x3a   : >> { %v9782_v15 = vld [vmem:[%s9578_s14 + $0x68] sm:$0xff]  ;;  %v9785_v16 = vld [vmem:[%s9578_s14 + $0x60] sm:$0xff]  ;;  %v6916_v17 = vld [vmem:[%s9578_s14 + $0x78] sm:$0xf] }
  0x3b   : >> { %v9793_v18 = vld [vmem:[%s9578_s14 + $0x70] sm:$0xff]  ;;  %v9804_v22 = vld [vmem:[%s9578_s14 + $0x61] sm:$0xff]  ;;  %v6920_v25 = vld [vmem:[%s9578_s14 + $0x79] sm:$0xf] }
  0x3c   : >> { %v9801_v21 = vld [vmem:[%s9578_s14 + $0x69] sm:$0xff]  ;;  %v9814_v26 = vld [vmem:[%s9578_s14 + $0x71] sm:$0xff] }
  0x3d   : >> { %459 = vrot.lane.b32.xlu1 %v450_v27, %s9415_s23  ;;  %457 = vrot.lane.b32.xlu0 %v449_v28, %s9415_s23  ;;  %v9822_v29 = vld [vmem:[%s9578_s14 + $0x6a] sm:$0xff]  ;;  %v9825_v30 = vld [vmem:[%s9578_s14 + $0x62] sm:$0xff] }
  0x3e   : >> { %v9992_v2 = vld [vmem:[%s9578_s14 + $0x8c] sm:$0xff]  ;;  %v9995_v12 = vld [vmem:[%s9578_s14 + $0x84] sm:$0xff] }
  0x41   : >> { %463 = vrot.lane.b32.xlu1 %v452_v31, %s9415_s23  ;;  %461 = vrot.lane.b32.xlu0 %v451_v32, %s9415_s23 }
  0x45   : >> { %488 = vrot.lane.b32.xlu1 %v6870_v33, %s12043_s24  ;;  %486 = vrot.lane.b32.xlu0 %v6869_v34, %s12043_s24  ;;  %v6924_v33 = vld [vmem:[%s9578_s14 + $0x7a] sm:$0xf]  ;;  %v9835_v34 = vld [vmem:[%s9578_s14 + $0x72] sm:$0xff] }
  0x49   : >> { %492 = vrot.lane.b32.xlu1 %v6872_v35, %s12043_s24  ;;  %490 = vrot.lane.b32.xlu0 %v6871_v36, %s12043_s24  ;;  %s9433_s24 = smov 88  }
  0x4d   : >> { %514 = vrot.lane.b32.xlu1 %v9627_v37, %s12038_s25  ;;  %512 = vrot.lane.b32.xlu0 %v9630_v38, %s12038_s25 }
  0x51   : >> { %518 = vrot.lane.b32.xlu1 %v6876_v39, %s12038_s25  ;;  %516 = vrot.lane.b32.xlu0 %v9640_v40, %s12038_s25  ;;  %v9843_v39 = vld [vmem:[%s9578_s14 + $0x6b] sm:$0xff]  ;;  %s9435_s25 = smov 96  }
  0x55   : >> { %540 = vrot.lane.b32.xlu1 %v9646_v41, %s12012_s29  ;;  %538 = vrot.lane.b32.xlu0 %v9649_v42, %s12012_s29 }
  0x59   : >> { %544 = vrot.lane.b32.xlu1 %v6880_v43, %s12012_s29  ;;  %542 = vrot.lane.b32.xlu0 %v9657_v44, %s12012_s29  ;;  %s12016_s29 = smov 36   ;;  %v9846_v43 = vld [vmem:[%s9578_s14 + $0x63] sm:$0xff] }
  0x5d   : >> { %566 = vrot.lane.b32.xlu1 %v9663_v45, %s12014_s21  ;;  %564 = vrot.lane.b32.xlu0 %v9666_v46, %s12014_s21 }
  0x61   : >> { %570 = vrot.lane.b32.xlu1 %v6884_v47, %s12014_s21  ;;  %568 = vrot.lane.b32.xlu0 %v9674_v48, %s12014_s21  ;;  %s12018_s21 = smov 40  }
  0x65   : >> { %592 = vrot.lane.b32.xlu1 %v9680_v49, %s12016_s29  ;;  %590 = vrot.lane.b32.xlu0 %v9683_v50, %s12016_s29 }
  0x69   : >> { %596 = vrot.lane.b32.xlu1 %v6888_v51, %s12016_s29  ;;  %594 = vrot.lane.b32.xlu0 %v9691_v52, %s12016_s29  ;;  %s12020_s29 = smov 44  }
  0x6d   : >> { %621 = vrot.lane.b32.xlu1 %v9697_v53, %s12018_s21  ;;  %619 = vrot.lane.b32.xlu0 %v9700_v54, %s12018_s21 }
  0x71   : >> { %625 = vrot.lane.b32.xlu1 %v6894_v55, %s12018_s21  ;;  %623 = vrot.lane.b32.xlu0 %v9708_v56, %s12018_s21  ;;  %s12022_s21 = smov 48   ;;  %v6928_v55 = vld [vmem:[%s9578_s14 + $0x7b] sm:$0xf] }
  0x75   : >> { %647 = vrot.lane.b32.xlu1 %v9714_v57, %s12020_s29  ;;  %645 = vrot.lane.b32.xlu0 %v9717_v58, %s12020_s29 }
  0x79   : >> { %651 = vrot.lane.b32.xlu1 %v6898_v59, %s12020_s29  ;;  %649 = vrot.lane.b32.xlu0 %v9725_v60, %s12020_s29  ;;  %s12024_s29 = smov 52   ;;  %v9856_v59 = vld [vmem:[%s9578_s14 + $0x73] sm:$0xff] }
  0x7d   : >> { %673 = vrot.lane.b32.xlu1 %v9731_v61, %s12022_s21  ;;  %671 = vrot.lane.b32.xlu0 %v9734_v62, %s12022_s21 }
  0x81   : >> { %677 = vrot.lane.b32.xlu1 %v6902_v63, %s12022_s21  ;;  %675 = vrot.lane.b32.xlu0 %v9742_v0, %s12022_s21  ;;  %s12026_s21 = smov 56  }
  0x85   : >> { %699 = vrot.lane.b32.xlu1 %v9748_v1, %s12024_s29  ;;  %697 = vrot.lane.b32.xlu0 %v9751_v3, %s12024_s29 }
  0x89   : >> { %703 = vrot.lane.b32.xlu1 %v6906_v4, %s12024_s29  ;;  %701 = vrot.lane.b32.xlu0 %v9759_v5, %s12024_s29  ;;  %s12028_s29 = smov 60  }
  0x8d   : >> { %725 = vrot.lane.b32.xlu1 %v9765_v6, %s12026_s21  ;;  %723 = vrot.lane.b32.xlu0 %v9768_v9, %s12026_s21 }
  0x91   : >> { %729 = vrot.lane.b32.xlu1 %v6910_v13, %s12026_s21  ;;  %727 = vrot.lane.b32.xlu0 %v9776_v14, %s12026_s21  ;;  %s12030_s21 = smov 64   ;;  %v9864_v13 = vld [vmem:[%s9578_s14 + $0x6c] sm:$0xff] }
  0x95   : >> { %754 = vrot.lane.b32.xlu1 %v9782_v15, %s12028_s29  ;;  %752 = vrot.lane.b32.xlu0 %v9785_v16, %s12028_s29 }
  0x97   : >> { %v384_v19 = vpop.permute.xlu1 %383  ;;  %v380_v20 = vpop.permute.xlu0 %379 }
  0x98   : >> { %394 = vst.msk [vmem:[#allocation2 + $0x10] sm:$0xff] %vm391_vm6, %v384_v19  ;;  %392 = vst.msk [vmem:[#allocation2] sm:$0xff] %vm391_vm6, %v380_v20 }
  0x99   : >> { %758 = vrot.lane.b32.xlu1 %v6916_v17, %s12028_s29  ;;  %756 = vrot.lane.b32.xlu0 %v9793_v18, %s12028_s29  ;;  %s12032_s29 = smov 68   ;;  %v9867_v17 = vld [vmem:[%s9578_s14 + $0x64] sm:$0xff] }
  0x9b   : >> { %v386_v23 = vpop.permute.xlu1 %385  ;;  %v382_v24 = vpop.permute.xlu0 %381 }
  0x9c   : >> { %396 = vst.msk [vmem:[#allocation2 + $0x18] sm:$0xf] %vm395_vm7, %v386_v23  ;;  %v6932_v23 = vld [vmem:[%s9578_s14 + $0x7c] sm:$0xf] }
  0x9d   : >> { %393 = vst.msk [vmem:[#allocation2 + $0x8] sm:$0xff] %vm391_vm6, %v382_v24  ;;  %780 = vrot.lane.b32.xlu1 %v9801_v21, %s12030_s21  ;;  %778 = vrot.lane.b32.xlu0 %v9804_v22, %s12030_s21  ;;  %v9877_v24 = vld [vmem:[%s9578_s14 + $0x74] sm:$0xff] }
  0x9f   : >> { %v408_v27 = vpop.permute.xlu1 %407  ;;  %v406_v28 = vpop.permute.xlu0 %405 }
  0xa0   : >> { %419 = vst.msk [vmem:[#allocation2 + $0x8] sm:$0xff] %vm417_vm8, %v408_v27  ;;  %418 = vst.msk [vmem:[#allocation2] sm:$0xff] %vm417_vm8, %v406_v28  ;;  %v9885_v28 = vld [vmem:[%s9578_s14 + $0x88] sm:$0xff] }
  0xa1   : >> { %784 = vrot.lane.b32.xlu1 %v6920_v25, %s12030_s21  ;;  %782 = vrot.lane.b32.xlu0 %v9814_v26, %s12030_s21  ;;  %s12034_s21 = smov 72  }
  0xa3   : >> { %v412_v31 = vpop.permute.xlu1 %411  ;;  %v410_v32 = vpop.permute.xlu0 %409 }
  0xa4   : >> { %422 = vst.msk [vmem:[#allocation2 + $0x18] sm:$0xf] %vm421_vm9, %v412_v31  ;;  %v9888_v31 = vld [vmem:[%s9578_s14 + $0x80] sm:$0xff] }
  0xa5   : >> { %420 = vst.msk [vmem:[#allocation2 + $0x10] sm:$0xff] %vm417_vm8, %v410_v32  ;;  %806 = vrot.lane.b32.xlu1 %v9822_v29, %s12032_s29  ;;  %804 = vrot.lane.b32.xlu0 %v9825_v30, %s12032_s29 }
  0xa7   : >> { %v434_v35 = vpop.permute.xlu1 %433  ;;  %v432_v36 = vpop.permute.xlu0 %431 }
  0xa8   : >> { %445 = vst.msk [vmem:[#allocation2 + $0x8] sm:$0xff] %vm443_vm10, %v434_v35  ;;  %444 = vst.msk [vmem:[#allocation2] sm:$0xff] %vm443_vm10, %v432_v36  ;;  %v6938_v35 = vld [vmem:[%s9578_s14 + $0x98] sm:$0xf]  ;;  %v9898_v36 = vld [vmem:[%s9578_s14 + $0x90] sm:$0xff] }
  0xa9   : >> { %810 = vrot.lane.b32.xlu1 %v6924_v33, %s12032_s29  ;;  %808 = vrot.lane.b32.xlu0 %v9835_v34, %s12032_s29  ;;  %s12036_s29 = smov 76  }
  0xab   : >> { %v438_v47 = vpop.permute.xlu1 %437  ;;  %v436_v51 = vpop.permute.xlu0 %435 }
  0xac   : >> { %448 = vst.msk [vmem:[#allocation2 + $0x18] sm:$0xf] %vm447_vm11, %v438_v47 }
  0xad   : >> { %446 = vst.msk [vmem:[#allocation2 + $0x10] sm:$0xff] %vm443_vm10, %v436_v51  ;;  %832 = vrot.lane.b32.xlu1 %v9843_v39, %s12034_s21  ;;  %830 = vrot.lane.b32.xlu0 %v9846_v43, %s12034_s21 }
  0xaf   : >> { %v460_v63 = vpop.permute.xlu1 %459  ;;  %v458_v4 = vpop.permute.xlu0 %457 }
  0xb0   : >> { %471 = vst.msk [vmem:[#allocation2 + $0x8] sm:$0xff] %vm469_vm12, %v460_v63  ;;  %470 = vst.msk [vmem:[#allocation2] sm:$0xff] %vm469_vm12, %v458_v4  ;;  %v9909_v63 = vld [vmem:[%s9578_s14 + $0x89] sm:$0xff]  ;;  %v9912_v4 = vld [vmem:[%s9578_s14 + $0x81] sm:$0xff] }
  0xb1   : >> { %836 = vrot.lane.b32.xlu1 %v6928_v55, %s12034_s21  ;;  %834 = vrot.lane.b32.xlu0 %v9856_v59, %s12034_s21  ;;  %s12040_s21 = smov 80   ;;  %v9007_v55 = vld [vmem:[%s12002_s1 + $0x30] ss:$0 sps:$4 sm:$0x33]  }
  0xb2   : >> { %8919 = vmatprep.subr.msk.bf16.mxu0 %vm12045_vm2, %v9007_v55 }
  0xb3   : >> { %v464_v19 = vpop.permute.xlu1 %463  ;;  %v462_v20 = vpop.permute.xlu0 %461 }
  0xb4   : >> { %474 = vst.msk [vmem:[#allocation2 + $0x18] sm:$0xf] %vm473_vm13, %v464_v19  ;;  %v1081_v19 = vsel %vm12045_vm2, %v9007_v55, 0  ;;  %v9941_v55 = vld [vmem:[%s9578_s14 + $0x82] sm:$0xff]  ;;  %vm12054_vm2 = vcmask 294144  }
  0xb5   : >> { %472 = vst.msk [vmem:[#allocation2 + $0x10] sm:$0xff] %vm469_vm12, %v462_v20  ;;  %858 = vrot.lane.b32.xlu1 %v9864_v13, %s12036_s29  ;;  %856 = vrot.lane.b32.xlu0 %v9867_v17, %s12036_s29 }
  0xb6   : >> { %8312 = vmatpush3.bf16.msra.mxu0 %v1081_v19 }
  0xb7   : >> { %v489_v25 = vpop.permute.xlu1 %488  ;;  %v487_v27 = vpop.permute.xlu0 %486 }
  0xb8   : >> { %500 = vst.msk [vmem:[#allocation2 + $0x8] sm:$0xff] %vm498_vm14, %v489_v25  ;;  %499 = vst.msk [vmem:[#allocation2] sm:$0xff] %vm498_vm14, %v487_v27  ;;  %v9008_v25 = vld [vmem:[%s12002_s1 + $0x28] sm:$0xff]   ;;  %v6942_v27 = vld [vmem:[%s9578_s14 + $0x99] sm:$0xf] }
  0xb9   : >> { %862 = vrot.lane.b32.xlu1 %v6932_v23, %s12036_s29  ;;  %860 = vrot.lane.b32.xlu0 %v9877_v24, %s12036_s29  ;;  %s12103_s29 = smov 36  }
  0xba   : >> { %8313 = vmatprep.subr.bf16.mxu0 %v9008_v25 }
  0xbb   : >> { %v493_v32 = vpop.permute.xlu1 %492  ;;  %v491_v33 = vpop.permute.xlu0 %490  ;;  %8314 = vmatpush3.bf16.msra.mxu0 %v9008_v25  ;;  %v6946_v25 = vld [vmem:[%s9578_s14 + $0x9a] sm:$0xf] }
  0xbc   : >> { %503 = vst.msk [vmem:[#allocation2 + $0x18] sm:$0xf] %vm502_vm15, %v493_v32  ;;  %v9927_v32 = vld [vmem:[%s9578_s14 + $0x91] sm:$0xff] }
  0xbd   : >> { %501 = vst.msk [vmem:[#allocation2 + $0x10] sm:$0xff] %vm498_vm14, %v491_v33  ;;  %887 = vrot.lane.b32.xlu1 %v9885_v28, %s12040_s21  ;;  %885 = vrot.lane.b32.xlu0 %v9888_v31, %s12040_s21 }
  0xbf   : >> { %v515_v47 = vpop.permute.xlu1 %514  ;;  %v513_v51 = vpop.permute.xlu0 %512 }
  0xc0   : >> { %526 = vst.msk [vmem:[#allocation2 + $0x8] sm:$0xff] %vm524_vm0, %v515_v47  ;;  %525 = vst.msk [vmem:[#allocation2] sm:$0xff] %vm524_vm0, %v513_v51  ;;  %v9009_v47 = vld [vmem:[%s12002_s1 + $0x20] sm:$0xff]   ;;  %v9938_v51 = vld [vmem:[%s9578_s14 + $0x8a] sm:$0xff] }
  0xc1   : >> { %891 = vrot.lane.b32.xlu1 %v6938_v35, %s12040_s21  ;;  %889 = vrot.lane.b32.xlu0 %v9898_v36, %s12040_s21  ;;  %s12047_s21 = smov 84  }
  0xc2   : >> { %8315 = vmatprep.subr.bf16.mxu0 %v9009_v47 }
  0xc3   : >> { %v519_v20 = vpop.permute.xlu1 %518  ;;  %v517_v23 = vpop.permute.xlu0 %516  ;;  %8316 = vmatpush3.bf16.msra.mxu0 %v9009_v47  ;;  %v9011_v47 = vld [vmem:[%s12002_s1 + $0x10] sm:$0xff]  }
  0xc4   : >> { %529 = vst.msk [vmem:[#allocation2 + $0x18] sm:$0xf] %vm12042_vm1, %v519_v20  ;;  %vm12046_vm1 = vcmask 257248  }
  0xc5   : >> { %527 = vst.msk [vmem:[#allocation2 + $0x10] sm:$0xff] %vm524_vm0, %v517_v23  ;;  %913 = vrot.lane.b32.xlu1 %v9909_v63, %s12047_s21  ;;  %911 = vrot.lane.b32.xlu0 %v9912_v4, %s12047_s21  ;;  %v9010_v23 = vld [vmem:[%s12002_s1 + $0x18] sm:$0xff]  }
  0xc6   : >> { %8317 = vmatprep.subr.bf16.mxu0 %v9010_v23 }
  0xc7   : >> { %v541_v33 = vpop.permute.xlu1 %540  ;;  %v539_v35 = vpop.permute.xlu0 %538  ;;  %8318 = vmatpush3.bf16.msra.mxu0 %v9010_v23 }
  0xc8   : >> { %552 = vst.msk [vmem:[#allocation2 + $0x8] sm:$0xff] %vm12049_vm3, %v541_v33  ;;  %551 = vst.msk [vmem:[#allocation2] sm:$0xff] %vm12049_vm3, %v539_v35  ;;  %8319 = vmatprep.subr.bf16.mxu0 %v9011_v47 }
  0xc9   : >> { %917 = vrot.lane.b32.xlu1 %v6942_v27, %s12047_s21  ;;  %915 = vrot.lane.b32.xlu0 %v9927_v32, %s12047_s21  ;;  %v9954_v27 = vld [vmem:[%s9578_s14 + $0x92] sm:$0xff]  ;;  %s9434_s21 = smov 92  }
  0xcb   : >> { %v545_v19 = vpop.permute.xlu1 %544  ;;  %v543_v20 = vpop.permute.xlu0 %542  ;;  %8320 = vmatpush3.bf16.msra.mxu0 %v9011_v47  ;;  %v9981_v47 = vld [vmem:[%s9578_s14 + $0x93] sm:$0xff] }
  0xcc   : >> { %555 = vst.msk [vmem:[#allocation2 + $0x18] sm:$0xf] %vm12046_vm1, %v545_v19  ;;  %vm12052_vm1 = vcmask 290048   ;;  %v9965_v19 = vld [vmem:[%s9578_s14 + $0x8b] sm:$0xff] }
  0xcd   : >> { %553 = vst.msk [vmem:[#allocation2 + $0x10] sm:$0xff] %vm12049_vm3, %v543_v20  ;;  %939 = vrot.lane.b32.xlu1 %v9938_v51, %s9433_s24  ;;  %937 = vrot.lane.b32.xlu0 %v9941_v55, %s9433_s24  ;;  %v9968_v20 = vld [vmem:[%s9578_s14 + $0x83] sm:$0xff]  ;;  %vm12056_vm3 = vcmask 326944  }
  0xcf   : >> { %v567_v33 = vpop.permute.xlu1 %566  ;;  %v565_v35 = vpop.permute.xlu0 %564 }
  0xd0   : >> { %578 = vst.msk [vmem:[#allocation2 + $0x8] sm:$0xff] %vm12054_vm2, %v567_v33  ;;  %577 = vst.msk [vmem:[#allocation2] sm:$0xff] %vm12054_vm2, %v565_v35  ;;  %v6950_v35 = vld [vmem:[%s9578_s14 + $0x9b] sm:$0xf] }
  0xd1   : >> { %943 = vrot.lane.b32.xlu1 %v6946_v25, %s9433_s24  ;;  %941 = vrot.lane.b32.xlu0 %v9954_v27, %s9433_s24  ;;  %v9012_v25 = vld [vmem:[%s12002_s1 + $0x8] sm:$0xff]  }
  0xd2   : >> { %8321 = vmatprep.subr.bf16.mxu0 %v9012_v25 }
  0xd3   : >> { %v571_v23 = vpop.permute.xlu1 %570  ;;  %v569_v33 = vpop.permute.xlu0 %568  ;;  %8322 = vmatpush3.bf16.msra.mxu0 %v9012_v25 }
  0xd4   : >> { %581 = vst.msk [vmem:[#allocation2 + $0x18] sm:$0xf] %vm12052_vm1, %v571_v23  ;;  %vm12055_vm1 = vcmask 322848   ;;  %8323 = vmatprep.subr.bf16.mxu0 %v9013_v7 }
  0xd5   : >> { %579 = vst.msk [vmem:[#allocation2 + $0x10] sm:$0xff] %vm12054_vm2, %v569_v33  ;;  %965 = vrot.lane.b32.xlu1 %v9965_v19, %s9434_s21  ;;  %963 = vrot.lane.b32.xlu0 %v9968_v20, %s9434_s21  ;;  %vm12058_vm2 = vcmask 359744  }
  0xd7   : >> { %v593_v23 = vpop.permute.xlu1 %592  ;;  %v591_v33 = vpop.permute.xlu0 %590  ;;  %8324 = vmatpush3.bf16.msra.mxu0 %v9013_v7 }
  0xd8   : >> { %604 = vst.msk [vmem:[#allocation2 + $0x8] sm:$0xff] %vm12056_vm3, %v593_v23  ;;  %603 = vst.msk [vmem:[#allocation2] sm:$0xff] %vm12056_vm3, %v591_v33  ;;  %v10005_v33 = vld [vmem:[%s9578_s14 + $0x94] sm:$0xff] }
  0xd9   : >> { %969 = vrot.lane.b32.xlu1 %v6950_v35, %s9434_s21  ;;  %967 = vrot.lane.b32.xlu0 %v9981_v47, %s9434_s21  ;;  %v6954_v35 = vld [vmem:[%s9578_s14 + $0x9c] sm:$0xf] }
  0xdb   : >> { %v597_v25 = vpop.permute.xlu1 %596  ;;  %v595_v23 = vpop.permute.xlu0 %594 }
  0xdc   : >> { %607 = vst.msk [vmem:[#allocation2 + $0x18] sm:$0xf] %vm12055_vm1, %v597_v25  ;;  %vm12057_vm1 = vcmask 355648  }
  0xdd   : >> { %605 = vst.msk [vmem:[#allocation2 + $0x10] sm:$0xff] %vm12056_vm3, %v595_v23  ;;  %991 = vrot.lane.b32.xlu1 %v9992_v2, %s9435_s25  ;;  %989 = vrot.lane.b32.xlu0 %v9995_v12, %s9435_s25  ;;  %vm12060_vm3 = vcmask 392544  }
  0xdf   : >> { %v622_v10 = vpop.permute.xlu1 %621  ;;  %v620_v11 = vpop.permute.xlu0 %619 }
  0xe0   : >> { %633 = vst.msk [vmem:[#allocation2 + $0x8] sm:$0xff] %vm12058_vm2, %v622_v10  ;;  %632 = vst.msk [vmem:[#allocation2] sm:$0xff] %vm12058_vm2, %v620_v11  ;;  %v6972_v10 = vld [vmem:[%s9578_s14 + $0x39] sm:$0xf] }
  0xe1   : >> { %995 = vrot.lane.b32.xlu1 %v6954_v35, %s9435_s25  ;;  %993 = vrot.lane.b32.xlu0 %v10005_v33, %s9435_s25 }
  0xe3   : >> { %v626_v7 = vpop.permute.xlu1 %625  ;;  %v624_v25 = vpop.permute.xlu0 %623 }
  0xe4   : >> { %636 = vst.msk [vmem:[#allocation2 + $0x18] sm:$0xf] %vm12057_vm1, %v626_v7  ;;  %vm12059_vm1 = vcmask 388448  }
  0xe5   : >> { %634 = vst.msk [vmem:[#allocation2 + $0x10] sm:$0xff] %vm12058_vm2, %v624_v25  ;;  %1154 = vrot.lane.b32.xlu1 %v9627_v37, %s9412_s16  ;;  %1152 = vrot.lane.b32.xlu0 %v9630_v38, %s9412_s16  ;;  %vm12062_vm2 = vcmask 425344   ;;  %v6976_v38 = vld [vmem:[%s9578_s14 + $0x3a] sm:$0xf] }
  0xe7   : >> { %v648_v11 = vpop.permute.xlu1 %647  ;;  %v646_v23 = vpop.permute.xlu0 %645 }
  0xe8   : >> { %659 = vst.msk [vmem:[#allocation2 + $0x8] sm:$0xff] %vm12060_vm3, %v648_v11  ;;  %658 = vst.msk [vmem:[#allocation2] sm:$0xff] %vm12060_vm3, %v646_v23 }
  0xe9   : >> { %1158 = vrot.lane.b32.xlu1 %v6972_v10, %s9412_s16  ;;  %1156 = vrot.lane.b32.xlu0 %v9640_v40, %s9412_s16  ;;  %s12099_s16 = smov 20  }
  0xeb   : >> { %v652_v35 = vpop.permute.xlu1 %651  ;;  %v650_v37 = vpop.permute.xlu0 %649 }
  0xec   : >> { %662 = vst.msk [vmem:[#allocation2 + $0x18] sm:$0xf] %vm12059_vm1, %v652_v35  ;;  %vm12061_vm1 = vcmask 421248  }
  0xed   : >> { %660 = vst.msk [vmem:[#allocation2 + $0x10] sm:$0xff] %vm12060_vm3, %v650_v37  ;;  %1178 = vrot.lane.b32.xlu1 %v9646_v41, %s9413_s17  ;;  %1176 = vrot.lane.b32.xlu0 %v9649_v42, %s9413_s17  ;;  %vm12064_vm3 = vcmask 458144   ;;  %v6980_v42 = vld [vmem:[%s9578_s14 + $0x3b] sm:$0xf] }
  0xef   : >> { %v674_v7 = vpop.permute.xlu1 %673  ;;  %v672_v25 = vpop.permute.xlu0 %671 }
  0xf0   : >> { %685 = vst.msk [vmem:[#allocation2 + $0x8] sm:$0xff] %vm12062_vm2, %v674_v7  ;;  %684 = vst.msk [vmem:[#allocation2] sm:$0xff] %vm12062_vm2, %v672_v25 }
  0xf1   : >> { %1182 = vrot.lane.b32.xlu1 %v6976_v38, %s9413_s17  ;;  %1180 = vrot.lane.b32.xlu0 %v9657_v44, %s9413_s17  ;;  %s12100_s17 = smov 24  }
  0xf3   : >> { %v678_v40 = vpop.permute.xlu1 %677  ;;  %v676_v41 = vpop.permute.xlu0 %675 }
  0xf4   : >> { %688 = vst.msk [vmem:[#allocation2 + $0x18] sm:$0xf] %vm12061_vm1, %v678_v40  ;;  %vm12063_vm1 = vcmask 454048  }
  0xf5   : >> { %686 = vst.msk [vmem:[#allocation2 + $0x10] sm:$0xff] %vm12062_vm2, %v676_v41  ;;  %1202 = vrot.lane.b32.xlu1 %v9663_v45, %s9414_s22  ;;  %1200 = vrot.lane.b32.xlu0 %v9666_v46, %s9414_s22  ;;  %vm12066_vm2 = vcmask 490944   ;;  %v6984_v46 = vld [vmem:[%s9578_s14 + $0x3c] sm:$0xf] }
  0xf7   : >> { %v700_v10 = vpop.permute.xlu1 %699  ;;  %v698_v11 = vpop.permute.xlu0 %697 }
  0xf8   : >> { %711 = vst.msk [vmem:[#allocation2 + $0x8] sm:$0xff] %vm12064_vm3, %v700_v10  ;;  %710 = vst.msk [vmem:[#allocation2] sm:$0xff] %vm12064_vm3, %v698_v11 }
  0xf9   : >> { %1206 = vrot.lane.b32.xlu1 %v6980_v42, %s9414_s22  ;;  %1204 = vrot.lane.b32.xlu0 %v9674_v48, %s9414_s22  ;;  %s12101_s22 = smov 28  }
  0xfb   : >> { %v704_v44 = vpop.permute.xlu1 %703  ;;  %v702_v45 = vpop.permute.xlu0 %701 }
  0xfc   : >> { %714 = vst.msk [vmem:[#allocation2 + $0x18] sm:$0xf] %vm12063_vm1, %v704_v44  ;;  %vm12065_vm1 = vcmask 486848  }
  0xfd   : >> { %712 = vst.msk [vmem:[#allocation2 + $0x10] sm:$0xff] %vm12064_vm3, %v702_v45  ;;  %1226 = vrot.lane.b32.xlu1 %v9680_v49, %s9415_s23  ;;  %1224 = vrot.lane.b32.xlu0 %v9683_v50, %s9415_s23  ;;  %vm12068_vm3 = vcmask 523744   ;;  %v6988_v50 = vld [vmem:[%s9578_s14 + $0x58] sm:$0xf] }
  0xff   : >> { %v726_v23 = vpop.permute.xlu1 %725  ;;  %v724_v35 = vpop.permute.xlu0 %723 }
 0x100   : >> { %737 = vst.msk [vmem:[#allocation2 + $0x8] sm:$0xff] %vm12066_vm2, %v726_v23  ;;  %736 = vst.msk [vmem:[#allocation2] sm:$0xff] %vm12066_vm2, %v724_v35 }
 0x101   : >> { %1230 = vrot.lane.b32.xlu1 %v6984_v46, %s9415_s23  ;;  %1228 = vrot.lane.b32.xlu0 %v9691_v52, %s9415_s23  ;;  %s12102_s23 = smov 32  }
 0x103   : >> { %v730_v48 = vpop.permute.xlu1 %729  ;;  %v728_v49 = vpop.permute.xlu0 %727 }
 0x104   : >> { %740 = vst.msk [vmem:[#allocation2 + $0x18] sm:$0xf] %vm12065_vm1, %v730_v48  ;;  %vm12067_vm1 = vcmask 519648  }
 0x105   : >> { %738 = vst.msk [vmem:[#allocation2 + $0x10] sm:$0xff] %vm12066_vm2, %v728_v49  ;;  %1250 = vrot.lane.b32.xlu1 %v9697_v53, %s12099_s16  ;;  %1248 = vrot.lane.b32.xlu0 %v9700_v54, %s12099_s16  ;;  %vm12070_vm2 = vcmask 556544   ;;  %v6992_v54 = vld [vmem:[%s9578_s14 + $0x59] sm:$0xf] }
 0x107   : >> { %v755_v37 = vpop.permute.xlu1 %754  ;;  %v753_v38 = vpop.permute.xlu0 %752 }
 0x108   : >> { %766 = vst.msk [vmem:[#allocation2 + $0x8] sm:$0xff] %vm12068_vm3, %v755_v37  ;;  %765 = vst.msk [vmem:[#allocation2] sm:$0xff] %vm12068_vm3, %v753_v38 }
 0x109   : >> { %1254 = vrot.lane.b32.xlu1 %v6988_v50, %s12099_s16  ;;  %1252 = vrot.lane.b32.xlu0 %v9708_v56, %s12099_s16  ;;  %s12104_s16 = smov 40  }
 0x10b   : >> { %v759_v52 = vpop.permute.xlu1 %758  ;;  %v757_v53 = vpop.permute.xlu0 %756 }
 0x10c   : >> { %769 = vst.msk [vmem:[#allocation2 + $0x18] sm:$0xf] %vm12067_vm1, %v759_v52  ;;  %vm12069_vm1 = vcmask 552448  }
 0x10d   : >> { %767 = vst.msk [vmem:[#allocation2 + $0x10] sm:$0xff] %vm12068_vm3, %v757_v53  ;;  %1274 = vrot.lane.b32.xlu1 %v9714_v57, %s12100_s17  ;;  %1272 = vrot.lane.b32.xlu0 %v9717_v58, %s12100_s17  ;;  %vm12072_vm3 = vcmask 589344   ;;  %v6996_v58 = vld [vmem:[%s9578_s14 + $0x5a] sm:$0xf]  ;;  %v6965_v53 = vld [vmem:[%s9578_s14 + $0x20] sm:$0xff] }
 0x10f   : >> { %v781_v7 = vpop.permute.xlu1 %780  ;;  %v779_v25 = vpop.permute.xlu0 %778 }
 0x110   : >> { %792 = vst.msk [vmem:[#allocation2 + $0x8] sm:$0xff] %vm12070_vm2, %v781_v7  ;;  %791 = vst.msk [vmem:[#allocation2] sm:$0xff] %vm12070_vm2, %v779_v25 }
 0x111   : >> { %1278 = vrot.lane.b32.xlu1 %v6992_v54, %s12100_s17  ;;  %1276 = vrot.lane.b32.xlu0 %v9725_v60, %s12100_s17  ;;  %s12105_s17 = smov 44   ;;  %v7028_v54 = vld [vmem:[%s9578_s14 + $0x98] sm:$0xf] }
 0x113   : >> { %v785_v56 = vpop.permute.xlu1 %784  ;;  %v783_v57 = vpop.permute.xlu0 %782 }
 0x114   : >> { %795 = vst.msk [vmem:[#allocation2 + $0x18] sm:$0xf] %vm12069_vm1, %v785_v56  ;;  %vm12071_vm1 = vcmask 585248  }
 0x115   : >> { %793 = vst.msk [vmem:[#allocation2 + $0x10] sm:$0xff] %vm12070_vm2, %v783_v57  ;;  %1298 = vrot.lane.b32.xlu1 %v9731_v61, %s12101_s22  ;;  %1296 = vrot.lane.b32.xlu0 %v9734_v62, %s12101_s22  ;;  %vm12074_vm2 = vcmask 622144   ;;  %v7000_v62 = vld [vmem:[%s9578_s14 + $0x5b] sm:$0xf] }
 0x117   : >> { %v807_v40 = vpop.permute.xlu1 %806  ;;  %v805_v41 = vpop.permute.xlu0 %804 }
 0x118   : >> { %818 = vst.msk [vmem:[#allocation2 + $0x8] sm:$0xff] %vm12072_vm3, %v807_v40  ;;  %817 = vst.msk [vmem:[#allocation2] sm:$0xff] %vm12072_vm3, %v805_v41 }
 0x119   : >> { %1302 = vrot.lane.b32.xlu1 %v6996_v58, %s12101_s22  ;;  %1300 = vrot.lane.b32.xlu0 %v9742_v0, %s12101_s22  ;;  %s12106_s22 = smov 48   ;;  %v6968_v58 = vld [vmem:[%s9578_s14 + $0x38] sm:$0xf] }
 0x11b   : >> { %v811_v60 = vpop.permute.xlu1 %810  ;;  %v809_v61 = vpop.permute.xlu0 %808 }
 0x11c   : >> { %821 = vst.msk [vmem:[#allocation2 + $0x18] sm:$0xf] %vm12071_vm1, %v811_v60  ;;  %vm12073_vm1 = vcmask 618048  }
 0x11d   : >> { %819 = vst.msk [vmem:[#allocation2 + $0x10] sm:$0xff] %vm12072_vm3, %v809_v61  ;;  %1322 = vrot.lane.b32.xlu1 %v9748_v1, %s12102_s23  ;;  %1320 = vrot.lane.b32.xlu0 %v9751_v3, %s12102_s23  ;;  %vm12076_vm3 = vcmask 654944   ;;  %v7004_v3 = vld [vmem:[%s9578_s14 + $0x5c] sm:$0xf] }
 0x11f   : >> { %v833_v42 = vpop.permute.xlu1 %832  ;;  %v831_v10 = vpop.permute.xlu0 %830 }
 0x120   : >> { %844 = vst.msk [vmem:[#allocation2 + $0x8] sm:$0xff] %vm12074_vm2, %v833_v42  ;;  %843 = vst.msk [vmem:[#allocation2] sm:$0xff] %vm12074_vm2, %v831_v10 }
 0x121   : >> { %1326 = vrot.lane.b32.xlu1 %v7000_v62, %s12102_s23  ;;  %1324 = vrot.lane.b32.xlu0 %v9759_v5, %s12102_s23  ;;  %s12107_s23 = smov 52  }
 0x123   : >> { %v837_v0 = vpop.permute.xlu1 %836  ;;  %v835_v1 = vpop.permute.xlu0 %834 }
 0x124   : >> { %847 = vst.msk [vmem:[#allocation2 + $0x18] sm:$0xf] %vm12073_vm1, %v837_v0  ;;  %vm12075_vm1 = vcmask 650848  }
 0x125   : >> { %845 = vst.msk [vmem:[#allocation2 + $0x10] sm:$0xff] %vm12074_vm2, %v835_v1  ;;  %1346 = vrot.lane.b32.xlu1 %v9765_v6, %s12103_s29  ;;  %1344 = vrot.lane.b32.xlu0 %v9768_v9, %s12103_s29  ;;  %vm12078_vm2 = vcmask 687744   ;;  %v7008_v9 = vld [vmem:[%s9578_s14 + $0x78] sm:$0xf] }
 0x127   : >> { %v859_v11 = vpop.permute.xlu1 %858  ;;  %v857_v44 = vpop.permute.xlu0 %856 }
 0x128   : >> { %870 = vst.msk [vmem:[#allocation2 + $0x8] sm:$0xff] %vm12076_vm3, %v859_v11  ;;  %869 = vst.msk [vmem:[#allocation2] sm:$0xff] %vm12076_vm3, %v857_v44 }
 0x129   : >> { %1350 = vrot.lane.b32.xlu1 %v7004_v3, %s12103_s29  ;;  %1348 = vrot.lane.b32.xlu0 %v9776_v14, %s12103_s29  ;;  %s12108_s29 = smov 56  }
 0x12b   : >> { %v863_v5 = vpop.permute.xlu1 %862  ;;  %v861_v6 = vpop.permute.xlu0 %860 }
 0x12c   : >> { %873 = vst.msk [vmem:[#allocation2 + $0x18] sm:$0xf] %vm12075_vm1, %v863_v5  ;;  %vm12077_vm1 = vcmask 683648  }
 0x12d   : >> { %871 = vst.msk [vmem:[#allocation2 + $0x10] sm:$0xff] %vm12076_vm3, %v861_v6  ;;  %1370 = vrot.lane.b32.xlu1 %v9782_v15, %s12104_s16  ;;  %1368 = vrot.lane.b32.xlu0 %v9785_v16, %s12104_s16  ;;  %vm12080_vm3 = vcmask 720544   ;;  %v7012_v16 = vld [vmem:[%s9578_s14 + $0x79] sm:$0xf]  ;;  %v7047_v6 = vld [vmem:[%s9578_s14 + $0xa0] sm:$0xff] }
 0x12f   : >> { %v888_v45 = vpop.permute.xlu1 %887  ;;  %v886_v46 = vpop.permute.xlu0 %885 }
 0x130   : >> { %899 = vst.msk [vmem:[#allocation2 + $0x8] sm:$0xff] %vm12078_vm2, %v888_v45  ;;  %898 = vst.msk [vmem:[#allocation2] sm:$0xff] %vm12078_vm2, %v886_v46  ;;  %v7049_v45 = vld [vmem:[%s9578_s14 + $0xb0] sm:$0xff] }
 0x131   : >> { %1374 = vrot.lane.b32.xlu1 %v7008_v9, %s12104_s16  ;;  %1372 = vrot.lane.b32.xlu0 %v9793_v18, %s12104_s16  ;;  %s12109_s16 = smov 60   ;;  %v7050_v9 = vld [vmem:[%s9578_s14 + $0xb8] sm:$0xf] }
 0x133   : >> { %v892_v14 = vpop.permute.xlu1 %891  ;;  %v890_v15 = vpop.permute.xlu0 %889 }
 0x134   : >> { %902 = vst.msk [vmem:[#allocation2 + $0x18] sm:$0xf] %vm12077_vm1, %v892_v14  ;;  %vm12079_vm1 = vcmask 716448  }
 0x135   : >> { %900 = vst.msk [vmem:[#allocation2 + $0x10] sm:$0xff] %vm12078_vm2, %v890_v15  ;;  %1394 = vrot.lane.b32.xlu1 %v9801_v21, %s12105_s17  ;;  %1392 = vrot.lane.b32.xlu0 %v9804_v22, %s12105_s17  ;;  %vm12082_vm2 = vcmask 753344   ;;  %v7016_v22 = vld [vmem:[%s9578_s14 + $0x7a] sm:$0xf]  ;;  %v7052_v15 = vld [vmem:[%s9578_s14 + $0xa9] sm:$0xff] }
 0x137   : >> { %v914_v23 = vpop.permute.xlu1 %913  ;;  %v912_v35 = vpop.permute.xlu0 %911 }
 0x138   : >> { %925 = vst.msk [vmem:[#allocation2 + $0x8] sm:$0xff] %vm12080_vm3, %v914_v23  ;;  %924 = vst.msk [vmem:[#allocation2] sm:$0xff] %vm12080_vm3, %v912_v35 }
 0x139   : >> { %1398 = vrot.lane.b32.xlu1 %v7012_v16, %s12105_s17  ;;  %1396 = vrot.lane.b32.xlu0 %v9814_v26, %s12105_s17  ;;  %s12110_s17 = smov 64   ;;  %v7051_v16 = vld [vmem:[%s9578_s14 + $0xa1] sm:$0xff] }
 0x13b   : >> { %v918_v18 = vpop.permute.xlu1 %917  ;;  %v916_v21 = vpop.permute.xlu0 %915 }
 0x13c   : >> { %928 = vst.msk [vmem:[#allocation2 + $0x18] sm:$0xf] %vm12079_vm1, %v918_v18  ;;  %vm12081_vm1 = vcmask 749248  }
 0x13d   : >> { %926 = vst.msk [vmem:[#allocation2 + $0x10] sm:$0xff] %vm12080_vm3, %v916_v21  ;;  %1418 = vrot.lane.b32.xlu1 %v9822_v29, %s12106_s22  ;;  %1416 = vrot.lane.b32.xlu0 %v9825_v30, %s12106_s22  ;;  %vm12084_vm3 = vcmask 786144   ;;  %v7020_v30 = vld [vmem:[%s9578_s14 + $0x7b] sm:$0xf]  ;;  %v9015_v21 = vld [vmem:[%s12002_s1 + $0x28] sm:$0xff]  }
 0x13f   : >> { %v940_v48 = vpop.permute.xlu1 %939  ;;  %v938_v49 = vpop.permute.xlu0 %937 }
 0x140   : >> { %951 = vst.msk [vmem:[#allocation2 + $0x8] sm:$0xff] %vm12082_vm2, %v940_v48  ;;  %950 = vst.msk [vmem:[#allocation2] sm:$0xff] %vm12082_vm2, %v938_v49  ;;  %v7053_v48 = vld [vmem:[%s9578_s14 + $0xb1] sm:$0xff] }
 0x141   : >> { %1422 = vrot.lane.b32.xlu1 %v7016_v22, %s12106_s22  ;;  %1420 = vrot.lane.b32.xlu0 %v9835_v34, %s12106_s22  ;;  %s12111_s22 = smov 68   ;;  %v7054_v22 = vld [vmem:[%s9578_s14 + $0xb9] sm:$0xf] }
 0x143   : >> { %v944_v26 = vpop.permute.xlu1 %943  ;;  %v942_v29 = vpop.permute.xlu0 %941 }
 0x144   : >> { %954 = vst.msk [vmem:[#allocation2 + $0x18] sm:$0xf] %vm12081_vm1, %v944_v26  ;;  %vm12083_vm1 = vcmask 782048  }
 0x145   : >> { %952 = vst.msk [vmem:[#allocation2 + $0x10] sm:$0xff] %vm12082_vm2, %v942_v29  ;;  %1442 = vrot.lane.b32.xlu1 %v9843_v39, %s12107_s23  ;;  %1440 = vrot.lane.b32.xlu0 %v9846_v43, %s12107_s23  ;;  %vm1001_vm2 = vcmask 818944   ;;  %v7024_v43 = vld [vmem:[%s9578_s14 + $0x7c] sm:$0xf]  ;;  %v9016_v29 = vld [vmem:[%s12002_s1 + $0x20] sm:$0xff]  }
 0x147   : >> { %v966_v50 = vpop.permute.xlu1 %965  ;;  %v964_v37 = vpop.permute.xlu0 %963 }
 0x148   : >> { %977 = vst.msk [vmem:[#allocation2 + $0x8] sm:$0xff] %vm12084_vm3, %v966_v50  ;;  %976 = vst.msk [vmem:[#allocation2] sm:$0xff] %vm12084_vm3, %v964_v37  ;;  %v7055_v50 = vld [vmem:[%s9578_s14 + $0xa2] sm:$0xff] }
 0x149   : >> { %1446 = vrot.lane.b32.xlu1 %v7020_v30, %s12107_s23  ;;  %1444 = vrot.lane.b32.xlu0 %v9856_v59, %s12107_s23  ;;  %s12112_s23 = smov 72   ;;  %v7056_v30 = vld [vmem:[%s9578_s14 + $0xaa] sm:$0xff] }
 0x14b   : >> { %v970_v34 = vpop.permute.xlu1 %969  ;;  %v968_v39 = vpop.permute.xlu0 %967 }
 0x14c   : >> { %980 = vst.msk [vmem:[#allocation2 + $0x18] sm:$0xf] %vm12083_vm1, %v970_v34  ;;  %vm1005_vm1 = vcmask 814848  }
 0x14d   : >> { %978 = vst.msk [vmem:[#allocation2 + $0x10] sm:$0xff] %vm12084_vm3, %v968_v39  ;;  %1466 = vrot.lane.b32.xlu1 %v9864_v13, %s12108_s29  ;;  %1464 = vrot.lane.b32.xlu0 %v9867_v17, %s12108_s29  ;;  %v6966_v17 = vld [vmem:[%s9578_s14 + $0x28] sm:$0xff]  ;;  %vm1072_vm3 = vcmask 818176   ;;  %v9017_v39 = vld [vmem:[%s12002_s1 + $0x18] sm:$0xff]  }
 0x14f   : >> { %v992_v38 = vpop.permute.xlu1 %991  ;;  %v990_v59 = vpop.permute.xlu0 %989 }
 0x150   : >> { %1003 = vst.msk [vmem:[#allocation2 + $0x8] sm:$0xff] %vm1001_vm2, %v992_v38  ;;  %1002 = vst.msk [vmem:[#allocation2] sm:$0xff] %vm1001_vm2, %v990_v59  ;;  %v7057_v38 = vld [vmem:[%s9578_s14 + $0xb2] sm:$0xff] }
 0x151   : >> { %1470 = vrot.lane.b32.xlu1 %v7024_v43, %s12108_s29  ;;  %1468 = vrot.lane.b32.xlu0 %v9877_v24, %s12108_s29  ;;  %s12113_s29 = smov 76   ;;  %v7058_v43 = vld [vmem:[%s9578_s14 + $0xba] sm:$0xf] }
 0x153   : >> { %v996_v13 = vpop.permute.xlu1 %995  ;;  %v994_v52 = vpop.permute.xlu0 %993 }
 0x154   : >> { %1006 = vst.msk [vmem:[#allocation2 + $0x18] sm:$0xf] %vm1005_vm1, %v996_v13 }
 0x155   : >> { %1004 = vst.msk [vmem:[#allocation2 + $0x10] sm:$0xff] %vm1001_vm2, %v994_v52  ;;  %1490 = vrot.lane.b32.xlu1 %v9885_v28, %s12109_s16  ;;  %1488 = vrot.lane.b32.xlu0 %v9888_v31, %s12109_s16  ;;  %v6967_v28 = vld [vmem:[%s9578_s14 + $0x30] sm:$0xff] }
 0x156   : >> { %v9018_v52 = vld [vmem:[%s12002_s1 + $0x10] sm:$0xff]  }
 0x157   : >> { %v1155_v7 = vpop.permute.xlu1 %1154  ;;  %v1008_v24 = vld [vmem:[#allocation2 + $0x8] sm:$0xff]  ;;  %v1153_v25 = vpop.permute.xlu0 %1152  ;;  %v1007_v56 = vld [vmem:[#allocation2] sm:$0xff] }
 0x158   : >> { %1141 = vst.msk [vmem:[#allocation2 + $0x8] sm:$0xff] %vm365_vm4, %v6966_v17  ;;  %1140 = vst.msk [vmem:[#allocation2] sm:$0xff] %vm365_vm4, %v6965_v53  ;;  %v1011_v57 = vpack.c.bf16 %v1008_v24, %v1007_v56  ;;  %v7060_v17 = vld [vmem:[%s9578_s14 + $0xab] sm:$0xff]  ;;  %v7059_v53 = vld [vmem:[%s9578_s14 + $0xa3] sm:$0xff] }
 0x159   : >> { %1165 = vst.msk [vmem:[#allocation2 + $0x8] sm:$0xff] %vm391_vm6, %v1155_v7  ;;  %1164 = vst.msk [vmem:[#allocation2] sm:$0xff] %vm391_vm6, %v1153_v25  ;;  %1494 = vrot.lane.b32.xlu1 %v7028_v54, %s12109_s16  ;;  %1492 = vrot.lane.b32.xlu0 %v9898_v36, %s12109_s16  ;;  %v7032_v36 = vld [vmem:[%s9578_s14 + $0x99] sm:$0xf]  ;;  %s12114_s16 = smov 80   ;;  %v9019_v24 = vld [vmem:[%s12002_s1 + $0x8] sm:$0xff]  }
 0x15a   : >> { %8325 = vmatprep.mubr.msk.bf16.mxu0 %vm1072_vm3, %v1011_v57  ;;  %v9020_v25 = vld [vmem:[%s12002_s1] sm:$0xff]   ;;  %v7062_v56 = vld [vmem:[%s9578_s14 + $0xbb] sm:$0xf]  ;;  %v7061_v57 = vld [vmem:[%s9578_s14 + $0xb3] sm:$0xff] }
 0x15b   : >> { %v1010_v31 = vld [vmem:[#allocation2 + $0x18] sm:$0xf]  ;;  %v1159_v40 = vpop.permute.xlu1 %1158  ;;  %v1157_v41 = vpop.permute.xlu0 %1156 }
 0x15c   : >> { %v1009_v60 = vld [vmem:[#allocation2 + $0x10] sm:$0xff]  ;;  %1143 = vst.msk [vmem:[#allocation2 + $0x18] sm:$0xf] %vm369_vm5, %v6968_v58 }
 0x15d   : >> { %1142 = vst.msk [vmem:[#allocation2 + $0x10] sm:$0xff] %vm365_vm4, %v6967_v28  ;;  %v1012_v61 = vpack.c.bf16 %v1010_v31, %v1009_v60  ;;  %1514 = vrot.lane.b32.xlu1 %v9909_v63, %s12110_s17  ;;  %1512 = vrot.lane.b32.xlu0 %v9912_v4, %s12110_s17  ;;  %v7036_v4 = vld [vmem:[%s9578_s14 + $0x9a] sm:$0xf]  ;;  %vm12115_vm4 = vcmask 1041408   ;;  %v7064_v31 = vld [vmem:[%s9578_s14 + $0xac] sm:$0xff] }
 0x15e   : >> { %1167 = vst.msk [vmem:[#allocation2 + $0x18] sm:$0xf] %vm395_vm7, %v1159_v40  ;;  %vm12116_vm5 = vmmov %vm12115_vm4  ;;  %vm12119_vm7 = vcmask 261344   ;;  %v7063_v40 = vld [vmem:[%s9578_s14 + $0xa4] sm:$0xff] }
 0x15f   : >> { %1166 = vst.msk [vmem:[#allocation2 + $0x10] sm:$0xff] %vm391_vm6, %v1157_v41  ;;  %8326 = vmatmul.mubr.msk.bf16.vlgmr.msra.gmra.mxu0 %vm1072_vm3, %v1012_v61  ;;  %v1179_v62 = vpop.permute.xlu1 %1178  ;;  %v1177_v42 = vpop.permute.xlu0 %1176  ;;  %vm12117_vm6 = vcmask 224448   ;;  %v7066_v61 = vld [vmem:[%s9578_s14 + $0xbc] sm:$0xf] }
 0x160   : >> { %1189 = vst.msk [vmem:[#allocation2 + $0x8] sm:$0xff] %vm417_vm8, %v1179_v62  ;;  %1188 = vst.msk [vmem:[#allocation2] sm:$0xff] %vm417_vm8, %v1177_v42 }
 0x161   : >> { %1518 = vrot.lane.b32.xlu1 %v7032_v36, %s12110_s17  ;;  %1516 = vrot.lane.b32.xlu0 %v9927_v32, %s12110_s17  ;;  %v7065_v36 = vld [vmem:[%s9578_s14 + $0xb4] sm:$0xff] }
 0x163   : >> { %v1183_v10 = vpop.permute.xlu1 %1182  ;;  %v1181_v63 = vpop.permute.xlu0 %1180 }
 0x164   : >> { %1191 = vst.msk [vmem:[#allocation2 + $0x18] sm:$0xf] %vm421_vm9, %v1183_v10  ;;  %vm12121_vm9 = vcmask 257248  }
 0x165   : >> { %1190 = vst.msk [vmem:[#allocation2 + $0x10] sm:$0xff] %vm417_vm8, %v1181_v63  ;;  %1538 = vrot.lane.b32.xlu1 %v9938_v51, %s12111_s22  ;;  %1536 = vrot.lane.b32.xlu0 %v9941_v55, %s12111_s22  ;;  %v7040_v51 = vld [vmem:[%s9578_s14 + $0x9b] sm:$0xf]  ;;  %vm12120_vm8 = vmmov %vm12119_vm7 }
 0x167   : >> { %v1203_v0 = vpop.permute.xlu1 %1202  ;;  %v1201_v1 = vpop.permute.xlu0 %1200 }
 0x168   : >> { %1213 = vst.msk [vmem:[#allocation2 + $0x8] sm:$0xff] %vm443_vm10, %v1203_v0  ;;  %1212 = vst.msk [vmem:[#allocation2] sm:$0xff] %vm443_vm10, %v1201_v1 }
 0x169   : >> { %1542 = vrot.lane.b32.xlu1 %v7036_v4, %s12111_s22  ;;  %1540 = vrot.lane.b32.xlu0 %v9954_v27, %s12111_s22 }
 0x16b   : >> { %v1207_v32 = vpop.permute.xlu1 %1206  ;;  %v1205_v3 = vpop.permute.xlu0 %1204 }
 0x16c   : >> { %1215 = vst.msk [vmem:[#allocation2 + $0x18] sm:$0xf] %vm447_vm11, %v1207_v32  ;;  %vm12123_vm11 = vcmask 294144  }
 0x16d   : >> { %1214 = vst.msk [vmem:[#allocation2 + $0x10] sm:$0xff] %vm443_vm10, %v1205_v3  ;;  %1562 = vrot.lane.b32.xlu1 %v9965_v19, %s12112_s23  ;;  %1560 = vrot.lane.b32.xlu0 %v9968_v20, %s12112_s23  ;;  %v7044_v19 = vld [vmem:[%s9578_s14 + $0x9c] sm:$0xf]  ;;  %vm12122_vm10 = vmmov %vm12119_vm7 }
 0x16f   : >> { %v1227_v55 = vpop.permute.xlu1 %1226  ;;  %v1225_v11 = vpop.permute.xlu0 %1224 }
 0x170   : >> { %1237 = vst.msk [vmem:[#allocation2 + $0x8] sm:$0xff] %vm469_vm12, %v1227_v55  ;;  %1236 = vst.msk [vmem:[#allocation2] sm:$0xff] %vm469_vm12, %v1225_v11 }
 0x171   : >> { %1566 = vrot.lane.b32.xlu1 %v7040_v51, %s12112_s23  ;;  %1564 = vrot.lane.b32.xlu0 %v9981_v47, %s12112_s23  ;;  %v7048_v47 = vld [vmem:[%s9578_s14 + $0xa8] sm:$0xff] }
 0x173   : >> { %v1231_v27 = vpop.permute.xlu1 %1230  ;;  %v1229_v44 = vpop.permute.xlu0 %1228 }
 0x174   : >> { %1239 = vst.msk [vmem:[#allocation2 + $0x18] sm:$0xf] %vm473_vm13, %v1231_v27  ;;  %vm12125_vm13 = vcmask 290048  }
 0x175   : >> { %1238 = vst.msk [vmem:[#allocation2 + $0x10] sm:$0xff] %vm469_vm12, %v1229_v44  ;;  %1586 = vrot.lane.b32.xlu1 %v9992_v2, %s12113_s29  ;;  %1584 = vrot.lane.b32.xlu0 %v9995_v12, %s12113_s29  ;;  %vm12124_vm12 = vmmov %vm12123_vm11 }
 0x177   : >> { %v1251_v20 = vpop.permute.xlu1 %1250  ;;  %v1249_v5 = vpop.permute.xlu0 %1248 }
 0x178   : >> { %1261 = vst.msk [vmem:[#allocation2 + $0x8] sm:$0xff] %vm498_vm14, %v1251_v20  ;;  %1260 = vst.msk [vmem:[#allocation2] sm:$0xff] %vm498_vm14, %v1249_v5 }
 0x179   : >> { %1590 = vrot.lane.b32.xlu1 %v7044_v19, %s12113_s29  ;;  %1588 = vrot.lane.b32.xlu0 %v10005_v33, %s12113_s29  ;;  %v9014_v33 = vld [vmem:[%s12002_s1 + $0x30] ss:$0 sps:$4 sm:$0x33]  }
 0x17a   : >> { %8920 = vmatprep.subr.msk.bf16.mxu1 %vm12115_vm4, %v9014_v33  ;;  %v1795_v23 = vsel %vm12116_vm5, %v9014_v33, 0  ;;  %vm12129_vm4 = vcmask 322848  }
 0x17b   : >> { %v1255_v2 = vpop.permute.xlu1 %1254  ;;  %v1253_v12 = vpop.permute.xlu0 %1252  ;;  %8330 = vmatpush3.bf16.msra.mxu1 %v1795_v23 }
 0x17c   : >> { %1263 = vst.msk [vmem:[#allocation2 + $0x18] sm:$0xf] %vm502_vm15, %v1255_v2  ;;  %8331 = vmatprep.subr.bf16.mxu1 %v9015_v21  ;;  %vm12127_vm15 = vcmask 326944  }
 0x17d   : >> { %1262 = vst.msk [vmem:[#allocation2 + $0x10] sm:$0xff] %vm498_vm14, %v1253_v12  ;;  %1613 = vrot.lane.b32.xlu1 %v7048_v47, %s12114_s16  ;;  %1611 = vrot.lane.b32.xlu0 %v7047_v6, %s12114_s16  ;;  %vm12126_vm14 = vmmov %vm12123_vm11 }
 0x17f   : >> { %v1275_v46 = vpop.permute.xlu1 %1274  ;;  %v1273_v14 = vpop.permute.xlu0 %1272  ;;  %8332 = vmatpush3.bf16.msra.mxu1 %v9015_v21 }
 0x180   : >> { %1285 = vst.msk [vmem:[#allocation2 + $0x8] sm:$0xff] %vm524_vm0, %v1275_v46  ;;  %1284 = vst.msk [vmem:[#allocation2] sm:$0xff] %vm524_vm0, %v1273_v14  ;;  %8333 = vmatprep.subr.bf16.mxu1 %v9016_v29 }
 0x181   : >> { %1617 = vrot.lane.b32.xlu1 %v7050_v9, %s12114_s16  ;;  %1615 = vrot.lane.b32.xlu0 %v7049_v45, %s12114_s16  ;;  %s12118_s16 = smov 84  }
 0x183   : >> { %v1279_v35 = vpop.permute.xlu1 %1278  ;;  %v1277_v18 = vpop.permute.xlu0 %1276  ;;  %8334 = vmatpush3.bf16.msra.mxu1 %v9016_v29 }
 0x184   : >> { %1287 = vst.msk [vmem:[#allocation2 + $0x18] sm:$0xf] %vm12117_vm6, %v1279_v35  ;;  %8335 = vmatprep.subr.bf16.mxu1 %v9017_v39  ;;  %vm12131_vm6 = vcmask 359744  }
 0x185   : >> { %1286 = vst.msk [vmem:[#allocation2 + $0x10] sm:$0xff] %vm524_vm0, %v1277_v18  ;;  %1637 = vrot.lane.b32.xlu1 %v7052_v15, %s12118_s16  ;;  %1635 = vrot.lane.b32.xlu0 %v7051_v16, %s12118_s16  ;;  %vm12128_vm0 = vmmov %vm12127_vm15 }
 0x186   : >> { %vm12130_vm5 = vmmov %vm12128_vm0 }
 0x187   : >> { %v1299_v49 = vpop.permute.xlu1 %1298  ;;  %v1297_v26 = vpop.permute.xlu0 %1296  ;;  %8336 = vmatpush3.bf16.msra.mxu1 %v9017_v39 }
 0x188   : >> { %1309 = vst.msk [vmem:[#allocation2 + $0x8] sm:$0xff] %vm12119_vm7, %v1299_v49  ;;  %8337 = vmatprep.subr.bf16.mxu1 %v9018_v52  ;;  %vm12132_vm7 = vmmov %vm12131_vm6 }
 0x189   : >> { %1308 = vst.msk [vmem:[#allocation2] sm:$0xff] %vm12120_vm8, %v1297_v26  ;;  %1641 = vrot.lane.b32.xlu1 %v7054_v22, %s12118_s16  ;;  %1639 = vrot.lane.b32.xlu0 %v7053_v48, %s12118_s16  ;;  %vm12133_vm8 = vcmask 355648  }
 0x18b   : >> { %v1303_v37 = vpop.permute.xlu1 %1302  ;;  %v1301_v34 = vpop.permute.xlu0 %1300  ;;  %8338 = vmatpush3.bf16.msra.mxu1 %v9018_v52 }
 0x18c   : >> { %1311 = vst.msk [vmem:[#allocation2 + $0x18] sm:$0xf] %vm12121_vm9, %v1303_v37  ;;  %8339 = vmatprep.subr.bf16.mxu1 %v9019_v24  ;;  %vm12134_vm9 = vmmov %vm12131_vm6 }
 0x18d   : >> { %1310 = vst.msk [vmem:[#allocation2 + $0x10] sm:$0xff] %vm12122_vm10, %v1301_v34  ;;  %1661 = vrot.lane.b32.xlu1 %v7056_v30, %s9433_s24  ;;  %1659 = vrot.lane.b32.xlu0 %v7055_v50, %s9433_s24  ;;  %vm12135_vm10 = vcmask 392544  }
 0x18f   : >> { %v1323_v59 = vpop.permute.xlu1 %1322  ;;  %v1321_v13 = vpop.permute.xlu0 %1320  ;;  %8340 = vmatpush3.bf16.msra.mxu1 %v9019_v24 }
 0x190   : >> { %1333 = vst.msk [vmem:[#allocation2 + $0x8] sm:$0xff] %vm12123_vm11, %v1323_v59  ;;  %8341 = vmatprep.subr.bf16.mxu1 %v9020_v25  ;;  %vm12136_vm11 = vmmov %vm12135_vm10 }
 0x191   : >> { %1332 = vst.msk [vmem:[#allocation2] sm:$0xff] %vm12124_vm12, %v1321_v13  ;;  %1665 = vrot.lane.b32.xlu1 %v7058_v43, %s9433_s24  ;;  %1663 = vrot.lane.b32.xlu0 %v7057_v38, %s9433_s24  ;;  %vm12137_vm12 = vcmask 388448   ;;  %s7083_s24 = sshll.u32 %s9405_s28, 4  ;;  %s357_s28 = sadd.s32 1, %s9405_s28  }
 0x192   : >> { %p354_p11 = scmp.ge.s32.totalorder %s357_s28, 14  }
 0x193   : >> { %v1327_v54 = vpop.permute.xlu1 %1326  ;;  %v1325_v7 = vpop.permute.xlu0 %1324  ;;  %8342 = vmatpush3.bf16.msra.mxu1 %v9020_v25  ;;  %s10409_s17 = smov (%p354_p11), 0  }
 0x194   : >> { %1335 = vst.msk [vmem:[#allocation2 + $0x18] sm:$0xf] %vm12125_vm13, %v1327_v54  ;;  %vm12138_vm13 = vmmov %vm12135_vm10 }
 0x195   : >> { %1334 = vst.msk [vmem:[#allocation2 + $0x10] sm:$0xff] %vm12126_vm14, %v1325_v7  ;;  %1685 = vrot.lane.b32.xlu1 %v7060_v17, %s9434_s21  ;;  %1683 = vrot.lane.b32.xlu0 %v7059_v53, %s9434_s21  ;;  %vm12139_vm14 = vcmask 425344  }
 0x197   : >> { %v1347_v58 = vpop.permute.xlu1 %1346  ;;  %v1345_v28 = vpop.permute.xlu0 %1344 }
 0x198   : >> { %1357 = vst.msk [vmem:[#allocation2 + $0x8] sm:$0xff] %vm12127_vm15, %v1347_v58  ;;  %vm12140_vm15 = vmmov %vm12139_vm14 }
 0x199   : >> { %1356 = vst.msk [vmem:[#allocation2] sm:$0xff] %vm12128_vm0, %v1345_v28  ;;  %1689 = vrot.lane.b32.xlu1 %v7062_v56, %s9434_s21  ;;  %1687 = vrot.lane.b32.xlu0 %v7061_v57, %s9434_s21  ;;  %vm12141_vm0 = vcmask 421248  }
 0x19b   : >> { %v1351_v41 = vpop.permute.xlu1 %1350  ;;  %v1349_v60 = vpop.permute.xlu0 %1348 }
 0x19c   : >> { %1359 = vst.msk [vmem:[#allocation2 + $0x18] sm:$0xf] %vm12129_vm4, %v1351_v41  ;;  %vm12142_vm4 = vmmov %vm12139_vm14 }
 0x19d   : >> { %1358 = vst.msk [vmem:[#allocation2 + $0x10] sm:$0xff] %vm12130_vm5, %v1349_v60  ;;  %1709 = vrot.lane.b32.xlu1 %v7064_v31, %s9435_s25  ;;  %1707 = vrot.lane.b32.xlu0 %v7063_v40, %s9435_s25  ;;  %vm12143_vm5 = vcmask 458144  }
 0x19f   : >> { %v1371_v62 = vpop.permute.xlu1 %1370  ;;  %v1369_v42 = vpop.permute.xlu0 %1368 }
 0x1a0   : >> { %1381 = vst.msk [vmem:[#allocation2 + $0x8] sm:$0xff] %vm12131_vm6, %v1371_v62  ;;  %vm12144_vm6 = vmmov %vm12143_vm5 }
 0x1a1   : >> { %1380 = vst.msk [vmem:[#allocation2] sm:$0xff] %vm12132_vm7, %v1369_v42  ;;  %1713 = vrot.lane.b32.xlu1 %v7066_v61, %s9435_s25  ;;  %1711 = vrot.lane.b32.xlu0 %v7065_v36, %s9435_s25  ;;  %vm12145_vm7 = vcmask 454048   ;;  %s2024_s25 = scalar_lea.vmem [#allocation4], %s7083_s24 }
 0x1a3   : >> { %v1375_v10 = vpop.permute.xlu1 %1374  ;;  %v1373_v63 = vpop.permute.xlu0 %1372 }
 0x1a4   : >> { %1383 = vst.msk [vmem:[#allocation2 + $0x18] sm:$0xf] %vm12133_vm8, %v1375_v10  ;;  %vm12146_vm8 = vmmov %vm12143_vm5 }
 0x1a5   : >> { %1382 = vst.msk [vmem:[#allocation2 + $0x10] sm:$0xff] %vm12134_vm9, %v1373_v63  ;;  %vm12147_vm9 = vcmask 490944   ;;  %v12187_v63 = vld [vmem:[#allocation11_spill] sm:$0xff] }
 0x1a7   : >> { %v1395_v4 = vpop.permute.xlu1 %1394  ;;  %v1393_v0 = vpop.permute.xlu0 %1392 }
 0x1a8   : >> { %1405 = vst.msk [vmem:[#allocation2 + $0x8] sm:$0xff] %vm12135_vm10, %v1395_v4  ;;  %vm12148_vm10 = vmmov %vm12147_vm9 }
 0x1a9   : >> { %1404 = vst.msk [vmem:[#allocation2] sm:$0xff] %vm12136_vm11, %v1393_v0  ;;  %vm12149_vm11 = vcmask 486848  }
 0x1ab   : >> { %v1399_v1 = vpop.permute.xlu1 %1398  ;;  %v1397_v32 = vpop.permute.xlu0 %1396 }
 0x1ac   : >> { %1407 = vst.msk [vmem:[#allocation2 + $0x18] sm:$0xf] %vm12137_vm12, %v1399_v1  ;;  %vm12150_vm12 = vmmov %vm12147_vm9 }
 0x1ad   : >> { %1406 = vst.msk [vmem:[#allocation2 + $0x10] sm:$0xff] %vm12138_vm13, %v1397_v32  ;;  %vm12151_vm13 = vcmask 523744  }
 0x1af   : >> { %v1419_v3 = vpop.permute.xlu1 %1418  ;;  %v1417_v51 = vpop.permute.xlu0 %1416 }
 0x1b0   : >> { %1429 = vst.msk [vmem:[#allocation2 + $0x8] sm:$0xff] %vm12139_vm14, %v1419_v3  ;;  %vm12152_vm14 = vmmov %vm12151_vm13  ;;  %v6955_v3 = vld [vmem:[%s12003_s2] ss:$0 sm:$0xff] }
 0x1b1   : >> { %1428 = vst.msk [vmem:[#allocation2] sm:$0xff] %vm12140_vm15, %v1417_v51  ;;  %vm12153_vm15 = vcmask 519648  }
 0x1b3   : >> { %v1423_v55 = vpop.permute.xlu1 %1422  ;;  %v1421_v11 = vpop.permute.xlu0 %1420 }
 0x1b4   : >> { %1431 = vst.msk [vmem:[#allocation2 + $0x18] sm:$0xf] %vm12141_vm0, %v1423_v55  ;;  %vm12154_vm0 = vmmov %vm12151_vm13 }
 0x1b5   : >> { %1430 = vst.msk [vmem:[#allocation2 + $0x10] sm:$0xff] %vm12142_vm4, %v1421_v11  ;;  %vm12155_vm4 = vcmask 556544  }
 0x1b7   : >> { %v1443_v27 = vpop.permute.xlu1 %1442  ;;  %v1441_v44 = vpop.permute.xlu0 %1440 }
 0x1b8   : >> { %1453 = vst.msk [vmem:[#allocation2 + $0x8] sm:$0xff] %vm12143_vm5, %v1443_v27  ;;  %vm12156_vm5 = vmmov %vm12155_vm4 }
 0x1b9   : >> { %1452 = vst.msk [vmem:[#allocation2] sm:$0xff] %vm12144_vm6, %v1441_v44  ;;  %vm12157_vm6 = vcmask 552448  }
 0x1bb   : >> { %v1447_v19 = vpop.permute.xlu1 %1446  ;;  %v1445_v20 = vpop.permute.xlu0 %1444 }
 0x1bc   : >> { %1455 = vst.msk [vmem:[#allocation2 + $0x18] sm:$0xf] %vm12145_vm7, %v1447_v19  ;;  %vm12158_vm7 = vmmov %vm12155_vm4 }
 0x1bd   : >> { %1454 = vst.msk [vmem:[#allocation2 + $0x10] sm:$0xff] %vm12146_vm8, %v1445_v20  ;;  %vm12159_vm8 = vcmask 589344  }
 0x1bf   : >> { %v1467_v5 = vpop.permute.xlu1 %1466  ;;  %v1465_v47 = vpop.permute.xlu0 %1464 }
 0x1c0   : >> { %1477 = vst.msk [vmem:[#allocation2 + $0x8] sm:$0xff] %vm12147_vm9, %v1467_v5  ;;  %vm12160_vm9 = vmmov %vm12159_vm8 }
 0x1c1   : >> { %1476 = vst.msk [vmem:[#allocation2] sm:$0xff] %vm12148_vm10, %v1465_v47  ;;  %vm12161_vm10 = vcmask 585248  }
 0x1c3   : >> { %v1471_v6 = vpop.permute.xlu1 %1470  ;;  %v1469_v2 = vpop.permute.xlu0 %1468 }
 0x1c4   : >> { %1479 = vst.msk [vmem:[#allocation2 + $0x18] sm:$0xf] %vm12149_vm11, %v1471_v6  ;;  %vm12162_vm11 = vmmov %vm12159_vm8 }
 0x1c5   : >> { %1478 = vst.msk [vmem:[#allocation2 + $0x10] sm:$0xff] %vm12150_vm12, %v1469_v2  ;;  %vm12163_vm12 = vcmask 622144  }
 0x1c7   : >> { %v1491_v12 = vpop.permute.xlu1 %1490  ;;  %v1489_v9 = vpop.permute.xlu0 %1488 }
 0x1c8   : >> { %1501 = vst.msk [vmem:[#allocation2 + $0x8] sm:$0xff] %vm12151_vm13, %v1491_v12  ;;  %vm12164_vm13 = vmmov %vm12163_vm12 }
 0x1c9   : >> { %1500 = vst.msk [vmem:[#allocation2] sm:$0xff] %vm12152_vm14, %v1489_v9  ;;  %vm12165_vm14 = vcmask 618048  }
 0x1cb   : >> { %v1495_v45 = vpop.permute.xlu1 %1494  ;;  %v1493_v46 = vpop.permute.xlu0 %1492 }
 0x1cc   : >> { %1503 = vst.msk [vmem:[#allocation2 + $0x18] sm:$0xf] %vm12153_vm15, %v1495_v45  ;;  %vm12166_vm15 = vmmov %vm12163_vm12 }
 0x1cd   : >> { %1502 = vst.msk [vmem:[#allocation2 + $0x10] sm:$0xff] %vm12154_vm0, %v1493_v46  ;;  %vm12167_vm0 = vcmask 654944  }
 0x1cf   : >> { %v1515_v14 = vpop.permute.xlu1 %1514  ;;  %v1513_v33 = vpop.permute.xlu0 %1512 }
 0x1d0   : >> { %1525 = vst.msk [vmem:[#allocation2 + $0x8] sm:$0xff] %vm12155_vm4, %v1515_v14  ;;  %vm12168_vm4 = vmmov %vm12167_vm0 }
 0x1d1   : >> { %1524 = vst.msk [vmem:[#allocation2] sm:$0xff] %vm12156_vm5, %v1513_v33  ;;  %vm12169_vm5 = vcmask 650848  }
 0x1d3   : >> { %v1519_v15 = vpop.permute.xlu1 %1518  ;;  %v1517_v16 = vpop.permute.xlu0 %1516 }
 0x1d4   : >> { %1527 = vst.msk [vmem:[#allocation2 + $0x18] sm:$0xf] %vm12157_vm6, %v1519_v15  ;;  %vm12170_vm6 = vmmov %vm12167_vm0 }
 0x1d5   : >> { %1526 = vst.msk [vmem:[#allocation2 + $0x10] sm:$0xff] %vm12158_vm7, %v1517_v16  ;;  %vm12171_vm7 = vcmask 687744  }
 0x1d7   : >> { %v1539_v23 = vpop.permute.xlu1 %1538  ;;  %v1537_v35 = vpop.permute.xlu0 %1536 }
 0x1d8   : >> { %1549 = vst.msk [vmem:[#allocation2 + $0x8] sm:$0xff] %vm12159_vm8, %v1539_v23  ;;  %vm12172_vm8 = vmmov %vm12171_vm7 }
 0x1d9   : >> { %1548 = vst.msk [vmem:[#allocation2] sm:$0xff] %vm12160_vm9, %v1537_v35  ;;  %vm12173_vm9 = vcmask 683648  }
 0x1db   : >> { %v1543_v18 = vpop.permute.xlu1 %1542  ;;  %v1541_v21 = vpop.permute.xlu0 %1540 }
 0x1dc   : >> { %1551 = vst.msk [vmem:[#allocation2 + $0x18] sm:$0xf] %vm12161_vm10, %v1543_v18  ;;  %vm12174_vm10 = vmmov %vm12171_vm7 }
 0x1dd   : >> { %1550 = vst.msk [vmem:[#allocation2 + $0x10] sm:$0xff] %vm12162_vm11, %v1541_v21  ;;  %vm12175_vm11 = vcmask 720544  }
 0x1df   : >> { %v1563_v22 = vpop.permute.xlu1 %1562  ;;  %v1561_v48 = vpop.permute.xlu0 %1560 }
 0x1e0   : >> { %1573 = vst.msk [vmem:[#allocation2 + $0x8] sm:$0xff] %vm12163_vm12, %v1563_v22  ;;  %vm12176_vm12 = vmmov %vm12175_vm11 }
 0x1e1   : >> { %1572 = vst.msk [vmem:[#allocation2] sm:$0xff] %vm12164_vm13, %v1561_v48  ;;  %vm12177_vm13 = vcmask 716448   ;;  %v12188_v48 = vld [vmem:[#allocation10_spill] sm:$0xff] }
 0x1e3   : >> { %v1567_v49 = vpop.permute.xlu1 %1566  ;;  %v1565_v26 = vpop.permute.xlu0 %1564 }
 0x1e4   : >> { %1575 = vst.msk [vmem:[#allocation2 + $0x18] sm:$0xf] %vm12165_vm14, %v1567_v49  ;;  %vm12178_vm14 = vmmov %vm12175_vm11  ;;  %v12189_v49 = vld [vmem:[#allocation12_spill] sm:$0xff] }
 0x1e5   : >> { %1574 = vst.msk [vmem:[#allocation2 + $0x10] sm:$0xff] %vm12166_vm15, %v1565_v26  ;;  %vm12179_vm15 = vcmask 753344  }
 0x1e7   : >> { %v1587_v29 = vpop.permute.xlu1 %1586  ;;  %v1585_v30 = vpop.permute.xlu0 %1584 }
 0x1e8   : >> { %1597 = vst.msk [vmem:[#allocation2 + $0x8] sm:$0xff] %vm12167_vm0, %v1587_v29  ;;  %vm12180_vm0 = vmmov %vm12179_vm15 }
 0x1e9   : >> { %1596 = vst.msk [vmem:[#allocation2] sm:$0xff] %vm12168_vm4, %v1585_v30  ;;  %vm12181_vm4 = vcmask 749248  }
 0x1eb   : >> { %v1591_v50 = vpop.permute.xlu1 %1590  ;;  %v1589_v37 = vpop.permute.xlu0 %1588 }
 0x1ec   : >> { %1599 = vst.msk [vmem:[#allocation2 + $0x18] sm:$0xf] %vm12169_vm5, %v1591_v50  ;;  %vm12182_vm5 = vmmov %vm12180_vm0 }
 0x1ed   : >> { %1598 = vst.msk [vmem:[#allocation2 + $0x10] sm:$0xff] %vm12170_vm6, %v1589_v37  ;;  %vm12183_vm6 = vcmask 786144  }
 0x1ef   : >> { %v1614_v34 = vpop.permute.xlu1 %1613  ;;  %v1612_v39 = vpop.permute.xlu0 %1611 }
 0x1f0   : >> { %1624 = vst.msk [vmem:[#allocation2 + $0x8] sm:$0xff] %vm12171_vm7, %v1614_v34  ;;  %vm12184_vm7 = vmmov %vm12183_vm6 }
 0x1f1   : >> { %1623 = vst.msk [vmem:[#allocation2] sm:$0xff] %vm12172_vm8, %v1612_v39  ;;  %vm12185_vm8 = vcmask 782048  }
 0x1f3   : >> { %v1618_v43 = vpop.permute.xlu1 %1617  ;;  %v1616_v38 = vpop.permute.xlu0 %1615 }
 0x1f4   : >> { %1626 = vst.msk [vmem:[#allocation2 + $0x18] sm:$0xf] %vm12173_vm9, %v1618_v43  ;;  %vm12186_vm9 = vmmov %vm12183_vm6 }
 0x1f5   : >> { %1625 = vst.msk [vmem:[#allocation2 + $0x10] sm:$0xff] %vm12174_vm10, %v1616_v38  ;;  %vm1854_vm10 = vcmask 228352  }
 0x1f6   : >> { %8355 = vmatprep.mubr.msk.f32.mxu0 %vm1854_vm10, %v9553_v8 }
 0x1f7   : >> { %v1638_v59 = vpop.permute.xlu1 %1637  ;;  %v1636_v13 = vpop.permute.xlu0 %1635 }
 0x1f8   : >> { %1648 = vst.msk [vmem:[#allocation2 + $0x8] sm:$0xff] %vm12175_vm11, %v1638_v59 }
 0x1f9   : >> { %1647 = vst.msk [vmem:[#allocation2] sm:$0xff] %vm12176_vm12, %v1636_v13 }
 0x1fb   : >> { %v1642_v52 = vpop.permute.xlu1 %1641  ;;  %v1640_v17 = vpop.permute.xlu0 %1639 }
 0x1fc   : >> { %1650 = vst.msk [vmem:[#allocation2 + $0x18] sm:$0xf] %vm12177_vm13, %v1642_v52 }
 0x1fd   : >> { %1649 = vst.msk [vmem:[#allocation2 + $0x10] sm:$0xff] %vm12178_vm14, %v1640_v17 }
 0x1ff   : >> { %v1662_v53 = vpop.permute.xlu1 %1661  ;;  %v1660_v54 = vpop.permute.xlu0 %1659 }
 0x200   : >> { %1672 = vst.msk [vmem:[#allocation2 + $0x8] sm:$0xff] %vm12179_vm15, %v1662_v53 }
 0x201   : >> { %1671 = vst.msk [vmem:[#allocation2] sm:$0xff] %vm12180_vm0, %v1660_v54 }
 0x203   : >> { %v1666_v7 = vpop.permute.xlu1 %1665  ;;  %v1664_v24 = vpop.permute.xlu0 %1663 }
 0x204   : >> { %1674 = vst.msk [vmem:[#allocation2 + $0x18] sm:$0xf] %vm12181_vm4, %v1666_v7 }
 0x205   : >> { %1673 = vst.msk [vmem:[#allocation2 + $0x10] sm:$0xff] %vm12182_vm5, %v1664_v24 }
 0x207   : >> { %v1686_v25 = vpop.permute.xlu1 %1685  ;;  %v1684_v56 = vpop.permute.xlu0 %1683 }
 0x208   : >> { %1696 = vst.msk [vmem:[#allocation2 + $0x8] sm:$0xff] %vm12183_vm6, %v1686_v25 }
 0x209   : >> { %1695 = vst.msk [vmem:[#allocation2] sm:$0xff] %vm12184_vm7, %v1684_v56 }
 0x20b   : >> { %v1690_v57 = vpop.permute.xlu1 %1689  ;;  %v1688_v58 = vpop.permute.xlu0 %1687 }
 0x20c   : >> { %1698 = vst.msk [vmem:[#allocation2 + $0x18] sm:$0xf] %vm12185_vm8, %v1690_v57 }
 0x20d   : >> { %1697 = vst.msk [vmem:[#allocation2 + $0x10] sm:$0xff] %vm12186_vm9, %v1688_v58 }
 0x20f   : >> { %v1710_v28 = vpop.permute.xlu1 %1709  ;;  %v1708_v31 = vpop.permute.xlu0 %1707 }
 0x210   : >> { %1720 = vst.msk [vmem:[#allocation2 + $0x8] sm:$0xff] %vm1001_vm2, %v1710_v28  ;;  %1719 = vst.msk [vmem:[#allocation2] sm:$0xff] %vm1001_vm2, %v1708_v31 }
 0x213   : >> { %v1714_v40 = vpop.permute.xlu1 %1713  ;;  %v1712_v41 = vpop.permute.xlu0 %1711 }
 0x214   : >> { %1722 = vst.msk [vmem:[#allocation2 + $0x18] sm:$0xf] %vm1005_vm1, %v1714_v40  ;;  %vm1861_vm1 = vcmask 1043456  }
 0x215   : >> { %1721 = vst.msk [vmem:[#allocation2 + $0x10] sm:$0xff] %vm1001_vm2, %v1712_v41  ;;  %vm2027_vm2 = vcmask 259072  }
 0x217   : >> { %v1723_v60 = vld [vmem:[#allocation2] sm:$0xff]  ;;  %v1724_v61 = vld [vmem:[#allocation2 + $0x8] sm:$0xff] }
 0x218   : >> { %v1727_v36 = vpack.c.bf16 %v1724_v61, %v1723_v60 }
 0x21a   : >> { %8343 = vmatprep.mubr.msk.bf16.mxu1 %vm1072_vm3, %v1727_v36 }
 0x21b   : >> { %v1726_v42 = vld [vmem:[#allocation2 + $0x18] sm:$0xf] }
 0x21c   : >> { %v1725_v62 = vld [vmem:[#allocation2 + $0x10] sm:$0xff] }
 0x21d   : >> { %v1728_v10 = vpack.c.bf16 %v1726_v42, %v1725_v62 }
 0x21f   : >> { %8344 = vmatmul.mubr.msk.bf16.vlgmr.msra.gmra.mxu1 %vm1072_vm3, %v1728_v10  ;;  %v8327_v4 = vpop.f32.mrf.mxu0  ;;  %vm2025_vm3 = vcmask 261120  }
 0x220   : >> { %8366 = vmatprep.mubr.msk.f32.mxu1 %vm1854_vm10, %v12187_v63  ;;  %v1126_v19 = vadd.f32 %v8327_v4, %v6955_v3 }
 0x221   : >> { %v1117_v0 = vpop.f32.mrf.mxu0 }
 0x222   : >> { %v1134_v46 = vmax.f32 %v1126_v19, 0.0  ;;  %v1118_v14 = vadd.f32 %v6955_v3, %v1117_v0 }
 0x223   : >> { %v8328_v1 = vpop.f32.mrf.mxu0 }
 0x224   : >> { %v1129_v51 = vadd.f32 %v8328_v1, %v6955_v3  ;;  %v1132_v18 = vmax.f32 %v1118_v14, 0.0 }
 0x225   : >> { %v1120_v11 = vpop.f32.mrf.mxu0 }
 0x226   : >> { %v1135_v5 = vmax.f32 %v1129_v51, 0.0  ;;  %v1121_v47 = vadd.f32 %v6955_v3, %v1120_v11 }
 0x228   : >> { %v1133_v16 = vmax.f32 %v1121_v47, 0.0 }
 0x2df   : >> { %v8345_v32 = vpop.f32.mrf.mxu1 }
 0x2e0   : >> { %v1840_v27 = vadd.f32 %v8345_v32, %v6955_v3 }
 0x2e1   : >> { %v1831_v55 = vpop.f32.mrf.mxu1 }
 0x2e2   : >> { %v1848_v2 = vmax.f32 %v1840_v27, 0.0  ;;  %v1832_v12 = vadd.f32 %v6955_v3, %v1831_v55 }
 0x2e3   : >> { %v8346_v44 = vpop.f32.mrf.mxu1 }
 0x2e4   : >> { %v1843_v20 = vadd.f32 %v8346_v44, %v6955_v3  ;;  %v1852_v23 = vmax.f32 %v1134_v46, %v1848_v2  ;;  %v1846_v35 = vmax.f32 %v1832_v12, 0.0 }
 0x2e5   : >> { %v1834_v6 = vpop.f32.mrf.mxu1 }
 0x2e6   : >> { %v1849_v9 = vmax.f32 %v1843_v20, 0.0  ;;  %v1835_v45 = vadd.f32 %v6955_v3, %v1834_v6  ;;  %v1850_v22 = vmax.f32 %v1132_v18, %v1846_v35 }
 0x2e8   : >> { %v1853_v33 = vmax.f32 %v1135_v5, %v1849_v9  ;;  %v1847_v15 = vmax.f32 %v1835_v45, 0.0 }
 0x2ea   : >> { %8347 = vmatprep.subr.msk.mxu0 %vm1861_vm1, %v1853_v33  ;;  %8358 = vmatprep.subr.msk.mxu1 %vm1861_vm1, %v1853_v33  ;;  %v1851_v21 = vmax.f32 %v1133_v16, %v1847_v15 }
 0x2eb   : >> { %8348 = vmatpush3.msk.msra.mxu0 %vm1861_vm1, %v1853_v33  ;;  %8359 = vmatpush3.msk.msra.mxu1 %vm1861_vm1, %v1853_v33 }
 0x2ec   : >> { %8349 = vmatprep.subr.mxu0 %v1852_v23  ;;  %8360 = vmatprep.subr.mxu1 %v1852_v23 }
 0x2ed   : >> { %8350 = vmatpush3.msra.mxu0 %v1852_v23  ;;  %8361 = vmatpush3.msra.mxu1 %v1852_v23 }
 0x2ee   : >> { %8351 = vmatprep.subr.mxu0 %v1851_v21  ;;  %8362 = vmatprep.subr.mxu1 %v1851_v21 }
 0x2ef   : >> { %8352 = vmatpush3.msra.mxu0 %v1851_v21  ;;  %8363 = vmatpush3.msra.mxu1 %v1851_v21 }
 0x2f0   : >> { %8353 = vmatprep.subr.mxu0 %v1850_v22  ;;  %8364 = vmatprep.subr.mxu1 %v1850_v22 }
 0x2f1   : >> { %8354 = vmatpush3.msra.mxu0 %v1850_v22  ;;  %8365 = vmatpush3.msra.mxu1 %v1850_v22 }
 0x2f2   : >> { %8356 = vmatmul.mubr.msk.f32.vlgmr.msra.gmra.mxu0 %vm1854_vm10, %v12188_v48  ;;  %8367 = vmatmul.mubr.msk.f32.vlgmr.msra.gmra.mxu1 %vm1854_vm10, %v12189_v49 }
 0x3b2   : >> { %v8357_v26 = vpop.f32.mrf.mxu0  ;;  %v8368_v29 = vpop.f32.mrf.mxu1 }
 0x3b3   : >> { %v2022_v30 = vmax.f32 %v8357_v26, %v8368_v29  ;;  %356 = sbr.rel (!%p354_p11) target bundleno = 34 (0x22), region = 147 }
 0x3b4   : >> { %v1931_v50 = vpop.f32.mrf.mxu0  ;;  %v2012_v37 = vpop.f32.mrf.mxu1 }
 0x3b5   : >> { %2028 = vst.msk [vmem:[%s2024_s25 + $0x8] sm:$0x3f] %vm2027_vm2, %v2022_v30  ;;  %v2021_v34 = vmax.f32 %v1931_v50, %v2012_v37 }
 0x3b7   : >> { %2026 = vst.msk [vmem:[%s2024_s25] sm:$0xff] %vm2025_vm3, %v2021_v34 }
 0x3b8 LB: >> { %v9021_v39 = vld [vmem:[%s12004_s3 + $0xf8] sm:$0xff]   ;;  %s7897_s21 = sshll.u32 %s9409_s17, 5  ;;  %v9023_v38 = vld [vmem:[%s12004_s3 + $0xf0] sm:$0xff]   ;;  %s12089_s22 = smov 32   ;;  %vm2042_vm11 = vcmask 254976   ;;  %v9025_v10 = vld [vmem:[%s12004_s3 + $0xe8] sm:$0xff]   ;;  %s9409_s17 = sphi %s10409_s17, %s2034_s17  }
 0x3b9   : >> { %v9022_v43 = vld [vmem:[%s12004_s3 + $0xb8] sm:$0xff]   ;;  %7955 = vmatprep.subr.bf16.mxu1 %v9021_v39  ;;  %v9024_v59 = vld [vmem:[%s12004_s3 + $0xb0] sm:$0xff]   ;;  %s10427_s25 = scalar_lea.vmem [#allocation4], %s7897_s21  ;;  %s12087_s23 = smov 64   ;;  %v9026_v63 = vld [vmem:[%s12004_s3 + $0xa8] sm:$0xff]   ;;  %vm2054_vm12 = vcmask 523520  }
 0x3ba   : >> { %7956 = vmatpush3.bf16.msra.mxu1 %v9022_v43  ;;  %s12085_s29 = smov 96   ;;  %v9027_v4 = vld [vmem:[%s12004_s3 + $0xe0] sm:$0xff]   ;;  %v9029_v3 = vld [vmem:[%s12004_s3 + $0xd8] sm:$0xff]   ;;  %v9031_v27 = vld [vmem:[%s12004_s3 + $0xd0] sm:$0xff]   ;;  %s12190_s28 = smov 96   ;;  %vm2056_vm13 = vcmask 517376  }
 0x3bb   : >> { %7957 = vmatprep.subr.bf16.mxu1 %v9023_v38  ;;  %v9028_v1 = vld [vmem:[%s12004_s3 + $0xa0] sm:$0xff]   ;;  %v9030_v11 = vld [vmem:[%s12004_s3 + $0x98] sm:$0xff]   ;;  %v9032_v19 = vld [vmem:[%s12004_s3 + $0x90] sm:$0xff]   ;;  %s12191_s0 = smov 32   ;;  %vm2068_vm14 = vcmask 785920   ;;  %vm2070_vm15 = vcmask 779776  }
 0x3bc   : >> { %v9033_v20 = vld [vmem:[%s12004_s3 + $0x78] sm:$0xff]   ;;  %v9035_v6 = vld [vmem:[%s12004_s3 + $0xc8] sm:$0xff]   ;;  %v9037_v14 = vld [vmem:[%s12004_s3 + $0x70] sm:$0xff]   ;;  %vm2082_vm0 = vcmask 1048320   ;;  %vm2084_vm4 = vcmask 1042176   ;;  %vm9440_vm5 = vmmov 0  }
 0x3bd   : >> { %7933 = vmatprep.subr.bf16.mxu0 %v9033_v20  ;;  %v9034_v47 = vld [vmem:[%s12004_s3 + $0x38] sm:$0xff]   ;;  %v9036_v12 = vld [vmem:[%s12004_s3 + $0x88] sm:$0xff]   ;;  %v9038_v23 = vld [vmem:[%s12004_s3 + $0x30] sm:$0xff]   ;;  %vm12193_vm6 = vcmask 1041408   ;;  %vm3745_vm8 = vcmask 80896  }
 0x3be   : >> { %v7106_v13 = vld [vmem:[%s10427_s25 + $0x23] sm:$0xff]  ;;  %v10431_v52 = vld [vmem:[%s10427_s25 + $0x14] sm:$0xff]  ;;  %v7107_v17 = vld [vmem:[%s10427_s25 + $0x2b] sm:$0x3]  ;;  %7958 = vmatpush3.bf16.msra.mxu1 %v9024_v59  ;;  %7934 = vmatpush3.bf16.msra.mxu0 %v9034_v47 }
 0x3bf   : >> { %2180 = vrot.lane.b32.xlu0 %v7106_v13, %s12089_s22  ;;  %2137 = vrot.lane.b32.xlu1 %v10431_v52, %s12089_s22  ;;  %v7097_v53 = vld [vmem:[%s10427_s25 + $0x1c] sm:$0x3]  ;;  %v10441_v54 = vld [vmem:[%s10427_s25 + $0x24] sm:$0xff]  ;;  %v9439_v13 = vmov 0.0   ;;  %vm12194_vm7 = vmmov %vm12193_vm6 }
 0x3c0   : >> { %v7109_v7 = vld [vmem:[%s10427_s25 + $0x2c] sm:$0x3]  ;;  %v10448_v24 = vld [vmem:[%s10427_s25 + $0x20] sm:$0xff]  ;;  %v7101_v25 = vld [vmem:[%s10427_s25 + $0x28] sm:$0x3]  ;;  %7959 = vmatprep.subr.bf16.mxu1 %v9025_v10  ;;  %7935 = vmatprep.subr.bf16.mxu0 %v9037_v14 }
 0x3c1   : >> { %v10455_v56 = vld [vmem:[%s10427_s25 + $0x30] sm:$0xff]  ;;  %v7113_v57 = vld [vmem:[%s10427_s25 + $0x38] sm:$0x3]  ;;  %v10459_v58 = vld [vmem:[%s10427_s25 + $0x22] sm:$0xff] }
 0x3c2   : >> { %v10462_v28 = vld [vmem:[%s10427_s25 + $0x13] sm:$0xff]  ;;  %2174 = vst.msk [vmem:[#allocation3 + $0x18] sm:$0xff] %vm2025_vm3, %v10459_v58  ;;  %v10472_v31 = vld [vmem:[%s10427_s25 + $0x21] sm:$0xff]  ;;  %v7103_v40 = vld [vmem:[%s10427_s25 + $0x29] sm:$0x3]  ;;  %7960 = vmatpush3.bf16.msra.mxu1 %v9026_v63  ;;  %7936 = vmatpush3.bf16.msra.mxu0 %v9038_v23 }
 0x3c3   : >> { %2182 = vrot.lane.b32.xlu0 %v7107_v17, %s12089_s22  ;;  %2139 = vrot.lane.b32.xlu1 %v7097_v53, %s12089_s22  ;;  %2131 = vst.msk [vmem:[#allocation3 + $0x10] sm:$0xff] %vm2025_vm3, %v10462_v28  ;;  %v10476_v41 = vld [vmem:[%s10427_s25 + $0x40] sm:$0xff]  ;;  %v7105_v60 = vld [vmem:[%s10427_s25 + $0x2a] sm:$0x3] }
 0x3c4   : >> { %v7095_v61 = vld [vmem:[%s10427_s25 + $0x1b] sm:$0x3]  ;;  %2260 = vst.msk [vmem:[#allocation3 + $0x28] sm:$0xff] %vm2025_vm3, %v10476_v41  ;;  %v7089_v36 = vld [vmem:[%s10427_s25 + $0x18] sm:$0x3]  ;;  %v10484_v62 = vld [vmem:[%s10427_s25 + $0x10] sm:$0xff]  ;;  %7961 = vmatprep.subr.bf16.mxu1 %v9027_v4 }
 0x3c5   : >> { %2175 = vst.msk [vmem:[#allocation3 + $0x50] sm:$0x3] %vm2042_vm11, %v7105_v60  ;;  %2132 = vst.msk [vmem:[#allocation3 + $0x48] sm:$0x3] %vm2042_vm11, %v7095_v61  ;;  %v10489_v42 = vld [vmem:[%s10427_s25 + $0x31] sm:$0xff]  ;;  %v2044_v32 = vld [vmem:[%s10427_s25 + $0x1] sm:$0xff] }
 0x3c6   : >> { %2217 = vst.msk [vmem:[#allocation3 + $0x20] sm:$0xff] %vm2025_vm3, %v10489_v42  ;;  %v2045_v0 = vld [vmem:[%s10427_s25 + $0x9] sm:$0x3]  ;;  %v7091_v51 = vld [vmem:[%s10427_s25 + $0x19] sm:$0x3]  ;;  %v10518_v55 = vld [vmem:[%s10427_s25 + $0x11] sm:$0xff]  ;;  %7962 = vmatpush3.bf16.msra.mxu1 %v9028_v1 }
 0x3c7   : >> { %2192 = vrot.lane.b32.xlu0 %v10441_v54, %s12087_s23  ;;  %2194 = vrot.lane.b32.xlu1 %v7109_v7, %s12087_s23  ;;  %v2059_v44 = vld [vmem:[%s10427_s25 + $0xa] sm:$0x3]  ;;  %v2058_v5 = vld [vmem:[%s10427_s25 + $0x2] sm:$0xff] }
 0x3c8   : >> { %7963 = vmatprep.subr.bf16.mxu1 %v9029_v3  ;;  %v7093_v2 = vld [vmem:[%s10427_s25 + $0x1a] sm:$0x3]  ;;  %v2087_v9 = vld [vmem:[%s10427_s25 + $0xc] sm:$0x3]  ;;  %v2086_v45 = vld [vmem:[%s10427_s25 + $0x4] sm:$0xff] }
 0x3c9   : >> { %2089 = vst.msk [vmem:[#allocation3 + $0x40] sm:$0x3] %vm2042_vm11, %v2087_v9  ;;  %v10555_v46 = vld [vmem:[%s10427_s25 + $0x12] sm:$0xff]  ;;  %v10562_v33 = vld [vmem:[%s10427_s25 + $0x44] sm:$0xff]  ;;  %v7117_v34 = vld [vmem:[%s10427_s25 + $0x3a] sm:$0x3] }
 0x3ca   : >> { %7964 = vmatpush3.bf16.msra.mxu1 %v9030_v11  ;;  %2088 = vst.msk [vmem:[#allocation3 + $0x8] sm:$0xff] %vm2025_vm3, %v2086_v45  ;;  %v2073_v15 = vld [vmem:[%s10427_s25 + $0xb] sm:$0x3]  ;;  %v2072_v16 = vld [vmem:[%s10427_s25 + $0x3] sm:$0xff]  ;;  %2300 = vst.msk [vmem:[#allocation3 + $0x30] sm:$0xff] %vm2025_vm3, %v10562_v33 }
 0x3cb   : >> { %2152 = vrot.lane.b32.xlu0 %v10448_v24, %s12087_s23  ;;  %2154 = vrot.lane.b32.xlu1 %v7101_v25, %s12087_s23  ;;  %v9039_v35 = vld [vmem:[%s12004_s3 + $0xc0] sm:$0xff]   ;;  %v2039_v21 = vld [vmem:[%s10427_s25 + $0x8] sm:$0x3] }
 0x3cc   : >> { %7965 = vmatprep.subr.bf16.mxu1 %v9031_v27  ;;  %v9040_v18 = vld [vmem:[%s12004_s3 + $0x80] sm:$0xff]   ;;  %2043 = vst.msk [vmem:[#allocation3 + $0x38] sm:$0x3] %vm2042_vm11, %v2039_v21  ;;  %v7127_v48 = vld [vmem:[%s10427_s25 + $0x49] sm:$0x3]  ;;  %v9045_v37 = vld [vmem:[%s12004_s3 + $0x58] sm:$0xff]  }
 0x3cd   : >> { %v2038_v22 = vld [vmem:[%s10427_s25] sm:$0xff]  ;;  %v9041_v26 = vld [vmem:[%s12004_s3 + $0x68] sm:$0xff]   ;;  %v10607_v39 = vld [vmem:[%s10427_s25 + $0x32] sm:$0xff] }
 0x3ce   : >> { %7966 = vmatpush3.bf16.msra.mxu1 %v9032_v19  ;;  %v7126_v49 = vld [vmem:[%s10427_s25 + $0x41] sm:$0xff]  ;;  %2041 = vst.msk [vmem:[#allocation3] sm:$0xff] %vm2025_vm3, %v2038_v22  ;;  %7937 = vmatprep.subr.bf16.mxu0 %v9041_v26  ;;  %v9046_v43 = vld [vmem:[%s12004_s3 + $0x18] sm:$0xff]   ;;  %v7129_v38 = vld [vmem:[%s10427_s25 + $0x4a] sm:$0x3] }
 0x3cf   : >> { %2207 = vrot.lane.b32.xlu0 %v10455_v56, %s12085_s29  ;;  %2209 = vrot.lane.b32.xlu1 %v7113_v57, %s12085_s29  ;;  %v9042_v29 = vld [vmem:[%s12004_s3 + $0x28] sm:$0xff]   ;;  %v9043_v30 = vld [vmem:[%s12004_s3 + $0x60] sm:$0xff]  }
 0x3d0   : >> { %7967 = vmatprep.subr.bf16.mxu1 %v9035_v6  ;;  %7938 = vmatpush3.bf16.msra.mxu0 %v9042_v29  ;;  %v9044_v50 = vld [vmem:[%s12004_s3 + $0x20] sm:$0xff]   ;;  %v9047_v59 = vld [vmem:[%s12004_s3 + $0x50] sm:$0xff]   ;;  %v7125_v7 = vld [vmem:[%s10427_s25 + $0x48] sm:$0x3] }
 0x3d1   : >> { %7939 = vmatprep.subr.bf16.mxu0 %v9043_v30  ;;  %v10621_v17 = vld [vmem:[%s10427_s25 + $0x42] sm:$0xff]  ;;  %v9048_v53 = vld [vmem:[%s12004_s3 + $0x10] sm:$0xff]   ;;  %2261 = vst.msk [vmem:[#allocation3 + $0x60] sm:$0x3] %vm2042_vm11, %v7125_v7  ;;  %v7119_v57 = vld [vmem:[%s10427_s25 + $0x3b] sm:$0x3] }
 0x3d2   : >> { %7968 = vmatpush3.bf16.msra.mxu1 %v9036_v12  ;;  %v9049_v25 = vld [vmem:[%s12004_s3 + $0x48] sm:$0xff]   ;;  %v7118_v60 = vld [vmem:[%s10427_s25 + $0x33] sm:$0xff]  ;;  %v9051_v10 = vld [vmem:[%s12004_s3 + $0x40] sm:$0xff]  }
 0x3d3   : >> { %2164 = vrot.lane.b32.xlu0 %v10472_v31, %s12085_s29  ;;  %2166 = vrot.lane.b32.xlu1 %v7103_v40, %s12085_s29  ;;  %s12192_s29 = smov 64   ;;  %v7115_v40 = vld [vmem:[%s10427_s25 + $0x39] sm:$0x3]  ;;  %v9050_v61 = vld [vmem:[%s12004_s3 + $0x8] sm:$0xff]   ;;  %v10666_v11 = vld [vmem:[#allocation3 + $0x30] sm:$0xff] }
 0x3d4   : >> { %7969 = vmatprep.subr.bf16.mxu1 %v9039_v35  ;;  %7940 = vmatpush3.bf16.msra.mxu0 %v9044_v50  ;;  %2218 = vst.msk [vmem:[#allocation3 + $0x58] sm:$0x3] %vm2042_vm11, %v7115_v40  ;;  %v10648_v63 = vld [vmem:[%s10427_s25 + $0x43] sm:$0xff]  ;;  %v7120_v3 = vld [vmem:[%s10427_s25 + $0x34] sm:$0xff]  ;;  %v7223_v22 = vld [vmem:[%s10427_s25 + $0x4b] sm:$0x3] }
 0x3d5   : >> { %7941 = vmatprep.subr.bf16.mxu0 %v9045_v37  ;;  %v9052_v4 = vld [vmem:[%s12004_s3] sm:$0xff]   ;;  %v7197_v1 = vld [vmem:[%s10427_s25 + $0x28] sm:$0x3]  ;;  %v7236_v27 = vld [vmem:[%s10427_s25 + $0x54] sm:$0xff] }
 0x3d6   : >> { %7970 = vmatpush3.bf16.msra.mxu1 %v9040_v18  ;;  %3144 = vst.msk [vmem:[#allocation3 + $0x30] sm:$0xff] %vm2025_vm3, %v7236_v27  ;;  %v7199_v19 = vld [vmem:[%s10427_s25 + $0x29] sm:$0x3]  ;;  %v7191_v47 = vld [vmem:[%s10427_s25 + $0x1a] sm:$0x3]  ;;  %v7232_v18 = vld [vmem:[%s10427_s25 + $0x52] sm:$0xff] }
 0x3d7   : >> { %2099 = vrot.lane.b32.xlu1 %v7089_v36, %s12089_s22  ;;  %2097 = vrot.lane.b32.xlu0 %v10484_v62, %s12089_s22  ;;  %v7131_v36 = vld [vmem:[%s10427_s25 + $0x4b] sm:$0x3]  ;;  %v7213_v6 = vld [vmem:[%s10427_s25 + $0x3b] sm:$0x3] }
 0x3d8   : >> { %8369 = vmatprep.subr.bf16.mxu1 %v9439_v13  ;;  %7942 = vmatpush3.bf16.msra.mxu0 %v9046_v43  ;;  %v7207_v12 = vld [vmem:[%s10427_s25 + $0x38] sm:$0x3]  ;;  %v7233_v35 = vld [vmem:[%s10427_s25 + $0x5a] sm:$0x3]  ;;  %v7203_v7 = vld [vmem:[%s10427_s25 + $0x2b] sm:$0x3] }
 0x3d9   : >> { %7943 = vmatprep.subr.bf16.mxu0 %v9047_v59  ;;  %v7231_v9 = vld [vmem:[%s10427_s25 + $0x59] sm:$0x3]  ;;  %v7235_v26 = vld [vmem:[%s10427_s25 + $0x5b] sm:$0x3] }
 0x3da   : >> { %v7234_v29 = vld [vmem:[%s10427_s25 + $0x53] sm:$0xff] }
 0x3db   : >> { %2050 = vrot.lane.b32.xlu1 %v2045_v0, %s12089_s22  ;;  %2048 = vrot.lane.b32.xlu0 %v2044_v32, %s12089_s22  ;;  %v9053_v0 = vld [vmem:[%s12004_s3 + $0x178] sm:$0xff]  }
 0x3dc   : >> { %7944 = vmatpush3.bf16.msra.mxu0 %v9048_v53  ;;  %v7121_v32 = vld [vmem:[%s10427_s25 + $0x3c] sm:$0x3]  ;;  %v7211_v37 = vld [vmem:[%s10427_s25 + $0x3a] sm:$0x3] }
 0x3dd   : >> { %7945 = vmatprep.subr.bf16.mxu0 %v9049_v25  ;;  %v7202_v25 = vld [vmem:[%s10427_s25 + $0x23] sm:$0xff] }
 0x3df   : >> { %2111 = vrot.lane.b32.xlu1 %v7091_v51, %s12087_s23  ;;  %2109 = vrot.lane.b32.xlu0 %v10518_v55, %s12087_s23  ;;  %v7133_v51 = vld [vmem:[%s10427_s25 + $0x4c] sm:$0x3] }
 0x3e0   : >> { %7946 = vmatpush3.bf16.msra.mxu0 %v9050_v61  ;;  %2301 = vst.msk [vmem:[#allocation3 + $0x68] sm:$0x3] %vm2042_vm11, %v7133_v51 }
 0x3e1   : >> { %7947 = vmatprep.subr.bf16.mxu0 %v9051_v10 }
 0x3e3   : >> { %2064 = vrot.lane.b32.xlu1 %v2059_v44, %s12087_s23  ;;  %2062 = vrot.lane.b32.xlu0 %v2058_v5, %s12087_s23  ;;  %v7189_v44 = vld [vmem:[%s10427_s25 + $0x19] sm:$0x3] }
 0x3e4   : >> { %7948 = vmatpush3.bf16.msra.mxu0 %v9052_v4  ;;  %v9065_v4 = vld [vmem:[%s12004_s3 + $0x78] sm:$0xff]  }
 0x3e5   : >> { %7977 = vmatprep.subr.bf16.mxu0 %v9053_v0 }
 0x3e7   : >> { %2123 = vrot.lane.b32.xlu1 %v7093_v2, %s12190_s28  ;;  %2121 = vrot.lane.b32.xlu0 %v10555_v46, %s12190_s28  ;;  %v10679_v20 = vld [vmem:[#allocation3 + $0x68] sm:$0x3]  ;;  %v7205_v2 = vld [vmem:[%s10427_s25 + $0x2c] sm:$0x3] }
 0x3e8   : >> { %v2322_v5 = vpack.c.bf16 %v10679_v20, %v10666_v11  ;;  %v9074_v20 = vld [vmem:[%s12004_s3 + $0x28] sm:$0xff]  }
 0x3eb   : >> { %2078 = vrot.lane.b32.xlu1 %v2073_v15, %s12190_s28  ;;  %2076 = vrot.lane.b32.xlu0 %v2072_v16, %s12190_s28 }
 0x3ef   : >> { %2268 = vrot.lane.b32.xlu1 %v7127_v48, %s12191_s0  ;;  %2266 = vrot.lane.b32.xlu0 %v7126_v49, %s12191_s0 }
 0x3f3   : >> { %2225 = vrot.lane.b32.xlu1 %v7117_v34, %s12191_s0  ;;  %2223 = vrot.lane.b32.xlu0 %v10607_v39, %s12191_s0  ;;  %v7225_v34 = vld [vmem:[%s10427_s25 + $0x4c] sm:$0x3] }
 0x3f7   : >> { %2280 = vrot.lane.b32.xlu1 %v7129_v38, %s12192_s29  ;;  %2278 = vrot.lane.b32.xlu0 %v10621_v17, %s12192_s29 }
 0x3fb   : >> { %2237 = vrot.lane.b32.xlu1 %v7119_v57, %s12192_s29  ;;  %2235 = vrot.lane.b32.xlu0 %v7118_v60, %s12192_s29 }
 0x3ff   : >> { %2292 = vrot.lane.b32.xlu1 %v7131_v36, %s12190_s28  ;;  %2290 = vrot.lane.b32.xlu0 %v10648_v63, %s12190_s28  ;;  %v9059_v36 = vld [vmem:[%s12004_s3 + $0x188] sm:$0xff]  }
 0x403   : >> { %2949 = vrot.lane.b32.xlu1 %v7197_v1, %s12191_s0  ;;  %2947 = vrot.lane.b32.xlu0 %v10448_v24, %s12191_s0  ;;  %v7237_v24 = vld [vmem:[%s10427_s25 + $0x5c] sm:$0x3] }
 0x404   : >> { %3145 = vst.msk [vmem:[#allocation3 + $0x68] sm:$0x3] %vm2042_vm11, %v7237_v24 }
 0x407   : >> { %2249 = vrot.lane.b32.xlu1 %v7121_v32, %s12190_s28  ;;  %2247 = vrot.lane.b32.xlu0 %v7120_v3, %s12190_s28  ;;  %v9066_v32 = vld [vmem:[%s12004_s3 + $0x38] sm:$0xff]  }
 0x40b   : >> { %2909 = vrot.lane.b32.xlu1 %v7189_v44, %s12191_s0  ;;  %2907 = vrot.lane.b32.xlu0 %v10518_v55, %s12191_s0  ;;  %v7201_v55 = vld [vmem:[%s10427_s25 + $0x2a] sm:$0x3]  ;;  %v9070_v44 = vld [vmem:[%s12004_s3 + $0x30] sm:$0xff]  }
 0x40f   : >> { %2961 = vrot.lane.b32.xlu1 %v7199_v19, %s12192_s29  ;;  %2959 = vrot.lane.b32.xlu0 %v10472_v31, %s12192_s29  ;;  %v7193_v31 = vld [vmem:[%s10427_s25 + $0x1b] sm:$0x3]  ;;  %v9073_v19 = vld [vmem:[%s12004_s3 + $0x68] sm:$0xff]  }
 0x413   : >> { %2921 = vrot.lane.b32.xlu1 %v7191_v47, %s12192_s29  ;;  %2919 = vrot.lane.b32.xlu0 %v10555_v46, %s12192_s29  ;;  %v7195_v47 = vld [vmem:[%s10427_s25 + $0x1c] sm:$0x3] }
 0x417   : >> { %2973 = vrot.lane.b32.xlu1 %v7201_v55, %s12190_s28  ;;  %2971 = vrot.lane.b32.xlu0 %v10459_v58, %s12190_s28  ;;  %v7215_v58 = vld [vmem:[%s10427_s25 + $0x3c] sm:$0x3] }
 0x41b   : >> { %2933 = vrot.lane.b32.xlu1 %v7193_v31, %s12190_s28  ;;  %2931 = vrot.lane.b32.xlu0 %v10462_v28, %s12190_s28  ;;  %v7217_v28 = vld [vmem:[%s10427_s25 + $0x48] sm:$0x3] }
 0x41f   : >> { %3029 = vrot.lane.b32.xlu1 %v7213_v6, %s12191_s0  ;;  %3027 = vrot.lane.b32.xlu0 %v7118_v60, %s12191_s0 }
 0x423   : >> { %2989 = vrot.lane.b32.xlu1 %v7205_v2, %s12191_s0  ;;  %2987 = vrot.lane.b32.xlu0 %v10441_v54, %s12191_s0  ;;  %v7230_v54 = vld [vmem:[%s10427_s25 + $0x51] sm:$0xff] }
 0x427   : >> { %3041 = vrot.lane.b32.xlu1 %v7215_v58, %s12192_s29  ;;  %3039 = vrot.lane.b32.xlu0 %v7120_v3, %s12192_s29  ;;  %v9069_v3 = vld [vmem:[%s12004_s3 + $0x70] sm:$0xff]   ;;  %v9078_v58 = vld [vmem:[%s12004_s3 + $0x20] sm:$0xff]  }
 0x42b   : >> { %3001 = vrot.lane.b32.xlu1 %v7207_v12, %s12192_s29  ;;  %2999 = vrot.lane.b32.xlu0 %v10455_v56, %s12192_s29  ;;  %v7209_v56 = vld [vmem:[%s10427_s25 + $0x39] sm:$0x3] }
 0x42f   : >> { %3053 = vrot.lane.b32.xlu1 %v7217_v28, %s12190_s28  ;;  %3051 = vrot.lane.b32.xlu0 %v10476_v41, %s12190_s28  ;;  %v7221_v41 = vld [vmem:[%s10427_s25 + $0x4a] sm:$0x3]  ;;  %v9079_v28 = vld [vmem:[%s12004_s3 + $0x58] sm:$0xff]  }
 0x431   : >> { %v2181_v45 = vpop.permute.xlu0 %2180  ;;  %v2138_v46 = vpop.permute.xlu1 %2137 }
 0x432   : >> { %2186 = vst.msk [vmem:[#allocation3 + $0x18] sm:$0xff] %vm2054_vm12, %v2181_v45  ;;  %2143 = vst.msk [vmem:[#allocation3 + $0x10] sm:$0xff] %vm2054_vm12, %v2138_v46 }
 0x433   : >> { %3112 = vrot.lane.b32.xlu1 %v7231_v9, %s12191_s0  ;;  %3110 = vrot.lane.b32.xlu0 %v7230_v54, %s12191_s0  ;;  %v7187_v9 = vld [vmem:[%s10427_s25 + $0x18] sm:$0x3] }
 0x434   : >> { %v9054_v54 = vld [vmem:[%s12004_s3 + $0x138] sm:$0xff]  }
 0x435   : >> { %v2183_v14 = vpop.permute.xlu0 %2182  ;;  %v2140_v15 = vpop.permute.xlu1 %2139 }
 0x436   : >> { %2187 = vst.msk [vmem:[#allocation3 + $0x50] sm:$0x3] %vm2056_vm13, %v2183_v14  ;;  %2144 = vst.msk [vmem:[#allocation3 + $0x48] sm:$0x3] %vm2056_vm13, %v2140_v15 }
 0x437   : >> { %3013 = vrot.lane.b32.xlu1 %v7209_v56, %s12190_s28  ;;  %3011 = vrot.lane.b32.xlu0 %v10489_v42, %s12190_s28 }
 0x439   : >> { %v2193_v16 = vpop.permute.xlu0 %2192  ;;  %v2195_v23 = vpop.permute.xlu1 %2194 }
 0x43a   : >> { %2198 = vst.msk [vmem:[#allocation3 + $0x18] sm:$0xff] %vm2068_vm14, %v2193_v16  ;;  %v9081_v16 = vld [vmem:[%s12004_s3 + $0x50] sm:$0xff]  }
 0x43b   : >> { %2199 = vst.msk [vmem:[#allocation3 + $0x50] sm:$0x3] %vm2070_vm15, %v2195_v23  ;;  %3069 = vrot.lane.b32.xlu1 %v7221_v41, %s12191_s0  ;;  %3067 = vrot.lane.b32.xlu0 %v10621_v17, %s12191_s0  ;;  %v9055_v41 = vld [vmem:[%s12004_s3 + $0x170] sm:$0xff]  }
 0x43d   : >> { %v2153_v21 = vpop.permute.xlu0 %2152  ;;  %v2155_v42 = vpop.permute.xlu1 %2154 }
 0x43e   : >> { %2158 = vst.msk [vmem:[#allocation3 + $0x10] sm:$0xff] %vm2068_vm14, %v2153_v21  ;;  %v9082_v21 = vld [vmem:[%s12004_s3 + $0x10] sm:$0xff]  }
 0x43f   : >> { %2159 = vst.msk [vmem:[#allocation3 + $0x48] sm:$0x3] %vm2070_vm15, %v2155_v42  ;;  %3124 = vrot.lane.b32.xlu1 %v7233_v35, %s12192_s29  ;;  %3122 = vrot.lane.b32.xlu0 %v7232_v18, %s12192_s29  ;;  %v9056_v18 = vld [vmem:[%s12004_s3 + $0x130] sm:$0xff]   ;;  %v9083_v42 = vld [vmem:[%s12004_s3 + $0x48] sm:$0xff]  }
 0x441   : >> { %v2208_v48 = vpop.permute.xlu0 %2207  ;;  %v2210_v49 = vpop.permute.xlu1 %2209 }
 0x442   : >> { %2213 = vst.msk [vmem:[#allocation3 + $0x18] sm:$0xff] %vm2082_vm0, %v2208_v48 }
 0x443   : >> { %2214 = vst.msk [vmem:[#allocation3 + $0x50] sm:$0x3] %vm2084_vm4, %v2210_v49  ;;  %3081 = vrot.lane.b32.xlu1 %v7223_v22, %s12192_s29  ;;  %3079 = vrot.lane.b32.xlu0 %v10648_v63, %s12192_s29  ;;  %v9062_v63 = vld [vmem:[%s12004_s3 + $0x180] sm:$0xff]   ;;  %v9058_v49 = vld [vmem:[%s12004_s3 + $0x128] sm:$0xff]  }
 0x445   : >> { %v2165_v30 = vpop.permute.xlu0 %2164  ;;  %v2167_v50 = vpop.permute.xlu1 %2166 }
 0x446   : >> { %2170 = vst.msk [vmem:[#allocation3 + $0x10] sm:$0xff] %vm2082_vm0, %v2165_v30  ;;  %v9085_v30 = vld [vmem:[%s12004_s3 + $0x40] sm:$0xff]  }
 0x447   : >> { %2171 = vst.msk [vmem:[#allocation3 + $0x48] sm:$0x3] %vm2084_vm4, %v2167_v50  ;;  %3136 = vrot.lane.b32.xlu1 %v7235_v26, %s12190_s28  ;;  %3134 = vrot.lane.b32.xlu0 %v7234_v29, %s12190_s28  ;;  %v9084_v26 = vld [vmem:[%s12004_s3 + $0x8] sm:$0xff]   ;;  %v9060_v29 = vld [vmem:[%s12004_s3 + $0x160] sm:$0xff]  }
 0x449   : >> { %v2100_v38 = vpop.permute.xlu1 %2099  ;;  %v2098_v59 = vpop.permute.xlu0 %2097  ;;  %v2305_v17 = vld [vmem:[#allocation3 + $0x18] sm:$0xff] }
 0x44a   : >> { %v2312_v43 = vld [vmem:[#allocation3 + $0x50] sm:$0x3]  ;;  %2104 = vst.msk [vmem:[#allocation3 + $0x40] sm:$0x3] %vm2056_vm13, %v2100_v38  ;;  %v9063_v38 = vld [vmem:[%s12004_s3 + $0x158] sm:$0xff]  }
 0x44b   : >> { %3022 = vst.msk [vmem:[#allocation3 + $0x50] sm:$0x3] %vm2042_vm11, %v7211_v37  ;;  %v2319_v53 = vpack.c.bf16 %v2312_v43, %v2305_v17  ;;  %3093 = vrot.lane.b32.xlu1 %v7225_v34, %s12190_s28  ;;  %3091 = vrot.lane.b32.xlu0 %v10562_v33, %s12190_s28  ;;  %v9061_v34 = vld [vmem:[%s12004_s3 + $0x120] sm:$0xff]  }
 0x44c   : >> { %2103 = vst.msk [vmem:[#allocation3 + $0x8] sm:$0xff] %vm2054_vm12, %v2098_v59  ;;  %v9087_v43 = vld [vmem:[%s12004_s3] sm:$0xff]   ;;  %v9098_v59 = vld [vmem:[%s12004_s3 + $0x178] sm:$0xff]  }
 0x44d   : >> { %3021 = vst.msk [vmem:[#allocation3 + $0x18] sm:$0xff] %vm2025_vm3, %v10607_v39  ;;  %2806 = vmatprep.mubr.bf16.mxu1 %v2319_v53  ;;  %v2051_v40 = vpop.permute.xlu1 %2050  ;;  %v2049_v60 = vpop.permute.xlu0 %2048  ;;  %v2304_v61 = vld [vmem:[#allocation3 + $0x10] sm:$0xff] }
 0x44e   : >> { %v2311_v57 = vld [vmem:[#allocation3 + $0x48] sm:$0x3]  ;;  %2057 = vst.msk [vmem:[#allocation3 + $0x38] sm:$0x3] %vm2056_vm13, %v2051_v40  ;;  %v7228_v40 = vld [vmem:[%s10427_s25 + $0x50] sm:$0xff] }
 0x44f   : >> { %2982 = vst.msk [vmem:[#allocation3 + $0x48] sm:$0x3] %vm2042_vm11, %v7203_v7  ;;  %v2318_v39 = vpack.c.bf16 %v2311_v57, %v2304_v61  ;;  %v9064_v7 = vld [vmem:[%s12004_s3 + $0x118] sm:$0xff]  }
 0x450   : >> { %2055 = vst.msk [vmem:[#allocation3] sm:$0xff] %vm2054_vm12, %v2049_v60  ;;  %v7229_v57 = vld [vmem:[%s10427_s25 + $0x58] sm:$0x3] }
 0x451   : >> { %2981 = vst.msk [vmem:[#allocation3 + $0x10] sm:$0xff] %vm2025_vm3, %v7202_v25  ;;  %2807 = vmatmul.mubr.bf16.vlgmr.msra.gmra.mxu1 %v2318_v39  ;;  %v2112_v33 = vpop.permute.xlu1 %2111  ;;  %v2110_v10 = vpop.permute.xlu0 %2109  ;;  %v9067_v25 = vld [vmem:[%s12004_s3 + $0x150] sm:$0xff]  }
 0x452   : >> { %8370 = vmatpush3.bf16.msra.mxu1 %v9059_v36  ;;  %8373 = vmatprep.mubr.msk.bf16.mxu1 %vm9440_vm5, %v9439_v13  ;;  %2116 = vst.msk [vmem:[#allocation3 + $0x40] sm:$0x3] %vm2070_vm15, %v2112_v33  ;;  %v9068_v39 = vld [vmem:[%s12004_s3 + $0x110] sm:$0xff]  }
 0x453   : >> { %2115 = vst.msk [vmem:[#allocation3 + $0x8] sm:$0xff] %vm2068_vm14, %v2110_v10  ;;  %8371 = vmatprep.subr.bf16.mxu1 %v9439_v13 }
 0x455   : >> { %v2065_v0 = vpop.permute.xlu1 %2064  ;;  %v2063_v1 = vpop.permute.xlu0 %2062 }
 0x456   : >> { %8372 = vmatpush3.bf16.msra.mxu1 %v9062_v63  ;;  %2071 = vst.msk [vmem:[#allocation3 + $0x38] sm:$0x3] %vm2070_vm15, %v2065_v0  ;;  %v9071_v63 = vld [vmem:[%s12004_s3 + $0x148] sm:$0xff]  }
 0x457   : >> { %2069 = vst.msk [vmem:[#allocation3] sm:$0xff] %vm2068_vm14, %v2063_v1  ;;  %8002 = vmatprep.subr.bf16.mxu1 %v9065_v4  ;;  %v9072_v1 = vld [vmem:[%s12004_s3 + $0x108] sm:$0xff]  }
 0x459   : >> { %8374 = vmatmul.mubr.msk.bf16.vlgmr.msra.gmra.mxu1 %vm2025_vm3, %v2322_v5  ;;  %v2124_v51 = vpop.permute.xlu1 %2123  ;;  %v2122_v27 = vpop.permute.xlu0 %2121  ;;  %v9077_v5 = vld [vmem:[%s12004_s3 + $0x60] sm:$0xff]  }
 0x45a   : >> { %8003 = vmatpush3.bf16.msra.mxu1 %v9066_v32  ;;  %2128 = vst.msk [vmem:[#allocation3 + $0x40] sm:$0x3] %vm2084_vm4, %v2124_v51  ;;  %v9075_v32 = vld [vmem:[%s12004_s3 + $0x140] sm:$0xff]  }
 0x45b   : >> { %2127 = vst.msk [vmem:[#allocation3 + $0x8] sm:$0xff] %vm2082_vm0, %v2122_v27  ;;  %8004 = vmatprep.subr.bf16.mxu1 %v9069_v3  ;;  %v7219_v3 = vld [vmem:[%s10427_s25 + $0x49] sm:$0x3]  ;;  %v7218_v51 = vld [vmem:[%s10427_s25 + $0x41] sm:$0xff]  ;;  %s7294_s25 = sshll.u32 %s9409_s17, 3  ;;  %s2034_s17 = sadd.s32 1, %s9409_s17  }
 0x45c   : >> { %s3898_s0 = scalar_lea.vmem [#allocation5], %s7294_s25  ;;  %p2031_p12 = scmp.ge.s32.totalorder %s2034_s17, 5  }
 0x45d   : >> { %v2079_v11 = vpop.permute.xlu1 %2078  ;;  %v2077_v24 = vpop.permute.xlu0 %2076  ;;  %vm9441_vm9 = vmmov (%p2031_p12), 0   ;;  %vm6713_vm1 = vcmask (%p2031_p12), 1040384   ;;  %s7887_s29 = sshll.u32 (%p2031_p12), %s9514_s13, 4  ;;  %s6742_s28 = sshll.u32 (%p2031_p12), %s9569_s27, 4  ;;  %s6743_s28 = int_to_ptr.vmem [resolvable:$true] %s6742_s28 }
 0x45e   : >> { %8005 = vmatpush3.bf16.msra.mxu1 %v9070_v44  ;;  %2085 = vst.msk [vmem:[#allocation3 + $0x38] sm:$0x3] %vm2084_vm4, %v2079_v11  ;;  %v9076_v11 = vld [vmem:[%s12004_s3 + $0x100] sm:$0xff]   ;;  %s6740_s17 = scalar_lea.hbm (%p2031_p12), %s12010_s9, %s7887_s29  ;;  %s12198_s26 = sand.u32 (%p2031_p12), 1, %s9393_s10  }
 0x45f   : >> { %2083 = vst.msk [vmem:[#allocation3] sm:$0xff] %vm2082_vm0, %v2077_v24  ;;  %8006 = vmatprep.subr.bf16.mxu1 %v9073_v19  ;;  %s6730_s24 = scalar_lea.sflag (%p2031_p12), [#allocation7], %s12198_s26  ;;  %s9333_s16 = scalar_lea.vmem (%p2031_p12), %s6743_s28, 16 }
 0x460   : > { %p9334_p13 = scmp.ne.s32.totalorder (%p2031_p12), %s6743_s28, %s9333_s16  ;;  %s9442_s21 = smov (%p2031_p12), [#allocation6]  }
 0x461   : >> { %v2310_v55 = vld [vmem:[#allocation3 + $0x40] sm:$0x3]  ;;  %v2269_v31 = vpop.permute.xlu1 %2268  ;;  %v2267_v6 = vpop.permute.xlu0 %2266  ;;  %s9337_s14 = sshll.u32 (%p2031_p12), %s9442_s21, 4  ;;  %s9338_s14 = int_to_ptr.vmem [resolvable:$false] %s9337_s14 }
 0x462   : >> { %v2303_v2 = vld [vmem:[#allocation3 + $0x8] sm:$0xff]  ;;  %8007 = vmatpush3.bf16.msra.mxu1 %v9074_v20  ;;  %2942 = vst.msk [vmem:[#allocation3 + $0x40] sm:$0x3] %vm2042_vm11, %v7195_v47  ;;  %v9086_v20 = vld [vmem:[%s12004_s3 + $0xf8] sm:$0xff]   ;;  %p9335_p0 = pnand (%p2031_p12), %p9334_p13, %p9531_p5  ;;  %s9339_s13 = scalar_lea.vmem (%p2031_p12), %s9338_s14, 32 }
 0x463   : >> { %2273 = vst.msk [vmem:[#allocation3 + $0x60] sm:$0x3] %vm2056_vm13, %v2269_v31  ;;  %v2317_v12 = vpack.c.bf16 %v2310_v55, %v2303_v2  ;;  %8008 = vmatprep.subr.bf16.mxu1 %v9077_v5  ;;  %v9088_v55 = vld [vmem:[%s12004_s3 + $0xb8] sm:$0xff]   ;;  %p9340_p2 = scmp.lt.s32.totalorder (%p2031_p12), %s6743_s28, %s9338_s14  ;;  %p9341_p3 = scmp.lt.s32.totalorder (%p2031_p12), %s9339_s13, %s9333_s16 }
 0x464   : >> { %2272 = vst.msk [vmem:[#allocation3 + $0x28] sm:$0xff] %vm2054_vm12, %v2267_v6  ;;  %v9089_v6 = vld [vmem:[%s12004_s3 + $0xf0] sm:$0xff]   ;;  %p9336_p1 = pneg (%p2031_p12), %p9335_p0 }
 0x465   : >> { %2941 = vst.msk [vmem:[#allocation3 + $0x8] sm:$0xff] %vm2025_vm3, %v10431_v52  ;;  %2765 = vmatprep.mubr.bf16.mxu0 %v2317_v12  ;;  %v2309_v45 = vld [vmem:[#allocation3 + $0x38] sm:$0x3]  ;;  %v2226_v46 = vpop.permute.xlu1 %2225  ;;  %v2224_v56 = vpop.permute.xlu0 %2223  ;;  %v9090_v12 = vld [vmem:[%s12004_s3 + $0xb0] sm:$0xff]   ;;  %p9342_p4 = por (%p2031_p12), %p9341_p3, %p9340_p2 }
 0x466   : >> { %v2302_v14 = vld [vmem:[#allocation3] sm:$0xff]  ;;  %8009 = vmatpush3.bf16.msra.mxu1 %v9078_v58  ;;  %v9080_v52 = vld [vmem:[%s12004_s3 + $0x18] sm:$0xff]   ;;  %2902 = vst.msk [vmem:[#allocation3 + $0x38] sm:$0x3] %vm2042_vm11, %v7187_v9 }
 0x467   : >> { %2230 = vst.msk [vmem:[#allocation3 + $0x58] sm:$0x3] %vm2056_vm13, %v2226_v46  ;;  %v2316_v15 = vpack.c.bf16 %v2309_v45, %v2302_v14  ;;  %8010 = vmatprep.subr.bf16.mxu1 %v9079_v28  ;;  %v9091_v28 = vld [vmem:[%s12004_s3 + $0xe8] sm:$0xff]   ;;  %v9093_v46 = vld [vmem:[%s12004_s3 + $0xe0] sm:$0xff]   ;;  %p9343_p7 = pnand (%p2031_p12), %p9342_p4, %p9336_p1 }
 0x468   : >> { %2229 = vst.msk [vmem:[#allocation3 + $0x20] sm:$0xff] %vm2054_vm12, %v2224_v56  ;;  %v9092_v45 = vld [vmem:[%s12004_s3 + $0xa8] sm:$0xff]  }
 0x469   : >> { %2901 = vst.msk [vmem:[#allocation3] sm:$0xff] %vm2025_vm3, %v10484_v62  ;;  %2766 = vmatmul.mubr.bf16.vlgmr.msra.gmra.mxu0 %v2316_v15  ;;  %v2281_v23 = vpop.permute.xlu1 %2280  ;;  %v2279_v35 = vpop.permute.xlu0 %2278  ;;  %v9057_v62 = vld [vmem:[%s12004_s3 + $0x168] sm:$0xff]  }
 0x46a   : >> { %7978 = vmatpush3.bf16.msra.mxu0 %v9054_v54  ;;  %8011 = vmatpush3.bf16.msra.mxu1 %v9080_v52  ;;  %2285 = vst.msk [vmem:[#allocation3 + $0x60] sm:$0x3] %vm2070_vm15, %v2281_v23  ;;  %v9095_v23 = vld [vmem:[%s12004_s3 + $0xd8] sm:$0xff]  }
 0x46b   : >> { %2284 = vst.msk [vmem:[#allocation3 + $0x28] sm:$0xff] %vm2068_vm14, %v2279_v35  ;;  %7979 = vmatprep.subr.bf16.mxu0 %v9055_v41  ;;  %8012 = vmatprep.subr.bf16.mxu1 %v9081_v16  ;;  %v9094_v41 = vld [vmem:[%s12004_s3 + $0xa0] sm:$0xff]   ;;  %v9096_v35 = vld [vmem:[%s12004_s3 + $0x98] sm:$0xff]  }
 0x46d   : >> { %v2238_v22 = vpop.permute.xlu1 %2237  ;;  %v2236_v48 = vpop.permute.xlu0 %2235 }
 0x46e   : >> { %7980 = vmatpush3.bf16.msra.mxu0 %v9056_v18  ;;  %8013 = vmatpush3.bf16.msra.mxu1 %v9082_v21  ;;  %2242 = vst.msk [vmem:[#allocation3 + $0x58] sm:$0x3] %vm2070_vm15, %v2238_v22  ;;  %v9100_v22 = vld [vmem:[%s12004_s3 + $0x138] sm:$0xff]  }
 0x46f   : >> { %2241 = vst.msk [vmem:[#allocation3 + $0x20] sm:$0xff] %vm2068_vm14, %v2236_v48  ;;  %7981 = vmatprep.subr.bf16.mxu0 %v9057_v62  ;;  %8014 = vmatprep.subr.bf16.mxu1 %v9083_v42 }
 0x471   : >> { %v2293_v50 = vpop.permute.xlu1 %2292  ;;  %v2291_v37 = vpop.permute.xlu0 %2290 }
 0x472   : >> { %7982 = vmatpush3.bf16.msra.mxu0 %v9058_v49  ;;  %8015 = vmatpush3.bf16.msra.mxu1 %v9084_v26  ;;  %2297 = vst.msk [vmem:[#allocation3 + $0x60] sm:$0x3] %vm2084_vm4, %v2293_v50  ;;  %v9097_v49 = vld [vmem:[%s12004_s3 + $0xd0] sm:$0xff]  }
 0x473   : >> { %2296 = vst.msk [vmem:[#allocation3 + $0x28] sm:$0xff] %vm2082_vm0, %v2291_v37  ;;  %7983 = vmatprep.subr.bf16.mxu0 %v9060_v29  ;;  %8016 = vmatprep.subr.bf16.mxu1 %v9085_v30  ;;  %v9102_v26 = vld [vmem:[%s12004_s3 + $0x170] sm:$0xff]  }
 0x474   : >> { %v9099_v50 = vld [vmem:[%s12004_s3 + $0x90] sm:$0xff]  }
 0x475   : >> { %v2950_v17 = vpop.permute.xlu1 %2949  ;;  %v2948_v53 = vpop.permute.xlu0 %2947  ;;  %v9104_v37 = vld [vmem:[%s12004_s3 + $0x130] sm:$0xff]  }
 0x476   : >> { %7984 = vmatpush3.bf16.msra.mxu0 %v9061_v34  ;;  %8017 = vmatpush3.bf16.msra.mxu1 %v9087_v43  ;;  %2954 = vst.msk [vmem:[#allocation3 + $0x40] sm:$0x3] %vm2056_vm13, %v2950_v17  ;;  %v9101_v34 = vld [vmem:[%s12004_s3 + $0xc8] sm:$0xff]  }
 0x477   : >> { %2953 = vst.msk [vmem:[#allocation3 + $0x8] sm:$0xff] %vm2054_vm12, %v2948_v53  ;;  %7985 = vmatprep.subr.bf16.mxu0 %v9063_v38  ;;  %8046 = vmatprep.subr.bf16.mxu1 %v9098_v59  ;;  %v9106_v43 = vld [vmem:[%s12004_s3 + $0x168] sm:$0xff]  }
 0x478   : >> { %v9103_v17 = vld [vmem:[%s12004_s3 + $0x88] sm:$0xff]  }
 0x479   : >> { %v2314_v60 = vld [vmem:[#allocation3 + $0x60] sm:$0x3]  ;;  %v2250_v61 = vpop.permute.xlu1 %2249  ;;  %v2248_v36 = vpop.permute.xlu0 %2247  ;;  %v9108_v53 = vld [vmem:[%s12004_s3 + $0x128] sm:$0xff]  }
 0x47a   : >> { %7986 = vmatpush3.bf16.msra.mxu0 %v9064_v7  ;;  %v2307_v33 = vld [vmem:[#allocation3 + $0x28] sm:$0xff]  ;;  %3105 = vst.msk [vmem:[#allocation3 + $0x60] sm:$0x3] %vm2042_vm11, %v7229_v57  ;;  %v9105_v7 = vld [vmem:[%s12004_s3 + $0xc0] sm:$0xff]  }
 0x47b   : >> { %2254 = vst.msk [vmem:[#allocation3 + $0x58] sm:$0x3] %vm2084_vm4, %v2250_v61  ;;  %7987 = vmatprep.subr.bf16.mxu0 %v9067_v25  ;;  %v2321_v10 = vpack.c.bf16 %v2314_v60, %v2307_v33  ;;  %v9109_v25 = vld [vmem:[%s12004_s3 + $0x160] sm:$0xff]  }
 0x47c   : >> { %2253 = vst.msk [vmem:[#allocation3 + $0x20] sm:$0xff] %vm2082_vm0, %v2248_v36  ;;  %v9107_v60 = vld [vmem:[%s12004_s3 + $0x80] sm:$0xff]   ;;  %v9111_v36 = vld [vmem:[%s12004_s3 + $0x158] sm:$0xff]  }
 0x47d   : >> { %3104 = vst.msk [vmem:[#allocation3 + $0x28] sm:$0xff] %vm2025_vm3, %v7228_v40  ;;  %2847 = vmatprep.mubr.bf16.mxu0 %v2321_v10  ;;  %v2910_v4 = vpop.permute.xlu1 %2909  ;;  %v2908_v0 = vpop.permute.xlu0 %2907  ;;  %v9110_v61 = vld [vmem:[%s12004_s3 + $0x120] sm:$0xff]   ;;  %v9112_v10 = vld [vmem:[%s12004_s3 + $0x118] sm:$0xff]  }
 0x47e   : >> { %7988 = vmatpush3.bf16.msra.mxu0 %v9068_v39  ;;  %2914 = vst.msk [vmem:[#allocation3 + $0x38] sm:$0x3] %vm2056_vm13, %v2910_v4 }
 0x47f   : >> { %2913 = vst.msk [vmem:[#allocation3] sm:$0xff] %vm2054_vm12, %v2908_v0  ;;  %7989 = vmatprep.subr.bf16.mxu0 %v9071_v63  ;;  %v9113_v63 = vld [vmem:[%s12004_s3 + $0x150] sm:$0xff]  }
 0x481   : >> { %v2962_v44 = vpop.permute.xlu1 %2961  ;;  %v2960_v19 = vpop.permute.xlu0 %2959 }
 0x482   : >> { %v2313_v27 = vld [vmem:[#allocation3 + $0x58] sm:$0x3]  ;;  %7990 = vmatpush3.bf16.msra.mxu0 %v9072_v1  ;;  %2966 = vst.msk [vmem:[#allocation3 + $0x40] sm:$0x3] %vm2070_vm15, %v2962_v44 }
 0x483   : >> { %v2306_v24 = vld [vmem:[#allocation3 + $0x20] sm:$0xff]  ;;  %3062 = vst.msk [vmem:[#allocation3 + $0x58] sm:$0x3] %vm2042_vm11, %v7219_v3  ;;  %7991 = vmatprep.subr.bf16.mxu0 %v9075_v32  ;;  %v9114_v3 = vld [vmem:[%s12004_s3 + $0x110] sm:$0xff]  }
 0x484   : >> { %2965 = vst.msk [vmem:[#allocation3 + $0x8] sm:$0xff] %vm2068_vm14, %v2960_v19  ;;  %v2320_v31 = vpack.c.bf16 %v2313_v27, %v2306_v24  ;;  %v9115_v27 = vld [vmem:[%s12004_s3 + $0x148] sm:$0xff]   ;;  %v9118_v24 = vld [vmem:[%s12004_s3 + $0x140] sm:$0xff]  }
 0x485   : >> { %3061 = vst.msk [vmem:[#allocation3 + $0x20] sm:$0xff] %vm2025_vm3, %v7218_v51  ;;  %v2922_v5 = vpop.permute.xlu1 %2921  ;;  %v2920_v47 = vpop.permute.xlu0 %2919 }
 0x486   : >> { %7992 = vmatpush3.bf16.msra.mxu0 %v9076_v11  ;;  %2926 = vst.msk [vmem:[#allocation3 + $0x38] sm:$0x3] %vm2070_vm15, %v2922_v5  ;;  %v9116_v11 = vld [vmem:[%s12004_s3 + $0x108] sm:$0xff]  }
 0x487   : >> { %2925 = vst.msk [vmem:[#allocation3] sm:$0xff] %vm2068_vm14, %v2920_v47  ;;  %8024 = vmatprep.subr.bf16.mxu0 %v9086_v20  ;;  %v9117_v20 = vld [vmem:[%s12004_s3 + $0x188] sm:$0xff]  }
 0x489   : >> { %2848 = vmatmul.mubr.bf16.vlgmr.msra.gmra.mxu0 %v2320_v31  ;;  %v2974_v2 = vpop.permute.xlu1 %2973  ;;  %v2972_v58 = vpop.permute.xlu0 %2971 }
 0x48a   : >> { %8025 = vmatpush3.bf16.msra.mxu0 %v9088_v55  ;;  %2978 = vst.msk [vmem:[#allocation3 + $0x40] sm:$0x3] %vm2084_vm4, %v2974_v2 }
 0x48b   : >> { %2977 = vst.msk [vmem:[#allocation3 + $0x8] sm:$0xff] %vm2082_vm0, %v2972_v58  ;;  %8026 = vmatprep.subr.bf16.mxu0 %v9089_v6  ;;  %v9119_v6 = vld [vmem:[%s12004_s3 + $0x100] sm:$0xff]  }
 0x48d   : >> { %v2934_v9 = vpop.permute.xlu1 %2933  ;;  %v2932_v54 = vpop.permute.xlu0 %2931 }
 0x48e   : >> { %8027 = vmatpush3.bf16.msra.mxu0 %v9090_v12  ;;  %2938 = vst.msk [vmem:[#allocation3 + $0x38] sm:$0x3] %vm2084_vm4, %v2934_v9  ;;  %v3152_v9 = vld [vmem:[#allocation3 + $0x30] sm:$0xff] }
 0x48f   : >> { %2937 = vst.msk [vmem:[#allocation3] sm:$0xff] %vm2082_vm0, %v2932_v54  ;;  %8028 = vmatprep.subr.bf16.mxu0 %v9091_v28  ;;  %v9120_v28 = vld [vmem:[%s12004_s3 + $0x180] sm:$0xff]   ;;  %v3159_v54 = vld [vmem:[#allocation3 + $0x68] sm:$0x3] }
 0x491   : >> { %v3030_v56 = vpop.permute.xlu1 %3029  ;;  %v3028_v14 = vpop.permute.xlu0 %3027  ;;  %v3154_v15 = vld [vmem:[#allocation3 + $0x40] sm:$0x3] }
 0x492   : >> { %v3147_v52 = vld [vmem:[#allocation3 + $0x8] sm:$0xff]  ;;  %8029 = vmatpush3.bf16.msra.mxu0 %v9092_v45  ;;  %3034 = vst.msk [vmem:[#allocation3 + $0x50] sm:$0x3] %vm2056_vm13, %v3030_v56  ;;  %v3166_v45 = vpack.c.bf16 %v3159_v54, %v3152_v9 }
 0x493   : >> { %3033 = vst.msk [vmem:[#allocation3 + $0x18] sm:$0xff] %vm2054_vm12, %v3028_v14  ;;  %v3161_v16 = vpack.c.bf16 %v3154_v15, %v3147_v52  ;;  %8030 = vmatprep.subr.bf16.mxu0 %v9093_v46 }
 0x495   : >> { %3609 = vmatprep.mubr.bf16.mxu1 %v3161_v16  ;;  %v2990_v18 = vpop.permute.xlu1 %2989  ;;  %v2988_v21 = vpop.permute.xlu0 %2987  ;;  %v3153_v42 = vld [vmem:[#allocation3 + $0x38] sm:$0x3] }
 0x496   : >> { %v3146_v62 = vld [vmem:[#allocation3] sm:$0xff]  ;;  %8031 = vmatpush3.bf16.msra.mxu0 %v9094_v41  ;;  %2994 = vst.msk [vmem:[#allocation3 + $0x48] sm:$0x3] %vm2056_vm13, %v2990_v18 }
 0x497   : >> { %2993 = vst.msk [vmem:[#allocation3 + $0x10] sm:$0xff] %vm2054_vm12, %v2988_v21  ;;  %v3160_v48 = vpack.c.bf16 %v3153_v42, %v3146_v62  ;;  %8032 = vmatprep.subr.bf16.mxu0 %v9095_v23 }
 0x499   : >> { %3610 = vmatmul.mubr.bf16.vlgmr.msra.gmra.mxu1 %v3160_v48  ;;  %v3042_v29 = vpop.permute.xlu1 %3041  ;;  %v3040_v30 = vpop.permute.xlu0 %3039 }
 0x49a   : >> { %8033 = vmatpush3.bf16.msra.mxu0 %v9096_v35  ;;  %8047 = vmatpush3.bf16.msra.mxu1 %v9100_v22  ;;  %3046 = vst.msk [vmem:[#allocation3 + $0x50] sm:$0x3] %vm2070_vm15, %v3042_v29 }
 0x49b   : >> { %3045 = vst.msk [vmem:[#allocation3 + $0x18] sm:$0xff] %vm2068_vm14, %v3040_v30  ;;  %8034 = vmatprep.subr.bf16.mxu0 %v9097_v49  ;;  %8048 = vmatprep.subr.bf16.mxu1 %v9102_v26 }
 0x49d   : >> { %v3002_v38 = vpop.permute.xlu1 %3001  ;;  %v3000_v59 = vpop.permute.xlu0 %2999 }
 0x49e   : >> { %8035 = vmatpush3.bf16.msra.mxu0 %v9099_v50  ;;  %8049 = vmatpush3.bf16.msra.mxu1 %v9104_v37  ;;  %3006 = vst.msk [vmem:[#allocation3 + $0x48] sm:$0x3] %vm2070_vm15, %v3002_v38 }
 0x49f   : >> { %3005 = vst.msk [vmem:[#allocation3 + $0x10] sm:$0xff] %vm2068_vm14, %v3000_v59  ;;  %8036 = vmatprep.subr.bf16.mxu0 %v9101_v34  ;;  %8050 = vmatprep.subr.bf16.mxu1 %v9106_v43  ;;  %v7134_v59 = vld [vmem:[%s12005_s4] ss:$0 sm:$0xff] }
 0x4a1   : >> { %v3054_v57 = vpop.permute.xlu1 %3053  ;;  %v3052_v40 = vpop.permute.xlu0 %3051 }
 0x4a2   : >> { %8037 = vmatpush3.bf16.msra.mxu0 %v9103_v17  ;;  %8051 = vmatpush3.bf16.msra.mxu1 %v9108_v53  ;;  %3058 = vst.msk [vmem:[#allocation3 + $0x50] sm:$0x3] %vm2084_vm4, %v3054_v57 }
 0x4a3   : >> { %3057 = vst.msk [vmem:[#allocation3 + $0x18] sm:$0xff] %vm2082_vm0, %v3052_v40  ;;  %8038 = vmatprep.subr.bf16.mxu0 %v9105_v7  ;;  %8052 = vmatprep.subr.bf16.mxu1 %v9109_v25 }
 0x4a5   : >> { %v3113_v39 = vpop.permute.xlu1 %3112  ;;  %v3111_v33 = vpop.permute.xlu0 %3110 }
 0x4a6   : >> { %8039 = vmatpush3.bf16.msra.mxu0 %v9107_v60  ;;  %8053 = vmatpush3.bf16.msra.mxu1 %v9110_v61  ;;  %3117 = vst.msk [vmem:[#allocation3 + $0x60] sm:$0x3] %vm2056_vm13, %v3113_v39 }
 0x4a7   : >> { %3116 = vst.msk [vmem:[#allocation3 + $0x28] sm:$0xff] %vm2054_vm12, %v3111_v33  ;;  %8054 = vmatprep.subr.bf16.mxu1 %v9111_v36  ;;  %8377 = vmatprep.subr.bf16.mxu0 %v9439_v13 }
 0x4a9   : >> { %v3014_v4 = vpop.permute.xlu1 %3013  ;;  %v3012_v0 = vpop.permute.xlu0 %3011  ;;  %v3156_v32 = vld [vmem:[#allocation3 + $0x50] sm:$0x3] }
 0x4aa   : >> { %v3149_v1 = vld [vmem:[#allocation3 + $0x18] sm:$0xff]  ;;  %8055 = vmatpush3.bf16.msra.mxu1 %v9112_v10  ;;  %3018 = vst.msk [vmem:[#allocation3 + $0x48] sm:$0x3] %vm2084_vm4, %v3014_v4 }
 0x4ab   : >> { %3017 = vst.msk [vmem:[#allocation3 + $0x10] sm:$0xff] %vm2082_vm0, %v3012_v0  ;;  %v3163_v51 = vpack.c.bf16 %v3156_v32, %v3149_v1  ;;  %8056 = vmatprep.subr.bf16.mxu1 %v9113_v63 }
 0x4ad   : >> { %3650 = vmatprep.mubr.bf16.mxu0 %v3163_v51  ;;  %v3070_v44 = vpop.permute.xlu1 %3069  ;;  %v3068_v19 = vpop.permute.xlu0 %3067 }
 0x4ae   : >> { %8057 = vmatpush3.bf16.msra.mxu1 %v9114_v3  ;;  %3074 = vst.msk [vmem:[#allocation3 + $0x58] sm:$0x3] %vm2056_vm13, %v3070_v44 }
 0x4af   : >> { %3073 = vst.msk [vmem:[#allocation3 + $0x20] sm:$0xff] %vm2054_vm12, %v3068_v19  ;;  %8058 = vmatprep.subr.bf16.mxu1 %v9115_v27 }
 0x4b1   : >> { %v3125_v5 = vpop.permute.xlu1 %3124  ;;  %v3123_v47 = vpop.permute.xlu0 %3122  ;;  %v3155_v31 = vld [vmem:[#allocation3 + $0x48] sm:$0x3] }
 0x4b2   : >> { %v3148_v55 = vld [vmem:[#allocation3 + $0x10] sm:$0xff]  ;;  %8059 = vmatpush3.bf16.msra.mxu1 %v9116_v11  ;;  %3129 = vst.msk [vmem:[#allocation3 + $0x60] sm:$0x3] %vm2070_vm15, %v3125_v5 }
 0x4b3   : >> { %3128 = vst.msk [vmem:[#allocation3 + $0x28] sm:$0xff] %vm2068_vm14, %v3123_v47  ;;  %v3162_v2 = vpack.c.bf16 %v3155_v31, %v3148_v55  ;;  %8060 = vmatprep.subr.bf16.mxu1 %v9118_v24 }
 0x4b5   : >> { %3651 = vmatmul.mubr.bf16.vlgmr.msra.gmra.mxu0 %v3162_v2  ;;  %v3082_v58 = vpop.permute.xlu1 %3081  ;;  %v3080_v12 = vpop.permute.xlu0 %3079 }
 0x4b6   : >> { %8378 = vmatpush3.bf16.msra.mxu0 %v9117_v20  ;;  %8061 = vmatpush3.bf16.msra.mxu1 %v9119_v6  ;;  %3086 = vst.msk [vmem:[#allocation3 + $0x58] sm:$0x3] %vm2070_vm15, %v3082_v58 }
 0x4b7   : >> { %3085 = vst.msk [vmem:[#allocation3 + $0x20] sm:$0xff] %vm2068_vm14, %v3080_v12  ;;  %8379 = vmatprep.subr.bf16.mxu0 %v9439_v13  ;;  %8381 = vmatprep.mubr.msk.bf16.mxu0 %vm9440_vm5, %v9439_v13 }
 0x4b8   : >> { %8392 = vmatprep.subr.mxu1 %v9439_v13 }
 0x4b9   : >> { %v3137_v46 = vpop.permute.xlu1 %3136  ;;  %v3135_v56 = vpop.permute.xlu0 %3134 }
 0x4ba   : >> { %8380 = vmatpush3.bf16.msra.mxu0 %v9120_v28  ;;  %3141 = vst.msk [vmem:[#allocation3 + $0x60] sm:$0x3] %vm2084_vm4, %v3137_v46 }
 0x4bb   : >> { %3140 = vst.msk [vmem:[#allocation3 + $0x28] sm:$0xff] %vm2082_vm0, %v3135_v56  ;;  %8385 = vmatprep.subr.mxu0 %v9439_v13 }
 0x4bd   : >> { %8382 = vmatmul.mubr.msk.bf16.vlgmr.msra.gmra.mxu0 %vm2025_vm3, %v3166_v45  ;;  %v3094_v14 = vpop.permute.xlu1 %3093  ;;  %v3092_v52 = vpop.permute.xlu0 %3091 }
 0x4be   : >> { %8389 = vmatprep.mubr.msk.f32.mxu0 %vm9440_vm5, %v9439_v13  ;;  %3098 = vst.msk [vmem:[#allocation3 + $0x58] sm:$0x3] %vm2084_vm4, %v3094_v14 }
 0x4bf   : >> { %3097 = vst.msk [vmem:[#allocation3 + $0x20] sm:$0xff] %vm2082_vm0, %v3092_v52 }
 0x4c1   : >> { %v3158_v41 = vld [vmem:[#allocation3 + $0x60] sm:$0x3] }
 0x4c2   : >> { %v3151_v15 = vld [vmem:[#allocation3 + $0x28] sm:$0xff] }
 0x4c3   : >> { %v3165_v16 = vpack.c.bf16 %v3158_v41, %v3151_v15 }
 0x4c5   : >> { %3691 = vmatprep.mubr.bf16.mxu1 %v3165_v16  ;;  %v3157_v35 = vld [vmem:[#allocation3 + $0x58] sm:$0x3] }
 0x4c6   : >> { %v3150_v23 = vld [vmem:[#allocation3 + $0x20] sm:$0xff] }
 0x4c7   : >> { %v3164_v18 = vpack.c.bf16 %v3157_v35, %v3150_v23 }
 0x4c9   : >> { %3692 = vmatmul.mubr.bf16.vlgmr.msra.gmra.mxu1 %v3164_v18 }
 0x4ca   : >> { %8396 = vmatprep.mubr.msk.f32.mxu1 %vm9440_vm5, %v9439_v13 }
 0x511   : >> { %v7971_v21 = vpop.f32.mrf.mxu1 }
 0x513   : >> { %v7972_v62 = vpop.f32.mrf.mxu1 }
 0x514   : >> { %v7973_v42 = vadd.f32 %v7972_v62, %v7971_v21 }
 0x515   : >> { %v7974_v22 = vpop.f32.mrf.mxu1 }
 0x517   : >> { %v7975_v48 = vpop.f32.mrf.mxu1 }
 0x518   : >> { %v7976_v49 = vadd.f32 %v7975_v48, %v7974_v22 }
 0x519   : >> { %v2890_v26 = vpop.f32.mrf.mxu1 }
 0x51b   : >> { %v8375_v29 = vpop.f32.mrf.mxu1 }
 0x51d   : >> { %v2893_v30 = vpop.f32.mrf.mxu1 }
 0x51f   : >> { %v8376_v50 = vpop.f32.mrf.mxu1 }
 0x529   : >> { %v7949_v37 = vpop.f32.mrf.mxu0 }
 0x52b   : >> { %v7950_v34 = vpop.f32.mrf.mxu0 }
 0x52c   : >> { %v7951_v38 = vadd.f32 %v7950_v34, %v7949_v37  ;;  %v9121_v34 = vld [vmem:[%s12006_s5 + $0x38] sm:$0xff] (%p2031_p12)  }
 0x52d   : >> { %v7952_v43 = vpop.f32.mrf.mxu0 }
 0x52e   : >> { %v2768_v53 = vadd.f32 %v7951_v38, %v7134_v59  ;;  %v9124_v38 = vld [vmem:[%s12006_s5 + $0x70] sm:$0xff] (%p2031_p12)  }
 0x52f   : >> { %v7953_v17 = vpop.f32.mrf.mxu0 }
 0x530   : >> { %v7954_v7 = vadd.f32 %v7953_v17, %v7952_v43  ;;  %v2809_v60 = vadd.f32 %v7973_v42, %v2768_v53  ;;  %v9122_v43 = vld [vmem:[%s12006_s5 + $0x78] sm:$0xff] (%p2031_p12)   ;;  %v9126_v17 = vld [vmem:[%s12006_s5 + $0x68] sm:$0xff] (%p2031_p12)   ;;  %v9127_v53 = vld [vmem:[%s12006_s5 + $0x20] sm:$0xff] (%p2031_p12)  }
 0x532   : >> { %v2771_v40 = vadd.f32 %v7954_v7, %v7134_v59  ;;  %v9128_v7 = vld [vmem:[%s12006_s5 + $0x60] sm:$0xff] (%p2031_p12)  }
 0x534   : >> { %v2812_v63 = vadd.f32 %v7976_v49, %v2771_v40  ;;  %v12195_v49 = vld [vmem:[#allocation11_spill] sm:$0xff] }
 0x535   : > { %v9131_v40 = vld [vmem:[%s12006_s5 + $0x10] sm:$0xff] (%p2031_p12)  }
 0x549   : >> { %v7993_v25 = vpop.f32.mrf.mxu0 }
 0x54b   : >> { %v7994_v57 = vpop.f32.mrf.mxu0 }
 0x54c   : >> { %v7995_v61 = vadd.f32 %v7994_v57, %v7993_v25  ;;  %v9129_v25 = vld [vmem:[%s12006_s5 + $0x18] sm:$0xff] (%p2031_p12)  }
 0x54d   : >> { %v7996_v36 = vpop.f32.mrf.mxu0  ;;  %v9130_v57 = vld [vmem:[%s12006_s5 + $0x58] sm:$0xff] (%p2031_p12)  }
 0x54e   : >> { %v2850_v39 = vadd.f32 %v7995_v61, %v2809_v60  ;;  %v9132_v60 = vld [vmem:[%s12006_s5 + $0x50] sm:$0xff] (%p2031_p12)   ;;  %v9133_v61 = vld [vmem:[%s12006_s5 + $0x8] sm:$0xff] (%p2031_p12)  }
 0x54f   : >> { %v7997_v33 = vpop.f32.mrf.mxu0 }
 0x550   : >> { %v2891_v10 = vadd.f32 %v2890_v26, %v2850_v39  ;;  %v7998_v4 = vadd.f32 %v7997_v33, %v7996_v36  ;;  %v9134_v36 = vld [vmem:[%s12006_s5 + $0x48] sm:$0xff] (%p2031_p12)   ;;  %v9135_v39 = vld [vmem:[%s12006_s5] sm:$0xff] (%p2031_p12)  }
 0x551   : > { %v9136_v33 = vld [vmem:[%s12006_s5 + $0x40] sm:$0xff] (%p2031_p12)  }
 0x552   : >> { %v2853_v0 = vadd.f32 %v7998_v4, %v2812_v63  ;;  %v2897_v42 = vmax.f32 %v2891_v10, 0.0 }
 0x554   : >> { %v2894_v1 = vadd.f32 %v2893_v30, %v2853_v0  ;;  %v9137_v0 = vld [vmem:[%s12006_s5 + $0xb8] sm:$0xff] (%p2031_p12)  }
 0x556   : >> { %v2898_v18 = vmax.f32 %v2894_v1, 0.0 }
 0x559   : >> { %v8018_v27 = vpop.f32.mrf.mxu1 }
 0x55b   : >> { %v8019_v11 = vpop.f32.mrf.mxu1 }
 0x55c   : >> { %v8020_v55 = vadd.f32 %v8019_v11, %v8018_v27  ;;  %v9141_v27 = vld [vmem:[%s12006_s5 + $0xa8] sm:$0xff] (%p2031_p12)   ;;  %v9144_v11 = vld [vmem:[%s12006_s5 + $0xe0] sm:$0xff] (%p2031_p12)  }
 0x55d   : >> { %v8021_v5 = vpop.f32.mrf.mxu1 }
 0x55e   : >> { %v3612_v58 = vadd.f32 %v8020_v55, %v7134_v59  ;;  %v9149_v55 = vld [vmem:[%s12006_s5 + $0x88] sm:$0xff] (%p2031_p12)  }
 0x55f   : >> { %v8022_v31 = vpop.f32.mrf.mxu1 }
 0x560   : >> { %v8023_v12 = vadd.f32 %v8022_v31, %v8021_v5  ;;  %v9147_v5 = vld [vmem:[%s12006_s5 + $0x90] sm:$0xff] (%p2031_p12)   ;;  %v9150_v31 = vld [vmem:[%s12006_s5 + $0xc8] sm:$0xff] (%p2031_p12)  }
 0x562   : >> { %v3615_v56 = vadd.f32 %v8023_v12, %v7134_v59  ;;  %v9125_v59 = vld [vmem:[%s12006_s5 + $0x28] sm:$0xff] (%p2031_p12)  }
 0x575   : >> { %v8040_v32 = vpop.f32.mrf.mxu0 }
 0x577   : >> { %v8041_v3 = vpop.f32.mrf.mxu0 }
 0x578   : >> { %v8042_v6 = vadd.f32 %v8041_v3, %v8040_v32  ;;  %v9138_v32 = vld [vmem:[%s12006_s5 + $0xf8] sm:$0xff] (%p2031_p12)   ;;  %v9139_v3 = vld [vmem:[%s12006_s5 + $0xb0] sm:$0xff] (%p2031_p12)  }
 0x579   : >> { %v8043_v51 = vpop.f32.mrf.mxu0 }
 0x57a   : >> { %v3653_v9 = vadd.f32 %v8042_v6, %v3612_v58  ;;  %v9151_v6 = vld [vmem:[%s12006_s5 + $0x80] sm:$0xff] (%p2031_p12)  }
 0x57b   : >> { %v8044_v44 = vpop.f32.mrf.mxu0 }
 0x57c   : >> { %v8045_v54 = vadd.f32 %v8044_v44, %v8043_v51  ;;  %v9140_v51 = vld [vmem:[%s12006_s5 + $0xf0] sm:$0xff] (%p2031_p12)   ;;  %v9142_v44 = vld [vmem:[%s12006_s5 + $0xe8] sm:$0xff] (%p2031_p12)  }
 0x57d   : >> { %v3734_v19 = vpop.f32.mrf.mxu0 }
 0x57e   : >> { %v3656_v15 = vadd.f32 %v8045_v54, %v3615_v56  ;;  %v9156_v56 = vld [vmem:[%s12006_s5 + $0x170] sm:$0xff] (%p2031_p12)  }
 0x57f   : >> { %v8383_v24 = vpop.f32.mrf.mxu0 }
 0x580   : > { %v9145_v24 = vld [vmem:[%s12006_s5 + $0x98] sm:$0xff] (%p2031_p12)  }
 0x581   : >> { %v3737_v20 = vpop.f32.mrf.mxu0 }
 0x583   : >> { %v8384_v47 = vpop.f32.mrf.mxu0 }
 0x584   : > { %v9148_v47 = vld [vmem:[%s12006_s5 + $0xd0] sm:$0xff] (%p2031_p12)  }
 0x589   : >> { %v8062_v2 = vpop.f32.mrf.mxu1 }
 0x58b   : >> { %v8063_v28 = vpop.f32.mrf.mxu1 }
 0x58c   : >> { %v8064_v45 = vadd.f32 %v8063_v28, %v8062_v2  ;;  %v9152_v2 = vld [vmem:[%s12006_s5 + $0xc0] sm:$0xff] (%p2031_p12)  }
 0x58d   : >> { %v8065_v46 = vpop.f32.mrf.mxu1 }
 0x58e   : >> { %v3694_v14 = vadd.f32 %v8064_v45, %v3653_v9  ;;  %v9153_v9 = vld [vmem:[%s12006_s5 + $0x138] sm:$0xff] (%p2031_p12)  }
 0x58f   : >> { %v8066_v52 = vpop.f32.mrf.mxu1  ;;  %v9154_v45 = vld [vmem:[%s12006_s5 + $0x178] sm:$0xff] (%p2031_p12)  }
 0x590   : >> { %v8067_v41 = vadd.f32 %v8066_v52, %v8065_v46  ;;  %v3735_v16 = vadd.f32 %v3734_v19, %v3694_v14  ;;  %v9143_v19 = vld [vmem:[%s12006_s5 + $0xa0] sm:$0xff] (%p2031_p12)   ;;  %v9155_v46 = vld [vmem:[%s12006_s5 + $0x130] sm:$0xff] (%p2031_p12)   ;;  %v9157_v14 = vld [vmem:[%s12006_s5 + $0x128] sm:$0xff] (%p2031_p12)  }
 0x591   : > { %v9158_v52 = vld [vmem:[%s12006_s5 + $0x168] sm:$0xff] (%p2031_p12)  }
 0x592   : >> { %v3697_v23 = vadd.f32 %v8067_v41, %v3656_v15  ;;  %v3741_v21 = vmax.f32 %v3735_v16, 0.0  ;;  %v9159_v15 = vld [vmem:[%s12006_s5 + $0x120] sm:$0xff] (%p2031_p12)   ;;  %v9161_v16 = vld [vmem:[%s12006_s5 + $0x118] sm:$0xff] (%p2031_p12)  }
 0x593   : > { %v9160_v41 = vld [vmem:[%s12006_s5 + $0x160] sm:$0xff] (%p2031_p12)  }
 0x594   : >> { %v3738_v35 = vadd.f32 %v3737_v20, %v3697_v23  ;;  %v3743_v48 = vmax.f32 %v2897_v42, %v3741_v21  ;;  %v9146_v20 = vld [vmem:[%s12006_s5 + $0xd8] sm:$0xff] (%p2031_p12)   ;;  %v9165_v21 = vld [vmem:[%s12006_s5 + $0x108] sm:$0xff] (%p2031_p12)   ;;  %v9167_v42 = vld [vmem:[%s12006_s5 + $0x100] sm:$0xff] (%p2031_p12)  }
 0x595   : > { %v9162_v23 = vld [vmem:[%s12006_s5 + $0x158] sm:$0xff] (%p2031_p12)  }
 0x596   : >> { %v3742_v62 = vmax.f32 %v3738_v35, 0.0  ;;  %v9163_v35 = vld [vmem:[%s12006_s5 + $0x110] sm:$0xff] (%p2031_p12)  }
 0x598   : >> { %v3744_v22 = vmax.f32 %v2898_v18, %v3742_v62  ;;  %v9164_v18 = vld [vmem:[%s12006_s5 + $0x150] sm:$0xff] (%p2031_p12)   ;;  %v9166_v62 = vld [vmem:[%s12006_s5 + $0x148] sm:$0xff] (%p2031_p12)  }
 0x59a   : >> { %8386 = vmatpush3.msk.msra.mxu0 %vm12193_vm6, %v3744_v22  ;;  %8393 = vmatpush3.msk.msra.mxu1 %vm12194_vm7, %v3744_v22  ;;  %v9168_v22 = vld [vmem:[%s12006_s5 + $0x140] sm:$0xff] (%p2031_p12)  }
 0x59b   : >> { %8387 = vmatprep.subr.mxu0 %v9439_v13  ;;  %8394 = vmatprep.subr.mxu1 %v9439_v13  ;;  %v12196_v13 = vmov (%p2031_p12), 0.0  }
 0x59c   : >> { %8388 = vmatpush3.msra.mxu0 %v3743_v48  ;;  %8395 = vmatpush3.msra.mxu1 %v3743_v48 }
 0x59d   : >> { %8390 = vmatmul.mubr.msk.f32.vlgmr.msra.gmra.mxu0 %vm3745_vm8, %v9553_v8  ;;  %8397 = vmatmul.mubr.msk.f32.vlgmr.msra.gmra.mxu1 %vm3745_vm8, %v12195_v49  ;;  %v9123_v8 = vld [vmem:[%s12006_s5 + $0x30] sm:$0xff] (%p2031_p12)  }
 0x59e   : > { %8399 = vmatprep.subr.bf16.mxu0 (%p2031_p12), %v12196_v13  ;;  %8419 = vmatprep.subr.bf16.mxu1 (%p2031_p12), %v12196_v13 }
 0x59f   : > { %8415 = vmatprep.mubr.msk.bf16.mxu0 (%p2031_p12), %vm9441_vm9, %v12196_v13  ;;  %8435 = vmatprep.mubr.msk.bf16.mxu1 (%p2031_p12), %vm9441_vm9, %v12196_v13 }
 0x5a0   : > { %8400 = vmatpush3.bf16.msra.mxu0 (%p2031_p12), %v9121_v34  ;;  %8420 = vmatpush3.bf16.msra.mxu1 (%p2031_p12), %v9122_v43  ;;  %v9172_v34 = vld [vmem:[%s12006_s5 + $0x1f0] sm:$0xff] (%p2031_p12)   ;;  %v9173_v43 = vld [vmem:[%s12006_s5 + $0x1a8] sm:$0xff] (%p2031_p12)  }
 0x5a1   : > { %8401 = vmatprep.subr.bf16.mxu0 (%p2031_p12), %v12196_v13  ;;  %8421 = vmatprep.subr.bf16.mxu1 (%p2031_p12), %v12196_v13 }
 0x5a4   : > { %8402 = vmatpush3.bf16.msra.mxu0 (%p2031_p12), %v9123_v8  ;;  %8422 = vmatpush3.bf16.msra.mxu1 (%p2031_p12), %v9124_v38  ;;  %v9174_v8 = vld [vmem:[%s12006_s5 + $0x1e8] sm:$0xff] (%p2031_p12)   ;;  %v9175_v38 = vld [vmem:[%s12006_s5 + $0x1a0] sm:$0xff] (%p2031_p12)  }
 0x5a5   : > { %8403 = vmatprep.subr.bf16.mxu0 (%p2031_p12), %v12196_v13  ;;  %8423 = vmatprep.subr.bf16.mxu1 (%p2031_p12), %v12196_v13 }
 0x5a8   : > { %8404 = vmatpush3.bf16.msra.mxu0 (%p2031_p12), %v9125_v59  ;;  %8424 = vmatpush3.bf16.msra.mxu1 (%p2031_p12), %v9126_v17  ;;  %v9176_v59 = vld [vmem:[%s12006_s5 + $0x1e0] sm:$0xff] (%p2031_p12)   ;;  %v9177_v17 = vld [vmem:[%s12006_s5 + $0x198] sm:$0xff] (%p2031_p12)  }
 0x5a9   : > { %8405 = vmatprep.subr.bf16.mxu0 (%p2031_p12), %v12196_v13  ;;  %8425 = vmatprep.subr.bf16.mxu1 (%p2031_p12), %v12196_v13 }
 0x5ac   : > { %8406 = vmatpush3.bf16.msra.mxu0 (%p2031_p12), %v9127_v53  ;;  %8426 = vmatpush3.bf16.msra.mxu1 (%p2031_p12), %v9128_v7  ;;  %v9178_v53 = vld [vmem:[%s12006_s5 + $0x1d8] sm:$0xff] (%p2031_p12)   ;;  %v9179_v7 = vld [vmem:[%s12006_s5 + $0x190] sm:$0xff] (%p2031_p12)  }
 0x5ad   : > { %8407 = vmatprep.subr.bf16.mxu0 (%p2031_p12), %v12196_v13  ;;  %8427 = vmatprep.subr.bf16.mxu1 (%p2031_p12), %v12196_v13 }
 0x5b0   : > { %8408 = vmatpush3.bf16.msra.mxu0 (%p2031_p12), %v9129_v25  ;;  %8428 = vmatpush3.bf16.msra.mxu1 (%p2031_p12), %v9130_v57  ;;  %v9180_v25 = vld [vmem:[%s12006_s5 + $0x1d0] sm:$0xff] (%p2031_p12)   ;;  %v9181_v57 = vld [vmem:[%s12006_s5 + $0x188] sm:$0xff] (%p2031_p12)  }
 0x5b1   : > { %8409 = vmatprep.subr.bf16.mxu0 (%p2031_p12), %v12196_v13  ;;  %8429 = vmatprep.subr.bf16.mxu1 (%p2031_p12), %v12196_v13 }
 0x5b4   : > { %8410 = vmatpush3.bf16.msra.mxu0 (%p2031_p12), %v9131_v40  ;;  %8430 = vmatpush3.bf16.msra.mxu1 (%p2031_p12), %v9132_v60  ;;  %v9182_v40 = vld [vmem:[%s12006_s5 + $0x1c8] sm:$0xff] (%p2031_p12)   ;;  %v9183_v60 = vld [vmem:[%s12006_s5 + $0x180] sm:$0xff] (%p2031_p12)  }
 0x5b5   : > { %8411 = vmatprep.subr.bf16.mxu0 (%p2031_p12), %v12196_v13  ;;  %8431 = vmatprep.subr.bf16.mxu1 (%p2031_p12), %v12196_v13 }
 0x5b8   : > { %8412 = vmatpush3.bf16.msra.mxu0 (%p2031_p12), %v9133_v61  ;;  %8432 = vmatpush3.bf16.msra.mxu1 (%p2031_p12), %v9134_v36  ;;  %v9184_v61 = vld [vmem:[%s12006_s5 + $0x1c0] sm:$0xff] (%p2031_p12)  }
 0x5b9   : > { %8413 = vmatprep.subr.bf16.mxu0 (%p2031_p12), %v12196_v13  ;;  %8433 = vmatprep.subr.bf16.mxu1 (%p2031_p12), %v12196_v13 }
 0x5bc   : > { %8414 = vmatpush3.bf16.msra.mxu0 (%p2031_p12), %v9135_v39  ;;  %8434 = vmatpush3.bf16.msra.mxu1 (%p2031_p12), %v9136_v33 }
 0x5bd   : > { %8439 = vmatprep.subr.bf16.mxu0 (%p2031_p12), %v12196_v13  ;;  %8459 = vmatprep.subr.bf16.mxu1 (%p2031_p12), %v12196_v13 }
 0x65c   : > { %2033 = sbr.rel (!%p2031_p12) target bundleno = 952 (0x3b8), region = 158 }
 0x65d   : >> { %v3819_v26 = vpop.f32.mrf.mxu0  ;;  %v3892_v29 = vpop.f32.mrf.mxu1 }
 0x65e   : >> { %v3896_v30 = vmax.f32 %v3819_v26, %v3892_v29  ;;  %v9169_v29 = vld [vmem:[%s12006_s5 + $0x1b8] sm:$0xff] (%p2031_p12)  }
 0x65f   : >> { %v8391_v50 = vpop.f32.mrf.mxu0  ;;  %v8398_v37 = vpop.f32.mrf.mxu1 }
 0x660   : >> { %3899 = vst [vmem:[%s3898_s0] sm:$0x1f] %v3896_v30  ;;  %v9170_v50 = vld [vmem:[%s12006_s5 + $0x1f8] sm:$0xff] (%p2031_p12)   ;;  %v9171_v37 = vld [vmem:[%s12006_s5 + $0x1b0] sm:$0xff] (%p2031_p12)  }
 0x667   : > { %v3901_v10 = vld [vmem:[#allocation5] sm:$0x1]  ;;  %v4008_v63 = vld [vmem:[#allocation5 + $0x1] sm:$0x1]  ;;  %v4116_v58 = vld [vmem:[#allocation5 + $0x2] sm:$0x1] }
 0x668   : > { %v3902_v4 = vpack.c.bf16 %v3901_v10, %v3901_v10  ;;  %v4009_v1 = vpack.c.bf16 %v4008_v63, %v4008_v63  ;;  %v4224_v12 = vld [vmem:[#allocation5 + $0x3] sm:$0x1]  ;;  %v4117_v28 = vpack.c.bf16 %v4116_v58, %v4116_v58  ;;  %v4332_v48 = vld [vmem:[#allocation5 + $0x4] sm:$0x1]  ;;  %v4441_v49 = vld [vmem:[#allocation5 + $0x8] sm:$0x1] }
 0x669   : > { %v4225_v54 = vpack.c.bf16 %v4224_v12, %v4224_v12  ;;  %v4333_v26 = vpack.c.bf16 %v4332_v48, %v4332_v48  ;;  %v4442_v30 = vpack.c.bf16 %v4441_v49, %v4441_v49  ;;  %v4549_v36 = vld [vmem:[#allocation5 + $0x9] sm:$0x1]  ;;  %v4657_v39 = vld [vmem:[#allocation5 + $0xa] sm:$0x1] }
 0x66a   : > { %8416 = vmatmul.mubr.bf16.vlgmr.msra.gmra.mxu0 %v3902_v4  ;;  %8436 = vmatmul.mubr.bf16.vlgmr.msra.gmra.mxu1 %v4009_v1  ;;  %v4550_v33 = vpack.c.bf16 %v4549_v36, %v4549_v36  ;;  %v9185_v10 = vld [vmem:[%s12006_s5 + $0x238] sm:$0xff]   ;;  %v4658_v63 = vpack.c.bf16 %v4657_v39, %v4657_v39  ;;  %v9188_v1 = vld [vmem:[%s12006_s5 + $0x270] sm:$0xff]  }
 0x66b   : > { %8440 = vmatpush3.bf16.msra.mxu0 %v9137_v0  ;;  %8460 = vmatpush3.bf16.msra.mxu1 %v9138_v32  ;;  %v9186_v4 = vld [vmem:[%s12006_s5 + $0x278] sm:$0xff]   ;;  %v9187_v0 = vld [vmem:[%s12006_s5 + $0x230] sm:$0xff]   ;;  %v9189_v32 = vld [vmem:[%s12006_s5 + $0x228] sm:$0xff]  }
 0x66c   : > { %8441 = vmatprep.subr.bf16.mxu0 %v12196_v13  ;;  %8461 = vmatprep.subr.bf16.mxu1 %v12196_v13  ;;  %v9201_v58 = vld [vmem:[%s12006_s5 + $0x2b8] sm:$0xff]  }
 0x66d   : > { %8455 = vmatprep.mubr.msk.bf16.mxu0 %vm9441_vm9, %v12196_v13  ;;  %8475 = vmatprep.mubr.msk.bf16.mxu1 %vm9441_vm9, %v12196_v13  ;;  %v9217_v48 = vld [vmem:[%s12006_s5 + $0x338] sm:$0xff]  }
 0x66e   : > { %v9233_v36 = vld [vmem:[%s12006_s5 + $0x3b8] sm:$0xff]  }
 0x66f   : > { %8442 = vmatpush3.bf16.msra.mxu0 %v9139_v3  ;;  %8462 = vmatpush3.bf16.msra.mxu1 %v9140_v51  ;;  %v9190_v3 = vld [vmem:[%s12006_s5 + $0x268] sm:$0xff]   ;;  %v9191_v51 = vld [vmem:[%s12006_s5 + $0x220] sm:$0xff]  }
 0x670   : > { %8443 = vmatprep.subr.bf16.mxu0 %v12196_v13  ;;  %8463 = vmatprep.subr.bf16.mxu1 %v12196_v13 }
 0x673   : > { %8444 = vmatpush3.bf16.msra.mxu0 %v9141_v27  ;;  %8464 = vmatpush3.bf16.msra.mxu1 %v9142_v44  ;;  %v9192_v27 = vld [vmem:[%s12006_s5 + $0x260] sm:$0xff]   ;;  %v9193_v44 = vld [vmem:[%s12006_s5 + $0x218] sm:$0xff]  }
 0x674   : > { %8445 = vmatprep.subr.bf16.mxu0 %v12196_v13  ;;  %8465 = vmatprep.subr.bf16.mxu1 %v12196_v13 }
 0x677   : > { %8446 = vmatpush3.bf16.msra.mxu0 %v9143_v19  ;;  %8466 = vmatpush3.bf16.msra.mxu1 %v9144_v11  ;;  %v9194_v19 = vld [vmem:[%s12006_s5 + $0x258] sm:$0xff]   ;;  %v9195_v11 = vld [vmem:[%s12006_s5 + $0x210] sm:$0xff]  }
 0x678   : > { %8447 = vmatprep.subr.bf16.mxu0 %v12196_v13  ;;  %8467 = vmatprep.subr.bf16.mxu1 %v12196_v13 }
 0x67b   : > { %8448 = vmatpush3.bf16.msra.mxu0 %v9145_v24  ;;  %8468 = vmatpush3.bf16.msra.mxu1 %v9146_v20  ;;  %v9196_v24 = vld [vmem:[%s12006_s5 + $0x250] sm:$0xff]   ;;  %v9197_v20 = vld [vmem:[%s12006_s5 + $0x208] sm:$0xff]  }
 0x67c   : > { %8449 = vmatprep.subr.bf16.mxu0 %v12196_v13  ;;  %8469 = vmatprep.subr.bf16.mxu1 %v12196_v13 }
 0x67f   : > { %8450 = vmatpush3.bf16.msra.mxu0 %v9147_v5  ;;  %8470 = vmatpush3.bf16.msra.mxu1 %v9148_v47  ;;  %v9198_v5 = vld [vmem:[%s12006_s5 + $0x248] sm:$0xff]   ;;  %v9199_v47 = vld [vmem:[%s12006_s5 + $0x200] sm:$0xff]  }
 0x680   : > { %8451 = vmatprep.subr.bf16.mxu0 %v12196_v13  ;;  %8471 = vmatprep.subr.bf16.mxu1 %v12196_v13 }
 0x683   : > { %8452 = vmatpush3.bf16.msra.mxu0 %v9149_v55  ;;  %8472 = vmatpush3.bf16.msra.mxu1 %v9150_v31  ;;  %v9200_v55 = vld [vmem:[%s12006_s5 + $0x240] sm:$0xff]   ;;  %v4765_v31 = vld [vmem:[#allocation5 + $0xb] sm:$0x1] }
 0x684   : > { %8453 = vmatprep.subr.bf16.mxu0 %v12196_v13  ;;  %8473 = vmatprep.subr.bf16.mxu1 %v12196_v13 }
 0x687   : > { %8454 = vmatpush3.bf16.msra.mxu0 %v9151_v6  ;;  %8474 = vmatpush3.bf16.msra.mxu1 %v9152_v2  ;;  %v4873_v6 = vld [vmem:[#allocation5 + $0xc] sm:$0x1]  ;;  %v4766_v2 = vpack.c.bf16 %v4765_v31, %v4765_v31 }
 0x688   : > { %8479 = vmatprep.subr.bf16.mxu0 %v12196_v13  ;;  %8499 = vmatprep.subr.bf16.mxu1 %v12196_v13  ;;  %v4874_v12 = vpack.c.bf16 %v4873_v6, %v4873_v6  ;;  %v9241_v31 = vld [vmem:[%s12006_s5 + $0x398] sm:$0xff]  }
 0x689   : > { %v9242_v6 = vld [vmem:[%s12006_s5 + $0x3d8] sm:$0xff]  }
 0x68a   : > { %8456 = vmatmul.mubr.bf16.vlgmr.msra.gmra.mxu0 %v4117_v28  ;;  %8476 = vmatmul.mubr.bf16.vlgmr.msra.gmra.mxu1 %v4225_v54  ;;  %v9202_v28 = vld [vmem:[%s12006_s5 + $0x2f8] sm:$0xff]   ;;  %v9204_v54 = vld [vmem:[%s12006_s5 + $0x2f0] sm:$0xff]  }
 0x68b   : > { %8480 = vmatpush3.bf16.msra.mxu0 %v9153_v9  ;;  %8500 = vmatpush3.bf16.msra.mxu1 %v9154_v45  ;;  %v9203_v9 = vld [vmem:[%s12006_s5 + $0x2b0] sm:$0xff]   ;;  %v9205_v45 = vld [vmem:[%s12006_s5 + $0x2a8] sm:$0xff]  }
 0x68c   : > { %8481 = vmatprep.subr.bf16.mxu0 %v12196_v13  ;;  %8501 = vmatprep.subr.bf16.mxu1 %v12196_v13 }
 0x68d   : > { %8495 = vmatprep.mubr.msk.bf16.mxu0 %vm9441_vm9, %v12196_v13  ;;  %8515 = vmatprep.mubr.msk.bf16.mxu1 %vm9441_vm9, %v12196_v13 }
 0x68f   : > { %8482 = vmatpush3.bf16.msra.mxu0 %v9155_v46  ;;  %8502 = vmatpush3.bf16.msra.mxu1 %v9156_v56  ;;  %v9206_v46 = vld [vmem:[%s12006_s5 + $0x2e8] sm:$0xff]   ;;  %v9207_v56 = vld [vmem:[%s12006_s5 + $0x2a0] sm:$0xff]  }
 0x690   : > { %8483 = vmatprep.subr.bf16.mxu0 %v12196_v13  ;;  %8503 = vmatprep.subr.bf16.mxu1 %v12196_v13 }
 0x693   : > { %8484 = vmatpush3.bf16.msra.mxu0 %v9157_v14  ;;  %8504 = vmatpush3.bf16.msra.mxu1 %v9158_v52  ;;  %v9208_v14 = vld [vmem:[%s12006_s5 + $0x2e0] sm:$0xff]   ;;  %v9209_v52 = vld [vmem:[%s12006_s5 + $0x298] sm:$0xff]  }
 0x694   : > { %8485 = vmatprep.subr.bf16.mxu0 %v12196_v13  ;;  %8505 = vmatprep.subr.bf16.mxu1 %v12196_v13 }
 0x697   : > { %8486 = vmatpush3.bf16.msra.mxu0 %v9159_v15  ;;  %8506 = vmatpush3.bf16.msra.mxu1 %v9160_v41  ;;  %v9210_v15 = vld [vmem:[%s12006_s5 + $0x2d8] sm:$0xff]   ;;  %v9211_v41 = vld [vmem:[%s12006_s5 + $0x290] sm:$0xff]  }
 0x698   : > { %8487 = vmatprep.subr.bf16.mxu0 %v12196_v13  ;;  %8507 = vmatprep.subr.bf16.mxu1 %v12196_v13 }
 0x69b   : > { %8488 = vmatpush3.bf16.msra.mxu0 %v9161_v16  ;;  %8508 = vmatpush3.bf16.msra.mxu1 %v9162_v23  ;;  %v9212_v16 = vld [vmem:[%s12006_s5 + $0x2d0] sm:$0xff]   ;;  %v9213_v23 = vld [vmem:[%s12006_s5 + $0x288] sm:$0xff]  }
 0x69c   : > { %8489 = vmatprep.subr.bf16.mxu0 %v12196_v13  ;;  %8509 = vmatprep.subr.bf16.mxu1 %v12196_v13 }
 0x69f   : > { %8490 = vmatpush3.bf16.msra.mxu0 %v9163_v35  ;;  %8510 = vmatpush3.bf16.msra.mxu1 %v9164_v18  ;;  %v9214_v35 = vld [vmem:[%s12006_s5 + $0x2c8] sm:$0xff]   ;;  %v9215_v18 = vld [vmem:[%s12006_s5 + $0x280] sm:$0xff]  }
 0x6a0   : > { %8491 = vmatprep.subr.bf16.mxu0 %v12196_v13  ;;  %8511 = vmatprep.subr.bf16.mxu1 %v12196_v13 }
 0x6a3   : > { %8492 = vmatpush3.bf16.msra.mxu0 %v9165_v21  ;;  %8512 = vmatpush3.bf16.msra.mxu1 %v9166_v62  ;;  %v9216_v21 = vld [vmem:[%s12006_s5 + $0x2c0] sm:$0xff]  }
 0x6a4   : > { %8493 = vmatprep.subr.bf16.mxu0 %v12196_v13  ;;  %8513 = vmatprep.subr.bf16.mxu1 %v12196_v13  ;;  %v4982_v62 = vld [vmem:[#allocation5 + $0x10] sm:$0x1] }
 0x6a7   : > { %8494 = vmatpush3.bf16.msra.mxu0 %v9167_v42  ;;  %8514 = vmatpush3.bf16.msra.mxu1 %v9168_v22  ;;  %v5090_v42 = vld [vmem:[#allocation5 + $0x11] sm:$0x1]  ;;  %v4983_v22 = vpack.c.bf16 %v4982_v62, %v4982_v62 }
 0x6a8   : > { %8519 = vmatprep.subr.bf16.mxu0 %v12196_v13  ;;  %8539 = vmatprep.subr.bf16.mxu1 %v12196_v13  ;;  %v5091_v49 = vpack.c.bf16 %v5090_v42, %v5090_v42 }
 0x6aa   : > { %8496 = vmatmul.mubr.bf16.vlgmr.msra.gmra.mxu0 %v4333_v26  ;;  %8516 = vmatmul.mubr.bf16.vlgmr.msra.gmra.mxu1 %v4442_v30  ;;  %v9218_v26 = vld [vmem:[%s12006_s5 + $0x378] sm:$0xff]   ;;  %v9220_v30 = vld [vmem:[%s12006_s5 + $0x370] sm:$0xff]  }
 0x6ab   : > { %8520 = vmatpush3.bf16.msra.mxu0 %v9169_v29  ;;  %8540 = vmatpush3.bf16.msra.mxu1 %v9170_v50  ;;  %v9219_v29 = vld [vmem:[%s12006_s5 + $0x330] sm:$0xff]   ;;  %v9221_v50 = vld [vmem:[%s12006_s5 + $0x328] sm:$0xff]  }
 0x6ac   : > { %8521 = vmatprep.subr.bf16.mxu0 %v12196_v13  ;;  %8541 = vmatprep.subr.bf16.mxu1 %v12196_v13 }
 0x6ad   : > { %8535 = vmatprep.mubr.msk.bf16.mxu0 %vm9441_vm9, %v12196_v13  ;;  %8555 = vmatprep.mubr.msk.bf16.mxu1 %vm9441_vm9, %v12196_v13 }
 0x6af   : > { %8522 = vmatpush3.bf16.msra.mxu0 %v9171_v37  ;;  %8542 = vmatpush3.bf16.msra.mxu1 %v9172_v34  ;;  %v9222_v37 = vld [vmem:[%s12006_s5 + $0x368] sm:$0xff]   ;;  %v9223_v34 = vld [vmem:[%s12006_s5 + $0x320] sm:$0xff]  }
 0x6b0   : > { %8523 = vmatprep.subr.bf16.mxu0 %v12196_v13  ;;  %8543 = vmatprep.subr.bf16.mxu1 %v12196_v13 }
 0x6b3   : > { %8524 = vmatpush3.bf16.msra.mxu0 %v9173_v43  ;;  %8544 = vmatpush3.bf16.msra.mxu1 %v9174_v8  ;;  %v9224_v43 = vld [vmem:[%s12006_s5 + $0x360] sm:$0xff]   ;;  %v9225_v8 = vld [vmem:[%s12006_s5 + $0x318] sm:$0xff]  }
 0x6b4   : > { %8525 = vmatprep.subr.bf16.mxu0 %v12196_v13  ;;  %8545 = vmatprep.subr.bf16.mxu1 %v12196_v13 }
 0x6b7   : > { %8526 = vmatpush3.bf16.msra.mxu0 %v9175_v38  ;;  %8546 = vmatpush3.bf16.msra.mxu1 %v9176_v59  ;;  %v9226_v38 = vld [vmem:[%s12006_s5 + $0x358] sm:$0xff]   ;;  %v9227_v59 = vld [vmem:[%s12006_s5 + $0x310] sm:$0xff]  }
 0x6b8   : > { %8527 = vmatprep.subr.bf16.mxu0 %v12196_v13  ;;  %8547 = vmatprep.subr.bf16.mxu1 %v12196_v13 }
 0x6bb   : > { %8528 = vmatpush3.bf16.msra.mxu0 %v9177_v17  ;;  %8548 = vmatpush3.bf16.msra.mxu1 %v9178_v53  ;;  %v9228_v17 = vld [vmem:[%s12006_s5 + $0x350] sm:$0xff]   ;;  %v9229_v53 = vld [vmem:[%s12006_s5 + $0x308] sm:$0xff]  }
 0x6bc   : > { %8529 = vmatprep.subr.bf16.mxu0 %v12196_v13  ;;  %8549 = vmatprep.subr.bf16.mxu1 %v12196_v13 }
 0x6bf   : > { %8530 = vmatpush3.bf16.msra.mxu0 %v9179_v7  ;;  %8550 = vmatpush3.bf16.msra.mxu1 %v9180_v25  ;;  %v9230_v7 = vld [vmem:[%s12006_s5 + $0x348] sm:$0xff]   ;;  %v9231_v25 = vld [vmem:[%s12006_s5 + $0x300] sm:$0xff]  }
 0x6c0   : > { %8531 = vmatprep.subr.bf16.mxu0 %v12196_v13  ;;  %8551 = vmatprep.subr.bf16.mxu1 %v12196_v13 }
 0x6c3   : > { %8532 = vmatpush3.bf16.msra.mxu0 %v9181_v57  ;;  %8552 = vmatpush3.bf16.msra.mxu1 %v9182_v40  ;;  %v5198_v57 = vld [vmem:[#allocation5 + $0x12] sm:$0x1] }
 0x6c4   : > { %8533 = vmatprep.subr.bf16.mxu0 %v12196_v13  ;;  %8553 = vmatprep.subr.bf16.mxu1 %v12196_v13  ;;  %v9232_v40 = vld [vmem:[%s12006_s5 + $0x340] sm:$0xff]  }
 0x6c7   : > { %8534 = vmatpush3.bf16.msra.mxu0 %v9183_v60  ;;  %8554 = vmatpush3.bf16.msra.mxu1 %v9184_v61  ;;  %v5306_v60 = vld [vmem:[#allocation5 + $0x13] sm:$0x1]  ;;  %v5199_v61 = vpack.c.bf16 %v5198_v57, %v5198_v57  ;;  %v5739_v57 = vld [vmem:[#allocation5 + $0x1a] sm:$0x1] }
 0x6c8   : > { %8559 = vmatprep.subr.bf16.mxu0 %v12196_v13  ;;  %8579 = vmatprep.subr.bf16.mxu1 %v12196_v13  ;;  %v5307_v39 = vpack.c.bf16 %v5306_v60, %v5306_v60  ;;  %v9265_v60 = vld [vmem:[%s12006_s5 + $0x4b8] sm:$0xff]  }
 0x6ca   : > { %8536 = vmatmul.mubr.bf16.vlgmr.msra.gmra.mxu0 %v4550_v33  ;;  %8556 = vmatmul.mubr.bf16.vlgmr.msra.gmra.mxu1 %v4658_v63  ;;  %v3900_v33 = vld [vmem:[%s12007_s6] sm:$0x1] }
 0x6cb   : > { %8560 = vmatpush3.bf16.msra.mxu0 %v9185_v10  ;;  %8580 = vmatpush3.bf16.msra.mxu1 %v9186_v4  ;;  %v9234_v10 = vld [vmem:[%s12006_s5 + $0x3f8] sm:$0xff]  }
 0x6cc   : > { %8561 = vmatprep.subr.bf16.mxu0 %v12196_v13  ;;  %8581 = vmatprep.subr.bf16.mxu1 %v12196_v13 }
 0x6cd   : > { %8575 = vmatprep.mubr.msk.bf16.mxu0 %vm9441_vm9, %v12196_v13  ;;  %8595 = vmatprep.mubr.msk.bf16.mxu1 %vm9441_vm9, %v12196_v13 }
 0x6cf   : > { %8562 = vmatpush3.bf16.msra.mxu0 %v9187_v0  ;;  %8582 = vmatpush3.bf16.msra.mxu1 %v9188_v1  ;;  %v9235_v1 = vld [vmem:[%s12006_s5 + $0x3b0] sm:$0xff]  }
 0x6d0   : > { %8563 = vmatprep.subr.bf16.mxu0 %v12196_v13  ;;  %8583 = vmatprep.subr.bf16.mxu1 %v12196_v13 }
 0x6d3   : > { %8564 = vmatpush3.bf16.msra.mxu0 %v9189_v32  ;;  %8584 = vmatpush3.bf16.msra.mxu1 %v9190_v3  ;;  %v9236_v3 = vld [vmem:[%s12006_s5 + $0x3f0] sm:$0xff]  }
 0x6d4   : > { %8565 = vmatprep.subr.bf16.mxu0 %v12196_v13  ;;  %8585 = vmatprep.subr.bf16.mxu1 %v12196_v13 }
 0x6d7   : > { %8566 = vmatpush3.bf16.msra.mxu0 %v9191_v51  ;;  %8586 = vmatpush3.bf16.msra.mxu1 %v9192_v27 }
 0x6d8   : > { %8567 = vmatprep.subr.bf16.mxu0 %v12196_v13  ;;  %8587 = vmatprep.subr.bf16.mxu1 %v12196_v13 }
 0x6db   : > { %8568 = vmatpush3.bf16.msra.mxu0 %v9193_v44  ;;  %8588 = vmatpush3.bf16.msra.mxu1 %v9194_v19  ;;  %v9237_v19 = vld [vmem:[%s12006_s5 + $0x3a8] sm:$0xff]  }
 0x6dc   : > { %8569 = vmatprep.subr.bf16.mxu0 %v12196_v13  ;;  %8589 = vmatprep.subr.bf16.mxu1 %v12196_v13 }
 0x6df   : > { %8570 = vmatpush3.bf16.msra.mxu0 %v9195_v11  ;;  %8590 = vmatpush3.bf16.msra.mxu1 %v9196_v24 }
 0x6e0   : > { %8571 = vmatprep.subr.bf16.mxu0 %v12196_v13  ;;  %8591 = vmatprep.subr.bf16.mxu1 %v12196_v13 }
 0x6e3   : > { %8572 = vmatpush3.bf16.msra.mxu0 %v9197_v20  ;;  %8592 = vmatpush3.bf16.msra.mxu1 %v9198_v5  ;;  %v9238_v20 = vld [vmem:[%s12006_s5 + $0x3e8] sm:$0xff]  }
 0x6e4   : > { %8573 = vmatprep.subr.bf16.mxu0 %v12196_v13  ;;  %8593 = vmatprep.subr.bf16.mxu1 %v12196_v13 }
 0x6e7   : > { %8574 = vmatpush3.bf16.msra.mxu0 %v9199_v47  ;;  %8594 = vmatpush3.bf16.msra.mxu1 %v9200_v55  ;;  %v9239_v47 = vld [vmem:[%s12006_s5 + $0x3a0] sm:$0xff]  }
 0x6e8   : > { %8599 = vmatprep.subr.bf16.mxu0 %v12196_v13  ;;  %8619 = vmatprep.subr.bf16.mxu1 %v12196_v13  ;;  %v9240_v55 = vld [vmem:[%s12006_s5 + $0x3e0] sm:$0xff]  }
 0x6ea   : > { %8576 = vmatmul.mubr.bf16.vlgmr.msra.gmra.mxu0 %v4766_v2  ;;  %8596 = vmatmul.mubr.bf16.vlgmr.msra.gmra.mxu1 %v4874_v12  ;;  %v9243_v2 = vld [vmem:[%s12006_s5 + $0x390] sm:$0xff]   ;;  %v9245_v12 = vld [vmem:[%s12006_s5 + $0x388] sm:$0xff]  }
 0x6eb   : > { %8600 = vmatpush3.bf16.msra.mxu0 %v9201_v58  ;;  %8620 = vmatpush3.bf16.msra.mxu1 %v9202_v28  ;;  %v9244_v58 = vld [vmem:[%s12006_s5 + $0x3d0] sm:$0xff]   ;;  %v9246_v28 = vld [vmem:[%s12006_s5 + $0x3c8] sm:$0xff]  }
 0x6ec   : > { %8601 = vmatprep.subr.bf16.mxu0 %v12196_v13  ;;  %8621 = vmatprep.subr.bf16.mxu1 %v12196_v13 }
 0x6ed   : > { %8615 = vmatprep.mubr.msk.bf16.mxu0 %vm9441_vm9, %v12196_v13  ;;  %8635 = vmatprep.mubr.msk.bf16.mxu1 %vm9441_vm9, %v12196_v13 }
 0x6ef   : > { %8602 = vmatpush3.bf16.msra.mxu0 %v9203_v9  ;;  %8622 = vmatpush3.bf16.msra.mxu1 %v9204_v54  ;;  %v9247_v9 = vld [vmem:[%s12006_s5 + $0x380] sm:$0xff]  }
 0x6f0   : > { %8603 = vmatprep.subr.bf16.mxu0 %v12196_v13  ;;  %8623 = vmatprep.subr.bf16.mxu1 %v12196_v13  ;;  %v5414_v54 = vld [vmem:[#allocation5 + $0x14] sm:$0x1] }
 0x6f3   : > { %8604 = vmatpush3.bf16.msra.mxu0 %v9205_v45  ;;  %8624 = vmatpush3.bf16.msra.mxu1 %v9206_v46  ;;  %v9248_v45 = vld [vmem:[%s12006_s5 + $0x3c0] sm:$0xff]   ;;  %v5523_v46 = vld [vmem:[#allocation5 + $0x18] sm:$0x1] }
 0x6f4   : > { %8605 = vmatprep.subr.bf16.mxu0 %v12196_v13  ;;  %8625 = vmatprep.subr.bf16.mxu1 %v12196_v13 }
 0x6f7   : > { %8606 = vmatpush3.bf16.msra.mxu0 %v9207_v56  ;;  %8626 = vmatpush3.bf16.msra.mxu1 %v9208_v14  ;;  %v5415_v56 = vpack.c.bf16 %v5414_v54, %v5414_v54  ;;  %v9249_v14 = vld [vmem:[%s12006_s5 + $0x438] sm:$0xff]  }
 0x6f8   : > { %8607 = vmatprep.subr.bf16.mxu0 %v12196_v13  ;;  %8627 = vmatprep.subr.bf16.mxu1 %v12196_v13 }
 0x6fb   : > { %8608 = vmatpush3.bf16.msra.mxu0 %v9209_v52  ;;  %8628 = vmatpush3.bf16.msra.mxu1 %v9210_v15  ;;  %v5524_v52 = vpack.c.bf16 %v5523_v46, %v5523_v46  ;;  %v9250_v15 = vld [vmem:[%s12006_s5 + $0x478] sm:$0xff]  }
 0x6fc   : > { %8609 = vmatprep.subr.bf16.mxu0 %v12196_v13  ;;  %8629 = vmatprep.subr.bf16.mxu1 %v12196_v13 }
 0x6ff   : > { %8610 = vmatpush3.bf16.msra.mxu0 %v9211_v41  ;;  %8630 = vmatpush3.bf16.msra.mxu1 %v9212_v16 }
 0x700   : > { %8611 = vmatprep.subr.bf16.mxu0 %v12196_v13  ;;  %8631 = vmatprep.subr.bf16.mxu1 %v12196_v13 }
 0x703   : > { %8612 = vmatpush3.bf16.msra.mxu0 %v9213_v23  ;;  %8632 = vmatpush3.bf16.msra.mxu1 %v9214_v35  ;;  %v9251_v35 = vld [vmem:[%s12006_s5 + $0x430] sm:$0xff]  }
 0x704   : > { %8613 = vmatprep.subr.bf16.mxu0 %v12196_v13  ;;  %8633 = vmatprep.subr.bf16.mxu1 %v12196_v13 }
 0x707   : > { %8614 = vmatpush3.bf16.msra.mxu0 %v9215_v18  ;;  %8634 = vmatpush3.bf16.msra.mxu1 %v9216_v21  ;;  %v9252_v21 = vld [vmem:[%s12006_s5 + $0x470] sm:$0xff]  }
 0x708   : > { %8639 = vmatprep.subr.bf16.mxu0 %v12196_v13  ;;  %8659 = vmatprep.subr.bf16.mxu1 %v12196_v13 }
 0x70a   : > { %8616 = vmatmul.mubr.bf16.vlgmr.msra.gmra.mxu0 %v4983_v22  ;;  %8636 = vmatmul.mubr.bf16.vlgmr.msra.gmra.mxu1 %v5091_v49 }
 0x70b   : > { %8640 = vmatpush3.bf16.msra.mxu0 %v9217_v48  ;;  %8660 = vmatpush3.bf16.msra.mxu1 %v9218_v26  ;;  %v9253_v48 = vld [vmem:[%s12006_s5 + $0x428] sm:$0xff]  }
 0x70c   : > { %8641 = vmatprep.subr.bf16.mxu0 %v12196_v13  ;;  %8661 = vmatprep.subr.bf16.mxu1 %v12196_v13 }
 0x70d   : > { %8655 = vmatprep.mubr.msk.bf16.mxu0 %vm9441_vm9, %v12196_v13  ;;  %8675 = vmatprep.mubr.msk.bf16.mxu1 %vm9441_vm9, %v12196_v13 }
 0x70f   : > { %8642 = vmatpush3.bf16.msra.mxu0 %v9219_v29  ;;  %8662 = vmatpush3.bf16.msra.mxu1 %v9220_v30  ;;  %v9254_v29 = vld [vmem:[%s12006_s5 + $0x468] sm:$0xff]  }
 0x710   : > { %8643 = vmatprep.subr.bf16.mxu0 %v12196_v13  ;;  %8663 = vmatprep.subr.bf16.mxu1 %v12196_v13 }
 0x713   : > { %8644 = vmatpush3.bf16.msra.mxu0 %v9221_v50  ;;  %8664 = vmatpush3.bf16.msra.mxu1 %v9222_v37  ;;  %v9255_v50 = vld [vmem:[%s12006_s5 + $0x420] sm:$0xff]  }
 0x714   : > { %8645 = vmatprep.subr.bf16.mxu0 %v12196_v13  ;;  %8665 = vmatprep.subr.bf16.mxu1 %v12196_v13  ;;  %v9256_v37 = vld [vmem:[%s12006_s5 + $0x460] sm:$0xff]  }
 0x717   : > { %8646 = vmatpush3.bf16.msra.mxu0 %v9223_v34  ;;  %8666 = vmatpush3.bf16.msra.mxu1 %v9224_v43  ;;  %v9257_v34 = vld [vmem:[%s12006_s5 + $0x418] sm:$0xff]  }
 0x718   : > { %8647 = vmatprep.subr.bf16.mxu0 %v12196_v13  ;;  %8667 = vmatprep.subr.bf16.mxu1 %v12196_v13  ;;  %v9258_v43 = vld [vmem:[%s12006_s5 + $0x458] sm:$0xff]  }
 0x71b   : > { %8648 = vmatpush3.bf16.msra.mxu0 %v9225_v8  ;;  %8668 = vmatpush3.bf16.msra.mxu1 %v9226_v38  ;;  %v9259_v8 = vld [vmem:[%s12006_s5 + $0x410] sm:$0xff]  }
 0x71c   : > { %8649 = vmatprep.subr.bf16.mxu0 %v12196_v13  ;;  %8669 = vmatprep.subr.bf16.mxu1 %v12196_v13  ;;  %v9260_v38 = vld [vmem:[%s12006_s5 + $0x450] sm:$0xff]  }
 0x71f   : > { %8650 = vmatpush3.bf16.msra.mxu0 %v9227_v59  ;;  %8670 = vmatpush3.bf16.msra.mxu1 %v9228_v17  ;;  %v9261_v59 = vld [vmem:[%s12006_s5 + $0x408] sm:$0xff]  }
 0x720   : > { %8651 = vmatprep.subr.bf16.mxu0 %v12196_v13  ;;  %8671 = vmatprep.subr.bf16.mxu1 %v12196_v13  ;;  %v9262_v17 = vld [vmem:[%s12006_s5 + $0x448] sm:$0xff]  }
 0x723   : > { %8652 = vmatpush3.bf16.msra.mxu0 %v9229_v53  ;;  %8672 = vmatpush3.bf16.msra.mxu1 %v9230_v7  ;;  %v9263_v53 = vld [vmem:[%s12006_s5 + $0x400] sm:$0xff]   ;;  %v5631_v7 = vld [vmem:[#allocation5 + $0x19] sm:$0x1] }
 0x724   : > { %8653 = vmatprep.subr.bf16.mxu0 %v12196_v13  ;;  %8673 = vmatprep.subr.bf16.mxu1 %v12196_v13 }
 0x727   : > { %8654 = vmatpush3.bf16.msra.mxu0 %v9231_v25  ;;  %8674 = vmatpush3.bf16.msra.mxu1 %v9232_v40  ;;  %v9264_v25 = vld [vmem:[%s12006_s5 + $0x440] sm:$0xff]   ;;  %v5632_v40 = vpack.c.bf16 %v5631_v7, %v5631_v7 }
 0x728   : > { %8679 = vmatprep.subr.bf16.mxu0 %v12196_v13  ;;  %8699 = vmatprep.subr.bf16.mxu1 %v12196_v13 }
 0x72a   : > { %v4001_v63 = vpop.f32.mrf.mxu0  ;;  %8656 = vmatmul.mubr.bf16.vlgmr.msra.gmra.mxu0 %v5199_v61  ;;  %8676 = vmatmul.mubr.bf16.vlgmr.msra.gmra.mxu1 %v5307_v39  ;;  %v4109_v0 = vpop.f32.mrf.mxu1  ;;  %v5740_v61 = vpack.c.bf16 %v5739_v57, %v5739_v57 }
 0x72b   : > { %v4007_v4 = vadd.f32 %v4001_v63, %v3900_v33  ;;  %8680 = vmatpush3.bf16.msra.mxu0 %v9233_v36  ;;  %8700 = vmatpush3.bf16.msra.mxu1 %v9234_v10  ;;  %v9266_v36 = vld [vmem:[%s12006_s5 + $0x4f8] sm:$0xff]   ;;  %v9267_v63 = vld [vmem:[%s12006_s5 + $0x4b0] sm:$0xff]  }
 0x72c   : > { %v8417_v32 = vpop.f32.mrf.mxu0  ;;  %8681 = vmatprep.subr.bf16.mxu0 %v12196_v13  ;;  %8701 = vmatprep.subr.bf16.mxu1 %v12196_v13  ;;  %v8437_v27 = vpop.f32.mrf.mxu1 }
 0x72d   : > { %v4115_v51 = vadd.f32 %v4109_v0, %v4007_v4  ;;  %8695 = vmatprep.mubr.msk.bf16.mxu0 %vm9441_vm9, %v12196_v13  ;;  %8715 = vmatprep.mubr.msk.bf16.mxu1 %vm9441_vm9, %v12196_v13  ;;  %v9268_v0 = vld [vmem:[%s12006_s5 + $0x4f0] sm:$0xff]  }
 0x72e   : > { %v4004_v44 = vpop.f32.mrf.mxu0  ;;  %v4112_v11 = vpop.f32.mrf.mxu1 }
 0x72f   : > { %8682 = vmatpush3.bf16.msra.mxu0 %v9235_v1  ;;  %8702 = vmatpush3.bf16.msra.mxu1 %v9236_v3 }
 0x730   : > { %v8418_v24 = vpop.f32.mrf.mxu0  ;;  %8683 = vmatprep.subr.bf16.mxu0 %v12196_v13  ;;  %8703 = vmatprep.subr.bf16.mxu1 %v12196_v13  ;;  %v8438_v5 = vpop.f32.mrf.mxu1 }
 0x731   : > { %v9271_v24 = vld [vmem:[%s12006_s5 + $0x4a0] sm:$0xff]   ;;  %v9273_v5 = vld [vmem:[%s12006_s5 + $0x498] sm:$0xff]  }
 0x733   : > { %8684 = vmatpush3.bf16.msra.mxu0 %v9237_v19  ;;  %8704 = vmatpush3.bf16.msra.mxu1 %v9238_v20  ;;  %v9270_v19 = vld [vmem:[%s12006_s5 + $0x4e8] sm:$0xff]   ;;  %v9272_v20 = vld [vmem:[%s12006_s5 + $0x4e0] sm:$0xff]  }
 0x734   : > { %8685 = vmatprep.subr.bf16.mxu0 %v12196_v13  ;;  %8705 = vmatprep.subr.bf16.mxu1 %v12196_v13 }
 0x737   : > { %8686 = vmatpush3.bf16.msra.mxu0 %v9239_v47  ;;  %8706 = vmatpush3.bf16.msra.mxu1 %v9240_v55  ;;  %v9274_v47 = vld [vmem:[%s12006_s5 + $0x4d8] sm:$0xff]   ;;  %v9275_v55 = vld [vmem:[%s12006_s5 + $0x490] sm:$0xff]  }
 0x738   : > { %8687 = vmatprep.subr.bf16.mxu0 %v12196_v13  ;;  %8707 = vmatprep.subr.bf16.mxu1 %v12196_v13 }
 0x73b   : > { %8688 = vmatpush3.bf16.msra.mxu0 %v9241_v31  ;;  %8708 = vmatpush3.bf16.msra.mxu1 %v9242_v6  ;;  %v9276_v31 = vld [vmem:[%s12006_s5 + $0x4d0] sm:$0xff]   ;;  %v9277_v6 = vld [vmem:[%s12006_s5 + $0x488] sm:$0xff]  }
 0x73c   : > { %8689 = vmatprep.subr.bf16.mxu0 %v12196_v13  ;;  %8709 = vmatprep.subr.bf16.mxu1 %v12196_v13 }
 0x73f   : > { %8690 = vmatpush3.bf16.msra.mxu0 %v9243_v2  ;;  %8710 = vmatpush3.bf16.msra.mxu1 %v9244_v58  ;;  %v9278_v2 = vld [vmem:[%s12006_s5 + $0x4c8] sm:$0xff]   ;;  %v9279_v58 = vld [vmem:[%s12006_s5 + $0x480] sm:$0xff]  }
 0x740   : > { %8691 = vmatprep.subr.bf16.mxu0 %v12196_v13  ;;  %8711 = vmatprep.subr.bf16.mxu1 %v12196_v13 }
 0x743   : > { %8692 = vmatpush3.bf16.msra.mxu0 %v9245_v12  ;;  %8712 = vmatpush3.bf16.msra.mxu1 %v9246_v28  ;;  %v5847_v12 = vld [vmem:[#allocation5 + $0x1b] sm:$0x1]  ;;  %v9280_v28 = vld [vmem:[%s12006_s5 + $0x4c0] sm:$0xff]  }
 0x744   : > { %8693 = vmatprep.subr.bf16.mxu0 %v12196_v13  ;;  %8713 = vmatprep.subr.bf16.mxu1 %v12196_v13  ;;  %v5848_v54 = vpack.c.bf16 %v5847_v12, %v5847_v12 }
 0x747   : > { %8694 = vmatpush3.bf16.msra.mxu0 %v9247_v9  ;;  %8714 = vmatpush3.bf16.msra.mxu1 %v9248_v45  ;;  %v5955_v9 = vld [vmem:[#allocation5 + $0x1c] sm:$0x1]  ;;  %v9281_v45 = vld [vmem:[%s12006_s5 + $0x538] sm:$0xff]  }
 0x748   : > { %8719 = vmatprep.subr.bf16.mxu0 %v12196_v13  ;;  %8739 = vmatprep.subr.bf16.mxu1 %v12196_v13  ;;  %v5956_v46 = vpack.c.bf16 %v5955_v9, %v5955_v9 }
 0x74a   : > { %v4217_v41 = vpop.f32.mrf.mxu0  ;;  %8696 = vmatmul.mubr.bf16.vlgmr.msra.gmra.mxu0 %v5415_v56  ;;  %v4325_v23 = vpop.f32.mrf.mxu1  ;;  %8716 = vmatmul.mubr.bf16.vlgmr.msra.gmra.mxu1 %v5524_v52  ;;  %v9282_v56 = vld [vmem:[%s12006_s5 + $0x578] sm:$0xff]  }
 0x74b   : > { %v4223_v16 = vadd.f32 %v4217_v41, %v4115_v51  ;;  %8720 = vmatpush3.bf16.msra.mxu0 %v9249_v14  ;;  %8740 = vmatpush3.bf16.msra.mxu1 %v9250_v15  ;;  %v9269_v51 = vld [vmem:[%s12006_s5 + $0x4a8] sm:$0xff]   ;;  %v9283_v41 = vld [vmem:[%s12006_s5 + $0x530] sm:$0xff]  }
 0x74c   : > { %v8457_v18 = vpop.f32.mrf.mxu0  ;;  %8721 = vmatprep.subr.bf16.mxu0 %v12196_v13  ;;  %8741 = vmatprep.subr.bf16.mxu1 %v12196_v13  ;;  %v8477_v42 = vpop.f32.mrf.mxu1 }
 0x74d   : > { %v4331_v62 = vadd.f32 %v4325_v23, %v4223_v16  ;;  %8735 = vmatprep.mubr.msk.bf16.mxu0 %vm9441_vm9, %v12196_v13  ;;  %8755 = vmatprep.mubr.msk.bf16.mxu1 %vm9441_vm9, %v12196_v13  ;;  %v9284_v23 = vld [vmem:[%s12006_s5 + $0x570] sm:$0xff]  }
 0x74e   : > { %v4220_v22 = vpop.f32.mrf.mxu0  ;;  %v4328_v49 = vpop.f32.mrf.mxu1 }
 0x74f   : > { %8722 = vmatpush3.bf16.msra.mxu0 %v9251_v35  ;;  %8742 = vmatpush3.bf16.msra.mxu1 %v9252_v21 }
 0x750   : > { %v8458_v26 = vpop.f32.mrf.mxu0  ;;  %8723 = vmatprep.subr.bf16.mxu0 %v12196_v13  ;;  %8743 = vmatprep.subr.bf16.mxu1 %v12196_v13  ;;  %v8478_v30 = vpop.f32.mrf.mxu1 }
 0x751   : > { %v9287_v26 = vld [vmem:[%s12006_s5 + $0x520] sm:$0xff]   ;;  %v9289_v30 = vld [vmem:[%s12006_s5 + $0x518] sm:$0xff]  }
 0x753   : > { %8724 = vmatpush3.bf16.msra.mxu0 %v9253_v48  ;;  %8744 = vmatpush3.bf16.msra.mxu1 %v9254_v29  ;;  %v9286_v48 = vld [vmem:[%s12006_s5 + $0x568] sm:$0xff]   ;;  %v9288_v29 = vld [vmem:[%s12006_s5 + $0x560] sm:$0xff]  }
 0x754   : > { %8725 = vmatprep.subr.bf16.mxu0 %v12196_v13  ;;  %8745 = vmatprep.subr.bf16.mxu1 %v12196_v13 }
 0x757   : > { %8726 = vmatpush3.bf16.msra.mxu0 %v9255_v50  ;;  %8746 = vmatpush3.bf16.msra.mxu1 %v9256_v37  ;;  %v9290_v50 = vld [vmem:[%s12006_s5 + $0x558] sm:$0xff]   ;;  %v9291_v37 = vld [vmem:[%s12006_s5 + $0x510] sm:$0xff]  }
 0x758   : > { %8727 = vmatprep.subr.bf16.mxu0 %v12196_v13  ;;  %8747 = vmatprep.subr.bf16.mxu1 %v12196_v13 }
 0x75b   : > { %8728 = vmatpush3.bf16.msra.mxu0 %v9257_v34  ;;  %8748 = vmatpush3.bf16.msra.mxu1 %v9258_v43  ;;  %v9292_v34 = vld [vmem:[%s12006_s5 + $0x550] sm:$0xff]   ;;  %v9293_v43 = vld [vmem:[%s12006_s5 + $0x508] sm:$0xff]  }
 0x75c   : > { %8729 = vmatprep.subr.bf16.mxu0 %v12196_v13  ;;  %8749 = vmatprep.subr.bf16.mxu1 %v12196_v13 }
 0x75f   : > { %8730 = vmatpush3.bf16.msra.mxu0 %v9259_v8  ;;  %8750 = vmatpush3.bf16.msra.mxu1 %v9260_v38  ;;  %v9294_v8 = vld [vmem:[%s12006_s5 + $0x548] sm:$0xff]   ;;  %v9295_v38 = vld [vmem:[%s12006_s5 + $0x500] sm:$0xff]  }
 0x760   : > { %8731 = vmatprep.subr.bf16.mxu0 %v12196_v13  ;;  %8751 = vmatprep.subr.bf16.mxu1 %v12196_v13 }
 0x763   : > { %8732 = vmatpush3.bf16.msra.mxu0 %v9261_v59  ;;  %8752 = vmatpush3.bf16.msra.mxu1 %v9262_v17  ;;  %v6064_v59 = vld [vmem:[#allocation5 + $0x20] sm:$0x1]  ;;  %v9296_v17 = vld [vmem:[%s12006_s5 + $0x540] sm:$0xff]  }
 0x764   : > { %8733 = vmatprep.subr.bf16.mxu0 %v12196_v13  ;;  %8753 = vmatprep.subr.bf16.mxu1 %v12196_v13  ;;  %v6065_v7 = vpack.c.bf16 %v6064_v59, %v6064_v59 }
 0x767   : > { %8734 = vmatpush3.bf16.msra.mxu0 %v9263_v53  ;;  %8754 = vmatpush3.bf16.msra.mxu1 %v9264_v25  ;;  %v6172_v53 = vld [vmem:[#allocation5 + $0x21] sm:$0x1]  ;;  %v9297_v25 = vld [vmem:[%s12006_s5 + $0x5b8] sm:$0xff]  }
 0x768   : > { %8759 = vmatprep.subr.bf16.mxu0 %v12196_v13  ;;  %8779 = vmatprep.subr.bf16.mxu1 %v12196_v13  ;;  %v6173_v57 = vpack.c.bf16 %v6172_v53, %v6172_v53 }
 0x76a   : > { %v4433_v39 = vpop.f32.mrf.mxu0  ;;  %8736 = vmatmul.mubr.bf16.vlgmr.msra.gmra.mxu0 %v5632_v40  ;;  %v4542_v10 = vpop.f32.mrf.mxu1  ;;  %8756 = vmatmul.mubr.bf16.vlgmr.msra.gmra.mxu1 %v5740_v61  ;;  %v9298_v40 = vld [vmem:[%s12006_s5 + $0x5f8] sm:$0xff]  }
 0x76b   : > { %v4439_v33 = vadd.f32 %v4433_v39, %v4331_v62  ;;  %8760 = vmatpush3.bf16.msra.mxu0 %v9265_v60  ;;  %8780 = vmatpush3.bf16.msra.mxu1 %v9266_v36  ;;  %v9285_v62 = vld [vmem:[%s12006_s5 + $0x528] sm:$0xff]   ;;  %v9299_v39 = vld [vmem:[%s12006_s5 + $0x5b0] sm:$0xff]  }
 0x76c   : > { %v8497_v4 = vpop.f32.mrf.mxu0  ;;  %8761 = vmatprep.subr.bf16.mxu0 %v12196_v13  ;;  %8781 = vmatprep.subr.bf16.mxu1 %v12196_v13  ;;  %v8517_v32 = vpop.f32.mrf.mxu1 }
 0x76d   : > { %v4548_v1 = vadd.f32 %v4542_v10, %v4439_v33  ;;  %8775 = vmatprep.mubr.msk.bf16.mxu0 %vm9441_vm9, %v12196_v13  ;;  %8795 = vmatprep.mubr.msk.bf16.mxu1 %vm9441_vm9, %v12196_v13  ;;  %v9300_v10 = vld [vmem:[%s12006_s5 + $0x5f0] sm:$0xff]  }
 0x76e   : > { %v4436_v3 = vpop.f32.mrf.mxu0  ;;  %v4545_v27 = vpop.f32.mrf.mxu1 }
 0x76f   : > { %8762 = vmatpush3.bf16.msra.mxu0 %v9267_v63  ;;  %8782 = vmatpush3.bf16.msra.mxu1 %v9268_v0 }
 0x770   : > { %v8498_v44 = vpop.f32.mrf.mxu0  ;;  %8763 = vmatprep.subr.bf16.mxu0 %v12196_v13  ;;  %8783 = vmatprep.subr.bf16.mxu1 %v12196_v13  ;;  %v8518_v11 = vpop.f32.mrf.mxu1 }
 0x771   : > { %v9303_v44 = vld [vmem:[%s12006_s5 + $0x5a0] sm:$0xff]   ;;  %v9305_v11 = vld [vmem:[%s12006_s5 + $0x598] sm:$0xff]  }
 0x773   : > { %8764 = vmatpush3.bf16.msra.mxu0 %v9269_v51  ;;  %8784 = vmatpush3.bf16.msra.mxu1 %v9270_v19  ;;  %v9302_v51 = vld [vmem:[%s12006_s5 + $0x5e8] sm:$0xff]   ;;  %v9304_v19 = vld [vmem:[%s12006_s5 + $0x5e0] sm:$0xff]  }
 0x774   : > { %8765 = vmatprep.subr.bf16.mxu0 %v12196_v13  ;;  %8785 = vmatprep.subr.bf16.mxu1 %v12196_v13 }
 0x777   : > { %8766 = vmatpush3.bf16.msra.mxu0 %v9271_v24  ;;  %8786 = vmatpush3.bf16.msra.mxu1 %v9272_v20  ;;  %v9306_v24 = vld [vmem:[%s12006_s5 + $0x5d8] sm:$0xff]   ;;  %v9307_v20 = vld [vmem:[%s12006_s5 + $0x590] sm:$0xff]  }
 0x778   : > { %8767 = vmatprep.subr.bf16.mxu0 %v12196_v13  ;;  %8787 = vmatprep.subr.bf16.mxu1 %v12196_v13 }
 0x77b   : > { %8768 = vmatpush3.bf16.msra.mxu0 %v9273_v5  ;;  %8788 = vmatpush3.bf16.msra.mxu1 %v9274_v47  ;;  %v9308_v5 = vld [vmem:[%s12006_s5 + $0x5d0] sm:$0xff]   ;;  %v9309_v47 = vld [vmem:[%s12006_s5 + $0x588] sm:$0xff]  }
 0x77c   : > { %8769 = vmatprep.subr.bf16.mxu0 %v12196_v13  ;;  %8789 = vmatprep.subr.bf16.mxu1 %v12196_v13 }
 0x77f   : > { %8770 = vmatpush3.bf16.msra.mxu0 %v9275_v55  ;;  %8790 = vmatpush3.bf16.msra.mxu1 %v9276_v31  ;;  %v9310_v55 = vld [vmem:[%s12006_s5 + $0x5c8] sm:$0xff]   ;;  %v9311_v31 = vld [vmem:[%s12006_s5 + $0x580] sm:$0xff]  }
 0x780   : > { %8771 = vmatprep.subr.bf16.mxu0 %v12196_v13  ;;  %8791 = vmatprep.subr.bf16.mxu1 %v12196_v13 }
 0x783   : > { %8772 = vmatpush3.bf16.msra.mxu0 %v9277_v6  ;;  %8792 = vmatpush3.bf16.msra.mxu1 %v9278_v2  ;;  %v6280_v6 = vld [vmem:[#allocation5 + $0x22] sm:$0x1]  ;;  %v9312_v2 = vld [vmem:[%s12006_s5 + $0x5c0] sm:$0xff]  }
 0x784   : > { %8773 = vmatprep.subr.bf16.mxu0 %v12196_v13  ;;  %8793 = vmatprep.subr.bf16.mxu1 %v12196_v13  ;;  %v6281_v12 = vpack.c.bf16 %v6280_v6, %v6280_v6 }
 0x787   : > { %8774 = vmatpush3.bf16.msra.mxu0 %v9279_v58  ;;  %8794 = vmatpush3.bf16.msra.mxu1 %v9280_v28  ;;  %v6388_v58 = vld [vmem:[#allocation5 + $0x23] sm:$0x1]  ;;  %v9313_v28 = vld [vmem:[%s12006_s5 + $0x638] sm:$0xff]  }
 0x788   : > { %8799 = vmatprep.subr.bf16.mxu0 %v12196_v13  ;;  %8819 = vmatprep.subr.bf16.mxu1 %v12196_v13  ;;  %v6389_v9 = vpack.c.bf16 %v6388_v58, %v6388_v58 }
 0x78a   : > { %v4650_v14 = vpop.f32.mrf.mxu0  ;;  %8776 = vmatmul.mubr.bf16.vlgmr.msra.gmra.mxu0 %v5848_v54  ;;  %v4758_v15 = vpop.f32.mrf.mxu1  ;;  %8796 = vmatmul.mubr.bf16.vlgmr.msra.gmra.mxu1 %v5956_v46 }
 0x78b   : > { %v4656_v52 = vadd.f32 %v4650_v14, %v4548_v1  ;;  %8800 = vmatpush3.bf16.msra.mxu0 %v9281_v45  ;;  %8820 = vmatpush3.bf16.msra.mxu1 %v9282_v56  ;;  %v9301_v1 = vld [vmem:[%s12006_s5 + $0x5a8] sm:$0xff]   ;;  %v9314_v56 = vld [vmem:[%s12006_s5 + $0x630] sm:$0xff]  }
 0x78c   : > { %v8537_v16 = vpop.f32.mrf.mxu0  ;;  %8801 = vmatprep.subr.bf16.mxu0 %v12196_v13  ;;  %8821 = vmatprep.subr.bf16.mxu1 %v12196_v13  ;;  %v8557_v18 = vpop.f32.mrf.mxu1 }
 0x78d   : > { %v4764_v35 = vadd.f32 %v4758_v15, %v4656_v52  ;;  %8815 = vmatprep.mubr.msk.bf16.mxu0 %vm9441_vm9, %v12196_v13  ;;  %8835 = vmatprep.mubr.msk.bf16.mxu1 %vm9441_vm9, %v12196_v13  ;;  %v9315_v16 = vld [vmem:[%s12006_s5 + $0x628] sm:$0xff]  }
 0x78e   : > { %v4653_v21 = vpop.f32.mrf.mxu0  ;;  %v4761_v42 = vpop.f32.mrf.mxu1 }
 0x78f   : > { %8802 = vmatpush3.bf16.msra.mxu0 %v9283_v41  ;;  %8822 = vmatpush3.bf16.msra.mxu1 %v9284_v23  ;;  %v9316_v21 = vld [vmem:[%s12006_s5 + $0x620] sm:$0xff]   ;;  %v9318_v42 = vld [vmem:[%s12006_s5 + $0x610] sm:$0xff]  }
 0x790   : > { %v8538_v22 = vpop.f32.mrf.mxu0  ;;  %8803 = vmatprep.subr.bf16.mxu0 %v12196_v13  ;;  %8823 = vmatprep.subr.bf16.mxu1 %v12196_v13  ;;  %v8558_v49 = vpop.f32.mrf.mxu1 }
 0x791   : > { %v9319_v22 = vld [vmem:[%s12006_s5 + $0x608] sm:$0xff]   ;;  %v6496_v49 = vld [vmem:[#allocation5 + $0x24] sm:$0x1] }
 0x793   : > { %8804 = vmatpush3.bf16.msra.mxu0 %v9285_v62  ;;  %8824 = vmatpush3.bf16.msra.mxu1 %v9286_v48  ;;  %v9317_v62 = vld [vmem:[%s12006_s5 + $0x618] sm:$0xff]   ;;  %v9320_v48 = vld [vmem:[%s12006_s5 + $0x600] sm:$0xff]  }
 0x794   : > { %8805 = vmatprep.subr.bf16.mxu0 %v12196_v13  ;;  %8825 = vmatprep.subr.bf16.mxu1 %v12196_v13 }
 0x797   : > { %8806 = vmatpush3.bf16.msra.mxu0 %v9287_v26  ;;  %8826 = vmatpush3.bf16.msra.mxu1 %v9288_v29  ;;  %v6497_v26 = vpack.c.bf16 %v6496_v49, %v6496_v49 }
 0x798   : > { %8807 = vmatprep.subr.bf16.mxu0 %v12196_v13  ;;  %8827 = vmatprep.subr.bf16.mxu1 %v12196_v13 }
 0x79b   : > { %8808 = vmatpush3.bf16.msra.mxu0 %v9289_v30  ;;  %8828 = vmatpush3.bf16.msra.mxu1 %v9290_v50 }
 0x79c   : > { %8809 = vmatprep.subr.bf16.mxu0 %v12196_v13  ;;  %8829 = vmatprep.subr.bf16.mxu1 %v12196_v13 }
 0x79f   : > { %8810 = vmatpush3.bf16.msra.mxu0 %v9291_v37  ;;  %8830 = vmatpush3.bf16.msra.mxu1 %v9292_v34 }
 0x7a0   : > { %8811 = vmatprep.subr.bf16.mxu0 %v12196_v13  ;;  %8831 = vmatprep.subr.bf16.mxu1 %v12196_v13 }
 0x7a3   : > { %8812 = vmatpush3.bf16.msra.mxu0 %v9293_v43  ;;  %8832 = vmatpush3.bf16.msra.mxu1 %v9294_v8 }
 0x7a4   : > { %8813 = vmatprep.subr.bf16.mxu0 %v12196_v13  ;;  %8833 = vmatprep.subr.bf16.mxu1 %v12196_v13 }
 0x7a7   : > { %8814 = vmatpush3.bf16.msra.mxu0 %v9295_v38  ;;  %8834 = vmatpush3.bf16.msra.mxu1 %v9296_v17 }
 0x7a8   : > { %8839 = vmatprep.subr.bf16.mxu0 %v12196_v13  ;;  %8859 = vmatprep.subr.bf16.mxu1 %v12196_v13 }
 0x7aa   : > { %v4866_v60 = vpop.f32.mrf.mxu0  ;;  %8816 = vmatmul.mubr.bf16.vlgmr.msra.gmra.mxu0 %v6065_v7  ;;  %v4974_v36 = vpop.f32.mrf.mxu1  ;;  %8836 = vmatmul.mubr.bf16.vlgmr.msra.gmra.mxu1 %v6173_v57 }
 0x7ab   : > { %v4872_v61 = vadd.f32 %v4866_v60, %v4764_v35  ;;  %8840 = vmatpush3.bf16.msra.mxu0 %v9297_v25  ;;  %8860 = vmatpush3.bf16.msra.mxu1 %v9298_v40 }
 0x7ac   : > { %v8577_v33 = vpop.f32.mrf.mxu0  ;;  %8841 = vmatprep.subr.bf16.mxu0 %v12196_v13  ;;  %8861 = vmatprep.subr.bf16.mxu1 %v12196_v13  ;;  %v8597_v4 = vpop.f32.mrf.mxu1 }
 0x7ad   : > { %v4980_v63 = vadd.f32 %v4974_v36, %v4872_v61  ;;  %8855 = vmatprep.mubr.msk.bf16.mxu0 %vm9441_vm9, %v12196_v13  ;;  %8875 = vmatprep.mubr.msk.bf16.mxu1 %vm9441_vm9, %v12196_v13  ;;  %v9321_v33 = vld [vmem:[%s12008_s7 + $0x38] sm:$0xff]   ;;  %v9323_v4 = vld [vmem:[%s12008_s7 + $0x28] sm:$0xff]  }
 0x7ae   : > { %v4869_v0 = vpop.f32.mrf.mxu0  ;;  %v4977_v32 = vpop.f32.mrf.mxu1 }
 0x7af   : > { %8842 = vmatpush3.bf16.msra.mxu0 %v9299_v39  ;;  %8862 = vmatpush3.bf16.msra.mxu1 %v9300_v10  ;;  %v9324_v0 = vld [vmem:[%s12008_s7 + $0x20] sm:$0xff]   ;;  %v9326_v32 = vld [vmem:[%s12008_s7 + $0x10] sm:$0xff]  }
 0x7b0   : > { %v8578_v3 = vpop.f32.mrf.mxu0  ;;  %8843 = vmatprep.subr.bf16.mxu0 %v12196_v13  ;;  %8863 = vmatprep.subr.bf16.mxu1 %v12196_v13  ;;  %v8598_v27 = vpop.f32.mrf.mxu1 }
 0x7b1   : > { %v9327_v3 = vld [vmem:[%s12008_s7 + $0x8] sm:$0xff]  }
 0x7b3   : > { %8844 = vmatpush3.bf16.msra.mxu0 %v9301_v1  ;;  %8864 = vmatpush3.bf16.msra.mxu1 %v9302_v51  ;;  %v9325_v1 = vld [vmem:[%s12008_s7 + $0x18] sm:$0xff]  }
 0x7b4   : > { %8845 = vmatprep.subr.bf16.mxu0 %v12196_v13  ;;  %8865 = vmatprep.subr.bf16.mxu1 %v12196_v13 }
 0x7b7   : > { %8846 = vmatpush3.bf16.msra.mxu0 %v9303_v44  ;;  %8866 = vmatpush3.bf16.msra.mxu1 %v9304_v19 }
 0x7b8   : > { %8847 = vmatprep.subr.bf16.mxu0 %v12196_v13  ;;  %8867 = vmatprep.subr.bf16.mxu1 %v12196_v13 }
 0x7bb   : > { %8848 = vmatpush3.bf16.msra.mxu0 %v9305_v11  ;;  %8868 = vmatpush3.bf16.msra.mxu1 %v9306_v24  ;;  %v9328_v11 = vld [vmem:[%s12008_s7] sm:$0xff]  }
 0x7bc   : > { %8849 = vmatprep.subr.bf16.mxu0 %v12196_v13  ;;  %8869 = vmatprep.subr.bf16.mxu1 %v12196_v13 }
 0x7bf   : > { %8850 = vmatpush3.bf16.msra.mxu0 %v9307_v20  ;;  %8870 = vmatpush3.bf16.msra.mxu1 %v9308_v5 }
 0x7c0   : > { %8851 = vmatprep.subr.bf16.mxu0 %v12196_v13  ;;  %8871 = vmatprep.subr.bf16.mxu1 %v12196_v13 }
 0x7c3   : > { %8852 = vmatpush3.bf16.msra.mxu0 %v9309_v47  ;;  %8872 = vmatpush3.bf16.msra.mxu1 %v9310_v55 }
 0x7c4   : > { %8853 = vmatprep.subr.bf16.mxu0 %v12196_v13  ;;  %8873 = vmatprep.subr.bf16.mxu1 %v12196_v13 }
 0x7c7   : > { %8854 = vmatpush3.bf16.msra.mxu0 %v9311_v31  ;;  %8874 = vmatpush3.bf16.msra.mxu1 %v9312_v2 }
 0x7c8   : > { %8879 = vmatprep.subr.bf16.mxu0 %v12196_v13  ;;  %8899 = vmatprep.subr.bf16.mxu1 %v12196_v13 }
 0x7ca   : > { %v5083_v54 = vpop.f32.mrf.mxu0  ;;  %8856 = vmatmul.mubr.bf16.vlgmr.msra.gmra.mxu0 %v6281_v12  ;;  %v5191_v46 = vpop.f32.mrf.mxu1  ;;  %8876 = vmatmul.mubr.bf16.vlgmr.msra.gmra.mxu1 %v6389_v9 }
 0x7cb   : > { %v5089_v45 = vadd.f32 %v5083_v54, %v4980_v63  ;;  %8880 = vmatpush3.bf16.msra.mxu0 %v9313_v28  ;;  %8895 = vmatprep.mubr.msk.bf16.mxu0 %vm9441_vm9, %v12196_v13  ;;  %v9322_v63 = vld [vmem:[%s12008_s7 + $0x30] sm:$0xff]  }
 0x7cc   : > { %v8617_v14 = vpop.f32.mrf.mxu0  ;;  %8881 = vmatprep.subr.bf16.mxu0 %v12196_v13  ;;  %v8637_v15 = vpop.f32.mrf.mxu1  ;;  %8915 = vmatprep.mubr.msk.bf16.mxu1 %vm9441_vm9, %v12196_v13 }
 0x7cd   : > { %v5197_v52 = vadd.f32 %v5191_v46, %v5089_v45  ;;  %8900 = vmatpush3.bf16.msra.mxu1 %v9321_v33 }
 0x7ce   : > { %v5086_v41 = vpop.f32.mrf.mxu0  ;;  %v5194_v23 = vpop.f32.mrf.mxu1  ;;  %8901 = vmatprep.subr.bf16.mxu1 %v12196_v13 }
 0x7cf   : > { %8882 = vmatpush3.bf16.msra.mxu0 %v9314_v56 }
 0x7d0   : > { %v8618_v35 = vpop.f32.mrf.mxu0  ;;  %8883 = vmatprep.subr.bf16.mxu0 %v12196_v13  ;;  %v8638_v18 = vpop.f32.mrf.mxu1 }
 0x7d1   : > { %8902 = vmatpush3.bf16.msra.mxu1 %v9322_v63 }
 0x7d2   : > { %8903 = vmatprep.subr.bf16.mxu1 %v12196_v13 }
 0x7d3   : > { %8884 = vmatpush3.bf16.msra.mxu0 %v9315_v16 }
 0x7d4   : > { %8885 = vmatprep.subr.bf16.mxu0 %v12196_v13 }
 0x7d5   : > { %8904 = vmatpush3.bf16.msra.mxu1 %v9323_v4 }
 0x7d6   : > { %8905 = vmatprep.subr.bf16.mxu1 %v12196_v13 }
 0x7d7   : > { %8886 = vmatpush3.bf16.msra.mxu0 %v9316_v21 }
 0x7d8   : > { %8887 = vmatprep.subr.bf16.mxu0 %v12196_v13 }
 0x7d9   : > { %8906 = vmatpush3.bf16.msra.mxu1 %v9324_v0 }
 0x7da   : > { %8907 = vmatprep.subr.bf16.mxu1 %v12196_v13 }
 0x7db   : > { %8888 = vmatpush3.bf16.msra.mxu0 %v9317_v62 }
 0x7dc   : > { %8889 = vmatprep.subr.bf16.mxu0 %v12196_v13 }
 0x7dd   : > { %8908 = vmatpush3.bf16.msra.mxu1 %v9325_v1 }
 0x7de   : > { %8909 = vmatprep.subr.bf16.mxu1 %v12196_v13 }
 0x7df   : > { %8890 = vmatpush3.bf16.msra.mxu0 %v9318_v42 }
 0x7e0   : > { %8891 = vmatprep.subr.bf16.mxu0 %v12196_v13 }
 0x7e1   : > { %8910 = vmatpush3.bf16.msra.mxu1 %v9326_v32 }
 0x7e2   : > { %8911 = vmatprep.subr.bf16.mxu1 %v12196_v13 }
 0x7e3   : > { %8892 = vmatpush3.bf16.msra.mxu0 %v9319_v22 }
 0x7e4   : > { %8893 = vmatprep.subr.bf16.mxu0 %v12196_v13 }
 0x7e5   : > { %8912 = vmatpush3.bf16.msra.mxu1 %v9327_v3 }
 0x7e6   : > { %8913 = vmatprep.subr.bf16.mxu1 %v12196_v13 }
 0x7e7   : > { %8894 = vmatpush3.bf16.msra.mxu0 %v9320_v48 }
 0x7e9   : > { %8914 = vmatpush3.bf16.msra.mxu1 %v9328_v11 }
 0x7ea   : > { %v5299_v29 = vpop.f32.mrf.mxu0  ;;  %8896 = vmatmul.mubr.bf16.vlgmr.msra.gmra.mxu0 %v6497_v26  ;;  %v5407_v50 = vpop.f32.mrf.mxu1 }
 0x7eb   : > { %v5305_v30 = vadd.f32 %v5299_v29, %v5197_v52 }
 0x7ec   : > { %v8657_v37 = vpop.f32.mrf.mxu0  ;;  %v8677_v43 = vpop.f32.mrf.mxu1 }
 0x7ed   : > { %v5413_v34 = vadd.f32 %v5407_v50, %v5305_v30 }
 0x7ee   : > { %v5302_v8 = vpop.f32.mrf.mxu0  ;;  %v5410_v38 = vpop.f32.mrf.mxu1 }
 0x7f0   : > { %v8658_v59 = vpop.f32.mrf.mxu0  ;;  %v8678_v17 = vpop.f32.mrf.mxu1 }
 0x80a   : > { %v5515_v53 = vpop.f32.mrf.mxu0  ;;  %v5624_v25 = vpop.f32.mrf.mxu1 }
 0x80b   : > { %v5521_v7 = vadd.f32 %v5515_v53, %v5413_v34 }
 0x80c   : > { %v8697_v57 = vpop.f32.mrf.mxu0  ;;  %v8717_v60 = vpop.f32.mrf.mxu1 }
 0x80d   : > { %v5630_v40 = vadd.f32 %v5624_v25, %v5521_v7  ;;  %v6622_v7 = vld [vmem:[%s12009_s8] sm:$0x1] }
 0x80e   : > { %v5518_v61 = vpop.f32.mrf.mxu0  ;;  %v5627_v36 = vpop.f32.mrf.mxu1  ;;  %v12197_v57 = vld [vmem:[#allocation9_spill] sm:$0xff] }
 0x80f   : > { %vm6711_vm10 = vcmp.lt.s32.totalorder %v12197_v57, 34 }
 0x810   : > { %v8698_v39 = vpop.f32.mrf.mxu0  ;;  %v8718_v10 = vpop.f32.mrf.mxu1 }
 0x82a   : > { %v5732_v51 = vpop.f32.mrf.mxu0  ;;  %v5840_v44 = vpop.f32.mrf.mxu1 }
 0x82b   : > { %v5738_v27 = vadd.f32 %v5732_v51, %v5630_v40 }
 0x82c   : > { %v8737_v19 = vpop.f32.mrf.mxu0  ;;  %v8757_v20 = vpop.f32.mrf.mxu1 }
 0x82d   : > { %v5846_v24 = vadd.f32 %v5840_v44, %v5738_v27 }
 0x82e   : > { %v5735_v5 = vpop.f32.mrf.mxu0  ;;  %v5843_v47 = vpop.f32.mrf.mxu1 }
 0x830   : > { %v8738_v55 = vpop.f32.mrf.mxu0  ;;  %v8758_v31 = vpop.f32.mrf.mxu1 }
 0x84a   : > { %v5948_v6 = vpop.f32.mrf.mxu0  ;;  %v6056_v58 = vpop.f32.mrf.mxu1 }
 0x84b   : > { %v5954_v2 = vadd.f32 %v5948_v6, %v5846_v24 }
 0x84c   : > { %v8777_v12 = vpop.f32.mrf.mxu0  ;;  %v8797_v9 = vpop.f32.mrf.mxu1 }
 0x84d   : > { %v6062_v28 = vadd.f32 %v6056_v58, %v5954_v2 }
 0x84e   : > { %v5951_v54 = vpop.f32.mrf.mxu0  ;;  %v6059_v13 = vpop.f32.mrf.mxu1 }
 0x850   : > { %v8778_v45 = vpop.f32.mrf.mxu0  ;;  %v8798_v46 = vpop.f32.mrf.mxu1 }
 0x86a   : > { %v6165_v56 = vpop.f32.mrf.mxu0  ;;  %v6273_v14 = vpop.f32.mrf.mxu1 }
 0x86b   : > { %v6171_v29 = vadd.f32 %v6165_v56, %v6062_v28 }
 0x86c   : > { %v8817_v52 = vpop.f32.mrf.mxu0  ;;  %v8837_v15 = vpop.f32.mrf.mxu1 }
 0x86d   : > { %v6279_v30 = vadd.f32 %v6273_v14, %v6171_v29 }
 0x86e   : > { %v6168_v41 = vpop.f32.mrf.mxu0  ;;  %v6276_v16 = vpop.f32.mrf.mxu1 }
 0x870   : > { %v8818_v23 = vpop.f32.mrf.mxu0  ;;  %v8838_v35 = vpop.f32.mrf.mxu1 }
 0x88a   : > { %v6381_v18 = vpop.f32.mrf.mxu0  ;;  %v6489_v21 = vpop.f32.mrf.mxu1 }
 0x88b   : > { %v6387_v50 = vadd.f32 %v6381_v18, %v6279_v30 }
 0x88c   : > { %v8857_v62 = vpop.f32.mrf.mxu0  ;;  %v8877_v42 = vpop.f32.mrf.mxu1 }
 0x88d   : > { %v6495_v37 = vadd.f32 %v6489_v21, %v6387_v50 }
 0x88e   : > { %v6384_v22 = vpop.f32.mrf.mxu0  ;;  %v6492_v48 = vpop.f32.mrf.mxu1 }
 0x890   : > { %v8858_v49 = vpop.f32.mrf.mxu0  ;;  %v8878_v26 = vpop.f32.mrf.mxu1 }
 0x8aa   : > { %v6597_v34 = vpop.f32.mrf.mxu0 }
 0x8ab   : > { %v6603_v43 = vadd.f32 %v6597_v34, %v6495_v37 }
 0x8ac   : > { %v8897_v8 = vpop.f32.mrf.mxu0 }
 0x8ad   : > { %v6604_v38 = vmax.f32 %v6603_v43, 0.0 }
 0x8ae   : > { %v6600_v59 = vpop.f32.mrf.mxu0 }
 0x8af   : > { %v6605_v17 = vpack.c.bf16 %v6604_v38, %v6604_v38 }
 0x8b0   : > { %v8898_v53 = vpop.f32.mrf.mxu0 }
 0x8b1   : > { %8916 = vmatmul.mubr.bf16.vlgmr.msra.gmra.mxu1 %v6605_v17 }
 0x971   : > { %v6705_v25 = vpop.f32.mrf.mxu1 }
 0x972   : > { %v6706_v40 = vadd.f32 %v6705_v25, %v6622_v7 }
 0x973   : > { %v8917_v60 = vpop.f32.mrf.mxu1 }
 0x974   : > { %v6712_v61 = vsel %vm6711_vm10, %v6706_v40, -inf }
 0x975   : > { %v6708_v36 = vpop.f32.mrf.mxu1  ;;  %v6714_v39 = vsel %vm6713_vm1, %v6712_v61, -inf }
 0x976   : > { %6715 = vmax.xlane.f32.xlu0 %v6714_v39 }
 0x977   : > { %v8918_v33 = vpop.f32.mrf.mxu1 }
 0x9ff   : > { %v6716_v10 = vpop.xlane.xlu0 %6715 }
 0xa00   : > { %v6717_v63 = vsub.f32 %v6706_v40, %v6716_v10 }
 0xa02   : > { %v6718_v4 = vmul.f32 1.442695, %v6717_v63 }
 0xa04   : > { %9329 = vpow2.f32 %v6718_v4 }
 0xa11   : > { %v9330_v0 = vpop.eup %9329 }
 0xa12   : > { %v6720_v1 = vsel %vm6711_vm10, %v9330_v0, 0.0 }
 0xa13   : > { %v6721_v32 = vsel %vm6713_vm1, %v6720_v1, 0.0 }
 0xa14   : > { %6722 = vadd.xlane.f32.xlu0 %v6721_v32 }
 0xa9d   : > { %v6723_v3 = vpop.xlane.xlu0 %6722 }
 0xa9e   : > { %9331 = vlog2.f32 %v6723_v3 }
 0xaab   : > { %v9332_v51 = vpop.eup %9331 }
 0xaac   : > { %v6725_v27 = vmul.f32 0.6931472, %v9332_v51 }
 0xaae   : > { %v6726_v44 = vadd.f32 %v6725_v27, %v6716_v10 }
 0xab0   : > { %v6727_v19 = vsub.f32 %v6706_v40, %v6726_v44 }
 0xab2   : > { %6728 = vst [vmem:[%s9569_s27] sm:$0x1] %v6727_v19 }
 0xab3   : > { %9346 = shalt.err (!%p9343_p7)
}
 0xab4   : > { %s9347_s25 = scalar_lea.hbm %s6740_s17, 16  ;;  %s9351_s29 = scalar_lea.hbm %s12010_s9, 32 }
 0xab5   : > { %p9348_p8 = scmp.ne.s32.totalorder %s6740_s17, %s9347_s25  ;;  %p9352_p11 = scmp.lt.s32.totalorder %s6740_s17, %s12010_s9 }
 0xab6   : > { %p9353_p12 = scmp.lt.s32.totalorder %s9351_s29, %s9347_s25 }
 0xab7   : > { %p9349_p9 = pnand %p9348_p8, %p9531_p5 }
 0xab8   : > { %p9354_p13 = por %p9353_p12, %p9352_p11 }
 0xab9   : > { %p9350_p10 = pneg %p9349_p9 }
 0xabb   : > { %p9355_p0 = pnand %p9354_p13, %p9350_p10 }
 0xabd   : > { %9358 = shalt.err (!%p9355_p0)
}
 0xabe   : > { %8921 = dma.vmem_to_hbm [thread:$0]  (%p9531_p5), %s6743_s28, 16, %s6740_s17, %s6730_s24  }
 0xabf PF: > { %p8927_p1 = scmp.ge.s32.totalorder %s9401_s12, 2  ;;  %s6754_s26 = sand.u32 1, %s9389_s30  }
 0xac0   : > { %s6755_s16 = scalar_lea.sflag [#allocation7], %s6754_s26 }
 0xac1   : > { %p8924_p2 = pnand %p8927_p1, %p9535_p6 }
 0xac3   : > { %p8925_p3 = pneg %p8924_p2 }
 0xac5   : > { %9384 = dma.done.wait (%p8925_p3), %s6755_s16, 16  }
 0xac6   : > { %9386 = vsyncadd (%p8925_p3), %s6755_s16, 4294967280  ;;  %p19_p4 = scmp.ge.s32.totalorder %s9518_s15, 4   ;;  %s12199_s30 = smov %s9393_s10 }
 0xac7   : > { %s12200_s10 = smov %s9397_s11  ;;  %s12201_s11 = smov %s9529_s18 }
 0xac8   : > { %s12202_s12 = smov %s9518_s15  ;;  %21 = sbr.rel (!%p19_p4) target bundleno = 5 (0x5), region = 169 }
 0xacd   :  { %6759 = vsyncpa [#allocation7], 1 }
 0xace   :  { %6761 = vsyncpa [#allocation7 + $0x1], 1 }

</bundles_post_ra>
